<compile_context>
chip_gen: v7x
topology: tpu7x:2x2x1
jax: 0.10.0
libtpu: 0.0.40
codegen_flags: <defaults>
</compile_context>

<pallas_src>
import functools

import jax
import jax.numpy as jnp
from jax.experimental import pallas as pl
from jax.experimental.pallas import tpu as pltpu


# ----------------------------- Pallas kernel ------------------------------- #
def _bayar_conv_kernel(w_ref, x_ref, o_ref, *, K, S, n_strips, CI, CO):
    """One image of the Bayar conv (strip-blocked VPU broadcast-FMA formulation).

    w_ref: (CO*CI*K*K,) f32 in SMEM, row-major over (co, ci, ky, kx).
    x_ref: (1, CI, H_in_pad, W_pad) input block in VMEM (NCHW, W_pad % 128 == 0).
    o_ref: (1, CO, Hout_pad, W_pad) output block in VMEM (NCHW).
    """
    Wp = x_ref.shape[-1]

    @pl.loop(0, n_strips)
    def _(s):
        h0 = pl.multiple_of(s * S, S)
        # Per-strip accumulators stay in vregs (CO * S * Wp * 4B, e.g. 32 KiB at
        # S=16, Wp=128) -- no accumulator RMW traffic through VMEM.
        acc = [jnp.zeros((S, Wp), jnp.float32) for _ in range(CO)]
        for ci in range(CI):
            for ky in range(K):
                # One aligned-width row-strip load per (ci, ky): K*CI loads per strip.
                rows = x_ref[0, ci, pl.ds(h0 + ky, S), :].astype(jnp.float32)  # (S, Wp)
                for kx in range(K):
                    # patch[:, j] == rows[:, j + kx] via an XLU lane rotate; the
                    # wrapped last K-1 columns fall in padding sliced off by the
                    # wrapper, so they never reach valid output.
                    patch = rows if kx == 0 else pltpu.roll(rows, shift=Wp - kx, axis=1)
                    for co in range(CO):
                        w = w_ref[((co * CI + ci) * K + ky) * K + kx]  # SMEM scalar
                        acc[co] = acc[co] + w * patch                  # VPU broadcast FMA
        # Direct per-channel stores (no jnp.stack); sublane-aligned and lane-dense
        # -> unmasked vst.
        for co in range(CO):
            o_ref[0, co, pl.ds(h0, S), :] = acc[co].astype(o_ref.dtype)


# ------------------------------ JAX glue ------------------------------------ #
def constraint_weight(kernel_weight, center_weight, kernel_size, magnitude):
    """Reproduces BayarConv2d._constraint_weight. Returns (O, I, K, K) conv weight."""
    K = kernel_size
    # permute(2,0,1) / sum(0) / permute back  ==  divide by sum over last axis.
    # Note: matches PyTorch exactly (no epsilon guard on the fiber sum).
    kw = kernel_weight / jnp.sum(kernel_weight, axis=2, keepdims=True)
    kw = kw * magnitude
    center_idx = K * K // 2
    full = jnp.concatenate(
        [kw[:, :, :center_idx], center_weight, kw[:, :, center_idx:]], axis=2)
    O, I = full.shape[0], full.shape[1]
    return full.reshape(O, I, K, K)


def _round_up(x, m):
    return ((x + m - 1) // m) * m


def bayar_conv2d_forward(x, kernel_weight, center_weight, *,
                         kernel_size=5, stride=1, padding=0, magnitude=1.0):
    """x: (N, C, H, W) NCHW, C == kernel_weight.shape[1] (conv input channels)."""
    K = kernel_size
    assert stride == 1  # TODO(synk): stride > 1 not implemented in the Pallas path (module default is 1).

    w_full = constraint_weight(kernel_weight, center_weight, K, magnitude)  # (CO, CI, K, K)
    CO, CI = int(w_full.shape[0]), int(w_full.shape[1])
    # Flat f32 weights, row-major over (co, ci, ky, kx); tiny table lives in SMEM.
    w_flat = w_full.reshape(-1).astype(jnp.float32)

    N, Cx, H, W = x.shape
    assert Cx == CI, "input channel count must match conv weight dim 1"

    Hc, Wc = H + 2 * padding, W + 2 * padding
    Hout, Wout = Hc - K + 1, Wc - K + 1
    assert Hout >= 1 and Wout >= 1, "kernel larger than (padded) input"

    # Lane-dense width (128-multiple) and strip size: 16 rows when the whole
    # width fits in <= 2 vregs per row-group, else 8 (keeps acc <= ~16 vregs).
    W_pad = _round_up(Wc, 128)
    S = 16 if W_pad <= 256 else 8
    n_strips = pl.cdiv(Hout, S)
    Hout_pad = n_strips * S
    H_in_pad = Hout_pad + K - 1          # rows touched by the last strip

    # Zero padding: conv `padding` on top/left, lane/strip padding on bottom/right.
    x_p = jnp.pad(x, ((0, 0), (0, 0),
                      (padding, H_in_pad - H - padding),
                      (padding, W_pad - W - padding)))

    kernel = functools.partial(_bayar_conv_kernel,
                               K=K, S=S, n_strips=n_strips, CI=CI, CO=CO)

    # VMEM budget: in + out blocks, double-buffered by Pallas, plus slack.
    in_block = CI * H_in_pad * W_pad * x_p.dtype.itemsize
    out_block = CO * Hout_pad * W_pad * x.dtype.itemsize
    vmem_limit = min(max(2 * (in_block + out_block) + (4 << 20), 32 << 20), 128 << 20)
    # TODO(synk): images big enough that one double-buffered (in+out) pair exceeds
    # ~64 MiB (v7x physical VMEM) need an H-tiled input BlockSpec instead of
    # whole-image blocks; not needed at typical image sizes.

    out = pl.pallas_call(
        kernel,
        out_shape=jax.ShapeDtypeStruct((N, CO, Hout_pad, W_pad), x.dtype),
        grid_spec=pltpu.PrefetchScalarGridSpec(
            num_scalar_prefetch=0,
            grid=(N,),  # one image per step: max independent steps for megacore
            in_specs=[
                # Constrained Bayar weights: tiny scalar table -> SMEM
                # (avoids padding trailing (4,4) tiles to (8,128) in VMEM).
                pl.BlockSpec(memory_space=pltpu.MemorySpace.SMEM),
                # NCHW image block; channel/H/W dims are full-extent.
                pl.BlockSpec((1, CI, H_in_pad, W_pad), lambda n: (n, 0, 0, 0)),
            ],
            out_specs=pl.BlockSpec((1, CO, Hout_pad, W_pad), lambda n: (n, 0, 0, 0)),
        ),
        compiler_params=pltpu.CompilerParams(
            dimension_semantics=("parallel",),
            vmem_limit_bytes=vmem_limit,
        ),
    )(w_flat, x_p)

    # Slice off the lane/strip padding; result is NCHW, no transposes needed.
    return out[:, :, :Hout, :Wout]


# -------------------------------- main -------------------------------------- #
if __name__ == "__main__":
    in_channels = 4       # module "in_channles"
    out_channels = 4      # module "out_channels"
    kernel_size = 5
    magnitude = 1.0

    key = jax.random.PRNGKey(0)
    k_x, k_w = jax.random.split(key)

    # Parameters (deterministic, mirroring __init__):
    center_weight = jnp.ones((in_channels, out_channels, 1), jnp.float32) * (-1.0 * magnitude)
    kernel_weight = jax.random.uniform(
        k_w, (in_channels, out_channels, kernel_size ** 2 - 1), jnp.float32)

    # Input: NCHW, channels must equal out_channels (F.conv2d weight-layout quirk
    # of the original module).
    x = jax.random.normal(k_x, (2, out_channels, 16, 16), jnp.float32)

    out = bayar_conv2d_forward(x, kernel_weight, center_weight,
                               kernel_size=kernel_size, stride=1, padding=0,
                               magnitude=magnitude)
    out = jax.block_until_ready(out)

    # Pure-JAX reference (same semantics as torch conv2d, cross-correlation, VALID).
    w_ref = constraint_weight(kernel_weight, center_weight, kernel_size, magnitude)
    ref = jax.lax.conv_general_dilated(
        x, w_ref, window_strides=(1, 1), padding="VALID",
        dimension_numbers=("NCHW", "OIHW", "NCHW"))
    ref = jax.block_until_ready(ref)

    assert out.shape == (2, in_channels, 12, 12), out.shape
    assert jnp.allclose(out, ref, atol=1e-4, rtol=1e-4), float(jnp.max(jnp.abs(out - ref)))

    print("KERNEL_OK")
</pallas_src>

<mosaic_0001>
module attributes {stable_mosaic.version = 11 : i64} {
  func.func @_bayar_conv_kernel(%arg0: i32, %arg1: memref<400xf32, #tpu.memory_space<smem>>, %arg2: memref<1x4x20x128xf32, #tpu.memory_space<vmem>>, %arg3: memref<1x4x16x128xf32, #tpu.memory_space<vmem>>) attributes {dimension_semantics = [#tpu.dimension_semantics<parallel>], iteration_bounds = array<i64: 2>, scalar_prefetch = 0 : i64, scratch_operands = 0 : i64, tpu.core_type = #tpu.core_type<tc>, window_params = [{transform_indices = @transform_0, window_bounds = array<i64: 400>}, {transform_indices = @transform_1, window_bounds = array<i64: 1, 4, 20, 128>}, {transform_indices = @transform_2, window_bounds = array<i64: 1, 4, 16, 128>}]} {
    %c0_i32 = arith.constant 0 : i32
    %c1_i32 = arith.constant 1 : i32
    %0 = arith.muli %c0_i32, %c1_i32 : i32
    %c0_i32_0 = arith.constant 0 : i32
    %1 = arith.addi %c0_i32_0, %0 : i32
    %c16_i32 = arith.constant 16 : i32
    %2 = arith.muli %1, %c16_i32 : i32
    %3 = tpu.assume_multiple %2, 16 : i32
    %cst = arith.constant 0.000000e+00 : f32
    %4 = vector.broadcast %cst : f32 to vector<16x128xf32>
    %cst_1 = arith.constant 0.000000e+00 : f32
    %5 = vector.broadcast %cst_1 : f32 to vector<16x128xf32>
    %cst_2 = arith.constant 0.000000e+00 : f32
    %6 = vector.broadcast %cst_2 : f32 to vector<16x128xf32>
    %cst_3 = arith.constant 0.000000e+00 : f32
    %7 = vector.broadcast %cst_3 : f32 to vector<16x128xf32>
    %c0_i32_4 = arith.constant 0 : i32
    %8 = arith.addi %3, %c0_i32_4 : i32
    %c0 = arith.constant 0 : index
    %c0_5 = arith.constant 0 : index
    %9 = arith.index_cast %8 : i32 to index
    %c0_6 = arith.constant 0 : index
    %10 = vector.load %arg2[%c0, %c0_5, %9, %c0_6] : memref<1x4x20x128xf32, #tpu.memory_space<vmem>>, vector<1x1x16x128xf32>
    %11 = vector.shape_cast %10 : vector<1x1x16x128xf32> to vector<16x128xf32>
    %c0_7 = arith.constant 0 : index
    %12 = memref.load %arg1[%c0_7] : memref<400xf32, #tpu.memory_space<smem>>
    %13 = vector.broadcast %12 : f32 to vector<16x128xf32>
    %14 = arith.mulf %13, %11 : vector<16x128xf32>
    %15 = arith.addf %4, %14 : vector<16x128xf32>
    %c100 = arith.constant 100 : index
    %16 = memref.load %arg1[%c100] : memref<400xf32, #tpu.memory_space<smem>>
    %17 = vector.broadcast %16 : f32 to vector<16x128xf32>
    %18 = arith.mulf %17, %11 : vector<16x128xf32>
    %19 = arith.addf %5, %18 : vector<16x128xf32>
    %c200 = arith.constant 200 : index
    %20 = memref.load %arg1[%c200] : memref<400xf32, #tpu.memory_space<smem>>
    %21 = vector.broadcast %20 : f32 to vector<16x128xf32>
    %22 = arith.mulf %21, %11 : vector<16x128xf32>
    %23 = arith.addf %6, %22 : vector<16x128xf32>
    %c300 = arith.constant 300 : index
    %24 = memref.load %arg1[%c300] : memref<400xf32, #tpu.memory_space<smem>>
    %25 = vector.broadcast %24 : f32 to vector<16x128xf32>
    %26 = arith.mulf %25, %11 : vector<16x128xf32>
    %27 = arith.addf %7, %26 : vector<16x128xf32>
    %c127_i32 = arith.constant 127 : i32
    %28 = tpu.dynamic_rotate %11 by %c127_i32 dim 1 : vector<16x128xf32>, i32 -> vector<16x128xf32>
    %c1 = arith.constant 1 : index
    %29 = memref.load %arg1[%c1] : memref<400xf32, #tpu.memory_space<smem>>
    %30 = vector.broadcast %29 : f32 to vector<16x128xf32>
    %31 = arith.mulf %30, %28 : vector<16x128xf32>
    %32 = arith.addf %15, %31 : vector<16x128xf32>
    %c101 = arith.constant 101 : index
    %33 = memref.load %arg1[%c101] : memref<400xf32, #tpu.memory_space<smem>>
    %34 = vector.broadcast %33 : f32 to vector<16x128xf32>
    %35 = arith.mulf %34, %28 : vector<16x128xf32>
    %36 = arith.addf %19, %35 : vector<16x128xf32>
    %c201 = arith.constant 201 : index
    %37 = memref.load %arg1[%c201] : memref<400xf32, #tpu.memory_space<smem>>
    %38 = vector.broadcast %37 : f32 to vector<16x128xf32>
    %39 = arith.mulf %38, %28 : vector<16x128xf32>
    %40 = arith.addf %23, %39 : vector<16x128xf32>
    %c301 = arith.constant 301 : index
    %41 = memref.load %arg1[%c301] : memref<400xf32, #tpu.memory_space<smem>>
    %42 = vector.broadcast %41 : f32 to vector<16x128xf32>
    %43 = arith.mulf %42, %28 : vector<16x128xf32>
    %44 = arith.addf %27, %43 : vector<16x128xf32>
    %c126_i32 = arith.constant 126 : i32
    %45 = tpu.dynamic_rotate %11 by %c126_i32 dim 1 : vector<16x128xf32>, i32 -> vector<16x128xf32>
    %c2 = arith.constant 2 : index
    %46 = memref.load %arg1[%c2] : memref<400xf32, #tpu.memory_space<smem>>
    %47 = vector.broadcast %46 : f32 to vector<16x128xf32>
    %48 = arith.mulf %47, %45 : vector<16x128xf32>
    %49 = arith.addf %32, %48 : vector<16x128xf32>
    %c102 = arith.constant 102 : index
    %50 = memref.load %arg1[%c102] : memref<400xf32, #tpu.memory_space<smem>>
    %51 = vector.broadcast %50 : f32 to vector<16x128xf32>
    %52 = arith.mulf %51, %45 : vector<16x128xf32>
    %53 = arith.addf %36, %52 : vector<16x128xf32>
    %c202 = arith.constant 202 : index
    %54 = memref.load %arg1[%c202] : memref<400xf32, #tpu.memory_space<smem>>
    %55 = vector.broadcast %54 : f32 to vector<16x128xf32>
    %56 = arith.mulf %55, %45 : vector<16x128xf32>
    %57 = arith.addf %40, %56 : vector<16x128xf32>
    %c302 = arith.constant 302 : index
    %58 = memref.load %arg1[%c302] : memref<400xf32, #tpu.memory_space<smem>>
    %59 = vector.broadcast %58 : f32 to vector<16x128xf32>
    %60 = arith.mulf %59, %45 : vector<16x128xf32>
    %61 = arith.addf %44, %60 : vector<16x128xf32>
    %c125_i32 = arith.constant 125 : i32
    %62 = tpu.dynamic_rotate %11 by %c125_i32 dim 1 : vector<16x128xf32>, i32 -> vector<16x128xf32>
    %c3 = arith.constant 3 : index
    %63 = memref.load %arg1[%c3] : memref<400xf32, #tpu.memory_space<smem>>
    %64 = vector.broadcast %63 : f32 to vector<16x128xf32>
    %65 = arith.mulf %64, %62 : vector<16x128xf32>
    %66 = arith.addf %49, %65 : vector<16x128xf32>
    %c103 = arith.constant 103 : index
    %67 = memref.load %arg1[%c103] : memref<400xf32, #tpu.memory_space<smem>>
    %68 = vector.broadcast %67 : f32 to vector<16x128xf32>
    %69 = arith.mulf %68, %62 : vector<16x128xf32>
    %70 = arith.addf %53, %69 : vector<16x128xf32>
    %c203 = arith.constant 203 : index
    %71 = memref.load %arg1[%c203] : memref<400xf32, #tpu.memory_space<smem>>
    %72 = vector.broadcast %71 : f32 to vector<16x128xf32>
    %73 = arith.mulf %72, %62 : vector<16x128xf32>
    %74 = arith.addf %57, %73 : vector<16x128xf32>
    %c303 = arith.constant 303 : index
    %75 = memref.load %arg1[%c303] : memref<400xf32, #tpu.memory_space<smem>>
    %76 = vector.broadcast %75 : f32 to vector<16x128xf32>
    %77 = arith.mulf %76, %62 : vector<16x128xf32>
    %78 = arith.addf %61, %77 : vector<16x128xf32>
    %c124_i32 = arith.constant 124 : i32
    %79 = tpu.dynamic_rotate %11 by %c124_i32 dim 1 : vector<16x128xf32>, i32 -> vector<16x128xf32>
    %c4 = arith.constant 4 : index
    %80 = memref.load %arg1[%c4] : memref<400xf32, #tpu.memory_space<smem>>
    %81 = vector.broadcast %80 : f32 to vector<16x128xf32>
    %82 = arith.mulf %81, %79 : vector<16x128xf32>
    %83 = arith.addf %66, %82 : vector<16x128xf32>
    %c104 = arith.constant 104 : index
    %84 = memref.load %arg1[%c104] : memref<400xf32, #tpu.memory_space<smem>>
    %85 = vector.broadcast %84 : f32 to vector<16x128xf32>
    %86 = arith.mulf %85, %79 : vector<16x128xf32>
    %87 = arith.addf %70, %86 : vector<16x128xf32>
    %c204 = arith.constant 204 : index
    %88 = memref.load %arg1[%c204] : memref<400xf32, #tpu.memory_space<smem>>
    %89 = vector.broadcast %88 : f32 to vector<16x128xf32>
    %90 = arith.mulf %89, %79 : vector<16x128xf32>
    %91 = arith.addf %74, %90 : vector<16x128xf32>
    %c304 = arith.constant 304 : index
    %92 = memref.load %arg1[%c304] : memref<400xf32, #tpu.memory_space<smem>>
    %93 = vector.broadcast %92 : f32 to vector<16x128xf32>
    %94 = arith.mulf %93, %79 : vector<16x128xf32>
    %95 = arith.addf %78, %94 : vector<16x128xf32>
    %c1_i32_8 = arith.constant 1 : i32
    %96 = arith.addi %3, %c1_i32_8 : i32
    %c0_9 = arith.constant 0 : index
    %c0_10 = arith.constant 0 : index
    %97 = arith.index_cast %96 : i32 to index
    %c0_11 = arith.constant 0 : index
    %98 = vector.load %arg2[%c0_9, %c0_10, %97, %c0_11] : memref<1x4x20x128xf32, #tpu.memory_space<vmem>>, vector<1x1x16x128xf32>
    %99 = vector.shape_cast %98 : vector<1x1x16x128xf32> to vector<16x128xf32>
    %c5 = arith.constant 5 : index
    %100 = memref.load %arg1[%c5] : memref<400xf32, #tpu.memory_space<smem>>
    %101 = vector.broadcast %100 : f32 to vector<16x128xf32>
    %102 = arith.mulf %101, %99 : vector<16x128xf32>
    %103 = arith.addf %83, %102 : vector<16x128xf32>
    %c105 = arith.constant 105 : index
    %104 = memref.load %arg1[%c105] : memref<400xf32, #tpu.memory_space<smem>>
    %105 = vector.broadcast %104 : f32 to vector<16x128xf32>
    %106 = arith.mulf %105, %99 : vector<16x128xf32>
    %107 = arith.addf %87, %106 : vector<16x128xf32>
    %c205 = arith.constant 205 : index
    %108 = memref.load %arg1[%c205] : memref<400xf32, #tpu.memory_space<smem>>
    %109 = vector.broadcast %108 : f32 to vector<16x128xf32>
    %110 = arith.mulf %109, %99 : vector<16x128xf32>
    %111 = arith.addf %91, %110 : vector<16x128xf32>
    %c305 = arith.constant 305 : index
    %112 = memref.load %arg1[%c305] : memref<400xf32, #tpu.memory_space<smem>>
    %113 = vector.broadcast %112 : f32 to vector<16x128xf32>
    %114 = arith.mulf %113, %99 : vector<16x128xf32>
    %115 = arith.addf %95, %114 : vector<16x128xf32>
    %c127_i32_12 = arith.constant 127 : i32
    %116 = tpu.dynamic_rotate %99 by %c127_i32_12 dim 1 : vector<16x128xf32>, i32 -> vector<16x128xf32>
    %c6 = arith.constant 6 : index
    %117 = memref.load %arg1[%c6] : memref<400xf32, #tpu.memory_space<smem>>
    %118 = vector.broadcast %117 : f32 to vector<16x128xf32>
    %119 = arith.mulf %118, %116 : vector<16x128xf32>
    %120 = arith.addf %103, %119 : vector<16x128xf32>
    %c106 = arith.constant 106 : index
    %121 = memref.load %arg1[%c106] : memref<400xf32, #tpu.memory_space<smem>>
    %122 = vector.broadcast %121 : f32 to vector<16x128xf32>
    %123 = arith.mulf %122, %116 : vector<16x128xf32>
    %124 = arith.addf %107, %123 : vector<16x128xf32>
    %c206 = arith.constant 206 : index
    %125 = memref.load %arg1[%c206] : memref<400xf32, #tpu.memory_space<smem>>
    %126 = vector.broadcast %125 : f32 to vector<16x128xf32>
    %127 = arith.mulf %126, %116 : vector<16x128xf32>
    %128 = arith.addf %111, %127 : vector<16x128xf32>
    %c306 = arith.constant 306 : index
    %129 = memref.load %arg1[%c306] : memref<400xf32, #tpu.memory_space<smem>>
    %130 = vector.broadcast %129 : f32 to vector<16x128xf32>
    %131 = arith.mulf %130, %116 : vector<16x128xf32>
    %132 = arith.addf %115, %131 : vector<16x128xf32>
    %c126_i32_13 = arith.constant 126 : i32
    %133 = tpu.dynamic_rotate %99 by %c126_i32_13 dim 1 : vector<16x128xf32>, i32 -> vector<16x128xf32>
    %c7 = arith.constant 7 : index
    %134 = memref.load %arg1[%c7] : memref<400xf32, #tpu.memory_space<smem>>
    %135 = vector.broadcast %134 : f32 to vector<16x128xf32>
    %136 = arith.mulf %135, %133 : vector<16x128xf32>
    %137 = arith.addf %120, %136 : vector<16x128xf32>
    %c107 = arith.constant 107 : index
    %138 = memref.load %arg1[%c107] : memref<400xf32, #tpu.memory_space<smem>>
    %139 = vector.broadcast %138 : f32 to vector<16x128xf32>
    %140 = arith.mulf %139, %133 : vector<16x128xf32>
    %141 = arith.addf %124, %140 : vector<16x128xf32>
    %c207 = arith.constant 207 : index
    %142 = memref.load %arg1[%c207] : memref<400xf32, #tpu.memory_space<smem>>
    %143 = vector.broadcast %142 : f32 to vector<16x128xf32>
    %144 = arith.mulf %143, %133 : vector<16x128xf32>
    %145 = arith.addf %128, %144 : vector<16x128xf32>
    %c307 = arith.constant 307 : index
    %146 = memref.load %arg1[%c307] : memref<400xf32, #tpu.memory_space<smem>>
    %147 = vector.broadcast %146 : f32 to vector<16x128xf32>
    %148 = arith.mulf %147, %133 : vector<16x128xf32>
    %149 = arith.addf %132, %148 : vector<16x128xf32>
    %c125_i32_14 = arith.constant 125 : i32
    %150 = tpu.dynamic_rotate %99 by %c125_i32_14 dim 1 : vector<16x128xf32>, i32 -> vector<16x128xf32>
    %c8 = arith.constant 8 : index
    %151 = memref.load %arg1[%c8] : memref<400xf32, #tpu.memory_space<smem>>
    %152 = vector.broadcast %151 : f32 to vector<16x128xf32>
    %153 = arith.mulf %152, %150 : vector<16x128xf32>
    %154 = arith.addf %137, %153 : vector<16x128xf32>
    %c108 = arith.constant 108 : index
    %155 = memref.load %arg1[%c108] : memref<400xf32, #tpu.memory_space<smem>>
    %156 = vector.broadcast %155 : f32 to vector<16x128xf32>
    %157 = arith.mulf %156, %150 : vector<16x128xf32>
    %158 = arith.addf %141, %157 : vector<16x128xf32>
    %c208 = arith.constant 208 : index
    %159 = memref.load %arg1[%c208] : memref<400xf32, #tpu.memory_space<smem>>
    %160 = vector.broadcast %159 : f32 to vector<16x128xf32>
    %161 = arith.mulf %160, %150 : vector<16x128xf32>
    %162 = arith.addf %145, %161 : vector<16x128xf32>
    %c308 = arith.constant 308 : index
    %163 = memref.load %arg1[%c308] : memref<400xf32, #tpu.memory_space<smem>>
    %164 = vector.broadcast %163 : f32 to vector<16x128xf32>
    %165 = arith.mulf %164, %150 : vector<16x128xf32>
    %166 = arith.addf %149, %165 : vector<16x128xf32>
    %c124_i32_15 = arith.constant 124 : i32
    %167 = tpu.dynamic_rotate %99 by %c124_i32_15 dim 1 : vector<16x128xf32>, i32 -> vector<16x128xf32>
    %c9 = arith.constant 9 : index
    %168 = memref.load %arg1[%c9] : memref<400xf32, #tpu.memory_space<smem>>
    %169 = vector.broadcast %168 : f32 to vector<16x128xf32>
    %170 = arith.mulf %169, %167 : vector<16x128xf32>
    %171 = arith.addf %154, %170 : vector<16x128xf32>
    %c109 = arith.constant 109 : index
    %172 = memref.load %arg1[%c109] : memref<400xf32, #tpu.memory_space<smem>>
    %173 = vector.broadcast %172 : f32 to vector<16x128xf32>
    %174 = arith.mulf %173, %167 : vector<16x128xf32>
    %175 = arith.addf %158, %174 : vector<16x128xf32>
    %c209 = arith.constant 209 : index
    %176 = memref.load %arg1[%c209] : memref<400xf32, #tpu.memory_space<smem>>
    %177 = vector.broadcast %176 : f32 to vector<16x128xf32>
    %178 = arith.mulf %177, %167 : vector<16x128xf32>
    %179 = arith.addf %162, %178 : vector<16x128xf32>
    %c309 = arith.constant 309 : index
    %180 = memref.load %arg1[%c309] : memref<400xf32, #tpu.memory_space<smem>>
    %181 = vector.broadcast %180 : f32 to vector<16x128xf32>
    %182 = arith.mulf %181, %167 : vector<16x128xf32>
    %183 = arith.addf %166, %182 : vector<16x128xf32>
    %c2_i32 = arith.constant 2 : i32
    %184 = arith.addi %3, %c2_i32 : i32
    %c0_16 = arith.constant 0 : index
    %c0_17 = arith.constant 0 : index
    %185 = arith.index_cast %184 : i32 to index
    %c0_18 = arith.constant 0 : index
    %186 = vector.load %arg2[%c0_16, %c0_17, %185, %c0_18] : memref<1x4x20x128xf32, #tpu.memory_space<vmem>>, vector<1x1x16x128xf32>
    %187 = vector.shape_cast %186 : vector<1x1x16x128xf32> to vector<16x128xf32>
    %c10 = arith.constant 10 : index
    %188 = memref.load %arg1[%c10] : memref<400xf32, #tpu.memory_space<smem>>
    %189 = vector.broadcast %188 : f32 to vector<16x128xf32>
    %190 = arith.mulf %189, %187 : vector<16x128xf32>
    %191 = arith.addf %171, %190 : vector<16x128xf32>
    %c110 = arith.constant 110 : index
    %192 = memref.load %arg1[%c110] : memref<400xf32, #tpu.memory_space<smem>>
    %193 = vector.broadcast %192 : f32 to vector<16x128xf32>
    %194 = arith.mulf %193, %187 : vector<16x128xf32>
    %195 = arith.addf %175, %194 : vector<16x128xf32>
    %c210 = arith.constant 210 : index
    %196 = memref.load %arg1[%c210] : memref<400xf32, #tpu.memory_space<smem>>
    %197 = vector.broadcast %196 : f32 to vector<16x128xf32>
    %198 = arith.mulf %197, %187 : vector<16x128xf32>
    %199 = arith.addf %179, %198 : vector<16x128xf32>
    %c310 = arith.constant 310 : index
    %200 = memref.load %arg1[%c310] : memref<400xf32, #tpu.memory_space<smem>>
    %201 = vector.broadcast %200 : f32 to vector<16x128xf32>
    %202 = arith.mulf %201, %187 : vector<16x128xf32>
    %203 = arith.addf %183, %202 : vector<16x128xf32>
    %c127_i32_19 = arith.constant 127 : i32
    %204 = tpu.dynamic_rotate %187 by %c127_i32_19 dim 1 : vector<16x128xf32>, i32 -> vector<16x128xf32>
    %c11 = arith.constant 11 : index
    %205 = memref.load %arg1[%c11] : memref<400xf32, #tpu.memory_space<smem>>
    %206 = vector.broadcast %205 : f32 to vector<16x128xf32>
    %207 = arith.mulf %206, %204 : vector<16x128xf32>
    %208 = arith.addf %191, %207 : vector<16x128xf32>
    %c111 = arith.constant 111 : index
    %209 = memref.load %arg1[%c111] : memref<400xf32, #tpu.memory_space<smem>>
    %210 = vector.broadcast %209 : f32 to vector<16x128xf32>
    %211 = arith.mulf %210, %204 : vector<16x128xf32>
    %212 = arith.addf %195, %211 : vector<16x128xf32>
    %c211 = arith.constant 211 : index
    %213 = memref.load %arg1[%c211] : memref<400xf32, #tpu.memory_space<smem>>
    %214 = vector.broadcast %213 : f32 to vector<16x128xf32>
    %215 = arith.mulf %214, %204 : vector<16x128xf32>
    %216 = arith.addf %199, %215 : vector<16x128xf32>
    %c311 = arith.constant 311 : index
    %217 = memref.load %arg1[%c311] : memref<400xf32, #tpu.memory_space<smem>>
    %218 = vector.broadcast %217 : f32 to vector<16x128xf32>
    %219 = arith.mulf %218, %204 : vector<16x128xf32>
    %220 = arith.addf %203, %219 : vector<16x128xf32>
    %c126_i32_20 = arith.constant 126 : i32
    %221 = tpu.dynamic_rotate %187 by %c126_i32_20 dim 1 : vector<16x128xf32>, i32 -> vector<16x128xf32>
    %c12 = arith.constant 12 : index
    %222 = memref.load %arg1[%c12] : memref<400xf32, #tpu.memory_space<smem>>
    %223 = vector.broadcast %222 : f32 to vector<16x128xf32>
    %224 = arith.mulf %223, %221 : vector<16x128xf32>
    %225 = arith.addf %208, %224 : vector<16x128xf32>
    %c112 = arith.constant 112 : index
    %226 = memref.load %arg1[%c112] : memref<400xf32, #tpu.memory_space<smem>>
    %227 = vector.broadcast %226 : f32 to vector<16x128xf32>
    %228 = arith.mulf %227, %221 : vector<16x128xf32>
    %229 = arith.addf %212, %228 : vector<16x128xf32>
    %c212 = arith.constant 212 : index
    %230 = memref.load %arg1[%c212] : memref<400xf32, #tpu.memory_space<smem>>
    %231 = vector.broadcast %230 : f32 to vector<16x128xf32>
    %232 = arith.mulf %231, %221 : vector<16x128xf32>
    %233 = arith.addf %216, %232 : vector<16x128xf32>
    %c312 = arith.constant 312 : index
    %234 = memref.load %arg1[%c312] : memref<400xf32, #tpu.memory_space<smem>>
    %235 = vector.broadcast %234 : f32 to vector<16x128xf32>
    %236 = arith.mulf %235, %221 : vector<16x128xf32>
    %237 = arith.addf %220, %236 : vector<16x128xf32>
    %c125_i32_21 = arith.constant 125 : i32
    %238 = tpu.dynamic_rotate %187 by %c125_i32_21 dim 1 : vector<16x128xf32>, i32 -> vector<16x128xf32>
    %c13 = arith.constant 13 : index
    %239 = memref.load %arg1[%c13] : memref<400xf32, #tpu.memory_space<smem>>
    %240 = vector.broadcast %239 : f32 to vector<16x128xf32>
    %241 = arith.mulf %240, %238 : vector<16x128xf32>
    %242 = arith.addf %225, %241 : vector<16x128xf32>
    %c113 = arith.constant 113 : index
    %243 = memref.load %arg1[%c113] : memref<400xf32, #tpu.memory_space<smem>>
    %244 = vector.broadcast %243 : f32 to vector<16x128xf32>
    %245 = arith.mulf %244, %238 : vector<16x128xf32>
    %246 = arith.addf %229, %245 : vector<16x128xf32>
    %c213 = arith.constant 213 : index
    %247 = memref.load %arg1[%c213] : memref<400xf32, #tpu.memory_space<smem>>
    %248 = vector.broadcast %247 : f32 to vector<16x128xf32>
    %249 = arith.mulf %248, %238 : vector<16x128xf32>
    %250 = arith.addf %233, %249 : vector<16x128xf32>
    %c313 = arith.constant 313 : index
    %251 = memref.load %arg1[%c313] : memref<400xf32, #tpu.memory_space<smem>>
    %252 = vector.broadcast %251 : f32 to vector<16x128xf32>
    %253 = arith.mulf %252, %238 : vector<16x128xf32>
    %254 = arith.addf %237, %253 : vector<16x128xf32>
    %c124_i32_22 = arith.constant 124 : i32
    %255 = tpu.dynamic_rotate %187 by %c124_i32_22 dim 1 : vector<16x128xf32>, i32 -> vector<16x128xf32>
    %c14 = arith.constant 14 : index
    %256 = memref.load %arg1[%c14] : memref<400xf32, #tpu.memory_space<smem>>
    %257 = vector.broadcast %256 : f32 to vector<16x128xf32>
    %258 = arith.mulf %257, %255 : vector<16x128xf32>
    %259 = arith.addf %242, %258 : vector<16x128xf32>
    %c114 = arith.constant 114 : index
    %260 = memref.load %arg1[%c114] : memref<400xf32, #tpu.memory_space<smem>>
    %261 = vector.broadcast %260 : f32 to vector<16x128xf32>
    %262 = arith.mulf %261, %255 : vector<16x128xf32>
    %263 = arith.addf %246, %262 : vector<16x128xf32>
    %c214 = arith.constant 214 : index
    %264 = memref.load %arg1[%c214] : memref<400xf32, #tpu.memory_space<smem>>
    %265 = vector.broadcast %264 : f32 to vector<16x128xf32>
    %266 = arith.mulf %265, %255 : vector<16x128xf32>
    %267 = arith.addf %250, %266 : vector<16x128xf32>
    %c314 = arith.constant 314 : index
    %268 = memref.load %arg1[%c314] : memref<400xf32, #tpu.memory_space<smem>>
    %269 = vector.broadcast %268 : f32 to vector<16x128xf32>
    %270 = arith.mulf %269, %255 : vector<16x128xf32>
    %271 = arith.addf %254, %270 : vector<16x128xf32>
    %c3_i32 = arith.constant 3 : i32
    %272 = arith.addi %3, %c3_i32 : i32
    %c0_23 = arith.constant 0 : index
    %c0_24 = arith.constant 0 : index
    %273 = arith.index_cast %272 : i32 to index
    %c0_25 = arith.constant 0 : index
    %274 = vector.load %arg2[%c0_23, %c0_24, %273, %c0_25] : memref<1x4x20x128xf32, #tpu.memory_space<vmem>>, vector<1x1x16x128xf32>
    %275 = vector.shape_cast %274 : vector<1x1x16x128xf32> to vector<16x128xf32>
    %c15 = arith.constant 15 : index
    %276 = memref.load %arg1[%c15] : memref<400xf32, #tpu.memory_space<smem>>
    %277 = vector.broadcast %276 : f32 to vector<16x128xf32>
    %278 = arith.mulf %277, %275 : vector<16x128xf32>
    %279 = arith.addf %259, %278 : vector<16x128xf32>
    %c115 = arith.constant 115 : index
    %280 = memref.load %arg1[%c115] : memref<400xf32, #tpu.memory_space<smem>>
    %281 = vector.broadcast %280 : f32 to vector<16x128xf32>
    %282 = arith.mulf %281, %275 : vector<16x128xf32>
    %283 = arith.addf %263, %282 : vector<16x128xf32>
    %c215 = arith.constant 215 : index
    %284 = memref.load %arg1[%c215] : memref<400xf32, #tpu.memory_space<smem>>
    %285 = vector.broadcast %284 : f32 to vector<16x128xf32>
    %286 = arith.mulf %285, %275 : vector<16x128xf32>
    %287 = arith.addf %267, %286 : vector<16x128xf32>
    %c315 = arith.constant 315 : index
    %288 = memref.load %arg1[%c315] : memref<400xf32, #tpu.memory_space<smem>>
    %289 = vector.broadcast %288 : f32 to vector<16x128xf32>
    %290 = arith.mulf %289, %275 : vector<16x128xf32>
    %291 = arith.addf %271, %290 : vector<16x128xf32>
    %c127_i32_26 = arith.constant 127 : i32
    %292 = tpu.dynamic_rotate %275 by %c127_i32_26 dim 1 : vector<16x128xf32>, i32 -> vector<16x128xf32>
    %c16 = arith.constant 16 : index
    %293 = memref.load %arg1[%c16] : memref<400xf32, #tpu.memory_space<smem>>
    %294 = vector.broadcast %293 : f32 to vector<16x128xf32>
    %295 = arith.mulf %294, %292 : vector<16x128xf32>
    %296 = arith.addf %279, %295 : vector<16x128xf32>
    %c116 = arith.constant 116 : index
    %297 = memref.load %arg1[%c116] : memref<400xf32, #tpu.memory_space<smem>>
    %298 = vector.broadcast %297 : f32 to vector<16x128xf32>
    %299 = arith.mulf %298, %292 : vector<16x128xf32>
    %300 = arith.addf %283, %299 : vector<16x128xf32>
    %c216 = arith.constant 216 : index
    %301 = memref.load %arg1[%c216] : memref<400xf32, #tpu.memory_space<smem>>
    %302 = vector.broadcast %301 : f32 to vector<16x128xf32>
    %303 = arith.mulf %302, %292 : vector<16x128xf32>
    %304 = arith.addf %287, %303 : vector<16x128xf32>
    %c316 = arith.constant 316 : index
    %305 = memref.load %arg1[%c316] : memref<400xf32, #tpu.memory_space<smem>>
    %306 = vector.broadcast %305 : f32 to vector<16x128xf32>
    %307 = arith.mulf %306, %292 : vector<16x128xf32>
    %308 = arith.addf %291, %307 : vector<16x128xf32>
    %c126_i32_27 = arith.constant 126 : i32
    %309 = tpu.dynamic_rotate %275 by %c126_i32_27 dim 1 : vector<16x128xf32>, i32 -> vector<16x128xf32>
    %c17 = arith.constant 17 : index
    %310 = memref.load %arg1[%c17] : memref<400xf32, #tpu.memory_space<smem>>
    %311 = vector.broadcast %310 : f32 to vector<16x128xf32>
    %312 = arith.mulf %311, %309 : vector<16x128xf32>
    %313 = arith.addf %296, %312 : vector<16x128xf32>
    %c117 = arith.constant 117 : index
    %314 = memref.load %arg1[%c117] : memref<400xf32, #tpu.memory_space<smem>>
    %315 = vector.broadcast %314 : f32 to vector<16x128xf32>
    %316 = arith.mulf %315, %309 : vector<16x128xf32>
    %317 = arith.addf %300, %316 : vector<16x128xf32>
    %c217 = arith.constant 217 : index
    %318 = memref.load %arg1[%c217] : memref<400xf32, #tpu.memory_space<smem>>
    %319 = vector.broadcast %318 : f32 to vector<16x128xf32>
    %320 = arith.mulf %319, %309 : vector<16x128xf32>
    %321 = arith.addf %304, %320 : vector<16x128xf32>
    %c317 = arith.constant 317 : index
    %322 = memref.load %arg1[%c317] : memref<400xf32, #tpu.memory_space<smem>>
    %323 = vector.broadcast %322 : f32 to vector<16x128xf32>
    %324 = arith.mulf %323, %309 : vector<16x128xf32>
    %325 = arith.addf %308, %324 : vector<16x128xf32>
    %c125_i32_28 = arith.constant 125 : i32
    %326 = tpu.dynamic_rotate %275 by %c125_i32_28 dim 1 : vector<16x128xf32>, i32 -> vector<16x128xf32>
    %c18 = arith.constant 18 : index
    %327 = memref.load %arg1[%c18] : memref<400xf32, #tpu.memory_space<smem>>
    %328 = vector.broadcast %327 : f32 to vector<16x128xf32>
    %329 = arith.mulf %328, %326 : vector<16x128xf32>
    %330 = arith.addf %313, %329 : vector<16x128xf32>
    %c118 = arith.constant 118 : index
    %331 = memref.load %arg1[%c118] : memref<400xf32, #tpu.memory_space<smem>>
    %332 = vector.broadcast %331 : f32 to vector<16x128xf32>
    %333 = arith.mulf %332, %326 : vector<16x128xf32>
    %334 = arith.addf %317, %333 : vector<16x128xf32>
    %c218 = arith.constant 218 : index
    %335 = memref.load %arg1[%c218] : memref<400xf32, #tpu.memory_space<smem>>
    %336 = vector.broadcast %335 : f32 to vector<16x128xf32>
    %337 = arith.mulf %336, %326 : vector<16x128xf32>
    %338 = arith.addf %321, %337 : vector<16x128xf32>
    %c318 = arith.constant 318 : index
    %339 = memref.load %arg1[%c318] : memref<400xf32, #tpu.memory_space<smem>>
    %340 = vector.broadcast %339 : f32 to vector<16x128xf32>
    %341 = arith.mulf %340, %326 : vector<16x128xf32>
    %342 = arith.addf %325, %341 : vector<16x128xf32>
    %c124_i32_29 = arith.constant 124 : i32
    %343 = tpu.dynamic_rotate %275 by %c124_i32_29 dim 1 : vector<16x128xf32>, i32 -> vector<16x128xf32>
    %c19 = arith.constant 19 : index
    %344 = memref.load %arg1[%c19] : memref<400xf32, #tpu.memory_space<smem>>
    %345 = vector.broadcast %344 : f32 to vector<16x128xf32>
    %346 = arith.mulf %345, %343 : vector<16x128xf32>
    %347 = arith.addf %330, %346 : vector<16x128xf32>
    %c119 = arith.constant 119 : index
    %348 = memref.load %arg1[%c119] : memref<400xf32, #tpu.memory_space<smem>>
    %349 = vector.broadcast %348 : f32 to vector<16x128xf32>
    %350 = arith.mulf %349, %343 : vector<16x128xf32>
    %351 = arith.addf %334, %350 : vector<16x128xf32>
    %c219 = arith.constant 219 : index
    %352 = memref.load %arg1[%c219] : memref<400xf32, #tpu.memory_space<smem>>
    %353 = vector.broadcast %352 : f32 to vector<16x128xf32>
    %354 = arith.mulf %353, %343 : vector<16x128xf32>
    %355 = arith.addf %338, %354 : vector<16x128xf32>
    %c319 = arith.constant 319 : index
    %356 = memref.load %arg1[%c319] : memref<400xf32, #tpu.memory_space<smem>>
    %357 = vector.broadcast %356 : f32 to vector<16x128xf32>
    %358 = arith.mulf %357, %343 : vector<16x128xf32>
    %359 = arith.addf %342, %358 : vector<16x128xf32>
    %c4_i32 = arith.constant 4 : i32
    %360 = arith.addi %3, %c4_i32 : i32
    %c0_30 = arith.constant 0 : index
    %c0_31 = arith.constant 0 : index
    %361 = arith.index_cast %360 : i32 to index
    %c0_32 = arith.constant 0 : index
    %362 = vector.load %arg2[%c0_30, %c0_31, %361, %c0_32] : memref<1x4x20x128xf32, #tpu.memory_space<vmem>>, vector<1x1x16x128xf32>
    %363 = vector.shape_cast %362 : vector<1x1x16x128xf32> to vector<16x128xf32>
    %c20 = arith.constant 20 : index
    %364 = memref.load %arg1[%c20] : memref<400xf32, #tpu.memory_space<smem>>
    %365 = vector.broadcast %364 : f32 to vector<16x128xf32>
    %366 = arith.mulf %365, %363 : vector<16x128xf32>
    %367 = arith.addf %347, %366 : vector<16x128xf32>
    %c120 = arith.constant 120 : index
    %368 = memref.load %arg1[%c120] : memref<400xf32, #tpu.memory_space<smem>>
    %369 = vector.broadcast %368 : f32 to vector<16x128xf32>
    %370 = arith.mulf %369, %363 : vector<16x128xf32>
    %371 = arith.addf %351, %370 : vector<16x128xf32>
    %c220 = arith.constant 220 : index
    %372 = memref.load %arg1[%c220] : memref<400xf32, #tpu.memory_space<smem>>
    %373 = vector.broadcast %372 : f32 to vector<16x128xf32>
    %374 = arith.mulf %373, %363 : vector<16x128xf32>
    %375 = arith.addf %355, %374 : vector<16x128xf32>
    %c320 = arith.constant 320 : index
    %376 = memref.load %arg1[%c320] : memref<400xf32, #tpu.memory_space<smem>>
    %377 = vector.broadcast %376 : f32 to vector<16x128xf32>
    %378 = arith.mulf %377, %363 : vector<16x128xf32>
    %379 = arith.addf %359, %378 : vector<16x128xf32>
    %c127_i32_33 = arith.constant 127 : i32
    %380 = tpu.dynamic_rotate %363 by %c127_i32_33 dim 1 : vector<16x128xf32>, i32 -> vector<16x128xf32>
    %c21 = arith.constant 21 : index
    %381 = memref.load %arg1[%c21] : memref<400xf32, #tpu.memory_space<smem>>
    %382 = vector.broadcast %381 : f32 to vector<16x128xf32>
    %383 = arith.mulf %382, %380 : vector<16x128xf32>
    %384 = arith.addf %367, %383 : vector<16x128xf32>
    %c121 = arith.constant 121 : index
    %385 = memref.load %arg1[%c121] : memref<400xf32, #tpu.memory_space<smem>>
    %386 = vector.broadcast %385 : f32 to vector<16x128xf32>
    %387 = arith.mulf %386, %380 : vector<16x128xf32>
    %388 = arith.addf %371, %387 : vector<16x128xf32>
    %c221 = arith.constant 221 : index
    %389 = memref.load %arg1[%c221] : memref<400xf32, #tpu.memory_space<smem>>
    %390 = vector.broadcast %389 : f32 to vector<16x128xf32>
    %391 = arith.mulf %390, %380 : vector<16x128xf32>
    %392 = arith.addf %375, %391 : vector<16x128xf32>
    %c321 = arith.constant 321 : index
    %393 = memref.load %arg1[%c321] : memref<400xf32, #tpu.memory_space<smem>>
    %394 = vector.broadcast %393 : f32 to vector<16x128xf32>
    %395 = arith.mulf %394, %380 : vector<16x128xf32>
    %396 = arith.addf %379, %395 : vector<16x128xf32>
    %c126_i32_34 = arith.constant 126 : i32
    %397 = tpu.dynamic_rotate %363 by %c126_i32_34 dim 1 : vector<16x128xf32>, i32 -> vector<16x128xf32>
    %c22 = arith.constant 22 : index
    %398 = memref.load %arg1[%c22] : memref<400xf32, #tpu.memory_space<smem>>
    %399 = vector.broadcast %398 : f32 to vector<16x128xf32>
    %400 = arith.mulf %399, %397 : vector<16x128xf32>
    %401 = arith.addf %384, %400 : vector<16x128xf32>
    %c122 = arith.constant 122 : index
    %402 = memref.load %arg1[%c122] : memref<400xf32, #tpu.memory_space<smem>>
    %403 = vector.broadcast %402 : f32 to vector<16x128xf32>
    %404 = arith.mulf %403, %397 : vector<16x128xf32>
    %405 = arith.addf %388, %404 : vector<16x128xf32>
    %c222 = arith.constant 222 : index
    %406 = memref.load %arg1[%c222] : memref<400xf32, #tpu.memory_space<smem>>
    %407 = vector.broadcast %406 : f32 to vector<16x128xf32>
    %408 = arith.mulf %407, %397 : vector<16x128xf32>
    %409 = arith.addf %392, %408 : vector<16x128xf32>
    %c322 = arith.constant 322 : index
    %410 = memref.load %arg1[%c322] : memref<400xf32, #tpu.memory_space<smem>>
    %411 = vector.broadcast %410 : f32 to vector<16x128xf32>
    %412 = arith.mulf %411, %397 : vector<16x128xf32>
    %413 = arith.addf %396, %412 : vector<16x128xf32>
    %c125_i32_35 = arith.constant 125 : i32
    %414 = tpu.dynamic_rotate %363 by %c125_i32_35 dim 1 : vector<16x128xf32>, i32 -> vector<16x128xf32>
    %c23 = arith.constant 23 : index
    %415 = memref.load %arg1[%c23] : memref<400xf32, #tpu.memory_space<smem>>
    %416 = vector.broadcast %415 : f32 to vector<16x128xf32>
    %417 = arith.mulf %416, %414 : vector<16x128xf32>
    %418 = arith.addf %401, %417 : vector<16x128xf32>
    %c123 = arith.constant 123 : index
    %419 = memref.load %arg1[%c123] : memref<400xf32, #tpu.memory_space<smem>>
    %420 = vector.broadcast %419 : f32 to vector<16x128xf32>
    %421 = arith.mulf %420, %414 : vector<16x128xf32>
    %422 = arith.addf %405, %421 : vector<16x128xf32>
    %c223 = arith.constant 223 : index
    %423 = memref.load %arg1[%c223] : memref<400xf32, #tpu.memory_space<smem>>
    %424 = vector.broadcast %423 : f32 to vector<16x128xf32>
    %425 = arith.mulf %424, %414 : vector<16x128xf32>
    %426 = arith.addf %409, %425 : vector<16x128xf32>
    %c323 = arith.constant 323 : index
    %427 = memref.load %arg1[%c323] : memref<400xf32, #tpu.memory_space<smem>>
    %428 = vector.broadcast %427 : f32 to vector<16x128xf32>
    %429 = arith.mulf %428, %414 : vector<16x128xf32>
    %430 = arith.addf %413, %429 : vector<16x128xf32>
    %c124_i32_36 = arith.constant 124 : i32
    %431 = tpu.dynamic_rotate %363 by %c124_i32_36 dim 1 : vector<16x128xf32>, i32 -> vector<16x128xf32>
    %c24 = arith.constant 24 : index
    %432 = memref.load %arg1[%c24] : memref<400xf32, #tpu.memory_space<smem>>
    %433 = vector.broadcast %432 : f32 to vector<16x128xf32>
    %434 = arith.mulf %433, %431 : vector<16x128xf32>
    %435 = arith.addf %418, %434 : vector<16x128xf32>
    %c124 = arith.constant 124 : index
    %436 = memref.load %arg1[%c124] : memref<400xf32, #tpu.memory_space<smem>>
    %437 = vector.broadcast %436 : f32 to vector<16x128xf32>
    %438 = arith.mulf %437, %431 : vector<16x128xf32>
    %439 = arith.addf %422, %438 : vector<16x128xf32>
    %c224 = arith.constant 224 : index
    %440 = memref.load %arg1[%c224] : memref<400xf32, #tpu.memory_space<smem>>
    %441 = vector.broadcast %440 : f32 to vector<16x128xf32>
    %442 = arith.mulf %441, %431 : vector<16x128xf32>
    %443 = arith.addf %426, %442 : vector<16x128xf32>
    %c324 = arith.constant 324 : index
    %444 = memref.load %arg1[%c324] : memref<400xf32, #tpu.memory_space<smem>>
    %445 = vector.broadcast %444 : f32 to vector<16x128xf32>
    %446 = arith.mulf %445, %431 : vector<16x128xf32>
    %447 = arith.addf %430, %446 : vector<16x128xf32>
    %c0_i32_37 = arith.constant 0 : i32
    %448 = arith.addi %3, %c0_i32_37 : i32
    %c0_38 = arith.constant 0 : index
    %c1_39 = arith.constant 1 : index
    %449 = arith.index_cast %448 : i32 to index
    %c0_40 = arith.constant 0 : index
    %450 = vector.load %arg2[%c0_38, %c1_39, %449, %c0_40] : memref<1x4x20x128xf32, #tpu.memory_space<vmem>>, vector<1x1x16x128xf32>
    %451 = vector.shape_cast %450 : vector<1x1x16x128xf32> to vector<16x128xf32>
    %c25 = arith.constant 25 : index
    %452 = memref.load %arg1[%c25] : memref<400xf32, #tpu.memory_space<smem>>
    %453 = vector.broadcast %452 : f32 to vector<16x128xf32>
    %454 = arith.mulf %453, %451 : vector<16x128xf32>
    %455 = arith.addf %435, %454 : vector<16x128xf32>
    %c125 = arith.constant 125 : index
    %456 = memref.load %arg1[%c125] : memref<400xf32, #tpu.memory_space<smem>>
    %457 = vector.broadcast %456 : f32 to vector<16x128xf32>
    %458 = arith.mulf %457, %451 : vector<16x128xf32>
    %459 = arith.addf %439, %458 : vector<16x128xf32>
    %c225 = arith.constant 225 : index
    %460 = memref.load %arg1[%c225] : memref<400xf32, #tpu.memory_space<smem>>
    %461 = vector.broadcast %460 : f32 to vector<16x128xf32>
    %462 = arith.mulf %461, %451 : vector<16x128xf32>
    %463 = arith.addf %443, %462 : vector<16x128xf32>
    %c325 = arith.constant 325 : index
    %464 = memref.load %arg1[%c325] : memref<400xf32, #tpu.memory_space<smem>>
    %465 = vector.broadcast %464 : f32 to vector<16x128xf32>
    %466 = arith.mulf %465, %451 : vector<16x128xf32>
    %467 = arith.addf %447, %466 : vector<16x128xf32>
    %c127_i32_41 = arith.constant 127 : i32
    %468 = tpu.dynamic_rotate %451 by %c127_i32_41 dim 1 : vector<16x128xf32>, i32 -> vector<16x128xf32>
    %c26 = arith.constant 26 : index
    %469 = memref.load %arg1[%c26] : memref<400xf32, #tpu.memory_space<smem>>
    %470 = vector.broadcast %469 : f32 to vector<16x128xf32>
    %471 = arith.mulf %470, %468 : vector<16x128xf32>
    %472 = arith.addf %455, %471 : vector<16x128xf32>
    %c126 = arith.constant 126 : index
    %473 = memref.load %arg1[%c126] : memref<400xf32, #tpu.memory_space<smem>>
    %474 = vector.broadcast %473 : f32 to vector<16x128xf32>
    %475 = arith.mulf %474, %468 : vector<16x128xf32>
    %476 = arith.addf %459, %475 : vector<16x128xf32>
    %c226 = arith.constant 226 : index
    %477 = memref.load %arg1[%c226] : memref<400xf32, #tpu.memory_space<smem>>
    %478 = vector.broadcast %477 : f32 to vector<16x128xf32>
    %479 = arith.mulf %478, %468 : vector<16x128xf32>
    %480 = arith.addf %463, %479 : vector<16x128xf32>
    %c326 = arith.constant 326 : index
    %481 = memref.load %arg1[%c326] : memref<400xf32, #tpu.memory_space<smem>>
    %482 = vector.broadcast %481 : f32 to vector<16x128xf32>
    %483 = arith.mulf %482, %468 : vector<16x128xf32>
    %484 = arith.addf %467, %483 : vector<16x128xf32>
    %c126_i32_42 = arith.constant 126 : i32
    %485 = tpu.dynamic_rotate %451 by %c126_i32_42 dim 1 : vector<16x128xf32>, i32 -> vector<16x128xf32>
    %c27 = arith.constant 27 : index
    %486 = memref.load %arg1[%c27] : memref<400xf32, #tpu.memory_space<smem>>
    %487 = vector.broadcast %486 : f32 to vector<16x128xf32>
    %488 = arith.mulf %487, %485 : vector<16x128xf32>
    %489 = arith.addf %472, %488 : vector<16x128xf32>
    %c127 = arith.constant 127 : index
    %490 = memref.load %arg1[%c127] : memref<400xf32, #tpu.memory_space<smem>>
    %491 = vector.broadcast %490 : f32 to vector<16x128xf32>
    %492 = arith.mulf %491, %485 : vector<16x128xf32>
    %493 = arith.addf %476, %492 : vector<16x128xf32>
    %c227 = arith.constant 227 : index
    %494 = memref.load %arg1[%c227] : memref<400xf32, #tpu.memory_space<smem>>
    %495 = vector.broadcast %494 : f32 to vector<16x128xf32>
    %496 = arith.mulf %495, %485 : vector<16x128xf32>
    %497 = arith.addf %480, %496 : vector<16x128xf32>
    %c327 = arith.constant 327 : index
    %498 = memref.load %arg1[%c327] : memref<400xf32, #tpu.memory_space<smem>>
    %499 = vector.broadcast %498 : f32 to vector<16x128xf32>
    %500 = arith.mulf %499, %485 : vector<16x128xf32>
    %501 = arith.addf %484, %500 : vector<16x128xf32>
    %c125_i32_43 = arith.constant 125 : i32
    %502 = tpu.dynamic_rotate %451 by %c125_i32_43 dim 1 : vector<16x128xf32>, i32 -> vector<16x128xf32>
    %c28 = arith.constant 28 : index
    %503 = memref.load %arg1[%c28] : memref<400xf32, #tpu.memory_space<smem>>
    %504 = vector.broadcast %503 : f32 to vector<16x128xf32>
    %505 = arith.mulf %504, %502 : vector<16x128xf32>
    %506 = arith.addf %489, %505 : vector<16x128xf32>
    %c128 = arith.constant 128 : index
    %507 = memref.load %arg1[%c128] : memref<400xf32, #tpu.memory_space<smem>>
    %508 = vector.broadcast %507 : f32 to vector<16x128xf32>
    %509 = arith.mulf %508, %502 : vector<16x128xf32>
    %510 = arith.addf %493, %509 : vector<16x128xf32>
    %c228 = arith.constant 228 : index
    %511 = memref.load %arg1[%c228] : memref<400xf32, #tpu.memory_space<smem>>
    %512 = vector.broadcast %511 : f32 to vector<16x128xf32>
    %513 = arith.mulf %512, %502 : vector<16x128xf32>
    %514 = arith.addf %497, %513 : vector<16x128xf32>
    %c328 = arith.constant 328 : index
    %515 = memref.load %arg1[%c328] : memref<400xf32, #tpu.memory_space<smem>>
    %516 = vector.broadcast %515 : f32 to vector<16x128xf32>
    %517 = arith.mulf %516, %502 : vector<16x128xf32>
    %518 = arith.addf %501, %517 : vector<16x128xf32>
    %c124_i32_44 = arith.constant 124 : i32
    %519 = tpu.dynamic_rotate %451 by %c124_i32_44 dim 1 : vector<16x128xf32>, i32 -> vector<16x128xf32>
    %c29 = arith.constant 29 : index
    %520 = memref.load %arg1[%c29] : memref<400xf32, #tpu.memory_space<smem>>
    %521 = vector.broadcast %520 : f32 to vector<16x128xf32>
    %522 = arith.mulf %521, %519 : vector<16x128xf32>
    %523 = arith.addf %506, %522 : vector<16x128xf32>
    %c129 = arith.constant 129 : index
    %524 = memref.load %arg1[%c129] : memref<400xf32, #tpu.memory_space<smem>>
    %525 = vector.broadcast %524 : f32 to vector<16x128xf32>
    %526 = arith.mulf %525, %519 : vector<16x128xf32>
    %527 = arith.addf %510, %526 : vector<16x128xf32>
    %c229 = arith.constant 229 : index
    %528 = memref.load %arg1[%c229] : memref<400xf32, #tpu.memory_space<smem>>
    %529 = vector.broadcast %528 : f32 to vector<16x128xf32>
    %530 = arith.mulf %529, %519 : vector<16x128xf32>
    %531 = arith.addf %514, %530 : vector<16x128xf32>
    %c329 = arith.constant 329 : index
    %532 = memref.load %arg1[%c329] : memref<400xf32, #tpu.memory_space<smem>>
    %533 = vector.broadcast %532 : f32 to vector<16x128xf32>
    %534 = arith.mulf %533, %519 : vector<16x128xf32>
    %535 = arith.addf %518, %534 : vector<16x128xf32>
    %c1_i32_45 = arith.constant 1 : i32
    %536 = arith.addi %3, %c1_i32_45 : i32
    %c0_46 = arith.constant 0 : index
    %c1_47 = arith.constant 1 : index
    %537 = arith.index_cast %536 : i32 to index
    %c0_48 = arith.constant 0 : index
    %538 = vector.load %arg2[%c0_46, %c1_47, %537, %c0_48] : memref<1x4x20x128xf32, #tpu.memory_space<vmem>>, vector<1x1x16x128xf32>
    %539 = vector.shape_cast %538 : vector<1x1x16x128xf32> to vector<16x128xf32>
    %c30 = arith.constant 30 : index
    %540 = memref.load %arg1[%c30] : memref<400xf32, #tpu.memory_space<smem>>
    %541 = vector.broadcast %540 : f32 to vector<16x128xf32>
    %542 = arith.mulf %541, %539 : vector<16x128xf32>
    %543 = arith.addf %523, %542 : vector<16x128xf32>
    %c130 = arith.constant 130 : index
    %544 = memref.load %arg1[%c130] : memref<400xf32, #tpu.memory_space<smem>>
    %545 = vector.broadcast %544 : f32 to vector<16x128xf32>
    %546 = arith.mulf %545, %539 : vector<16x128xf32>
    %547 = arith.addf %527, %546 : vector<16x128xf32>
    %c230 = arith.constant 230 : index
    %548 = memref.load %arg1[%c230] : memref<400xf32, #tpu.memory_space<smem>>
    %549 = vector.broadcast %548 : f32 to vector<16x128xf32>
    %550 = arith.mulf %549, %539 : vector<16x128xf32>
    %551 = arith.addf %531, %550 : vector<16x128xf32>
    %c330 = arith.constant 330 : index
    %552 = memref.load %arg1[%c330] : memref<400xf32, #tpu.memory_space<smem>>
    %553 = vector.broadcast %552 : f32 to vector<16x128xf32>
    %554 = arith.mulf %553, %539 : vector<16x128xf32>
    %555 = arith.addf %535, %554 : vector<16x128xf32>
    %c127_i32_49 = arith.constant 127 : i32
    %556 = tpu.dynamic_rotate %539 by %c127_i32_49 dim 1 : vector<16x128xf32>, i32 -> vector<16x128xf32>
    %c31 = arith.constant 31 : index
    %557 = memref.load %arg1[%c31] : memref<400xf32, #tpu.memory_space<smem>>
    %558 = vector.broadcast %557 : f32 to vector<16x128xf32>
    %559 = arith.mulf %558, %556 : vector<16x128xf32>
    %560 = arith.addf %543, %559 : vector<16x128xf32>
    %c131 = arith.constant 131 : index
    %561 = memref.load %arg1[%c131] : memref<400xf32, #tpu.memory_space<smem>>
    %562 = vector.broadcast %561 : f32 to vector<16x128xf32>
    %563 = arith.mulf %562, %556 : vector<16x128xf32>
    %564 = arith.addf %547, %563 : vector<16x128xf32>
    %c231 = arith.constant 231 : index
    %565 = memref.load %arg1[%c231] : memref<400xf32, #tpu.memory_space<smem>>
    %566 = vector.broadcast %565 : f32 to vector<16x128xf32>
    %567 = arith.mulf %566, %556 : vector<16x128xf32>
    %568 = arith.addf %551, %567 : vector<16x128xf32>
    %c331 = arith.constant 331 : index
    %569 = memref.load %arg1[%c331] : memref<400xf32, #tpu.memory_space<smem>>
    %570 = vector.broadcast %569 : f32 to vector<16x128xf32>
    %571 = arith.mulf %570, %556 : vector<16x128xf32>
    %572 = arith.addf %555, %571 : vector<16x128xf32>
    %c126_i32_50 = arith.constant 126 : i32
    %573 = tpu.dynamic_rotate %539 by %c126_i32_50 dim 1 : vector<16x128xf32>, i32 -> vector<16x128xf32>
    %c32 = arith.constant 32 : index
    %574 = memref.load %arg1[%c32] : memref<400xf32, #tpu.memory_space<smem>>
    %575 = vector.broadcast %574 : f32 to vector<16x128xf32>
    %576 = arith.mulf %575, %573 : vector<16x128xf32>
    %577 = arith.addf %560, %576 : vector<16x128xf32>
    %c132 = arith.constant 132 : index
    %578 = memref.load %arg1[%c132] : memref<400xf32, #tpu.memory_space<smem>>
    %579 = vector.broadcast %578 : f32 to vector<16x128xf32>
    %580 = arith.mulf %579, %573 : vector<16x128xf32>
    %581 = arith.addf %564, %580 : vector<16x128xf32>
    %c232 = arith.constant 232 : index
    %582 = memref.load %arg1[%c232] : memref<400xf32, #tpu.memory_space<smem>>
    %583 = vector.broadcast %582 : f32 to vector<16x128xf32>
    %584 = arith.mulf %583, %573 : vector<16x128xf32>
    %585 = arith.addf %568, %584 : vector<16x128xf32>
    %c332 = arith.constant 332 : index
    %586 = memref.load %arg1[%c332] : memref<400xf32, #tpu.memory_space<smem>>
    %587 = vector.broadcast %586 : f32 to vector<16x128xf32>
    %588 = arith.mulf %587, %573 : vector<16x128xf32>
    %589 = arith.addf %572, %588 : vector<16x128xf32>
    %c125_i32_51 = arith.constant 125 : i32
    %590 = tpu.dynamic_rotate %539 by %c125_i32_51 dim 1 : vector<16x128xf32>, i32 -> vector<16x128xf32>
    %c33 = arith.constant 33 : index
    %591 = memref.load %arg1[%c33] : memref<400xf32, #tpu.memory_space<smem>>
    %592 = vector.broadcast %591 : f32 to vector<16x128xf32>
    %593 = arith.mulf %592, %590 : vector<16x128xf32>
    %594 = arith.addf %577, %593 : vector<16x128xf32>
    %c133 = arith.constant 133 : index
    %595 = memref.load %arg1[%c133] : memref<400xf32, #tpu.memory_space<smem>>
    %596 = vector.broadcast %595 : f32 to vector<16x128xf32>
    %597 = arith.mulf %596, %590 : vector<16x128xf32>
    %598 = arith.addf %581, %597 : vector<16x128xf32>
    %c233 = arith.constant 233 : index
    %599 = memref.load %arg1[%c233] : memref<400xf32, #tpu.memory_space<smem>>
    %600 = vector.broadcast %599 : f32 to vector<16x128xf32>
    %601 = arith.mulf %600, %590 : vector<16x128xf32>
    %602 = arith.addf %585, %601 : vector<16x128xf32>
    %c333 = arith.constant 333 : index
    %603 = memref.load %arg1[%c333] : memref<400xf32, #tpu.memory_space<smem>>
    %604 = vector.broadcast %603 : f32 to vector<16x128xf32>
    %605 = arith.mulf %604, %590 : vector<16x128xf32>
    %606 = arith.addf %589, %605 : vector<16x128xf32>
    %c124_i32_52 = arith.constant 124 : i32
    %607 = tpu.dynamic_rotate %539 by %c124_i32_52 dim 1 : vector<16x128xf32>, i32 -> vector<16x128xf32>
    %c34 = arith.constant 34 : index
    %608 = memref.load %arg1[%c34] : memref<400xf32, #tpu.memory_space<smem>>
    %609 = vector.broadcast %608 : f32 to vector<16x128xf32>
    %610 = arith.mulf %609, %607 : vector<16x128xf32>
    %611 = arith.addf %594, %610 : vector<16x128xf32>
    %c134 = arith.constant 134 : index
    %612 = memref.load %arg1[%c134] : memref<400xf32, #tpu.memory_space<smem>>
    %613 = vector.broadcast %612 : f32 to vector<16x128xf32>
    %614 = arith.mulf %613, %607 : vector<16x128xf32>
    %615 = arith.addf %598, %614 : vector<16x128xf32>
    %c234 = arith.constant 234 : index
    %616 = memref.load %arg1[%c234] : memref<400xf32, #tpu.memory_space<smem>>
    %617 = vector.broadcast %616 : f32 to vector<16x128xf32>
    %618 = arith.mulf %617, %607 : vector<16x128xf32>
    %619 = arith.addf %602, %618 : vector<16x128xf32>
    %c334 = arith.constant 334 : index
    %620 = memref.load %arg1[%c334] : memref<400xf32, #tpu.memory_space<smem>>
    %621 = vector.broadcast %620 : f32 to vector<16x128xf32>
    %622 = arith.mulf %621, %607 : vector<16x128xf32>
    %623 = arith.addf %606, %622 : vector<16x128xf32>
    %c2_i32_53 = arith.constant 2 : i32
    %624 = arith.addi %3, %c2_i32_53 : i32
    %c0_54 = arith.constant 0 : index
    %c1_55 = arith.constant 1 : index
    %625 = arith.index_cast %624 : i32 to index
    %c0_56 = arith.constant 0 : index
    %626 = vector.load %arg2[%c0_54, %c1_55, %625, %c0_56] : memref<1x4x20x128xf32, #tpu.memory_space<vmem>>, vector<1x1x16x128xf32>
    %627 = vector.shape_cast %626 : vector<1x1x16x128xf32> to vector<16x128xf32>
    %c35 = arith.constant 35 : index
    %628 = memref.load %arg1[%c35] : memref<400xf32, #tpu.memory_space<smem>>
    %629 = vector.broadcast %628 : f32 to vector<16x128xf32>
    %630 = arith.mulf %629, %627 : vector<16x128xf32>
    %631 = arith.addf %611, %630 : vector<16x128xf32>
    %c135 = arith.constant 135 : index
    %632 = memref.load %arg1[%c135] : memref<400xf32, #tpu.memory_space<smem>>
    %633 = vector.broadcast %632 : f32 to vector<16x128xf32>
    %634 = arith.mulf %633, %627 : vector<16x128xf32>
    %635 = arith.addf %615, %634 : vector<16x128xf32>
    %c235 = arith.constant 235 : index
    %636 = memref.load %arg1[%c235] : memref<400xf32, #tpu.memory_space<smem>>
    %637 = vector.broadcast %636 : f32 to vector<16x128xf32>
    %638 = arith.mulf %637, %627 : vector<16x128xf32>
    %639 = arith.addf %619, %638 : vector<16x128xf32>
    %c335 = arith.constant 335 : index
    %640 = memref.load %arg1[%c335] : memref<400xf32, #tpu.memory_space<smem>>
    %641 = vector.broadcast %640 : f32 to vector<16x128xf32>
    %642 = arith.mulf %641, %627 : vector<16x128xf32>
    %643 = arith.addf %623, %642 : vector<16x128xf32>
    %c127_i32_57 = arith.constant 127 : i32
    %644 = tpu.dynamic_rotate %627 by %c127_i32_57 dim 1 : vector<16x128xf32>, i32 -> vector<16x128xf32>
    %c36 = arith.constant 36 : index
    %645 = memref.load %arg1[%c36] : memref<400xf32, #tpu.memory_space<smem>>
    %646 = vector.broadcast %645 : f32 to vector<16x128xf32>
    %647 = arith.mulf %646, %644 : vector<16x128xf32>
    %648 = arith.addf %631, %647 : vector<16x128xf32>
    %c136 = arith.constant 136 : index
    %649 = memref.load %arg1[%c136] : memref<400xf32, #tpu.memory_space<smem>>
    %650 = vector.broadcast %649 : f32 to vector<16x128xf32>
    %651 = arith.mulf %650, %644 : vector<16x128xf32>
    %652 = arith.addf %635, %651 : vector<16x128xf32>
    %c236 = arith.constant 236 : index
    %653 = memref.load %arg1[%c236] : memref<400xf32, #tpu.memory_space<smem>>
    %654 = vector.broadcast %653 : f32 to vector<16x128xf32>
    %655 = arith.mulf %654, %644 : vector<16x128xf32>
    %656 = arith.addf %639, %655 : vector<16x128xf32>
    %c336 = arith.constant 336 : index
    %657 = memref.load %arg1[%c336] : memref<400xf32, #tpu.memory_space<smem>>
    %658 = vector.broadcast %657 : f32 to vector<16x128xf32>
    %659 = arith.mulf %658, %644 : vector<16x128xf32>
    %660 = arith.addf %643, %659 : vector<16x128xf32>
    %c126_i32_58 = arith.constant 126 : i32
    %661 = tpu.dynamic_rotate %627 by %c126_i32_58 dim 1 : vector<16x128xf32>, i32 -> vector<16x128xf32>
    %c37 = arith.constant 37 : index
    %662 = memref.load %arg1[%c37] : memref<400xf32, #tpu.memory_space<smem>>
    %663 = vector.broadcast %662 : f32 to vector<16x128xf32>
    %664 = arith.mulf %663, %661 : vector<16x128xf32>
    %665 = arith.addf %648, %664 : vector<16x128xf32>
    %c137 = arith.constant 137 : index
    %666 = memref.load %arg1[%c137] : memref<400xf32, #tpu.memory_space<smem>>
    %667 = vector.broadcast %666 : f32 to vector<16x128xf32>
    %668 = arith.mulf %667, %661 : vector<16x128xf32>
    %669 = arith.addf %652, %668 : vector<16x128xf32>
    %c237 = arith.constant 237 : index
    %670 = memref.load %arg1[%c237] : memref<400xf32, #tpu.memory_space<smem>>
    %671 = vector.broadcast %670 : f32 to vector<16x128xf32>
    %672 = arith.mulf %671, %661 : vector<16x128xf32>
    %673 = arith.addf %656, %672 : vector<16x128xf32>
    %c337 = arith.constant 337 : index
    %674 = memref.load %arg1[%c337] : memref<400xf32, #tpu.memory_space<smem>>
    %675 = vector.broadcast %674 : f32 to vector<16x128xf32>
    %676 = arith.mulf %675, %661 : vector<16x128xf32>
    %677 = arith.addf %660, %676 : vector<16x128xf32>
    %c125_i32_59 = arith.constant 125 : i32
    %678 = tpu.dynamic_rotate %627 by %c125_i32_59 dim 1 : vector<16x128xf32>, i32 -> vector<16x128xf32>
    %c38 = arith.constant 38 : index
    %679 = memref.load %arg1[%c38] : memref<400xf32, #tpu.memory_space<smem>>
    %680 = vector.broadcast %679 : f32 to vector<16x128xf32>
    %681 = arith.mulf %680, %678 : vector<16x128xf32>
    %682 = arith.addf %665, %681 : vector<16x128xf32>
    %c138 = arith.constant 138 : index
    %683 = memref.load %arg1[%c138] : memref<400xf32, #tpu.memory_space<smem>>
    %684 = vector.broadcast %683 : f32 to vector<16x128xf32>
    %685 = arith.mulf %684, %678 : vector<16x128xf32>
    %686 = arith.addf %669, %685 : vector<16x128xf32>
    %c238 = arith.constant 238 : index
    %687 = memref.load %arg1[%c238] : memref<400xf32, #tpu.memory_space<smem>>
    %688 = vector.broadcast %687 : f32 to vector<16x128xf32>
    %689 = arith.mulf %688, %678 : vector<16x128xf32>
    %690 = arith.addf %673, %689 : vector<16x128xf32>
    %c338 = arith.constant 338 : index
    %691 = memref.load %arg1[%c338] : memref<400xf32, #tpu.memory_space<smem>>
    %692 = vector.broadcast %691 : f32 to vector<16x128xf32>
    %693 = arith.mulf %692, %678 : vector<16x128xf32>
    %694 = arith.addf %677, %693 : vector<16x128xf32>
    %c124_i32_60 = arith.constant 124 : i32
    %695 = tpu.dynamic_rotate %627 by %c124_i32_60 dim 1 : vector<16x128xf32>, i32 -> vector<16x128xf32>
    %c39 = arith.constant 39 : index
    %696 = memref.load %arg1[%c39] : memref<400xf32, #tpu.memory_space<smem>>
    %697 = vector.broadcast %696 : f32 to vector<16x128xf32>
    %698 = arith.mulf %697, %695 : vector<16x128xf32>
    %699 = arith.addf %682, %698 : vector<16x128xf32>
    %c139 = arith.constant 139 : index
    %700 = memref.load %arg1[%c139] : memref<400xf32, #tpu.memory_space<smem>>
    %701 = vector.broadcast %700 : f32 to vector<16x128xf32>
    %702 = arith.mulf %701, %695 : vector<16x128xf32>
    %703 = arith.addf %686, %702 : vector<16x128xf32>
    %c239 = arith.constant 239 : index
    %704 = memref.load %arg1[%c239] : memref<400xf32, #tpu.memory_space<smem>>
    %705 = vector.broadcast %704 : f32 to vector<16x128xf32>
    %706 = arith.mulf %705, %695 : vector<16x128xf32>
    %707 = arith.addf %690, %706 : vector<16x128xf32>
    %c339 = arith.constant 339 : index
    %708 = memref.load %arg1[%c339] : memref<400xf32, #tpu.memory_space<smem>>
    %709 = vector.broadcast %708 : f32 to vector<16x128xf32>
    %710 = arith.mulf %709, %695 : vector<16x128xf32>
    %711 = arith.addf %694, %710 : vector<16x128xf32>
    %c3_i32_61 = arith.constant 3 : i32
    %712 = arith.addi %3, %c3_i32_61 : i32
    %c0_62 = arith.constant 0 : index
    %c1_63 = arith.constant 1 : index
    %713 = arith.index_cast %712 : i32 to index
    %c0_64 = arith.constant 0 : index
    %714 = vector.load %arg2[%c0_62, %c1_63, %713, %c0_64] : memref<1x4x20x128xf32, #tpu.memory_space<vmem>>, vector<1x1x16x128xf32>
    %715 = vector.shape_cast %714 : vector<1x1x16x128xf32> to vector<16x128xf32>
    %c40 = arith.constant 40 : index
    %716 = memref.load %arg1[%c40] : memref<400xf32, #tpu.memory_space<smem>>
    %717 = vector.broadcast %716 : f32 to vector<16x128xf32>
    %718 = arith.mulf %717, %715 : vector<16x128xf32>
    %719 = arith.addf %699, %718 : vector<16x128xf32>
    %c140 = arith.constant 140 : index
    %720 = memref.load %arg1[%c140] : memref<400xf32, #tpu.memory_space<smem>>
    %721 = vector.broadcast %720 : f32 to vector<16x128xf32>
    %722 = arith.mulf %721, %715 : vector<16x128xf32>
    %723 = arith.addf %703, %722 : vector<16x128xf32>
    %c240 = arith.constant 240 : index
    %724 = memref.load %arg1[%c240] : memref<400xf32, #tpu.memory_space<smem>>
    %725 = vector.broadcast %724 : f32 to vector<16x128xf32>
    %726 = arith.mulf %725, %715 : vector<16x128xf32>
    %727 = arith.addf %707, %726 : vector<16x128xf32>
    %c340 = arith.constant 340 : index
    %728 = memref.load %arg1[%c340] : memref<400xf32, #tpu.memory_space<smem>>
    %729 = vector.broadcast %728 : f32 to vector<16x128xf32>
    %730 = arith.mulf %729, %715 : vector<16x128xf32>
    %731 = arith.addf %711, %730 : vector<16x128xf32>
    %c127_i32_65 = arith.constant 127 : i32
    %732 = tpu.dynamic_rotate %715 by %c127_i32_65 dim 1 : vector<16x128xf32>, i32 -> vector<16x128xf32>
    %c41 = arith.constant 41 : index
    %733 = memref.load %arg1[%c41] : memref<400xf32, #tpu.memory_space<smem>>
    %734 = vector.broadcast %733 : f32 to vector<16x128xf32>
    %735 = arith.mulf %734, %732 : vector<16x128xf32>
    %736 = arith.addf %719, %735 : vector<16x128xf32>
    %c141 = arith.constant 141 : index
    %737 = memref.load %arg1[%c141] : memref<400xf32, #tpu.memory_space<smem>>
    %738 = vector.broadcast %737 : f32 to vector<16x128xf32>
    %739 = arith.mulf %738, %732 : vector<16x128xf32>
    %740 = arith.addf %723, %739 : vector<16x128xf32>
    %c241 = arith.constant 241 : index
    %741 = memref.load %arg1[%c241] : memref<400xf32, #tpu.memory_space<smem>>
    %742 = vector.broadcast %741 : f32 to vector<16x128xf32>
    %743 = arith.mulf %742, %732 : vector<16x128xf32>
    %744 = arith.addf %727, %743 : vector<16x128xf32>
    %c341 = arith.constant 341 : index
    %745 = memref.load %arg1[%c341] : memref<400xf32, #tpu.memory_space<smem>>
    %746 = vector.broadcast %745 : f32 to vector<16x128xf32>
    %747 = arith.mulf %746, %732 : vector<16x128xf32>
    %748 = arith.addf %731, %747 : vector<16x128xf32>
    %c126_i32_66 = arith.constant 126 : i32
    %749 = tpu.dynamic_rotate %715 by %c126_i32_66 dim 1 : vector<16x128xf32>, i32 -> vector<16x128xf32>
    %c42 = arith.constant 42 : index
    %750 = memref.load %arg1[%c42] : memref<400xf32, #tpu.memory_space<smem>>
    %751 = vector.broadcast %750 : f32 to vector<16x128xf32>
    %752 = arith.mulf %751, %749 : vector<16x128xf32>
    %753 = arith.addf %736, %752 : vector<16x128xf32>
    %c142 = arith.constant 142 : index
    %754 = memref.load %arg1[%c142] : memref<400xf32, #tpu.memory_space<smem>>
    %755 = vector.broadcast %754 : f32 to vector<16x128xf32>
    %756 = arith.mulf %755, %749 : vector<16x128xf32>
    %757 = arith.addf %740, %756 : vector<16x128xf32>
    %c242 = arith.constant 242 : index
    %758 = memref.load %arg1[%c242] : memref<400xf32, #tpu.memory_space<smem>>
    %759 = vector.broadcast %758 : f32 to vector<16x128xf32>
    %760 = arith.mulf %759, %749 : vector<16x128xf32>
    %761 = arith.addf %744, %760 : vector<16x128xf32>
    %c342 = arith.constant 342 : index
    %762 = memref.load %arg1[%c342] : memref<400xf32, #tpu.memory_space<smem>>
    %763 = vector.broadcast %762 : f32 to vector<16x128xf32>
    %764 = arith.mulf %763, %749 : vector<16x128xf32>
    %765 = arith.addf %748, %764 : vector<16x128xf32>
    %c125_i32_67 = arith.constant 125 : i32
    %766 = tpu.dynamic_rotate %715 by %c125_i32_67 dim 1 : vector<16x128xf32>, i32 -> vector<16x128xf32>
    %c43 = arith.constant 43 : index
    %767 = memref.load %arg1[%c43] : memref<400xf32, #tpu.memory_space<smem>>
    %768 = vector.broadcast %767 : f32 to vector<16x128xf32>
    %769 = arith.mulf %768, %766 : vector<16x128xf32>
    %770 = arith.addf %753, %769 : vector<16x128xf32>
    %c143 = arith.constant 143 : index
    %771 = memref.load %arg1[%c143] : memref<400xf32, #tpu.memory_space<smem>>
    %772 = vector.broadcast %771 : f32 to vector<16x128xf32>
    %773 = arith.mulf %772, %766 : vector<16x128xf32>
    %774 = arith.addf %757, %773 : vector<16x128xf32>
    %c243 = arith.constant 243 : index
    %775 = memref.load %arg1[%c243] : memref<400xf32, #tpu.memory_space<smem>>
    %776 = vector.broadcast %775 : f32 to vector<16x128xf32>
    %777 = arith.mulf %776, %766 : vector<16x128xf32>
    %778 = arith.addf %761, %777 : vector<16x128xf32>
    %c343 = arith.constant 343 : index
    %779 = memref.load %arg1[%c343] : memref<400xf32, #tpu.memory_space<smem>>
    %780 = vector.broadcast %779 : f32 to vector<16x128xf32>
    %781 = arith.mulf %780, %766 : vector<16x128xf32>
    %782 = arith.addf %765, %781 : vector<16x128xf32>
    %c124_i32_68 = arith.constant 124 : i32
    %783 = tpu.dynamic_rotate %715 by %c124_i32_68 dim 1 : vector<16x128xf32>, i32 -> vector<16x128xf32>
    %c44 = arith.constant 44 : index
    %784 = memref.load %arg1[%c44] : memref<400xf32, #tpu.memory_space<smem>>
    %785 = vector.broadcast %784 : f32 to vector<16x128xf32>
    %786 = arith.mulf %785, %783 : vector<16x128xf32>
    %787 = arith.addf %770, %786 : vector<16x128xf32>
    %c144 = arith.constant 144 : index
    %788 = memref.load %arg1[%c144] : memref<400xf32, #tpu.memory_space<smem>>
    %789 = vector.broadcast %788 : f32 to vector<16x128xf32>
    %790 = arith.mulf %789, %783 : vector<16x128xf32>
    %791 = arith.addf %774, %790 : vector<16x128xf32>
    %c244 = arith.constant 244 : index
    %792 = memref.load %arg1[%c244] : memref<400xf32, #tpu.memory_space<smem>>
    %793 = vector.broadcast %792 : f32 to vector<16x128xf32>
    %794 = arith.mulf %793, %783 : vector<16x128xf32>
    %795 = arith.addf %778, %794 : vector<16x128xf32>
    %c344 = arith.constant 344 : index
    %796 = memref.load %arg1[%c344] : memref<400xf32, #tpu.memory_space<smem>>
    %797 = vector.broadcast %796 : f32 to vector<16x128xf32>
    %798 = arith.mulf %797, %783 : vector<16x128xf32>
    %799 = arith.addf %782, %798 : vector<16x128xf32>
    %c4_i32_69 = arith.constant 4 : i32
    %800 = arith.addi %3, %c4_i32_69 : i32
    %c0_70 = arith.constant 0 : index
    %c1_71 = arith.constant 1 : index
    %801 = arith.index_cast %800 : i32 to index
    %c0_72 = arith.constant 0 : index
    %802 = vector.load %arg2[%c0_70, %c1_71, %801, %c0_72] : memref<1x4x20x128xf32, #tpu.memory_space<vmem>>, vector<1x1x16x128xf32>
    %803 = vector.shape_cast %802 : vector<1x1x16x128xf32> to vector<16x128xf32>
    %c45 = arith.constant 45 : index
    %804 = memref.load %arg1[%c45] : memref<400xf32, #tpu.memory_space<smem>>
    %805 = vector.broadcast %804 : f32 to vector<16x128xf32>
    %806 = arith.mulf %805, %803 : vector<16x128xf32>
    %807 = arith.addf %787, %806 : vector<16x128xf32>
    %c145 = arith.constant 145 : index
    %808 = memref.load %arg1[%c145] : memref<400xf32, #tpu.memory_space<smem>>
    %809 = vector.broadcast %808 : f32 to vector<16x128xf32>
    %810 = arith.mulf %809, %803 : vector<16x128xf32>
    %811 = arith.addf %791, %810 : vector<16x128xf32>
    %c245 = arith.constant 245 : index
    %812 = memref.load %arg1[%c245] : memref<400xf32, #tpu.memory_space<smem>>
    %813 = vector.broadcast %812 : f32 to vector<16x128xf32>
    %814 = arith.mulf %813, %803 : vector<16x128xf32>
    %815 = arith.addf %795, %814 : vector<16x128xf32>
    %c345 = arith.constant 345 : index
    %816 = memref.load %arg1[%c345] : memref<400xf32, #tpu.memory_space<smem>>
    %817 = vector.broadcast %816 : f32 to vector<16x128xf32>
    %818 = arith.mulf %817, %803 : vector<16x128xf32>
    %819 = arith.addf %799, %818 : vector<16x128xf32>
    %c127_i32_73 = arith.constant 127 : i32
    %820 = tpu.dynamic_rotate %803 by %c127_i32_73 dim 1 : vector<16x128xf32>, i32 -> vector<16x128xf32>
    %c46 = arith.constant 46 : index
    %821 = memref.load %arg1[%c46] : memref<400xf32, #tpu.memory_space<smem>>
    %822 = vector.broadcast %821 : f32 to vector<16x128xf32>
    %823 = arith.mulf %822, %820 : vector<16x128xf32>
    %824 = arith.addf %807, %823 : vector<16x128xf32>
    %c146 = arith.constant 146 : index
    %825 = memref.load %arg1[%c146] : memref<400xf32, #tpu.memory_space<smem>>
    %826 = vector.broadcast %825 : f32 to vector<16x128xf32>
    %827 = arith.mulf %826, %820 : vector<16x128xf32>
    %828 = arith.addf %811, %827 : vector<16x128xf32>
    %c246 = arith.constant 246 : index
    %829 = memref.load %arg1[%c246] : memref<400xf32, #tpu.memory_space<smem>>
    %830 = vector.broadcast %829 : f32 to vector<16x128xf32>
    %831 = arith.mulf %830, %820 : vector<16x128xf32>
    %832 = arith.addf %815, %831 : vector<16x128xf32>
    %c346 = arith.constant 346 : index
    %833 = memref.load %arg1[%c346] : memref<400xf32, #tpu.memory_space<smem>>
    %834 = vector.broadcast %833 : f32 to vector<16x128xf32>
    %835 = arith.mulf %834, %820 : vector<16x128xf32>
    %836 = arith.addf %819, %835 : vector<16x128xf32>
    %c126_i32_74 = arith.constant 126 : i32
    %837 = tpu.dynamic_rotate %803 by %c126_i32_74 dim 1 : vector<16x128xf32>, i32 -> vector<16x128xf32>
    %c47 = arith.constant 47 : index
    %838 = memref.load %arg1[%c47] : memref<400xf32, #tpu.memory_space<smem>>
    %839 = vector.broadcast %838 : f32 to vector<16x128xf32>
    %840 = arith.mulf %839, %837 : vector<16x128xf32>
    %841 = arith.addf %824, %840 : vector<16x128xf32>
    %c147 = arith.constant 147 : index
    %842 = memref.load %arg1[%c147] : memref<400xf32, #tpu.memory_space<smem>>
    %843 = vector.broadcast %842 : f32 to vector<16x128xf32>
    %844 = arith.mulf %843, %837 : vector<16x128xf32>
    %845 = arith.addf %828, %844 : vector<16x128xf32>
    %c247 = arith.constant 247 : index
    %846 = memref.load %arg1[%c247] : memref<400xf32, #tpu.memory_space<smem>>
    %847 = vector.broadcast %846 : f32 to vector<16x128xf32>
    %848 = arith.mulf %847, %837 : vector<16x128xf32>
    %849 = arith.addf %832, %848 : vector<16x128xf32>
    %c347 = arith.constant 347 : index
    %850 = memref.load %arg1[%c347] : memref<400xf32, #tpu.memory_space<smem>>
    %851 = vector.broadcast %850 : f32 to vector<16x128xf32>
    %852 = arith.mulf %851, %837 : vector<16x128xf32>
    %853 = arith.addf %836, %852 : vector<16x128xf32>
    %c125_i32_75 = arith.constant 125 : i32
    %854 = tpu.dynamic_rotate %803 by %c125_i32_75 dim 1 : vector<16x128xf32>, i32 -> vector<16x128xf32>
    %c48 = arith.constant 48 : index
    %855 = memref.load %arg1[%c48] : memref<400xf32, #tpu.memory_space<smem>>
    %856 = vector.broadcast %855 : f32 to vector<16x128xf32>
    %857 = arith.mulf %856, %854 : vector<16x128xf32>
    %858 = arith.addf %841, %857 : vector<16x128xf32>
    %c148 = arith.constant 148 : index
    %859 = memref.load %arg1[%c148] : memref<400xf32, #tpu.memory_space<smem>>
    %860 = vector.broadcast %859 : f32 to vector<16x128xf32>
    %861 = arith.mulf %860, %854 : vector<16x128xf32>
    %862 = arith.addf %845, %861 : vector<16x128xf32>
    %c248 = arith.constant 248 : index
    %863 = memref.load %arg1[%c248] : memref<400xf32, #tpu.memory_space<smem>>
    %864 = vector.broadcast %863 : f32 to vector<16x128xf32>
    %865 = arith.mulf %864, %854 : vector<16x128xf32>
    %866 = arith.addf %849, %865 : vector<16x128xf32>
    %c348 = arith.constant 348 : index
    %867 = memref.load %arg1[%c348] : memref<400xf32, #tpu.memory_space<smem>>
    %868 = vector.broadcast %867 : f32 to vector<16x128xf32>
    %869 = arith.mulf %868, %854 : vector<16x128xf32>
    %870 = arith.addf %853, %869 : vector<16x128xf32>
    %c124_i32_76 = arith.constant 124 : i32
    %871 = tpu.dynamic_rotate %803 by %c124_i32_76 dim 1 : vector<16x128xf32>, i32 -> vector<16x128xf32>
    %c49 = arith.constant 49 : index
    %872 = memref.load %arg1[%c49] : memref<400xf32, #tpu.memory_space<smem>>
    %873 = vector.broadcast %872 : f32 to vector<16x128xf32>
    %874 = arith.mulf %873, %871 : vector<16x128xf32>
    %875 = arith.addf %858, %874 : vector<16x128xf32>
    %c149 = arith.constant 149 : index
    %876 = memref.load %arg1[%c149] : memref<400xf32, #tpu.memory_space<smem>>
    %877 = vector.broadcast %876 : f32 to vector<16x128xf32>
    %878 = arith.mulf %877, %871 : vector<16x128xf32>
    %879 = arith.addf %862, %878 : vector<16x128xf32>
    %c249 = arith.constant 249 : index
    %880 = memref.load %arg1[%c249] : memref<400xf32, #tpu.memory_space<smem>>
    %881 = vector.broadcast %880 : f32 to vector<16x128xf32>
    %882 = arith.mulf %881, %871 : vector<16x128xf32>
    %883 = arith.addf %866, %882 : vector<16x128xf32>
    %c349 = arith.constant 349 : index
    %884 = memref.load %arg1[%c349] : memref<400xf32, #tpu.memory_space<smem>>
    %885 = vector.broadcast %884 : f32 to vector<16x128xf32>
    %886 = arith.mulf %885, %871 : vector<16x128xf32>
    %887 = arith.addf %870, %886 : vector<16x128xf32>
    %c0_i32_77 = arith.constant 0 : i32
    %888 = arith.addi %3, %c0_i32_77 : i32
    %c0_78 = arith.constant 0 : index
    %c2_79 = arith.constant 2 : index
    %889 = arith.index_cast %888 : i32 to index
    %c0_80 = arith.constant 0 : index
    %890 = vector.load %arg2[%c0_78, %c2_79, %889, %c0_80] : memref<1x4x20x128xf32, #tpu.memory_space<vmem>>, vector<1x1x16x128xf32>
    %891 = vector.shape_cast %890 : vector<1x1x16x128xf32> to vector<16x128xf32>
    %c50 = arith.constant 50 : index
    %892 = memref.load %arg1[%c50] : memref<400xf32, #tpu.memory_space<smem>>
    %893 = vector.broadcast %892 : f32 to vector<16x128xf32>
    %894 = arith.mulf %893, %891 : vector<16x128xf32>
    %895 = arith.addf %875, %894 : vector<16x128xf32>
    %c150 = arith.constant 150 : index
    %896 = memref.load %arg1[%c150] : memref<400xf32, #tpu.memory_space<smem>>
    %897 = vector.broadcast %896 : f32 to vector<16x128xf32>
    %898 = arith.mulf %897, %891 : vector<16x128xf32>
    %899 = arith.addf %879, %898 : vector<16x128xf32>
    %c250 = arith.constant 250 : index
    %900 = memref.load %arg1[%c250] : memref<400xf32, #tpu.memory_space<smem>>
    %901 = vector.broadcast %900 : f32 to vector<16x128xf32>
    %902 = arith.mulf %901, %891 : vector<16x128xf32>
    %903 = arith.addf %883, %902 : vector<16x128xf32>
    %c350 = arith.constant 350 : index
    %904 = memref.load %arg1[%c350] : memref<400xf32, #tpu.memory_space<smem>>
    %905 = vector.broadcast %904 : f32 to vector<16x128xf32>
    %906 = arith.mulf %905, %891 : vector<16x128xf32>
    %907 = arith.addf %887, %906 : vector<16x128xf32>
    %c127_i32_81 = arith.constant 127 : i32
    %908 = tpu.dynamic_rotate %891 by %c127_i32_81 dim 1 : vector<16x128xf32>, i32 -> vector<16x128xf32>
    %c51 = arith.constant 51 : index
    %909 = memref.load %arg1[%c51] : memref<400xf32, #tpu.memory_space<smem>>
    %910 = vector.broadcast %909 : f32 to vector<16x128xf32>
    %911 = arith.mulf %910, %908 : vector<16x128xf32>
    %912 = arith.addf %895, %911 : vector<16x128xf32>
    %c151 = arith.constant 151 : index
    %913 = memref.load %arg1[%c151] : memref<400xf32, #tpu.memory_space<smem>>
    %914 = vector.broadcast %913 : f32 to vector<16x128xf32>
    %915 = arith.mulf %914, %908 : vector<16x128xf32>
    %916 = arith.addf %899, %915 : vector<16x128xf32>
    %c251 = arith.constant 251 : index
    %917 = memref.load %arg1[%c251] : memref<400xf32, #tpu.memory_space<smem>>
    %918 = vector.broadcast %917 : f32 to vector<16x128xf32>
    %919 = arith.mulf %918, %908 : vector<16x128xf32>
    %920 = arith.addf %903, %919 : vector<16x128xf32>
    %c351 = arith.constant 351 : index
    %921 = memref.load %arg1[%c351] : memref<400xf32, #tpu.memory_space<smem>>
    %922 = vector.broadcast %921 : f32 to vector<16x128xf32>
    %923 = arith.mulf %922, %908 : vector<16x128xf32>
    %924 = arith.addf %907, %923 : vector<16x128xf32>
    %c126_i32_82 = arith.constant 126 : i32
    %925 = tpu.dynamic_rotate %891 by %c126_i32_82 dim 1 : vector<16x128xf32>, i32 -> vector<16x128xf32>
    %c52 = arith.constant 52 : index
    %926 = memref.load %arg1[%c52] : memref<400xf32, #tpu.memory_space<smem>>
    %927 = vector.broadcast %926 : f32 to vector<16x128xf32>
    %928 = arith.mulf %927, %925 : vector<16x128xf32>
    %929 = arith.addf %912, %928 : vector<16x128xf32>
    %c152 = arith.constant 152 : index
    %930 = memref.load %arg1[%c152] : memref<400xf32, #tpu.memory_space<smem>>
    %931 = vector.broadcast %930 : f32 to vector<16x128xf32>
    %932 = arith.mulf %931, %925 : vector<16x128xf32>
    %933 = arith.addf %916, %932 : vector<16x128xf32>
    %c252 = arith.constant 252 : index
    %934 = memref.load %arg1[%c252] : memref<400xf32, #tpu.memory_space<smem>>
    %935 = vector.broadcast %934 : f32 to vector<16x128xf32>
    %936 = arith.mulf %935, %925 : vector<16x128xf32>
    %937 = arith.addf %920, %936 : vector<16x128xf32>
    %c352 = arith.constant 352 : index
    %938 = memref.load %arg1[%c352] : memref<400xf32, #tpu.memory_space<smem>>
    %939 = vector.broadcast %938 : f32 to vector<16x128xf32>
    %940 = arith.mulf %939, %925 : vector<16x128xf32>
    %941 = arith.addf %924, %940 : vector<16x128xf32>
    %c125_i32_83 = arith.constant 125 : i32
    %942 = tpu.dynamic_rotate %891 by %c125_i32_83 dim 1 : vector<16x128xf32>, i32 -> vector<16x128xf32>
    %c53 = arith.constant 53 : index
    %943 = memref.load %arg1[%c53] : memref<400xf32, #tpu.memory_space<smem>>
    %944 = vector.broadcast %943 : f32 to vector<16x128xf32>
    %945 = arith.mulf %944, %942 : vector<16x128xf32>
    %946 = arith.addf %929, %945 : vector<16x128xf32>
    %c153 = arith.constant 153 : index
    %947 = memref.load %arg1[%c153] : memref<400xf32, #tpu.memory_space<smem>>
    %948 = vector.broadcast %947 : f32 to vector<16x128xf32>
    %949 = arith.mulf %948, %942 : vector<16x128xf32>
    %950 = arith.addf %933, %949 : vector<16x128xf32>
    %c253 = arith.constant 253 : index
    %951 = memref.load %arg1[%c253] : memref<400xf32, #tpu.memory_space<smem>>
    %952 = vector.broadcast %951 : f32 to vector<16x128xf32>
    %953 = arith.mulf %952, %942 : vector<16x128xf32>
    %954 = arith.addf %937, %953 : vector<16x128xf32>
    %c353 = arith.constant 353 : index
    %955 = memref.load %arg1[%c353] : memref<400xf32, #tpu.memory_space<smem>>
    %956 = vector.broadcast %955 : f32 to vector<16x128xf32>
    %957 = arith.mulf %956, %942 : vector<16x128xf32>
    %958 = arith.addf %941, %957 : vector<16x128xf32>
    %c124_i32_84 = arith.constant 124 : i32
    %959 = tpu.dynamic_rotate %891 by %c124_i32_84 dim 1 : vector<16x128xf32>, i32 -> vector<16x128xf32>
    %c54 = arith.constant 54 : index
    %960 = memref.load %arg1[%c54] : memref<400xf32, #tpu.memory_space<smem>>
    %961 = vector.broadcast %960 : f32 to vector<16x128xf32>
    %962 = arith.mulf %961, %959 : vector<16x128xf32>
    %963 = arith.addf %946, %962 : vector<16x128xf32>
    %c154 = arith.constant 154 : index
    %964 = memref.load %arg1[%c154] : memref<400xf32, #tpu.memory_space<smem>>
    %965 = vector.broadcast %964 : f32 to vector<16x128xf32>
    %966 = arith.mulf %965, %959 : vector<16x128xf32>
    %967 = arith.addf %950, %966 : vector<16x128xf32>
    %c254 = arith.constant 254 : index
    %968 = memref.load %arg1[%c254] : memref<400xf32, #tpu.memory_space<smem>>
    %969 = vector.broadcast %968 : f32 to vector<16x128xf32>
    %970 = arith.mulf %969, %959 : vector<16x128xf32>
    %971 = arith.addf %954, %970 : vector<16x128xf32>
    %c354 = arith.constant 354 : index
    %972 = memref.load %arg1[%c354] : memref<400xf32, #tpu.memory_space<smem>>
    %973 = vector.broadcast %972 : f32 to vector<16x128xf32>
    %974 = arith.mulf %973, %959 : vector<16x128xf32>
    %975 = arith.addf %958, %974 : vector<16x128xf32>
    %c1_i32_85 = arith.constant 1 : i32
    %976 = arith.addi %3, %c1_i32_85 : i32
    %c0_86 = arith.constant 0 : index
    %c2_87 = arith.constant 2 : index
    %977 = arith.index_cast %976 : i32 to index
    %c0_88 = arith.constant 0 : index
    %978 = vector.load %arg2[%c0_86, %c2_87, %977, %c0_88] : memref<1x4x20x128xf32, #tpu.memory_space<vmem>>, vector<1x1x16x128xf32>
    %979 = vector.shape_cast %978 : vector<1x1x16x128xf32> to vector<16x128xf32>
    %c55 = arith.constant 55 : index
    %980 = memref.load %arg1[%c55] : memref<400xf32, #tpu.memory_space<smem>>
    %981 = vector.broadcast %980 : f32 to vector<16x128xf32>
    %982 = arith.mulf %981, %979 : vector<16x128xf32>
    %983 = arith.addf %963, %982 : vector<16x128xf32>
    %c155 = arith.constant 155 : index
    %984 = memref.load %arg1[%c155] : memref<400xf32, #tpu.memory_space<smem>>
    %985 = vector.broadcast %984 : f32 to vector<16x128xf32>
    %986 = arith.mulf %985, %979 : vector<16x128xf32>
    %987 = arith.addf %967, %986 : vector<16x128xf32>
    %c255 = arith.constant 255 : index
    %988 = memref.load %arg1[%c255] : memref<400xf32, #tpu.memory_space<smem>>
    %989 = vector.broadcast %988 : f32 to vector<16x128xf32>
    %990 = arith.mulf %989, %979 : vector<16x128xf32>
    %991 = arith.addf %971, %990 : vector<16x128xf32>
    %c355 = arith.constant 355 : index
    %992 = memref.load %arg1[%c355] : memref<400xf32, #tpu.memory_space<smem>>
    %993 = vector.broadcast %992 : f32 to vector<16x128xf32>
    %994 = arith.mulf %993, %979 : vector<16x128xf32>
    %995 = arith.addf %975, %994 : vector<16x128xf32>
    %c127_i32_89 = arith.constant 127 : i32
    %996 = tpu.dynamic_rotate %979 by %c127_i32_89 dim 1 : vector<16x128xf32>, i32 -> vector<16x128xf32>
    %c56 = arith.constant 56 : index
    %997 = memref.load %arg1[%c56] : memref<400xf32, #tpu.memory_space<smem>>
    %998 = vector.broadcast %997 : f32 to vector<16x128xf32>
    %999 = arith.mulf %998, %996 : vector<16x128xf32>
    %1000 = arith.addf %983, %999 : vector<16x128xf32>
    %c156 = arith.constant 156 : index
    %1001 = memref.load %arg1[%c156] : memref<400xf32, #tpu.memory_space<smem>>
    %1002 = vector.broadcast %1001 : f32 to vector<16x128xf32>
    %1003 = arith.mulf %1002, %996 : vector<16x128xf32>
    %1004 = arith.addf %987, %1003 : vector<16x128xf32>
    %c256 = arith.constant 256 : index
    %1005 = memref.load %arg1[%c256] : memref<400xf32, #tpu.memory_space<smem>>
    %1006 = vector.broadcast %1005 : f32 to vector<16x128xf32>
    %1007 = arith.mulf %1006, %996 : vector<16x128xf32>
    %1008 = arith.addf %991, %1007 : vector<16x128xf32>
    %c356 = arith.constant 356 : index
    %1009 = memref.load %arg1[%c356] : memref<400xf32, #tpu.memory_space<smem>>
    %1010 = vector.broadcast %1009 : f32 to vector<16x128xf32>
    %1011 = arith.mulf %1010, %996 : vector<16x128xf32>
    %1012 = arith.addf %995, %1011 : vector<16x128xf32>
    %c126_i32_90 = arith.constant 126 : i32
    %1013 = tpu.dynamic_rotate %979 by %c126_i32_90 dim 1 : vector<16x128xf32>, i32 -> vector<16x128xf32>
    %c57 = arith.constant 57 : index
    %1014 = memref.load %arg1[%c57] : memref<400xf32, #tpu.memory_space<smem>>
    %1015 = vector.broadcast %1014 : f32 to vector<16x128xf32>
    %1016 = arith.mulf %1015, %1013 : vector<16x128xf32>
    %1017 = arith.addf %1000, %1016 : vector<16x128xf32>
    %c157 = arith.constant 157 : index
    %1018 = memref.load %arg1[%c157] : memref<400xf32, #tpu.memory_space<smem>>
    %1019 = vector.broadcast %1018 : f32 to vector<16x128xf32>
    %1020 = arith.mulf %1019, %1013 : vector<16x128xf32>
    %1021 = arith.addf %1004, %1020 : vector<16x128xf32>
    %c257 = arith.constant 257 : index
    %1022 = memref.load %arg1[%c257] : memref<400xf32, #tpu.memory_space<smem>>
    %1023 = vector.broadcast %1022 : f32 to vector<16x128xf32>
    %1024 = arith.mulf %1023, %1013 : vector<16x128xf32>
    %1025 = arith.addf %1008, %1024 : vector<16x128xf32>
    %c357 = arith.constant 357 : index
    %1026 = memref.load %arg1[%c357] : memref<400xf32, #tpu.memory_space<smem>>
    %1027 = vector.broadcast %1026 : f32 to vector<16x128xf32>
    %1028 = arith.mulf %1027, %1013 : vector<16x128xf32>
    %1029 = arith.addf %1012, %1028 : vector<16x128xf32>
    %c125_i32_91 = arith.constant 125 : i32
    %1030 = tpu.dynamic_rotate %979 by %c125_i32_91 dim 1 : vector<16x128xf32>, i32 -> vector<16x128xf32>
    %c58 = arith.constant 58 : index
    %1031 = memref.load %arg1[%c58] : memref<400xf32, #tpu.memory_space<smem>>
    %1032 = vector.broadcast %1031 : f32 to vector<16x128xf32>
    %1033 = arith.mulf %1032, %1030 : vector<16x128xf32>
    %1034 = arith.addf %1017, %1033 : vector<16x128xf32>
    %c158 = arith.constant 158 : index
    %1035 = memref.load %arg1[%c158] : memref<400xf32, #tpu.memory_space<smem>>
    %1036 = vector.broadcast %1035 : f32 to vector<16x128xf32>
    %1037 = arith.mulf %1036, %1030 : vector<16x128xf32>
    %1038 = arith.addf %1021, %1037 : vector<16x128xf32>
    %c258 = arith.constant 258 : index
    %1039 = memref.load %arg1[%c258] : memref<400xf32, #tpu.memory_space<smem>>
    %1040 = vector.broadcast %1039 : f32 to vector<16x128xf32>
    %1041 = arith.mulf %1040, %1030 : vector<16x128xf32>
    %1042 = arith.addf %1025, %1041 : vector<16x128xf32>
    %c358 = arith.constant 358 : index
    %1043 = memref.load %arg1[%c358] : memref<400xf32, #tpu.memory_space<smem>>
    %1044 = vector.broadcast %1043 : f32 to vector<16x128xf32>
    %1045 = arith.mulf %1044, %1030 : vector<16x128xf32>
    %1046 = arith.addf %1029, %1045 : vector<16x128xf32>
    %c124_i32_92 = arith.constant 124 : i32
    %1047 = tpu.dynamic_rotate %979 by %c124_i32_92 dim 1 : vector<16x128xf32>, i32 -> vector<16x128xf32>
    %c59 = arith.constant 59 : index
    %1048 = memref.load %arg1[%c59] : memref<400xf32, #tpu.memory_space<smem>>
    %1049 = vector.broadcast %1048 : f32 to vector<16x128xf32>
    %1050 = arith.mulf %1049, %1047 : vector<16x128xf32>
    %1051 = arith.addf %1034, %1050 : vector<16x128xf32>
    %c159 = arith.constant 159 : index
    %1052 = memref.load %arg1[%c159] : memref<400xf32, #tpu.memory_space<smem>>
    %1053 = vector.broadcast %1052 : f32 to vector<16x128xf32>
    %1054 = arith.mulf %1053, %1047 : vector<16x128xf32>
    %1055 = arith.addf %1038, %1054 : vector<16x128xf32>
    %c259 = arith.constant 259 : index
    %1056 = memref.load %arg1[%c259] : memref<400xf32, #tpu.memory_space<smem>>
    %1057 = vector.broadcast %1056 : f32 to vector<16x128xf32>
    %1058 = arith.mulf %1057, %1047 : vector<16x128xf32>
    %1059 = arith.addf %1042, %1058 : vector<16x128xf32>
    %c359 = arith.constant 359 : index
    %1060 = memref.load %arg1[%c359] : memref<400xf32, #tpu.memory_space<smem>>
    %1061 = vector.broadcast %1060 : f32 to vector<16x128xf32>
    %1062 = arith.mulf %1061, %1047 : vector<16x128xf32>
    %1063 = arith.addf %1046, %1062 : vector<16x128xf32>
    %c2_i32_93 = arith.constant 2 : i32
    %1064 = arith.addi %3, %c2_i32_93 : i32
    %c0_94 = arith.constant 0 : index
    %c2_95 = arith.constant 2 : index
    %1065 = arith.index_cast %1064 : i32 to index
    %c0_96 = arith.constant 0 : index
    %1066 = vector.load %arg2[%c0_94, %c2_95, %1065, %c0_96] : memref<1x4x20x128xf32, #tpu.memory_space<vmem>>, vector<1x1x16x128xf32>
    %1067 = vector.shape_cast %1066 : vector<1x1x16x128xf32> to vector<16x128xf32>
    %c60 = arith.constant 60 : index
    %1068 = memref.load %arg1[%c60] : memref<400xf32, #tpu.memory_space<smem>>
    %1069 = vector.broadcast %1068 : f32 to vector<16x128xf32>
    %1070 = arith.mulf %1069, %1067 : vector<16x128xf32>
    %1071 = arith.addf %1051, %1070 : vector<16x128xf32>
    %c160 = arith.constant 160 : index
    %1072 = memref.load %arg1[%c160] : memref<400xf32, #tpu.memory_space<smem>>
    %1073 = vector.broadcast %1072 : f32 to vector<16x128xf32>
    %1074 = arith.mulf %1073, %1067 : vector<16x128xf32>
    %1075 = arith.addf %1055, %1074 : vector<16x128xf32>
    %c260 = arith.constant 260 : index
    %1076 = memref.load %arg1[%c260] : memref<400xf32, #tpu.memory_space<smem>>
    %1077 = vector.broadcast %1076 : f32 to vector<16x128xf32>
    %1078 = arith.mulf %1077, %1067 : vector<16x128xf32>
    %1079 = arith.addf %1059, %1078 : vector<16x128xf32>
    %c360 = arith.constant 360 : index
    %1080 = memref.load %arg1[%c360] : memref<400xf32, #tpu.memory_space<smem>>
    %1081 = vector.broadcast %1080 : f32 to vector<16x128xf32>
    %1082 = arith.mulf %1081, %1067 : vector<16x128xf32>
    %1083 = arith.addf %1063, %1082 : vector<16x128xf32>
    %c127_i32_97 = arith.constant 127 : i32
    %1084 = tpu.dynamic_rotate %1067 by %c127_i32_97 dim 1 : vector<16x128xf32>, i32 -> vector<16x128xf32>
    %c61 = arith.constant 61 : index
    %1085 = memref.load %arg1[%c61] : memref<400xf32, #tpu.memory_space<smem>>
    %1086 = vector.broadcast %1085 : f32 to vector<16x128xf32>
    %1087 = arith.mulf %1086, %1084 : vector<16x128xf32>
    %1088 = arith.addf %1071, %1087 : vector<16x128xf32>
    %c161 = arith.constant 161 : index
    %1089 = memref.load %arg1[%c161] : memref<400xf32, #tpu.memory_space<smem>>
    %1090 = vector.broadcast %1089 : f32 to vector<16x128xf32>
    %1091 = arith.mulf %1090, %1084 : vector<16x128xf32>
    %1092 = arith.addf %1075, %1091 : vector<16x128xf32>
    %c261 = arith.constant 261 : index
    %1093 = memref.load %arg1[%c261] : memref<400xf32, #tpu.memory_space<smem>>
    %1094 = vector.broadcast %1093 : f32 to vector<16x128xf32>
    %1095 = arith.mulf %1094, %1084 : vector<16x128xf32>
    %1096 = arith.addf %1079, %1095 : vector<16x128xf32>
    %c361 = arith.constant 361 : index
    %1097 = memref.load %arg1[%c361] : memref<400xf32, #tpu.memory_space<smem>>
    %1098 = vector.broadcast %1097 : f32 to vector<16x128xf32>
    %1099 = arith.mulf %1098, %1084 : vector<16x128xf32>
    %1100 = arith.addf %1083, %1099 : vector<16x128xf32>
    %c126_i32_98 = arith.constant 126 : i32
    %1101 = tpu.dynamic_rotate %1067 by %c126_i32_98 dim 1 : vector<16x128xf32>, i32 -> vector<16x128xf32>
    %c62 = arith.constant 62 : index
    %1102 = memref.load %arg1[%c62] : memref<400xf32, #tpu.memory_space<smem>>
    %1103 = vector.broadcast %1102 : f32 to vector<16x128xf32>
    %1104 = arith.mulf %1103, %1101 : vector<16x128xf32>
    %1105 = arith.addf %1088, %1104 : vector<16x128xf32>
    %c162 = arith.constant 162 : index
    %1106 = memref.load %arg1[%c162] : memref<400xf32, #tpu.memory_space<smem>>
    %1107 = vector.broadcast %1106 : f32 to vector<16x128xf32>
    %1108 = arith.mulf %1107, %1101 : vector<16x128xf32>
    %1109 = arith.addf %1092, %1108 : vector<16x128xf32>
    %c262 = arith.constant 262 : index
    %1110 = memref.load %arg1[%c262] : memref<400xf32, #tpu.memory_space<smem>>
    %1111 = vector.broadcast %1110 : f32 to vector<16x128xf32>
    %1112 = arith.mulf %1111, %1101 : vector<16x128xf32>
    %1113 = arith.addf %1096, %1112 : vector<16x128xf32>
    %c362 = arith.constant 362 : index
    %1114 = memref.load %arg1[%c362] : memref<400xf32, #tpu.memory_space<smem>>
    %1115 = vector.broadcast %1114 : f32 to vector<16x128xf32>
    %1116 = arith.mulf %1115, %1101 : vector<16x128xf32>
    %1117 = arith.addf %1100, %1116 : vector<16x128xf32>
    %c125_i32_99 = arith.constant 125 : i32
    %1118 = tpu.dynamic_rotate %1067 by %c125_i32_99 dim 1 : vector<16x128xf32>, i32 -> vector<16x128xf32>
    %c63 = arith.constant 63 : index
    %1119 = memref.load %arg1[%c63] : memref<400xf32, #tpu.memory_space<smem>>
    %1120 = vector.broadcast %1119 : f32 to vector<16x128xf32>
    %1121 = arith.mulf %1120, %1118 : vector<16x128xf32>
    %1122 = arith.addf %1105, %1121 : vector<16x128xf32>
    %c163 = arith.constant 163 : index
    %1123 = memref.load %arg1[%c163] : memref<400xf32, #tpu.memory_space<smem>>
    %1124 = vector.broadcast %1123 : f32 to vector<16x128xf32>
    %1125 = arith.mulf %1124, %1118 : vector<16x128xf32>
    %1126 = arith.addf %1109, %1125 : vector<16x128xf32>
    %c263 = arith.constant 263 : index
    %1127 = memref.load %arg1[%c263] : memref<400xf32, #tpu.memory_space<smem>>
    %1128 = vector.broadcast %1127 : f32 to vector<16x128xf32>
    %1129 = arith.mulf %1128, %1118 : vector<16x128xf32>
    %1130 = arith.addf %1113, %1129 : vector<16x128xf32>
    %c363 = arith.constant 363 : index
    %1131 = memref.load %arg1[%c363] : memref<400xf32, #tpu.memory_space<smem>>
    %1132 = vector.broadcast %1131 : f32 to vector<16x128xf32>
    %1133 = arith.mulf %1132, %1118 : vector<16x128xf32>
    %1134 = arith.addf %1117, %1133 : vector<16x128xf32>
    %c124_i32_100 = arith.constant 124 : i32
    %1135 = tpu.dynamic_rotate %1067 by %c124_i32_100 dim 1 : vector<16x128xf32>, i32 -> vector<16x128xf32>
    %c64 = arith.constant 64 : index
    %1136 = memref.load %arg1[%c64] : memref<400xf32, #tpu.memory_space<smem>>
    %1137 = vector.broadcast %1136 : f32 to vector<16x128xf32>
    %1138 = arith.mulf %1137, %1135 : vector<16x128xf32>
    %1139 = arith.addf %1122, %1138 : vector<16x128xf32>
    %c164 = arith.constant 164 : index
    %1140 = memref.load %arg1[%c164] : memref<400xf32, #tpu.memory_space<smem>>
    %1141 = vector.broadcast %1140 : f32 to vector<16x128xf32>
    %1142 = arith.mulf %1141, %1135 : vector<16x128xf32>
    %1143 = arith.addf %1126, %1142 : vector<16x128xf32>
    %c264 = arith.constant 264 : index
    %1144 = memref.load %arg1[%c264] : memref<400xf32, #tpu.memory_space<smem>>
    %1145 = vector.broadcast %1144 : f32 to vector<16x128xf32>
    %1146 = arith.mulf %1145, %1135 : vector<16x128xf32>
    %1147 = arith.addf %1130, %1146 : vector<16x128xf32>
    %c364 = arith.constant 364 : index
    %1148 = memref.load %arg1[%c364] : memref<400xf32, #tpu.memory_space<smem>>
    %1149 = vector.broadcast %1148 : f32 to vector<16x128xf32>
    %1150 = arith.mulf %1149, %1135 : vector<16x128xf32>
    %1151 = arith.addf %1134, %1150 : vector<16x128xf32>
    %c3_i32_101 = arith.constant 3 : i32
    %1152 = arith.addi %3, %c3_i32_101 : i32
    %c0_102 = arith.constant 0 : index
    %c2_103 = arith.constant 2 : index
    %1153 = arith.index_cast %1152 : i32 to index
    %c0_104 = arith.constant 0 : index
    %1154 = vector.load %arg2[%c0_102, %c2_103, %1153, %c0_104] : memref<1x4x20x128xf32, #tpu.memory_space<vmem>>, vector<1x1x16x128xf32>
    %1155 = vector.shape_cast %1154 : vector<1x1x16x128xf32> to vector<16x128xf32>
    %c65 = arith.constant 65 : index
    %1156 = memref.load %arg1[%c65] : memref<400xf32, #tpu.memory_space<smem>>
    %1157 = vector.broadcast %1156 : f32 to vector<16x128xf32>
    %1158 = arith.mulf %1157, %1155 : vector<16x128xf32>
    %1159 = arith.addf %1139, %1158 : vector<16x128xf32>
    %c165 = arith.constant 165 : index
    %1160 = memref.load %arg1[%c165] : memref<400xf32, #tpu.memory_space<smem>>
    %1161 = vector.broadcast %1160 : f32 to vector<16x128xf32>
    %1162 = arith.mulf %1161, %1155 : vector<16x128xf32>
    %1163 = arith.addf %1143, %1162 : vector<16x128xf32>
    %c265 = arith.constant 265 : index
    %1164 = memref.load %arg1[%c265] : memref<400xf32, #tpu.memory_space<smem>>
    %1165 = vector.broadcast %1164 : f32 to vector<16x128xf32>
    %1166 = arith.mulf %1165, %1155 : vector<16x128xf32>
    %1167 = arith.addf %1147, %1166 : vector<16x128xf32>
    %c365 = arith.constant 365 : index
    %1168 = memref.load %arg1[%c365] : memref<400xf32, #tpu.memory_space<smem>>
    %1169 = vector.broadcast %1168 : f32 to vector<16x128xf32>
    %1170 = arith.mulf %1169, %1155 : vector<16x128xf32>
    %1171 = arith.addf %1151, %1170 : vector<16x128xf32>
    %c127_i32_105 = arith.constant 127 : i32
    %1172 = tpu.dynamic_rotate %1155 by %c127_i32_105 dim 1 : vector<16x128xf32>, i32 -> vector<16x128xf32>
    %c66 = arith.constant 66 : index
    %1173 = memref.load %arg1[%c66] : memref<400xf32, #tpu.memory_space<smem>>
    %1174 = vector.broadcast %1173 : f32 to vector<16x128xf32>
    %1175 = arith.mulf %1174, %1172 : vector<16x128xf32>
    %1176 = arith.addf %1159, %1175 : vector<16x128xf32>
    %c166 = arith.constant 166 : index
    %1177 = memref.load %arg1[%c166] : memref<400xf32, #tpu.memory_space<smem>>
    %1178 = vector.broadcast %1177 : f32 to vector<16x128xf32>
    %1179 = arith.mulf %1178, %1172 : vector<16x128xf32>
    %1180 = arith.addf %1163, %1179 : vector<16x128xf32>
    %c266 = arith.constant 266 : index
    %1181 = memref.load %arg1[%c266] : memref<400xf32, #tpu.memory_space<smem>>
    %1182 = vector.broadcast %1181 : f32 to vector<16x128xf32>
    %1183 = arith.mulf %1182, %1172 : vector<16x128xf32>
    %1184 = arith.addf %1167, %1183 : vector<16x128xf32>
    %c366 = arith.constant 366 : index
    %1185 = memref.load %arg1[%c366] : memref<400xf32, #tpu.memory_space<smem>>
    %1186 = vector.broadcast %1185 : f32 to vector<16x128xf32>
    %1187 = arith.mulf %1186, %1172 : vector<16x128xf32>
    %1188 = arith.addf %1171, %1187 : vector<16x128xf32>
    %c126_i32_106 = arith.constant 126 : i32
    %1189 = tpu.dynamic_rotate %1155 by %c126_i32_106 dim 1 : vector<16x128xf32>, i32 -> vector<16x128xf32>
    %c67 = arith.constant 67 : index
    %1190 = memref.load %arg1[%c67] : memref<400xf32, #tpu.memory_space<smem>>
    %1191 = vector.broadcast %1190 : f32 to vector<16x128xf32>
    %1192 = arith.mulf %1191, %1189 : vector<16x128xf32>
    %1193 = arith.addf %1176, %1192 : vector<16x128xf32>
    %c167 = arith.constant 167 : index
    %1194 = memref.load %arg1[%c167] : memref<400xf32, #tpu.memory_space<smem>>
    %1195 = vector.broadcast %1194 : f32 to vector<16x128xf32>
    %1196 = arith.mulf %1195, %1189 : vector<16x128xf32>
    %1197 = arith.addf %1180, %1196 : vector<16x128xf32>
    %c267 = arith.constant 267 : index
    %1198 = memref.load %arg1[%c267] : memref<400xf32, #tpu.memory_space<smem>>
    %1199 = vector.broadcast %1198 : f32 to vector<16x128xf32>
    %1200 = arith.mulf %1199, %1189 : vector<16x128xf32>
    %1201 = arith.addf %1184, %1200 : vector<16x128xf32>
    %c367 = arith.constant 367 : index
    %1202 = memref.load %arg1[%c367] : memref<400xf32, #tpu.memory_space<smem>>
    %1203 = vector.broadcast %1202 : f32 to vector<16x128xf32>
    %1204 = arith.mulf %1203, %1189 : vector<16x128xf32>
    %1205 = arith.addf %1188, %1204 : vector<16x128xf32>
    %c125_i32_107 = arith.constant 125 : i32
    %1206 = tpu.dynamic_rotate %1155 by %c125_i32_107 dim 1 : vector<16x128xf32>, i32 -> vector<16x128xf32>
    %c68 = arith.constant 68 : index
    %1207 = memref.load %arg1[%c68] : memref<400xf32, #tpu.memory_space<smem>>
    %1208 = vector.broadcast %1207 : f32 to vector<16x128xf32>
    %1209 = arith.mulf %1208, %1206 : vector<16x128xf32>
    %1210 = arith.addf %1193, %1209 : vector<16x128xf32>
    %c168 = arith.constant 168 : index
    %1211 = memref.load %arg1[%c168] : memref<400xf32, #tpu.memory_space<smem>>
    %1212 = vector.broadcast %1211 : f32 to vector<16x128xf32>
    %1213 = arith.mulf %1212, %1206 : vector<16x128xf32>
    %1214 = arith.addf %1197, %1213 : vector<16x128xf32>
    %c268 = arith.constant 268 : index
    %1215 = memref.load %arg1[%c268] : memref<400xf32, #tpu.memory_space<smem>>
    %1216 = vector.broadcast %1215 : f32 to vector<16x128xf32>
    %1217 = arith.mulf %1216, %1206 : vector<16x128xf32>
    %1218 = arith.addf %1201, %1217 : vector<16x128xf32>
    %c368 = arith.constant 368 : index
    %1219 = memref.load %arg1[%c368] : memref<400xf32, #tpu.memory_space<smem>>
    %1220 = vector.broadcast %1219 : f32 to vector<16x128xf32>
    %1221 = arith.mulf %1220, %1206 : vector<16x128xf32>
    %1222 = arith.addf %1205, %1221 : vector<16x128xf32>
    %c124_i32_108 = arith.constant 124 : i32
    %1223 = tpu.dynamic_rotate %1155 by %c124_i32_108 dim 1 : vector<16x128xf32>, i32 -> vector<16x128xf32>
    %c69 = arith.constant 69 : index
    %1224 = memref.load %arg1[%c69] : memref<400xf32, #tpu.memory_space<smem>>
    %1225 = vector.broadcast %1224 : f32 to vector<16x128xf32>
    %1226 = arith.mulf %1225, %1223 : vector<16x128xf32>
    %1227 = arith.addf %1210, %1226 : vector<16x128xf32>
    %c169 = arith.constant 169 : index
    %1228 = memref.load %arg1[%c169] : memref<400xf32, #tpu.memory_space<smem>>
    %1229 = vector.broadcast %1228 : f32 to vector<16x128xf32>
    %1230 = arith.mulf %1229, %1223 : vector<16x128xf32>
    %1231 = arith.addf %1214, %1230 : vector<16x128xf32>
    %c269 = arith.constant 269 : index
    %1232 = memref.load %arg1[%c269] : memref<400xf32, #tpu.memory_space<smem>>
    %1233 = vector.broadcast %1232 : f32 to vector<16x128xf32>
    %1234 = arith.mulf %1233, %1223 : vector<16x128xf32>
    %1235 = arith.addf %1218, %1234 : vector<16x128xf32>
    %c369 = arith.constant 369 : index
    %1236 = memref.load %arg1[%c369] : memref<400xf32, #tpu.memory_space<smem>>
    %1237 = vector.broadcast %1236 : f32 to vector<16x128xf32>
    %1238 = arith.mulf %1237, %1223 : vector<16x128xf32>
    %1239 = arith.addf %1222, %1238 : vector<16x128xf32>
    %c4_i32_109 = arith.constant 4 : i32
    %1240 = arith.addi %3, %c4_i32_109 : i32
    %c0_110 = arith.constant 0 : index
    %c2_111 = arith.constant 2 : index
    %1241 = arith.index_cast %1240 : i32 to index
    %c0_112 = arith.constant 0 : index
    %1242 = vector.load %arg2[%c0_110, %c2_111, %1241, %c0_112] : memref<1x4x20x128xf32, #tpu.memory_space<vmem>>, vector<1x1x16x128xf32>
    %1243 = vector.shape_cast %1242 : vector<1x1x16x128xf32> to vector<16x128xf32>
    %c70 = arith.constant 70 : index
    %1244 = memref.load %arg1[%c70] : memref<400xf32, #tpu.memory_space<smem>>
    %1245 = vector.broadcast %1244 : f32 to vector<16x128xf32>
    %1246 = arith.mulf %1245, %1243 : vector<16x128xf32>
    %1247 = arith.addf %1227, %1246 : vector<16x128xf32>
    %c170 = arith.constant 170 : index
    %1248 = memref.load %arg1[%c170] : memref<400xf32, #tpu.memory_space<smem>>
    %1249 = vector.broadcast %1248 : f32 to vector<16x128xf32>
    %1250 = arith.mulf %1249, %1243 : vector<16x128xf32>
    %1251 = arith.addf %1231, %1250 : vector<16x128xf32>
    %c270 = arith.constant 270 : index
    %1252 = memref.load %arg1[%c270] : memref<400xf32, #tpu.memory_space<smem>>
    %1253 = vector.broadcast %1252 : f32 to vector<16x128xf32>
    %1254 = arith.mulf %1253, %1243 : vector<16x128xf32>
    %1255 = arith.addf %1235, %1254 : vector<16x128xf32>
    %c370 = arith.constant 370 : index
    %1256 = memref.load %arg1[%c370] : memref<400xf32, #tpu.memory_space<smem>>
    %1257 = vector.broadcast %1256 : f32 to vector<16x128xf32>
    %1258 = arith.mulf %1257, %1243 : vector<16x128xf32>
    %1259 = arith.addf %1239, %1258 : vector<16x128xf32>
    %c127_i32_113 = arith.constant 127 : i32
    %1260 = tpu.dynamic_rotate %1243 by %c127_i32_113 dim 1 : vector<16x128xf32>, i32 -> vector<16x128xf32>
    %c71 = arith.constant 71 : index
    %1261 = memref.load %arg1[%c71] : memref<400xf32, #tpu.memory_space<smem>>
    %1262 = vector.broadcast %1261 : f32 to vector<16x128xf32>
    %1263 = arith.mulf %1262, %1260 : vector<16x128xf32>
    %1264 = arith.addf %1247, %1263 : vector<16x128xf32>
    %c171 = arith.constant 171 : index
    %1265 = memref.load %arg1[%c171] : memref<400xf32, #tpu.memory_space<smem>>
    %1266 = vector.broadcast %1265 : f32 to vector<16x128xf32>
    %1267 = arith.mulf %1266, %1260 : vector<16x128xf32>
    %1268 = arith.addf %1251, %1267 : vector<16x128xf32>
    %c271 = arith.constant 271 : index
    %1269 = memref.load %arg1[%c271] : memref<400xf32, #tpu.memory_space<smem>>
    %1270 = vector.broadcast %1269 : f32 to vector<16x128xf32>
    %1271 = arith.mulf %1270, %1260 : vector<16x128xf32>
    %1272 = arith.addf %1255, %1271 : vector<16x128xf32>
    %c371 = arith.constant 371 : index
    %1273 = memref.load %arg1[%c371] : memref<400xf32, #tpu.memory_space<smem>>
    %1274 = vector.broadcast %1273 : f32 to vector<16x128xf32>
    %1275 = arith.mulf %1274, %1260 : vector<16x128xf32>
    %1276 = arith.addf %1259, %1275 : vector<16x128xf32>
    %c126_i32_114 = arith.constant 126 : i32
    %1277 = tpu.dynamic_rotate %1243 by %c126_i32_114 dim 1 : vector<16x128xf32>, i32 -> vector<16x128xf32>
    %c72 = arith.constant 72 : index
    %1278 = memref.load %arg1[%c72] : memref<400xf32, #tpu.memory_space<smem>>
    %1279 = vector.broadcast %1278 : f32 to vector<16x128xf32>
    %1280 = arith.mulf %1279, %1277 : vector<16x128xf32>
    %1281 = arith.addf %1264, %1280 : vector<16x128xf32>
    %c172 = arith.constant 172 : index
    %1282 = memref.load %arg1[%c172] : memref<400xf32, #tpu.memory_space<smem>>
    %1283 = vector.broadcast %1282 : f32 to vector<16x128xf32>
    %1284 = arith.mulf %1283, %1277 : vector<16x128xf32>
    %1285 = arith.addf %1268, %1284 : vector<16x128xf32>
    %c272 = arith.constant 272 : index
    %1286 = memref.load %arg1[%c272] : memref<400xf32, #tpu.memory_space<smem>>
    %1287 = vector.broadcast %1286 : f32 to vector<16x128xf32>
    %1288 = arith.mulf %1287, %1277 : vector<16x128xf32>
    %1289 = arith.addf %1272, %1288 : vector<16x128xf32>
    %c372 = arith.constant 372 : index
    %1290 = memref.load %arg1[%c372] : memref<400xf32, #tpu.memory_space<smem>>
    %1291 = vector.broadcast %1290 : f32 to vector<16x128xf32>
    %1292 = arith.mulf %1291, %1277 : vector<16x128xf32>
    %1293 = arith.addf %1276, %1292 : vector<16x128xf32>
    %c125_i32_115 = arith.constant 125 : i32
    %1294 = tpu.dynamic_rotate %1243 by %c125_i32_115 dim 1 : vector<16x128xf32>, i32 -> vector<16x128xf32>
    %c73 = arith.constant 73 : index
    %1295 = memref.load %arg1[%c73] : memref<400xf32, #tpu.memory_space<smem>>
    %1296 = vector.broadcast %1295 : f32 to vector<16x128xf32>
    %1297 = arith.mulf %1296, %1294 : vector<16x128xf32>
    %1298 = arith.addf %1281, %1297 : vector<16x128xf32>
    %c173 = arith.constant 173 : index
    %1299 = memref.load %arg1[%c173] : memref<400xf32, #tpu.memory_space<smem>>
    %1300 = vector.broadcast %1299 : f32 to vector<16x128xf32>
    %1301 = arith.mulf %1300, %1294 : vector<16x128xf32>
    %1302 = arith.addf %1285, %1301 : vector<16x128xf32>
    %c273 = arith.constant 273 : index
    %1303 = memref.load %arg1[%c273] : memref<400xf32, #tpu.memory_space<smem>>
    %1304 = vector.broadcast %1303 : f32 to vector<16x128xf32>
    %1305 = arith.mulf %1304, %1294 : vector<16x128xf32>
    %1306 = arith.addf %1289, %1305 : vector<16x128xf32>
    %c373 = arith.constant 373 : index
    %1307 = memref.load %arg1[%c373] : memref<400xf32, #tpu.memory_space<smem>>
    %1308 = vector.broadcast %1307 : f32 to vector<16x128xf32>
    %1309 = arith.mulf %1308, %1294 : vector<16x128xf32>
    %1310 = arith.addf %1293, %1309 : vector<16x128xf32>
    %c124_i32_116 = arith.constant 124 : i32
    %1311 = tpu.dynamic_rotate %1243 by %c124_i32_116 dim 1 : vector<16x128xf32>, i32 -> vector<16x128xf32>
    %c74 = arith.constant 74 : index
    %1312 = memref.load %arg1[%c74] : memref<400xf32, #tpu.memory_space<smem>>
    %1313 = vector.broadcast %1312 : f32 to vector<16x128xf32>
    %1314 = arith.mulf %1313, %1311 : vector<16x128xf32>
    %1315 = arith.addf %1298, %1314 : vector<16x128xf32>
    %c174 = arith.constant 174 : index
    %1316 = memref.load %arg1[%c174] : memref<400xf32, #tpu.memory_space<smem>>
    %1317 = vector.broadcast %1316 : f32 to vector<16x128xf32>
    %1318 = arith.mulf %1317, %1311 : vector<16x128xf32>
    %1319 = arith.addf %1302, %1318 : vector<16x128xf32>
    %c274 = arith.constant 274 : index
    %1320 = memref.load %arg1[%c274] : memref<400xf32, #tpu.memory_space<smem>>
    %1321 = vector.broadcast %1320 : f32 to vector<16x128xf32>
    %1322 = arith.mulf %1321, %1311 : vector<16x128xf32>
    %1323 = arith.addf %1306, %1322 : vector<16x128xf32>
    %c374 = arith.constant 374 : index
    %1324 = memref.load %arg1[%c374] : memref<400xf32, #tpu.memory_space<smem>>
    %1325 = vector.broadcast %1324 : f32 to vector<16x128xf32>
    %1326 = arith.mulf %1325, %1311 : vector<16x128xf32>
    %1327 = arith.addf %1310, %1326 : vector<16x128xf32>
    %c0_i32_117 = arith.constant 0 : i32
    %1328 = arith.addi %3, %c0_i32_117 : i32
    %c0_118 = arith.constant 0 : index
    %c3_119 = arith.constant 3 : index
    %1329 = arith.index_cast %1328 : i32 to index
    %c0_120 = arith.constant 0 : index
    %1330 = vector.load %arg2[%c0_118, %c3_119, %1329, %c0_120] : memref<1x4x20x128xf32, #tpu.memory_space<vmem>>, vector<1x1x16x128xf32>
    %1331 = vector.shape_cast %1330 : vector<1x1x16x128xf32> to vector<16x128xf32>
    %c75 = arith.constant 75 : index
    %1332 = memref.load %arg1[%c75] : memref<400xf32, #tpu.memory_space<smem>>
    %1333 = vector.broadcast %1332 : f32 to vector<16x128xf32>
    %1334 = arith.mulf %1333, %1331 : vector<16x128xf32>
    %1335 = arith.addf %1315, %1334 : vector<16x128xf32>
    %c175 = arith.constant 175 : index
    %1336 = memref.load %arg1[%c175] : memref<400xf32, #tpu.memory_space<smem>>
    %1337 = vector.broadcast %1336 : f32 to vector<16x128xf32>
    %1338 = arith.mulf %1337, %1331 : vector<16x128xf32>
    %1339 = arith.addf %1319, %1338 : vector<16x128xf32>
    %c275 = arith.constant 275 : index
    %1340 = memref.load %arg1[%c275] : memref<400xf32, #tpu.memory_space<smem>>
    %1341 = vector.broadcast %1340 : f32 to vector<16x128xf32>
    %1342 = arith.mulf %1341, %1331 : vector<16x128xf32>
    %1343 = arith.addf %1323, %1342 : vector<16x128xf32>
    %c375 = arith.constant 375 : index
    %1344 = memref.load %arg1[%c375] : memref<400xf32, #tpu.memory_space<smem>>
    %1345 = vector.broadcast %1344 : f32 to vector<16x128xf32>
    %1346 = arith.mulf %1345, %1331 : vector<16x128xf32>
    %1347 = arith.addf %1327, %1346 : vector<16x128xf32>
    %c127_i32_121 = arith.constant 127 : i32
    %1348 = tpu.dynamic_rotate %1331 by %c127_i32_121 dim 1 : vector<16x128xf32>, i32 -> vector<16x128xf32>
    %c76 = arith.constant 76 : index
    %1349 = memref.load %arg1[%c76] : memref<400xf32, #tpu.memory_space<smem>>
    %1350 = vector.broadcast %1349 : f32 to vector<16x128xf32>
    %1351 = arith.mulf %1350, %1348 : vector<16x128xf32>
    %1352 = arith.addf %1335, %1351 : vector<16x128xf32>
    %c176 = arith.constant 176 : index
    %1353 = memref.load %arg1[%c176] : memref<400xf32, #tpu.memory_space<smem>>
    %1354 = vector.broadcast %1353 : f32 to vector<16x128xf32>
    %1355 = arith.mulf %1354, %1348 : vector<16x128xf32>
    %1356 = arith.addf %1339, %1355 : vector<16x128xf32>
    %c276 = arith.constant 276 : index
    %1357 = memref.load %arg1[%c276] : memref<400xf32, #tpu.memory_space<smem>>
    %1358 = vector.broadcast %1357 : f32 to vector<16x128xf32>
    %1359 = arith.mulf %1358, %1348 : vector<16x128xf32>
    %1360 = arith.addf %1343, %1359 : vector<16x128xf32>
    %c376 = arith.constant 376 : index
    %1361 = memref.load %arg1[%c376] : memref<400xf32, #tpu.memory_space<smem>>
    %1362 = vector.broadcast %1361 : f32 to vector<16x128xf32>
    %1363 = arith.mulf %1362, %1348 : vector<16x128xf32>
    %1364 = arith.addf %1347, %1363 : vector<16x128xf32>
    %c126_i32_122 = arith.constant 126 : i32
    %1365 = tpu.dynamic_rotate %1331 by %c126_i32_122 dim 1 : vector<16x128xf32>, i32 -> vector<16x128xf32>
    %c77 = arith.constant 77 : index
    %1366 = memref.load %arg1[%c77] : memref<400xf32, #tpu.memory_space<smem>>
    %1367 = vector.broadcast %1366 : f32 to vector<16x128xf32>
    %1368 = arith.mulf %1367, %1365 : vector<16x128xf32>
    %1369 = arith.addf %1352, %1368 : vector<16x128xf32>
    %c177 = arith.constant 177 : index
    %1370 = memref.load %arg1[%c177] : memref<400xf32, #tpu.memory_space<smem>>
    %1371 = vector.broadcast %1370 : f32 to vector<16x128xf32>
    %1372 = arith.mulf %1371, %1365 : vector<16x128xf32>
    %1373 = arith.addf %1356, %1372 : vector<16x128xf32>
    %c277 = arith.constant 277 : index
    %1374 = memref.load %arg1[%c277] : memref<400xf32, #tpu.memory_space<smem>>
    %1375 = vector.broadcast %1374 : f32 to vector<16x128xf32>
    %1376 = arith.mulf %1375, %1365 : vector<16x128xf32>
    %1377 = arith.addf %1360, %1376 : vector<16x128xf32>
    %c377 = arith.constant 377 : index
    %1378 = memref.load %arg1[%c377] : memref<400xf32, #tpu.memory_space<smem>>
    %1379 = vector.broadcast %1378 : f32 to vector<16x128xf32>
    %1380 = arith.mulf %1379, %1365 : vector<16x128xf32>
    %1381 = arith.addf %1364, %1380 : vector<16x128xf32>
    %c125_i32_123 = arith.constant 125 : i32
    %1382 = tpu.dynamic_rotate %1331 by %c125_i32_123 dim 1 : vector<16x128xf32>, i32 -> vector<16x128xf32>
    %c78 = arith.constant 78 : index
    %1383 = memref.load %arg1[%c78] : memref<400xf32, #tpu.memory_space<smem>>
    %1384 = vector.broadcast %1383 : f32 to vector<16x128xf32>
    %1385 = arith.mulf %1384, %1382 : vector<16x128xf32>
    %1386 = arith.addf %1369, %1385 : vector<16x128xf32>
    %c178 = arith.constant 178 : index
    %1387 = memref.load %arg1[%c178] : memref<400xf32, #tpu.memory_space<smem>>
    %1388 = vector.broadcast %1387 : f32 to vector<16x128xf32>
    %1389 = arith.mulf %1388, %1382 : vector<16x128xf32>
    %1390 = arith.addf %1373, %1389 : vector<16x128xf32>
    %c278 = arith.constant 278 : index
    %1391 = memref.load %arg1[%c278] : memref<400xf32, #tpu.memory_space<smem>>
    %1392 = vector.broadcast %1391 : f32 to vector<16x128xf32>
    %1393 = arith.mulf %1392, %1382 : vector<16x128xf32>
    %1394 = arith.addf %1377, %1393 : vector<16x128xf32>
    %c378 = arith.constant 378 : index
    %1395 = memref.load %arg1[%c378] : memref<400xf32, #tpu.memory_space<smem>>
    %1396 = vector.broadcast %1395 : f32 to vector<16x128xf32>
    %1397 = arith.mulf %1396, %1382 : vector<16x128xf32>
    %1398 = arith.addf %1381, %1397 : vector<16x128xf32>
    %c124_i32_124 = arith.constant 124 : i32
    %1399 = tpu.dynamic_rotate %1331 by %c124_i32_124 dim 1 : vector<16x128xf32>, i32 -> vector<16x128xf32>
    %c79 = arith.constant 79 : index
    %1400 = memref.load %arg1[%c79] : memref<400xf32, #tpu.memory_space<smem>>
    %1401 = vector.broadcast %1400 : f32 to vector<16x128xf32>
    %1402 = arith.mulf %1401, %1399 : vector<16x128xf32>
    %1403 = arith.addf %1386, %1402 : vector<16x128xf32>
    %c179 = arith.constant 179 : index
    %1404 = memref.load %arg1[%c179] : memref<400xf32, #tpu.memory_space<smem>>
    %1405 = vector.broadcast %1404 : f32 to vector<16x128xf32>
    %1406 = arith.mulf %1405, %1399 : vector<16x128xf32>
    %1407 = arith.addf %1390, %1406 : vector<16x128xf32>
    %c279 = arith.constant 279 : index
    %1408 = memref.load %arg1[%c279] : memref<400xf32, #tpu.memory_space<smem>>
    %1409 = vector.broadcast %1408 : f32 to vector<16x128xf32>
    %1410 = arith.mulf %1409, %1399 : vector<16x128xf32>
    %1411 = arith.addf %1394, %1410 : vector<16x128xf32>
    %c379 = arith.constant 379 : index
    %1412 = memref.load %arg1[%c379] : memref<400xf32, #tpu.memory_space<smem>>
    %1413 = vector.broadcast %1412 : f32 to vector<16x128xf32>
    %1414 = arith.mulf %1413, %1399 : vector<16x128xf32>
    %1415 = arith.addf %1398, %1414 : vector<16x128xf32>
    %c1_i32_125 = arith.constant 1 : i32
    %1416 = arith.addi %3, %c1_i32_125 : i32
    %c0_126 = arith.constant 0 : index
    %c3_127 = arith.constant 3 : index
    %1417 = arith.index_cast %1416 : i32 to index
    %c0_128 = arith.constant 0 : index
    %1418 = vector.load %arg2[%c0_126, %c3_127, %1417, %c0_128] : memref<1x4x20x128xf32, #tpu.memory_space<vmem>>, vector<1x1x16x128xf32>
    %1419 = vector.shape_cast %1418 : vector<1x1x16x128xf32> to vector<16x128xf32>
    %c80 = arith.constant 80 : index
    %1420 = memref.load %arg1[%c80] : memref<400xf32, #tpu.memory_space<smem>>
    %1421 = vector.broadcast %1420 : f32 to vector<16x128xf32>
    %1422 = arith.mulf %1421, %1419 : vector<16x128xf32>
    %1423 = arith.addf %1403, %1422 : vector<16x128xf32>
    %c180 = arith.constant 180 : index
    %1424 = memref.load %arg1[%c180] : memref<400xf32, #tpu.memory_space<smem>>
    %1425 = vector.broadcast %1424 : f32 to vector<16x128xf32>
    %1426 = arith.mulf %1425, %1419 : vector<16x128xf32>
    %1427 = arith.addf %1407, %1426 : vector<16x128xf32>
    %c280 = arith.constant 280 : index
    %1428 = memref.load %arg1[%c280] : memref<400xf32, #tpu.memory_space<smem>>
    %1429 = vector.broadcast %1428 : f32 to vector<16x128xf32>
    %1430 = arith.mulf %1429, %1419 : vector<16x128xf32>
    %1431 = arith.addf %1411, %1430 : vector<16x128xf32>
    %c380 = arith.constant 380 : index
    %1432 = memref.load %arg1[%c380] : memref<400xf32, #tpu.memory_space<smem>>
    %1433 = vector.broadcast %1432 : f32 to vector<16x128xf32>
    %1434 = arith.mulf %1433, %1419 : vector<16x128xf32>
    %1435 = arith.addf %1415, %1434 : vector<16x128xf32>
    %c127_i32_129 = arith.constant 127 : i32
    %1436 = tpu.dynamic_rotate %1419 by %c127_i32_129 dim 1 : vector<16x128xf32>, i32 -> vector<16x128xf32>
    %c81 = arith.constant 81 : index
    %1437 = memref.load %arg1[%c81] : memref<400xf32, #tpu.memory_space<smem>>
    %1438 = vector.broadcast %1437 : f32 to vector<16x128xf32>
    %1439 = arith.mulf %1438, %1436 : vector<16x128xf32>
    %1440 = arith.addf %1423, %1439 : vector<16x128xf32>
    %c181 = arith.constant 181 : index
    %1441 = memref.load %arg1[%c181] : memref<400xf32, #tpu.memory_space<smem>>
    %1442 = vector.broadcast %1441 : f32 to vector<16x128xf32>
    %1443 = arith.mulf %1442, %1436 : vector<16x128xf32>
    %1444 = arith.addf %1427, %1443 : vector<16x128xf32>
    %c281 = arith.constant 281 : index
    %1445 = memref.load %arg1[%c281] : memref<400xf32, #tpu.memory_space<smem>>
    %1446 = vector.broadcast %1445 : f32 to vector<16x128xf32>
    %1447 = arith.mulf %1446, %1436 : vector<16x128xf32>
    %1448 = arith.addf %1431, %1447 : vector<16x128xf32>
    %c381 = arith.constant 381 : index
    %1449 = memref.load %arg1[%c381] : memref<400xf32, #tpu.memory_space<smem>>
    %1450 = vector.broadcast %1449 : f32 to vector<16x128xf32>
    %1451 = arith.mulf %1450, %1436 : vector<16x128xf32>
    %1452 = arith.addf %1435, %1451 : vector<16x128xf32>
    %c126_i32_130 = arith.constant 126 : i32
    %1453 = tpu.dynamic_rotate %1419 by %c126_i32_130 dim 1 : vector<16x128xf32>, i32 -> vector<16x128xf32>
    %c82 = arith.constant 82 : index
    %1454 = memref.load %arg1[%c82] : memref<400xf32, #tpu.memory_space<smem>>
    %1455 = vector.broadcast %1454 : f32 to vector<16x128xf32>
    %1456 = arith.mulf %1455, %1453 : vector<16x128xf32>
    %1457 = arith.addf %1440, %1456 : vector<16x128xf32>
    %c182 = arith.constant 182 : index
    %1458 = memref.load %arg1[%c182] : memref<400xf32, #tpu.memory_space<smem>>
    %1459 = vector.broadcast %1458 : f32 to vector<16x128xf32>
    %1460 = arith.mulf %1459, %1453 : vector<16x128xf32>
    %1461 = arith.addf %1444, %1460 : vector<16x128xf32>
    %c282 = arith.constant 282 : index
    %1462 = memref.load %arg1[%c282] : memref<400xf32, #tpu.memory_space<smem>>
    %1463 = vector.broadcast %1462 : f32 to vector<16x128xf32>
    %1464 = arith.mulf %1463, %1453 : vector<16x128xf32>
    %1465 = arith.addf %1448, %1464 : vector<16x128xf32>
    %c382 = arith.constant 382 : index
    %1466 = memref.load %arg1[%c382] : memref<400xf32, #tpu.memory_space<smem>>
    %1467 = vector.broadcast %1466 : f32 to vector<16x128xf32>
    %1468 = arith.mulf %1467, %1453 : vector<16x128xf32>
    %1469 = arith.addf %1452, %1468 : vector<16x128xf32>
    %c125_i32_131 = arith.constant 125 : i32
    %1470 = tpu.dynamic_rotate %1419 by %c125_i32_131 dim 1 : vector<16x128xf32>, i32 -> vector<16x128xf32>
    %c83 = arith.constant 83 : index
    %1471 = memref.load %arg1[%c83] : memref<400xf32, #tpu.memory_space<smem>>
    %1472 = vector.broadcast %1471 : f32 to vector<16x128xf32>
    %1473 = arith.mulf %1472, %1470 : vector<16x128xf32>
    %1474 = arith.addf %1457, %1473 : vector<16x128xf32>
    %c183 = arith.constant 183 : index
    %1475 = memref.load %arg1[%c183] : memref<400xf32, #tpu.memory_space<smem>>
    %1476 = vector.broadcast %1475 : f32 to vector<16x128xf32>
    %1477 = arith.mulf %1476, %1470 : vector<16x128xf32>
    %1478 = arith.addf %1461, %1477 : vector<16x128xf32>
    %c283 = arith.constant 283 : index
    %1479 = memref.load %arg1[%c283] : memref<400xf32, #tpu.memory_space<smem>>
    %1480 = vector.broadcast %1479 : f32 to vector<16x128xf32>
    %1481 = arith.mulf %1480, %1470 : vector<16x128xf32>
    %1482 = arith.addf %1465, %1481 : vector<16x128xf32>
    %c383 = arith.constant 383 : index
    %1483 = memref.load %arg1[%c383] : memref<400xf32, #tpu.memory_space<smem>>
    %1484 = vector.broadcast %1483 : f32 to vector<16x128xf32>
    %1485 = arith.mulf %1484, %1470 : vector<16x128xf32>
    %1486 = arith.addf %1469, %1485 : vector<16x128xf32>
    %c124_i32_132 = arith.constant 124 : i32
    %1487 = tpu.dynamic_rotate %1419 by %c124_i32_132 dim 1 : vector<16x128xf32>, i32 -> vector<16x128xf32>
    %c84 = arith.constant 84 : index
    %1488 = memref.load %arg1[%c84] : memref<400xf32, #tpu.memory_space<smem>>
    %1489 = vector.broadcast %1488 : f32 to vector<16x128xf32>
    %1490 = arith.mulf %1489, %1487 : vector<16x128xf32>
    %1491 = arith.addf %1474, %1490 : vector<16x128xf32>
    %c184 = arith.constant 184 : index
    %1492 = memref.load %arg1[%c184] : memref<400xf32, #tpu.memory_space<smem>>
    %1493 = vector.broadcast %1492 : f32 to vector<16x128xf32>
    %1494 = arith.mulf %1493, %1487 : vector<16x128xf32>
    %1495 = arith.addf %1478, %1494 : vector<16x128xf32>
    %c284 = arith.constant 284 : index
    %1496 = memref.load %arg1[%c284] : memref<400xf32, #tpu.memory_space<smem>>
    %1497 = vector.broadcast %1496 : f32 to vector<16x128xf32>
    %1498 = arith.mulf %1497, %1487 : vector<16x128xf32>
    %1499 = arith.addf %1482, %1498 : vector<16x128xf32>
    %c384 = arith.constant 384 : index
    %1500 = memref.load %arg1[%c384] : memref<400xf32, #tpu.memory_space<smem>>
    %1501 = vector.broadcast %1500 : f32 to vector<16x128xf32>
    %1502 = arith.mulf %1501, %1487 : vector<16x128xf32>
    %1503 = arith.addf %1486, %1502 : vector<16x128xf32>
    %c2_i32_133 = arith.constant 2 : i32
    %1504 = arith.addi %3, %c2_i32_133 : i32
    %c0_134 = arith.constant 0 : index
    %c3_135 = arith.constant 3 : index
    %1505 = arith.index_cast %1504 : i32 to index
    %c0_136 = arith.constant 0 : index
    %1506 = vector.load %arg2[%c0_134, %c3_135, %1505, %c0_136] : memref<1x4x20x128xf32, #tpu.memory_space<vmem>>, vector<1x1x16x128xf32>
    %1507 = vector.shape_cast %1506 : vector<1x1x16x128xf32> to vector<16x128xf32>
    %c85 = arith.constant 85 : index
    %1508 = memref.load %arg1[%c85] : memref<400xf32, #tpu.memory_space<smem>>
    %1509 = vector.broadcast %1508 : f32 to vector<16x128xf32>
    %1510 = arith.mulf %1509, %1507 : vector<16x128xf32>
    %1511 = arith.addf %1491, %1510 : vector<16x128xf32>
    %c185 = arith.constant 185 : index
    %1512 = memref.load %arg1[%c185] : memref<400xf32, #tpu.memory_space<smem>>
    %1513 = vector.broadcast %1512 : f32 to vector<16x128xf32>
    %1514 = arith.mulf %1513, %1507 : vector<16x128xf32>
    %1515 = arith.addf %1495, %1514 : vector<16x128xf32>
    %c285 = arith.constant 285 : index
    %1516 = memref.load %arg1[%c285] : memref<400xf32, #tpu.memory_space<smem>>
    %1517 = vector.broadcast %1516 : f32 to vector<16x128xf32>
    %1518 = arith.mulf %1517, %1507 : vector<16x128xf32>
    %1519 = arith.addf %1499, %1518 : vector<16x128xf32>
    %c385 = arith.constant 385 : index
    %1520 = memref.load %arg1[%c385] : memref<400xf32, #tpu.memory_space<smem>>
    %1521 = vector.broadcast %1520 : f32 to vector<16x128xf32>
    %1522 = arith.mulf %1521, %1507 : vector<16x128xf32>
    %1523 = arith.addf %1503, %1522 : vector<16x128xf32>
    %c127_i32_137 = arith.constant 127 : i32
    %1524 = tpu.dynamic_rotate %1507 by %c127_i32_137 dim 1 : vector<16x128xf32>, i32 -> vector<16x128xf32>
    %c86 = arith.constant 86 : index
    %1525 = memref.load %arg1[%c86] : memref<400xf32, #tpu.memory_space<smem>>
    %1526 = vector.broadcast %1525 : f32 to vector<16x128xf32>
    %1527 = arith.mulf %1526, %1524 : vector<16x128xf32>
    %1528 = arith.addf %1511, %1527 : vector<16x128xf32>
    %c186 = arith.constant 186 : index
    %1529 = memref.load %arg1[%c186] : memref<400xf32, #tpu.memory_space<smem>>
    %1530 = vector.broadcast %1529 : f32 to vector<16x128xf32>
    %1531 = arith.mulf %1530, %1524 : vector<16x128xf32>
    %1532 = arith.addf %1515, %1531 : vector<16x128xf32>
    %c286 = arith.constant 286 : index
    %1533 = memref.load %arg1[%c286] : memref<400xf32, #tpu.memory_space<smem>>
    %1534 = vector.broadcast %1533 : f32 to vector<16x128xf32>
    %1535 = arith.mulf %1534, %1524 : vector<16x128xf32>
    %1536 = arith.addf %1519, %1535 : vector<16x128xf32>
    %c386 = arith.constant 386 : index
    %1537 = memref.load %arg1[%c386] : memref<400xf32, #tpu.memory_space<smem>>
    %1538 = vector.broadcast %1537 : f32 to vector<16x128xf32>
    %1539 = arith.mulf %1538, %1524 : vector<16x128xf32>
    %1540 = arith.addf %1523, %1539 : vector<16x128xf32>
    %c126_i32_138 = arith.constant 126 : i32
    %1541 = tpu.dynamic_rotate %1507 by %c126_i32_138 dim 1 : vector<16x128xf32>, i32 -> vector<16x128xf32>
    %c87 = arith.constant 87 : index
    %1542 = memref.load %arg1[%c87] : memref<400xf32, #tpu.memory_space<smem>>
    %1543 = vector.broadcast %1542 : f32 to vector<16x128xf32>
    %1544 = arith.mulf %1543, %1541 : vector<16x128xf32>
    %1545 = arith.addf %1528, %1544 : vector<16x128xf32>
    %c187 = arith.constant 187 : index
    %1546 = memref.load %arg1[%c187] : memref<400xf32, #tpu.memory_space<smem>>
    %1547 = vector.broadcast %1546 : f32 to vector<16x128xf32>
    %1548 = arith.mulf %1547, %1541 : vector<16x128xf32>
    %1549 = arith.addf %1532, %1548 : vector<16x128xf32>
    %c287 = arith.constant 287 : index
    %1550 = memref.load %arg1[%c287] : memref<400xf32, #tpu.memory_space<smem>>
    %1551 = vector.broadcast %1550 : f32 to vector<16x128xf32>
    %1552 = arith.mulf %1551, %1541 : vector<16x128xf32>
    %1553 = arith.addf %1536, %1552 : vector<16x128xf32>
    %c387 = arith.constant 387 : index
    %1554 = memref.load %arg1[%c387] : memref<400xf32, #tpu.memory_space<smem>>
    %1555 = vector.broadcast %1554 : f32 to vector<16x128xf32>
    %1556 = arith.mulf %1555, %1541 : vector<16x128xf32>
    %1557 = arith.addf %1540, %1556 : vector<16x128xf32>
    %c125_i32_139 = arith.constant 125 : i32
    %1558 = tpu.dynamic_rotate %1507 by %c125_i32_139 dim 1 : vector<16x128xf32>, i32 -> vector<16x128xf32>
    %c88 = arith.constant 88 : index
    %1559 = memref.load %arg1[%c88] : memref<400xf32, #tpu.memory_space<smem>>
    %1560 = vector.broadcast %1559 : f32 to vector<16x128xf32>
    %1561 = arith.mulf %1560, %1558 : vector<16x128xf32>
    %1562 = arith.addf %1545, %1561 : vector<16x128xf32>
    %c188 = arith.constant 188 : index
    %1563 = memref.load %arg1[%c188] : memref<400xf32, #tpu.memory_space<smem>>
    %1564 = vector.broadcast %1563 : f32 to vector<16x128xf32>
    %1565 = arith.mulf %1564, %1558 : vector<16x128xf32>
    %1566 = arith.addf %1549, %1565 : vector<16x128xf32>
    %c288 = arith.constant 288 : index
    %1567 = memref.load %arg1[%c288] : memref<400xf32, #tpu.memory_space<smem>>
    %1568 = vector.broadcast %1567 : f32 to vector<16x128xf32>
    %1569 = arith.mulf %1568, %1558 : vector<16x128xf32>
    %1570 = arith.addf %1553, %1569 : vector<16x128xf32>
    %c388 = arith.constant 388 : index
    %1571 = memref.load %arg1[%c388] : memref<400xf32, #tpu.memory_space<smem>>
    %1572 = vector.broadcast %1571 : f32 to vector<16x128xf32>
    %1573 = arith.mulf %1572, %1558 : vector<16x128xf32>
    %1574 = arith.addf %1557, %1573 : vector<16x128xf32>
    %c124_i32_140 = arith.constant 124 : i32
    %1575 = tpu.dynamic_rotate %1507 by %c124_i32_140 dim 1 : vector<16x128xf32>, i32 -> vector<16x128xf32>
    %c89 = arith.constant 89 : index
    %1576 = memref.load %arg1[%c89] : memref<400xf32, #tpu.memory_space<smem>>
    %1577 = vector.broadcast %1576 : f32 to vector<16x128xf32>
    %1578 = arith.mulf %1577, %1575 : vector<16x128xf32>
    %1579 = arith.addf %1562, %1578 : vector<16x128xf32>
    %c189 = arith.constant 189 : index
    %1580 = memref.load %arg1[%c189] : memref<400xf32, #tpu.memory_space<smem>>
    %1581 = vector.broadcast %1580 : f32 to vector<16x128xf32>
    %1582 = arith.mulf %1581, %1575 : vector<16x128xf32>
    %1583 = arith.addf %1566, %1582 : vector<16x128xf32>
    %c289 = arith.constant 289 : index
    %1584 = memref.load %arg1[%c289] : memref<400xf32, #tpu.memory_space<smem>>
    %1585 = vector.broadcast %1584 : f32 to vector<16x128xf32>
    %1586 = arith.mulf %1585, %1575 : vector<16x128xf32>
    %1587 = arith.addf %1570, %1586 : vector<16x128xf32>
    %c389 = arith.constant 389 : index
    %1588 = memref.load %arg1[%c389] : memref<400xf32, #tpu.memory_space<smem>>
    %1589 = vector.broadcast %1588 : f32 to vector<16x128xf32>
    %1590 = arith.mulf %1589, %1575 : vector<16x128xf32>
    %1591 = arith.addf %1574, %1590 : vector<16x128xf32>
    %c3_i32_141 = arith.constant 3 : i32
    %1592 = arith.addi %3, %c3_i32_141 : i32
    %c0_142 = arith.constant 0 : index
    %c3_143 = arith.constant 3 : index
    %1593 = arith.index_cast %1592 : i32 to index
    %c0_144 = arith.constant 0 : index
    %1594 = vector.load %arg2[%c0_142, %c3_143, %1593, %c0_144] : memref<1x4x20x128xf32, #tpu.memory_space<vmem>>, vector<1x1x16x128xf32>
    %1595 = vector.shape_cast %1594 : vector<1x1x16x128xf32> to vector<16x128xf32>
    %c90 = arith.constant 90 : index
    %1596 = memref.load %arg1[%c90] : memref<400xf32, #tpu.memory_space<smem>>
    %1597 = vector.broadcast %1596 : f32 to vector<16x128xf32>
    %1598 = arith.mulf %1597, %1595 : vector<16x128xf32>
    %1599 = arith.addf %1579, %1598 : vector<16x128xf32>
    %c190 = arith.constant 190 : index
    %1600 = memref.load %arg1[%c190] : memref<400xf32, #tpu.memory_space<smem>>
    %1601 = vector.broadcast %1600 : f32 to vector<16x128xf32>
    %1602 = arith.mulf %1601, %1595 : vector<16x128xf32>
    %1603 = arith.addf %1583, %1602 : vector<16x128xf32>
    %c290 = arith.constant 290 : index
    %1604 = memref.load %arg1[%c290] : memref<400xf32, #tpu.memory_space<smem>>
    %1605 = vector.broadcast %1604 : f32 to vector<16x128xf32>
    %1606 = arith.mulf %1605, %1595 : vector<16x128xf32>
    %1607 = arith.addf %1587, %1606 : vector<16x128xf32>
    %c390 = arith.constant 390 : index
    %1608 = memref.load %arg1[%c390] : memref<400xf32, #tpu.memory_space<smem>>
    %1609 = vector.broadcast %1608 : f32 to vector<16x128xf32>
    %1610 = arith.mulf %1609, %1595 : vector<16x128xf32>
    %1611 = arith.addf %1591, %1610 : vector<16x128xf32>
    %c127_i32_145 = arith.constant 127 : i32
    %1612 = tpu.dynamic_rotate %1595 by %c127_i32_145 dim 1 : vector<16x128xf32>, i32 -> vector<16x128xf32>
    %c91 = arith.constant 91 : index
    %1613 = memref.load %arg1[%c91] : memref<400xf32, #tpu.memory_space<smem>>
    %1614 = vector.broadcast %1613 : f32 to vector<16x128xf32>
    %1615 = arith.mulf %1614, %1612 : vector<16x128xf32>
    %1616 = arith.addf %1599, %1615 : vector<16x128xf32>
    %c191 = arith.constant 191 : index
    %1617 = memref.load %arg1[%c191] : memref<400xf32, #tpu.memory_space<smem>>
    %1618 = vector.broadcast %1617 : f32 to vector<16x128xf32>
    %1619 = arith.mulf %1618, %1612 : vector<16x128xf32>
    %1620 = arith.addf %1603, %1619 : vector<16x128xf32>
    %c291 = arith.constant 291 : index
    %1621 = memref.load %arg1[%c291] : memref<400xf32, #tpu.memory_space<smem>>
    %1622 = vector.broadcast %1621 : f32 to vector<16x128xf32>
    %1623 = arith.mulf %1622, %1612 : vector<16x128xf32>
    %1624 = arith.addf %1607, %1623 : vector<16x128xf32>
    %c391 = arith.constant 391 : index
    %1625 = memref.load %arg1[%c391] : memref<400xf32, #tpu.memory_space<smem>>
    %1626 = vector.broadcast %1625 : f32 to vector<16x128xf32>
    %1627 = arith.mulf %1626, %1612 : vector<16x128xf32>
    %1628 = arith.addf %1611, %1627 : vector<16x128xf32>
    %c126_i32_146 = arith.constant 126 : i32
    %1629 = tpu.dynamic_rotate %1595 by %c126_i32_146 dim 1 : vector<16x128xf32>, i32 -> vector<16x128xf32>
    %c92 = arith.constant 92 : index
    %1630 = memref.load %arg1[%c92] : memref<400xf32, #tpu.memory_space<smem>>
    %1631 = vector.broadcast %1630 : f32 to vector<16x128xf32>
    %1632 = arith.mulf %1631, %1629 : vector<16x128xf32>
    %1633 = arith.addf %1616, %1632 : vector<16x128xf32>
    %c192 = arith.constant 192 : index
    %1634 = memref.load %arg1[%c192] : memref<400xf32, #tpu.memory_space<smem>>
    %1635 = vector.broadcast %1634 : f32 to vector<16x128xf32>
    %1636 = arith.mulf %1635, %1629 : vector<16x128xf32>
    %1637 = arith.addf %1620, %1636 : vector<16x128xf32>
    %c292 = arith.constant 292 : index
    %1638 = memref.load %arg1[%c292] : memref<400xf32, #tpu.memory_space<smem>>
    %1639 = vector.broadcast %1638 : f32 to vector<16x128xf32>
    %1640 = arith.mulf %1639, %1629 : vector<16x128xf32>
    %1641 = arith.addf %1624, %1640 : vector<16x128xf32>
    %c392 = arith.constant 392 : index
    %1642 = memref.load %arg1[%c392] : memref<400xf32, #tpu.memory_space<smem>>
    %1643 = vector.broadcast %1642 : f32 to vector<16x128xf32>
    %1644 = arith.mulf %1643, %1629 : vector<16x128xf32>
    %1645 = arith.addf %1628, %1644 : vector<16x128xf32>
    %c125_i32_147 = arith.constant 125 : i32
    %1646 = tpu.dynamic_rotate %1595 by %c125_i32_147 dim 1 : vector<16x128xf32>, i32 -> vector<16x128xf32>
    %c93 = arith.constant 93 : index
    %1647 = memref.load %arg1[%c93] : memref<400xf32, #tpu.memory_space<smem>>
    %1648 = vector.broadcast %1647 : f32 to vector<16x128xf32>
    %1649 = arith.mulf %1648, %1646 : vector<16x128xf32>
    %1650 = arith.addf %1633, %1649 : vector<16x128xf32>
    %c193 = arith.constant 193 : index
    %1651 = memref.load %arg1[%c193] : memref<400xf32, #tpu.memory_space<smem>>
    %1652 = vector.broadcast %1651 : f32 to vector<16x128xf32>
    %1653 = arith.mulf %1652, %1646 : vector<16x128xf32>
    %1654 = arith.addf %1637, %1653 : vector<16x128xf32>
    %c293 = arith.constant 293 : index
    %1655 = memref.load %arg1[%c293] : memref<400xf32, #tpu.memory_space<smem>>
    %1656 = vector.broadcast %1655 : f32 to vector<16x128xf32>
    %1657 = arith.mulf %1656, %1646 : vector<16x128xf32>
    %1658 = arith.addf %1641, %1657 : vector<16x128xf32>
    %c393 = arith.constant 393 : index
    %1659 = memref.load %arg1[%c393] : memref<400xf32, #tpu.memory_space<smem>>
    %1660 = vector.broadcast %1659 : f32 to vector<16x128xf32>
    %1661 = arith.mulf %1660, %1646 : vector<16x128xf32>
    %1662 = arith.addf %1645, %1661 : vector<16x128xf32>
    %c124_i32_148 = arith.constant 124 : i32
    %1663 = tpu.dynamic_rotate %1595 by %c124_i32_148 dim 1 : vector<16x128xf32>, i32 -> vector<16x128xf32>
    %c94 = arith.constant 94 : index
    %1664 = memref.load %arg1[%c94] : memref<400xf32, #tpu.memory_space<smem>>
    %1665 = vector.broadcast %1664 : f32 to vector<16x128xf32>
    %1666 = arith.mulf %1665, %1663 : vector<16x128xf32>
    %1667 = arith.addf %1650, %1666 : vector<16x128xf32>
    %c194 = arith.constant 194 : index
    %1668 = memref.load %arg1[%c194] : memref<400xf32, #tpu.memory_space<smem>>
    %1669 = vector.broadcast %1668 : f32 to vector<16x128xf32>
    %1670 = arith.mulf %1669, %1663 : vector<16x128xf32>
    %1671 = arith.addf %1654, %1670 : vector<16x128xf32>
    %c294 = arith.constant 294 : index
    %1672 = memref.load %arg1[%c294] : memref<400xf32, #tpu.memory_space<smem>>
    %1673 = vector.broadcast %1672 : f32 to vector<16x128xf32>
    %1674 = arith.mulf %1673, %1663 : vector<16x128xf32>
    %1675 = arith.addf %1658, %1674 : vector<16x128xf32>
    %c394 = arith.constant 394 : index
    %1676 = memref.load %arg1[%c394] : memref<400xf32, #tpu.memory_space<smem>>
    %1677 = vector.broadcast %1676 : f32 to vector<16x128xf32>
    %1678 = arith.mulf %1677, %1663 : vector<16x128xf32>
    %1679 = arith.addf %1662, %1678 : vector<16x128xf32>
    %c4_i32_149 = arith.constant 4 : i32
    %1680 = arith.addi %3, %c4_i32_149 : i32
    %c0_150 = arith.constant 0 : index
    %c3_151 = arith.constant 3 : index
    %1681 = arith.index_cast %1680 : i32 to index
    %c0_152 = arith.constant 0 : index
    %1682 = vector.load %arg2[%c0_150, %c3_151, %1681, %c0_152] : memref<1x4x20x128xf32, #tpu.memory_space<vmem>>, vector<1x1x16x128xf32>
    %1683 = vector.shape_cast %1682 : vector<1x1x16x128xf32> to vector<16x128xf32>
    %c95 = arith.constant 95 : index
    %1684 = memref.load %arg1[%c95] : memref<400xf32, #tpu.memory_space<smem>>
    %1685 = vector.broadcast %1684 : f32 to vector<16x128xf32>
    %1686 = arith.mulf %1685, %1683 : vector<16x128xf32>
    %1687 = arith.addf %1667, %1686 : vector<16x128xf32>
    %c195 = arith.constant 195 : index
    %1688 = memref.load %arg1[%c195] : memref<400xf32, #tpu.memory_space<smem>>
    %1689 = vector.broadcast %1688 : f32 to vector<16x128xf32>
    %1690 = arith.mulf %1689, %1683 : vector<16x128xf32>
    %1691 = arith.addf %1671, %1690 : vector<16x128xf32>
    %c295 = arith.constant 295 : index
    %1692 = memref.load %arg1[%c295] : memref<400xf32, #tpu.memory_space<smem>>
    %1693 = vector.broadcast %1692 : f32 to vector<16x128xf32>
    %1694 = arith.mulf %1693, %1683 : vector<16x128xf32>
    %1695 = arith.addf %1675, %1694 : vector<16x128xf32>
    %c395 = arith.constant 395 : index
    %1696 = memref.load %arg1[%c395] : memref<400xf32, #tpu.memory_space<smem>>
    %1697 = vector.broadcast %1696 : f32 to vector<16x128xf32>
    %1698 = arith.mulf %1697, %1683 : vector<16x128xf32>
    %1699 = arith.addf %1679, %1698 : vector<16x128xf32>
    %c127_i32_153 = arith.constant 127 : i32
    %1700 = tpu.dynamic_rotate %1683 by %c127_i32_153 dim 1 : vector<16x128xf32>, i32 -> vector<16x128xf32>
    %c96 = arith.constant 96 : index
    %1701 = memref.load %arg1[%c96] : memref<400xf32, #tpu.memory_space<smem>>
    %1702 = vector.broadcast %1701 : f32 to vector<16x128xf32>
    %1703 = arith.mulf %1702, %1700 : vector<16x128xf32>
    %1704 = arith.addf %1687, %1703 : vector<16x128xf32>
    %c196 = arith.constant 196 : index
    %1705 = memref.load %arg1[%c196] : memref<400xf32, #tpu.memory_space<smem>>
    %1706 = vector.broadcast %1705 : f32 to vector<16x128xf32>
    %1707 = arith.mulf %1706, %1700 : vector<16x128xf32>
    %1708 = arith.addf %1691, %1707 : vector<16x128xf32>
    %c296 = arith.constant 296 : index
    %1709 = memref.load %arg1[%c296] : memref<400xf32, #tpu.memory_space<smem>>
    %1710 = vector.broadcast %1709 : f32 to vector<16x128xf32>
    %1711 = arith.mulf %1710, %1700 : vector<16x128xf32>
    %1712 = arith.addf %1695, %1711 : vector<16x128xf32>
    %c396 = arith.constant 396 : index
    %1713 = memref.load %arg1[%c396] : memref<400xf32, #tpu.memory_space<smem>>
    %1714 = vector.broadcast %1713 : f32 to vector<16x128xf32>
    %1715 = arith.mulf %1714, %1700 : vector<16x128xf32>
    %1716 = arith.addf %1699, %1715 : vector<16x128xf32>
    %c126_i32_154 = arith.constant 126 : i32
    %1717 = tpu.dynamic_rotate %1683 by %c126_i32_154 dim 1 : vector<16x128xf32>, i32 -> vector<16x128xf32>
    %c97 = arith.constant 97 : index
    %1718 = memref.load %arg1[%c97] : memref<400xf32, #tpu.memory_space<smem>>
    %1719 = vector.broadcast %1718 : f32 to vector<16x128xf32>
    %1720 = arith.mulf %1719, %1717 : vector<16x128xf32>
    %1721 = arith.addf %1704, %1720 : vector<16x128xf32>
    %c197 = arith.constant 197 : index
    %1722 = memref.load %arg1[%c197] : memref<400xf32, #tpu.memory_space<smem>>
    %1723 = vector.broadcast %1722 : f32 to vector<16x128xf32>
    %1724 = arith.mulf %1723, %1717 : vector<16x128xf32>
    %1725 = arith.addf %1708, %1724 : vector<16x128xf32>
    %c297 = arith.constant 297 : index
    %1726 = memref.load %arg1[%c297] : memref<400xf32, #tpu.memory_space<smem>>
    %1727 = vector.broadcast %1726 : f32 to vector<16x128xf32>
    %1728 = arith.mulf %1727, %1717 : vector<16x128xf32>
    %1729 = arith.addf %1712, %1728 : vector<16x128xf32>
    %c397 = arith.constant 397 : index
    %1730 = memref.load %arg1[%c397] : memref<400xf32, #tpu.memory_space<smem>>
    %1731 = vector.broadcast %1730 : f32 to vector<16x128xf32>
    %1732 = arith.mulf %1731, %1717 : vector<16x128xf32>
    %1733 = arith.addf %1716, %1732 : vector<16x128xf32>
    %c125_i32_155 = arith.constant 125 : i32
    %1734 = tpu.dynamic_rotate %1683 by %c125_i32_155 dim 1 : vector<16x128xf32>, i32 -> vector<16x128xf32>
    %c98 = arith.constant 98 : index
    %1735 = memref.load %arg1[%c98] : memref<400xf32, #tpu.memory_space<smem>>
    %1736 = vector.broadcast %1735 : f32 to vector<16x128xf32>
    %1737 = arith.mulf %1736, %1734 : vector<16x128xf32>
    %1738 = arith.addf %1721, %1737 : vector<16x128xf32>
    %c198 = arith.constant 198 : index
    %1739 = memref.load %arg1[%c198] : memref<400xf32, #tpu.memory_space<smem>>
    %1740 = vector.broadcast %1739 : f32 to vector<16x128xf32>
    %1741 = arith.mulf %1740, %1734 : vector<16x128xf32>
    %1742 = arith.addf %1725, %1741 : vector<16x128xf32>
    %c298 = arith.constant 298 : index
    %1743 = memref.load %arg1[%c298] : memref<400xf32, #tpu.memory_space<smem>>
    %1744 = vector.broadcast %1743 : f32 to vector<16x128xf32>
    %1745 = arith.mulf %1744, %1734 : vector<16x128xf32>
    %1746 = arith.addf %1729, %1745 : vector<16x128xf32>
    %c398 = arith.constant 398 : index
    %1747 = memref.load %arg1[%c398] : memref<400xf32, #tpu.memory_space<smem>>
    %1748 = vector.broadcast %1747 : f32 to vector<16x128xf32>
    %1749 = arith.mulf %1748, %1734 : vector<16x128xf32>
    %1750 = arith.addf %1733, %1749 : vector<16x128xf32>
    %c124_i32_156 = arith.constant 124 : i32
    %1751 = tpu.dynamic_rotate %1683 by %c124_i32_156 dim 1 : vector<16x128xf32>, i32 -> vector<16x128xf32>
    %c99 = arith.constant 99 : index
    %1752 = memref.load %arg1[%c99] : memref<400xf32, #tpu.memory_space<smem>>
    %1753 = vector.broadcast %1752 : f32 to vector<16x128xf32>
    %1754 = arith.mulf %1753, %1751 : vector<16x128xf32>
    %1755 = arith.addf %1738, %1754 : vector<16x128xf32>
    %c199 = arith.constant 199 : index
    %1756 = memref.load %arg1[%c199] : memref<400xf32, #tpu.memory_space<smem>>
    %1757 = vector.broadcast %1756 : f32 to vector<16x128xf32>
    %1758 = arith.mulf %1757, %1751 : vector<16x128xf32>
    %1759 = arith.addf %1742, %1758 : vector<16x128xf32>
    %c299 = arith.constant 299 : index
    %1760 = memref.load %arg1[%c299] : memref<400xf32, #tpu.memory_space<smem>>
    %1761 = vector.broadcast %1760 : f32 to vector<16x128xf32>
    %1762 = arith.mulf %1761, %1751 : vector<16x128xf32>
    %1763 = arith.addf %1746, %1762 : vector<16x128xf32>
    %c399 = arith.constant 399 : index
    %1764 = memref.load %arg1[%c399] : memref<400xf32, #tpu.memory_space<smem>>
    %1765 = vector.broadcast %1764 : f32 to vector<16x128xf32>
    %1766 = arith.mulf %1765, %1751 : vector<16x128xf32>
    %1767 = arith.addf %1750, %1766 : vector<16x128xf32>
    %c0_157 = arith.constant 0 : index
    %c0_158 = arith.constant 0 : index
    %1768 = arith.index_cast %3 : i32 to index
    %c0_159 = arith.constant 0 : index
    %1769 = vector.load %arg3[%c0_157, %c0_158, %1768, %c0_159] : memref<1x4x16x128xf32, #tpu.memory_space<vmem>>, vector<1x1x16x128xf32>
    %1770 = vector.shape_cast %1769 : vector<1x1x16x128xf32> to vector<16x128xf32>
    %1771 = vector.shape_cast %1755 : vector<16x128xf32> to vector<1x1x16x128xf32>
    tpu.vector_store %arg3[%c0_157, %c0_158, %1768, %c0_159], %1771 {strides = array<i32>} : memref<1x4x16x128xf32, #tpu.memory_space<vmem>>, vector<1x1x16x128xf32>,
    %c0_160 = arith.constant 0 : index
    %c1_161 = arith.constant 1 : index
    %1772 = arith.index_cast %3 : i32 to index
    %c0_162 = arith.constant 0 : index
    %1773 = vector.load %arg3[%c0_160, %c1_161, %1772, %c0_162] : memref<1x4x16x128xf32, #tpu.memory_space<vmem>>, vector<1x1x16x128xf32>
    %1774 = vector.shape_cast %1773 : vector<1x1x16x128xf32> to vector<16x128xf32>
    %1775 = vector.shape_cast %1759 : vector<16x128xf32> to vector<1x1x16x128xf32>
    tpu.vector_store %arg3[%c0_160, %c1_161, %1772, %c0_162], %1775 {strides = array<i32>} : memref<1x4x16x128xf32, #tpu.memory_space<vmem>>, vector<1x1x16x128xf32>,
    %c0_163 = arith.constant 0 : index
    %c2_164 = arith.constant 2 : index
    %1776 = arith.index_cast %3 : i32 to index
    %c0_165 = arith.constant 0 : index
    %1777 = vector.load %arg3[%c0_163, %c2_164, %1776, %c0_165] : memref<1x4x16x128xf32, #tpu.memory_space<vmem>>, vector<1x1x16x128xf32>
    %1778 = vector.shape_cast %1777 : vector<1x1x16x128xf32> to vector<16x128xf32>
    %1779 = vector.shape_cast %1763 : vector<16x128xf32> to vector<1x1x16x128xf32>
    tpu.vector_store %arg3[%c0_163, %c2_164, %1776, %c0_165], %1779 {strides = array<i32>} : memref<1x4x16x128xf32, #tpu.memory_space<vmem>>, vector<1x1x16x128xf32>,
    %c0_166 = arith.constant 0 : index
    %c3_167 = arith.constant 3 : index
    %1780 = arith.index_cast %3 : i32 to index
    %c0_168 = arith.constant 0 : index
    %1781 = vector.load %arg3[%c0_166, %c3_167, %1780, %c0_168] : memref<1x4x16x128xf32, #tpu.memory_space<vmem>>, vector<1x1x16x128xf32>
    %1782 = vector.shape_cast %1781 : vector<1x1x16x128xf32> to vector<16x128xf32>
    %1783 = vector.shape_cast %1767 : vector<16x128xf32> to vector<1x1x16x128xf32>
    tpu.vector_store %arg3[%c0_166, %c3_167, %1780, %c0_168], %1783 {strides = array<i32>} : memref<1x4x16x128xf32, #tpu.memory_space<vmem>>, vector<1x1x16x128xf32>,
    %c1_i32_169 = arith.constant 1 : i32
    return
  }
  func.func @transform_0(%arg0: i32) -> i32 {
    %c0_i32 = arith.constant 0 : i32
    %c0_i32_0 = arith.constant 0 : i32
    return %c0_i32 : i32
  }
  func.func @transform_1(%arg0: i32) -> (i32, i32, i32, i32) {
    %c0_i32 = arith.constant 0 : i32
    %c0_i32_0 = arith.constant 0 : i32
    %c0_i32_1 = arith.constant 0 : i32
    %c0_i32_2 = arith.constant 0 : i32
    return %arg0, %c0_i32, %c0_i32_0, %c0_i32_1 : i32, i32, i32, i32
  }
  func.func @transform_2(%arg0: i32) -> (i32, i32, i32, i32) {
    %c0_i32 = arith.constant 0 : i32
    %c0_i32_0 = arith.constant 0 : i32
    %c0_i32_1 = arith.constant 0 : i32
    %c0_i32_2 = arith.constant 0 : i32
    return %arg0, %c0_i32, %c0_i32_0, %c0_i32_1 : i32, i32, i32, i32
  }
}

</mosaic_0001>

<bundles_post_ra>
// kernel: tpu_custom_call.1
= control target key start
LH: loop header
LB: loop body
LE: loop exit
PB: predicated region body
PF: predicated region fallthrough
CT: control target
= control target key end

     0   :  { %s6284_s0 = inlined_call_operand.vmem [shape: f32[400], index: 0, kind: input, shape index: {}]   ;;  %s6285_s1 = inlined_call_operand.vmem [shape: f32[2,4,20,128], index: 1, kind: input, shape index: {}]   ;;  %s6286_s2 = inlined_call_operand.hbm [shape: f32[2,4,16,128], index: 2, kind: output, shape index: {}]  }
   0x1   :  { %6466 = sst [smem:[#allocation146_spill]] %s6284_s0 }
   0x2   :  { %6467 = sst [smem:[#allocation147_spill]] %s6285_s1 }
   0x3   :  { %6468 = sst [smem:[#allocation148_spill]] %s6286_s2 }
   0x4   :  { %7 = vsyncpa [#allocation4], 0 }
   0x5   :  { %8 = vsyncpa [#allocation3], 0 }
   0x6   :  { %10 = vsyncpa [#allocation3 + $0x1], 0  ;;  %s3721_s9 = smov 0   ;;  %s3723_s10 = smov 0  }
   0x7   :  { %s3725_s11 = smov 0   ;;  %s3727_s12 = smov 0  }
   0x8 LB: > { %6469 = sst [smem:[#allocation8_spill]] %s3684_s9  ;;  %s3742_s13 = sadd.s32 4294967295, %s3696_s12   ;;  %s3696_s12 = sphi %s3727_s12, %s7062_s12   ;;  %s3692_s11 = sphi %s3725_s11, %s7065_s11   ;;  %s3688_s10 = sphi %s3723_s10, %s7064_s10   ;;  %s3684_s9 = sphi %s3721_s9, %s7063_s9  }
   0x9   : > { %6470 = sst [smem:[#allocation9_spill]] %s3688_s10  ;;  %s3077_s14 = sadd.s32 4294967294, %s3696_s12  }
   0xa   : > { %6471 = sst [smem:[#allocation10_spill]] %s3692_s11  ;;  %s3746_s15 = sadd.s32 1, %s3696_s12  }
   0xb   : > { %6472 = sst [smem:[#allocation11_spill]] %s3696_s12  ;;  %s70_s16 = sadd.s32 1, %s3692_s11 }
   0xc   : > { %6473 = sst [smem:[#allocation12_spill]] %s3742_s13  ;;  %s67_s17 = ssub.s32 %s3696_s12, %s3746_s15 }
   0xd   : > { %6474 = sst [smem:[#allocation13_spill]] %s3746_s15  ;;  %p80_p0 = scmp.ne.s32.totalorder %s3692_s11, %s3688_s10 }
   0xe   : > { %p68_p1 = scmp.eq.s32.totalorder %s67_s17, 0  ;;  %p81_p2 = scmp.eq.s32.totalorder %s3742_s13, 1 }
   0xf   : > { %p86_p3 = scmp.ne.s32.totalorder %s3688_s10, %s3684_s9  ;;  %p87_p4 = scmp.eq.s32.totalorder %s3077_s14, 1 }
  0x10   : > { %s3757_s18 = scalar_select %p68_p1, %s3692_s11, %s70_s16  }
  0x11   : > { %p3759_p5 = por %p81_p2, %p80_p0  ;;  %p3763_p6 = por %p87_p4, %p86_p3 }
  0x12   : > { %6475 = sst [smem:[#allocation14_spill]] %s3757_s18  ;;  %p3078_p7 = scmp.ge.s32.totalorder %s3696_s12, 1 }
  0x13   : > { %s6476_s19 = scalar_select %p3759_p5, 1, 0 }
  0x14   : > { %s6478_s20 = scalar_select %p3763_p6, 1, 0 }
  0x15   : > { %6477 = sst [smem:[#allocation15_spill]] %s6476_s19  ;;  %p94_p8 = scmp.lt.s32.totalorder %s3696_s12, 3 }
  0x16   : > { %6479 = sst [smem:[#allocation16_spill]] %s6478_s20  ;;  %p3549_p9 = scmp.eq.s32.totalorder %s3742_s13, 0 }
  0x17   : > { %p3770_p10 = pnand %p3078_p7, %p94_p8  ;;  %s6481_s0 = sld [smem:[#allocation146_spill]] }
  0x19   : > { %p3541_p11 = pneg %p3770_p10 }
  0x1b   : > { %p3542_p12 = pnand %p3549_p9, %p3541_p11 }
  0x1d   : > { %s107_s24 = sshll.u32 %s6481_s0, 4  ;;  %p3617_p0 = pneg %p3542_p12  ;;  %s108_s24 = int_to_ptr.vmem [resolvable:$true] %s107_s24 }
  0x1e   : > { %s3615_s25 = scalar_lea.vmem %s108_s24, 64  ;;  %p3623_p3 = scmp.lt.s32.totalorder %s108_s24, %s108_s24 }
  0x1f   : > { %p3616_p13 = scmp.ne.s32.totalorder %s108_s24, %s3615_s25  ;;  %p3624_p4 = scmp.lt.s32.totalorder %s3615_s25, %s3615_s25 }
  0x21   : > { %p3618_p1 = pnand %p3617_p0, %p3616_p13  ;;  %p3625_p7 = por %p3624_p4, %p3623_p3 }
  0x23   : > { %p3619_p2 = pneg %p3618_p1 }
  0x25   : > { %p3626_p8 = pnand %p3625_p7, %p3619_p2 }
  0x27   : > { %3629 = shalt.err (!%p3626_p8)
}
  0x28   : > { %s3698_s26 = smov [#allocation2]   ;;  %128 = sbr.rel (%p3770_p10) target bundleno = 718 (0x2ce), region = 28 }
  0x29   : > { %3544 = dma.vmem_to_smem (!%p3542_p12), %s108_s24, 64, %s3698_s26, [#allocation4]  }
  0x2f   : > { %3675 = dma.done.wait (%p3549_p9), [#allocation4], 64  }
  0x30   : > { %3677 = vsyncadd (%p3549_p9), [#allocation4], 4294967232 }
  0x31   : > { %134 = sfence }
  0x32   : > { %p151_p11 = scmp.lt.s32.totalorder %s3742_s13, 1  ;;  %s6482_s1 = sld [smem:[#allocation147_spill]] }
  0x33   : > { %s6287_s4 = smov 126   ;;  %s6289_s5 = smov 127  }
  0x34   : > { %s152_s27 = scalar_select %p151_p11, %s3742_s13, 1 }
  0x35   : > { %s6293_s6 = smov 125   ;;  %s6291_s7 = smov 124  }
  0x36   : > { %s3534_s28 = smul.u32 96, %s152_s27  ;;  %s3848_s8 = sld [smem:[#allocation2 + $0x2]] }
  0x37   : > { %s3850_s14 = sld [smem:[#allocation2 + $0x66]]  ;;  %s3856_s16 = sld [smem:[#allocation2 + $0xca]] }
  0x38   : > { %s3792_s3 = scalar_lea.vmem %s6482_s1, %s3534_s28  ;;  %s3858_s17 = sld [smem:[#allocation2 + $0x12e]] }
  0x39   : > { %6483 = sst [smem:[#allocation17_spill]] %s3792_s3  ;;  %v3795_v0 = vld [vmem:[%s3792_s3] sm:$0xff]  ;;  %v3802_v1 = vld [vmem:[%s3792_s3 + $0x8] sm:$0xff]  ;;  %s3860_s21 = sld [smem:[#allocation2]]  ;;  %v4140_v59 = vld [vmem:[%s3792_s3 + $0x18] sm:$0xff] }
  0x3a   : > { %210 = vrot.lane.b32.xlu1 %v3795_v0, %s6287_s4  ;;  %182 = vrot.lane.b32.xlu0 %v3795_v0, %s6289_s5  ;;  %v3817_v2 = vld [vmem:[%s3792_s3 + $0x9] sm:$0xff]  ;;  %v3820_v3 = vld [vmem:[%s3792_s3 + $0x1] sm:$0xff]  ;;  %s3862_s22 = sld [smem:[#allocation2 + $0x64]]  ;;  %s3864_s23 = sld [smem:[#allocation2 + $0xc8]] }
  0x3b   : > { %v3839_v4 = vld [vmem:[%s3792_s3 + $0xa] sm:$0xff]  ;;  %v3842_v5 = vld [vmem:[%s3792_s3 + $0x2] sm:$0xff]  ;;  %s3866_s24 = sld [smem:[#allocation2 + $0x12c]]  ;;  %s3868_s25 = sld [smem:[#allocation2 + $0x1]]  ;;  %v4354_v50 = vld [vmem:[%s3792_s3 + $0x19] sm:$0xff] }
  0x3c   : > { %6484 = sst [smem:[#allocation18_spill]] %s3848_s8  ;;  %s3870_s26 = sld [smem:[#allocation2 + $0x65]]  ;;  %v3901_v6 = vld [vmem:[%s3792_s3 + $0xb] sm:$0xff]  ;;  %v3904_v7 = vld [vmem:[%s3792_s3 + $0x3] sm:$0xff] }
  0x3d   : > { %6485 = sst [smem:[#allocation19_spill]] %s3850_s14  ;;  %s3876_s27 = sld [smem:[#allocation2 + $0xc9]]  ;;  %v3987_v8 = vld [vmem:[%s3792_s3 + $0xc] sm:$0xff]  ;;  %v3990_v9 = vld [vmem:[%s3792_s3 + $0x4] sm:$0xff] }
  0x3e   : > { %212 = vrot.lane.b32.xlu1 %v3802_v1, %s6287_s4  ;;  %184 = vrot.lane.b32.xlu0 %v3802_v1, %s6289_s5  ;;  %6486 = sst [smem:[#allocation20_spill]] %s3856_s16  ;;  %s3878_s28 = sld [smem:[#allocation2 + $0x12d]]  ;;  %v4137_v58 = vld [vmem:[%s3792_s3 + $0x20] sm:$0xff] }
  0x3f   : > { %6487 = sst [smem:[#allocation21_spill]] %s3858_s17  ;;  %s3880_s29 = sld [smem:[#allocation2 + $0x3]]  ;;  %v159_v10 = vstv %s3860_s21 }
  0x40   : > { %s3882_s30 = sld [smem:[#allocation2 + $0x67]]  ;;  %s3890_s0 = sld [smem:[#allocation2 + $0x68]]  ;;  %v165_v11 = vstv %s3862_s22  ;;  %v171_v12 = vstv %s3864_s23  ;;  %v4022_v19 = vmul.f32 %v159_v10, %v3795_v0  ;;  %v4039_v24 = vmul.f32 %v159_v10, %v3802_v1 }
  0x41   : > { %6488 = sst [smem:[#allocation22_spill]] %s3868_s25  ;;  %s6498_s1 = smov 124   ;;  %v177_v15 = vstv %s3866_s24  ;;  %v4025_v20 = vmul.f32 %v165_v11, %v3795_v0  ;;  %v4028_v21 = vmul.f32 %v171_v12, %v3795_v0  ;;  %v4042_v25 = vmul.f32 %v165_v11, %v3802_v1 }
  0x42   : > { %240 = vrot.lane.b32.xlu1 %v3802_v1, %s6293_s6  ;;  %238 = vrot.lane.b32.xlu0 %v3795_v0, %s6293_s6  ;;  %6489 = sst [smem:[#allocation23_spill]] %s3870_s26  ;;  %s3898_s18 = sld [smem:[#allocation2 + $0x130]]  ;;  %v4036_v23 = vmul.f32 %v177_v15, %v3795_v0  ;;  %v4061_v30 = vmul.f32 %v171_v12, %v3802_v1  ;;  %v4064_v31 = vmul.f32 %v177_v15, %v3802_v1 }
  0x43   : > { %6490 = sst [smem:[#allocation24_spill]] %s3876_s27  ;;  %s3906_s11 = sld [smem:[#allocation2 + $0x5]] }
  0x44   : > { %6491 = sst [smem:[#allocation25_spill]] %s3878_s28  ;;  %s3910_s20 = sld [smem:[#allocation2 + $0xcd]] }
  0x45   : > { %6492 = sst [smem:[#allocation26_spill]] %s3880_s29  ;;  %s3908_s15 = sld [smem:[#allocation2 + $0x69]] }
  0x46   : > { %268 = vrot.lane.b32.xlu1 %v3802_v1, %s6291_s7  ;;  %266 = vrot.lane.b32.xlu0 %v3795_v0, %s6291_s7  ;;  %6493 = sst [smem:[#allocation27_spill]] %s3882_s30  ;;  %s3912_s9 = sld [smem:[#allocation2 + $0x131]] }
  0x47   : > { %6497 = sst [smem:[#allocation31_spill]] %s3890_s0  ;;  %s3914_s12 = sld [smem:[#allocation2 + $0x6]] }
  0x48   : > { %6500 = sst [smem:[#allocation33_spill]] %s3898_s18  ;;  %s3916_s2 = sld [smem:[#allocation2 + $0x6a]] }
  0x49   : > { %s6504_s19 = smov 127   ;;  %s3922_s13 = sld [smem:[#allocation2 + $0xce]]  ;;  %v299_v29 = vstv %s3906_s11 }
  0x4a   : > { %324 = vrot.lane.b32.xlu1 %v3817_v2, %s6289_s5  ;;  %322 = vrot.lane.b32.xlu0 %v3820_v3, %s6289_s5  ;;  %s3924_s10 = sld [smem:[#allocation2 + $0x132]]  ;;  %s3926_s18 = sld [smem:[#allocation2 + $0x7]]  ;;  %v311_v33 = vstv %s3910_s20  ;;  %v4089_v42 = vmul.f32 %v3817_v2, %v299_v29  ;;  %v4098_v45 = vmul.f32 %v3820_v3, %v299_v29 }
  0x4b   : > { %s3930_s0 = sld [smem:[#allocation2 + $0xcf]]  ;;  %s4016_s21 = sld [smem:[#allocation2 + $0xd6]]  ;;  %v305_v32 = vstv %s3908_s15  ;;  %v4095_v44 = vmul.f32 %v3817_v2, %v311_v33  ;;  %v4155_v0 = vmul.f32 %v3820_v3, %v311_v33 }
  0x4c   : > { %6501 = sst [smem:[#allocation34_spill]] %s3912_s9  ;;  %s6513_s9 = smov 126   ;;  %v4092_v43 = vmul.f32 %v3817_v2, %v305_v32  ;;  %v4112_v47 = vmul.f32 %v3820_v3, %v305_v32 }
  0x4d   : > { %6502 = sst [smem:[#allocation35_spill]] %s3914_s12  ;;  %s3934_s12 = sld [smem:[#allocation2 + $0x8]] }
  0x4e   : > { %352 = vrot.lane.b32.xlu1 %v3817_v2, %s6287_s4  ;;  %350 = vrot.lane.b32.xlu0 %v3820_v3, %s6287_s4  ;;  %6503 = sst [smem:[#allocation36_spill]] %s3916_s2  ;;  %s4018_s22 = sld [smem:[#allocation2 + $0x13a]] }
  0x4f   : > { %6505 = sst [smem:[#allocation37_spill]] %s3922_s13  ;;  %s3936_s2 = sld [smem:[#allocation2 + $0x6c]] }
  0x50   : > { %6506 = sst [smem:[#allocation38_spill]] %s3924_s10  ;;  %s3942_s13 = sld [smem:[#allocation2 + $0xd0]] }
  0x51   : > { %6507 = sst [smem:[#allocation39_spill]] %s3926_s18  ;;  %s3944_s10 = sld [smem:[#allocation2 + $0x134]] }
  0x52   : > { %380 = vrot.lane.b32.xlu1 %v3817_v2, %s6293_s6  ;;  %378 = vrot.lane.b32.xlu0 %v3820_v3, %s6293_s6  ;;  %6509 = sst [smem:[#allocation41_spill]] %s3930_s0  ;;  %s4030_s23 = sld [smem:[#allocation2 + $0xf]] }
  0x53   : > { %6511 = sst [smem:[#allocation43_spill]] %s3934_s12  ;;  %s3946_s18 = sld [smem:[#allocation2 + $0x9]] }
  0x54   : > { %s3950_s0 = sld [smem:[#allocation2 + $0xd1]]  ;;  %s3954_s12 = sld [smem:[#allocation2 + $0xa]] }
  0x55   : > { %6512 = sst [smem:[#allocation44_spill]] %s3936_s2  ;;  %s3956_s2 = sld [smem:[#allocation2 + $0x6e]] }
  0x56   : > { %408 = vrot.lane.b32.xlu1 %v3817_v2, %s6291_s7  ;;  %406 = vrot.lane.b32.xlu0 %v3820_v3, %s6291_s7  ;;  %s3888_s7 = sld [smem:[#allocation2 + $0x4]]  ;;  %6514 = sst [smem:[#allocation45_spill]] %s3942_s13 }
  0x57   : > { %6515 = sst [smem:[#allocation46_spill]] %s3944_s10  ;;  %s3962_s10 = sld [smem:[#allocation2 + $0xd2]] }
  0x58   : > { %s3976_s13 = sld [smem:[#allocation2 + $0x70]]  ;;  %6537 = sst [smem:[#allocation67_spill]] %s4016_s21 }
  0x59   : > { %6516 = sst [smem:[#allocation47_spill]] %s3946_s18  ;;  %s3970_s18 = sld [smem:[#allocation2 + $0xd3]] }
  0x5a   : > { %464 = vrot.lane.b32.xlu1 %v3839_v4, %s6289_s5  ;;  %462 = vrot.lane.b32.xlu0 %v3842_v5, %s6289_s5  ;;  %s3886_s5 = sld [smem:[#allocation2 + $0x12f]]  ;;  %6518 = sst [smem:[#allocation49_spill]] %s3950_s0 }
  0x5b   : > { %6520 = sst [smem:[#allocation51_spill]] %s3954_s12  ;;  %s3974_s12 = sld [smem:[#allocation2 + $0xc]] }
  0x5c   : > { %6496 = sst [smem:[#allocation30_spill]] %s3888_s7  ;;  %s3932_s7 = sld [smem:[#allocation2 + $0x133]] }
  0x5d   : > { %6521 = sst [smem:[#allocation52_spill]] %s3956_s2  ;;  %s3966_s0 = sld [smem:[#allocation2 + $0xb]]  ;;  %v451_v63 = vstv %s3962_s10 }
  0x5e   : > { %492 = vrot.lane.b32.xlu1 %v3839_v4, %s6287_s4  ;;  %490 = vrot.lane.b32.xlu0 %v3842_v5, %s6287_s4  ;;  %s3884_s4 = sld [smem:[#allocation2 + $0xcb]]  ;;  %s3972_s2 = sld [smem:[#allocation2 + $0x137]]  ;;  %v4181_v33 = vmul.f32 %v3839_v4, %v451_v63  ;;  %v4243_v57 = vmul.f32 %v3842_v5, %v451_v63 }
  0x5f   : > { %6525 = sst [smem:[#allocation55_spill]] %s3970_s18  ;;  %s4001_s18 = sld [smem:[#allocation2 + $0x139]] }
  0x60   : > { %6495 = sst [smem:[#allocation29_spill]] %s3886_s5  ;;  %s6522_s5 = smov 125  }
  0x61   : > { %6527 = sst [smem:[#allocation57_spill]] %s3974_s12  ;;  %s3992_s12 = sld [smem:[#allocation2 + $0xd]] }
  0x62   : > { %520 = vrot.lane.b32.xlu1 %v3839_v4, %s6293_s6  ;;  %518 = vrot.lane.b32.xlu0 %v3842_v5, %s6293_s6  ;;  %s3896_s6 = sld [smem:[#allocation2 + $0xcc]]  ;;  %6510 = sst [smem:[#allocation42_spill]] %s3932_s7 }
  0x63   : > { %s3952_s7 = sld [smem:[#allocation2 + $0x135]]  ;;  %6528 = sst [smem:[#allocation58_spill]] %s3976_s13 }
  0x64   : > { %6494 = sst [smem:[#allocation28_spill]] %s3884_s4  ;;  %s3994_s13 = sld [smem:[#allocation2 + $0x71]] }
  0x65   : > { %6523 = sst [smem:[#allocation53_spill]] %s3966_s0  ;;  %s3982_s0 = sld [smem:[#allocation2 + $0xd4]] }
  0x66   : > { %548 = vrot.lane.b32.xlu1 %v3839_v4, %s6498_s1  ;;  %546 = vrot.lane.b32.xlu0 %v3842_v5, %s6498_s1  ;;  %6526 = sst [smem:[#allocation56_spill]] %s3972_s2  ;;  %s3999_s2 = sld [smem:[#allocation2 + $0xd5]] }
  0x67   : > { %6531 = sst [smem:[#allocation61_spill]] %s3992_s12  ;;  %s4032_s24 = sld [smem:[#allocation2 + $0x73]] }
  0x68   : > { %6499 = sst [smem:[#allocation32_spill]] %s3896_s6  ;;  %s3928_s6 = sld [smem:[#allocation2 + $0x6b]] }
  0x69   : > { %6519 = sst [smem:[#allocation50_spill]] %s3952_s7  ;;  %s3968_s7 = sld [smem:[#allocation2 + $0x6f]] }
  0x6a   : > { %604 = vrot.lane.b32.xlu1 %v3901_v6, %s6504_s19  ;;  %602 = vrot.lane.b32.xlu0 %v3904_v7, %s6504_s19  ;;  %6532 = sst [smem:[#allocation62_spill]] %s3994_s13  ;;  %s4044_s17 = sld [smem:[#allocation2 + $0xd7]] }
  0x6b   : > { %6529 = sst [smem:[#allocation59_spill]] %s3982_s0  ;;  %s4008_s0 = sld [smem:[#allocation2 + $0x72]] }
  0x6c   : > { %6533 = sst [smem:[#allocation63_spill]] %s3999_s2  ;;  %s4046_s16 = sld [smem:[#allocation2 + $0x13b]] }
  0x6d   : > { %6534 = sst [smem:[#allocation64_spill]] %s4001_s18  ;;  %s6540_s26 = sld [smem:[#allocation34_spill]] }
  0x6e   : > { %6508 = sst [smem:[#allocation40_spill]] %s3928_s6  ;;  %632 = vrot.lane.b32.xlu1 %v3901_v6, %s6513_s9  ;;  %630 = vrot.lane.b32.xlu0 %v3904_v7, %s6513_s9  ;;  %s3948_s6 = sld [smem:[#allocation2 + $0x6d]] }
  0x6f   : > { %6524 = sst [smem:[#allocation54_spill]] %s3968_s7  ;;  %s3984_s7 = sld [smem:[#allocation2 + $0x138]] }
  0x70   : > { %6538 = sst [smem:[#allocation68_spill]] %s4018_s22  ;;  %s4052_s14 = sld [smem:[#allocation2 + $0x10]]  ;;  %v591_v12 = vstv %s4044_s17 }
  0x71   : > { %6536 = sst [smem:[#allocation66_spill]] %s4008_s0  ;;  %s4054_s22 = sld [smem:[#allocation2 + $0x74]]  ;;  %v4261_v63 = vmul.f32 %v3901_v6, %v591_v12 }
  0x72   : > { %660 = vrot.lane.b32.xlu1 %v3901_v6, %s6522_s5  ;;  %658 = vrot.lane.b32.xlu0 %v3904_v7, %s6522_s5  ;;  %s4068_s11 = sld [smem:[#allocation2 + $0xd8]]  ;;  %s4070_s29 = sld [smem:[#allocation2 + $0x13c]]  ;;  %v597_v10 = vstv %s4046_s16 }
  0x73   : > { %v317_v37 = vstv %s6540_s26  ;;  %s4076_s28 = sld [smem:[#allocation2 + $0x11]]  ;;  %s4100_s27 = sld [smem:[#allocation2 + $0x12]]  ;;  %v4298_v52 = vmul.f32 %v3904_v7, %v597_v10 }
  0x74   : > { %6517 = sst [smem:[#allocation48_spill]] %s3948_s6  ;;  %s3964_s6 = sld [smem:[#allocation2 + $0x136]]  ;;  %v4109_v46 = vmul.f32 %v3817_v2, %v317_v37  ;;  %v4158_v1 = vmul.f32 %v3820_v3, %v317_v37 }
  0x75   : > { %6530 = sst [smem:[#allocation60_spill]] %s3984_s7  ;;  %s4006_s7 = sld [smem:[#allocation2 + $0xe]] }
  0x76   : > { %688 = vrot.lane.b32.xlu1 %v3901_v6, %s6498_s1  ;;  %686 = vrot.lane.b32.xlu0 %v3904_v7, %s6498_s1  ;;  %6541 = sst [smem:[#allocation34_spill]] %s4052_s14  ;;  %s4084_s15 = sld [smem:[#allocation2 + $0xd9]] }
  0x77   : > { %6543 = sst [smem:[#allocation69_spill]] %s4054_s22  ;;  %s4102_s21 = sld [smem:[#allocation2 + $0x76]] }
  0x78   : > { %6547 = sst [smem:[#allocation70_spill]] %s4068_s11  ;;  %s4078_s22 = sld [smem:[#allocation2 + $0x75]] }
  0x79   : > { %6548 = sst [smem:[#allocation71_spill]] %s4070_s29  ;;  %s4086_s11 = sld [smem:[#allocation2 + $0x13d]] }
  0x7a   : > { %744 = vrot.lane.b32.xlu1 %v3987_v8, %s6504_s19  ;;  %742 = vrot.lane.b32.xlu0 %v3990_v9, %s6504_s19  ;;  %6549 = sst [smem:[#allocation72_spill]] %s4076_s28  ;;  %s6569_s28 = sld [smem:[#allocation52_spill]]  ;;  %v457_v29 = vstv %s3964_s6 }
  0x7b   : > { %6535 = sst [smem:[#allocation65_spill]] %s4006_s7  ;;  %s4126_s29 = sld [smem:[#allocation2 + $0x77]]  ;;  %v4246_v56 = vmul.f32 %v3842_v5, %v457_v29 }
  0x7c   : > { %6553 = sst [smem:[#allocation74_spill]] %s4084_s15  ;;  %s4118_s15 = sld [smem:[#allocation2 + $0x13e]] }
  0x7d   : > { %6559 = sst [smem:[#allocation76_spill]] %s4100_s27  ;;  %s4164_s25 = sld [smem:[#allocation2 + $0x140]] }
  0x7e   : > { %772 = vrot.lane.b32.xlu1 %v3987_v8, %s6513_s9  ;;  %770 = vrot.lane.b32.xlu0 %v3990_v9, %s6513_s9  ;;  %6550 = sst [smem:[#allocation73_spill]] %s4078_s22  ;;  %s6568_s22 = sld [smem:[#allocation51_spill]] }
  0x7f   : > { %6555 = sst [smem:[#allocation75_spill]] %s4086_s11  ;;  %s4146_s4 = sld [smem:[#allocation2 + $0x14]] }
  0x80   : > { %6561 = sst [smem:[#allocation77_spill]] %s4102_s21  ;;  %s4116_s21 = sld [smem:[#allocation2 + $0xda]]  ;;  %v445_v62 = vstv %s6569_s28 }
  0x81   : > { %6571 = sst [smem:[#allocation52_spill]] %s4126_s29  ;;  %s4148_s11 = sld [smem:[#allocation2 + $0x78]]  ;;  %v4178_v32 = vmul.f32 %v3839_v4, %v445_v62  ;;  %v4206_v11 = vmul.f32 %v3842_v5, %v445_v62  ;;  %v585_v62 = vstv %s4032_s24 }
  0x82   : > { %800 = vrot.lane.b32.xlu1 %v3987_v8, %s6522_s5  ;;  %798 = vrot.lane.b32.xlu0 %v3990_v9, %s6522_s5  ;;  %6567 = sst [smem:[#allocation79_spill]] %s4118_s15  ;;  %s4124_s5 = sld [smem:[#allocation2 + $0x13]]  ;;  %v4258_v60 = vmul.f32 %v3901_v6, %v585_v62  ;;  %v4274_v2 = vmul.f32 %v3904_v7, %v585_v62  ;;  %v4295_v62 = vmul.f32 %v3904_v7, %v591_v12  ;;  %v4351_v12 = vld [vmem:[%s3792_s3 + $0x21] sm:$0xff] }
  0x83   : > { %s4134_s15 = sld [smem:[#allocation2 + $0x13f]]  ;;  %s4162_s28 = sld [smem:[#allocation2 + $0xdc]]  ;;  %v737_v51 = vstv %s4164_s25 }
  0x84   : > { %v439_v61 = vstv %s6568_s22  ;;  %s4170_s20 = sld [smem:[#allocation2 + $0x15]]  ;;  %s4188_s8 = sld [smem:[#allocation2 + $0x141]] }
  0x85   : > { %v4175_v3 = vmul.f32 %v3839_v4, %v439_v61  ;;  %v4184_v37 = vmul.f32 %v3842_v5, %v439_v61  ;;  %s4186_s26 = sld [smem:[#allocation2 + $0xdd]]  ;;  %v4203_v61 = vmul.f32 %v3839_v4, %v457_v29  ;;  %s4210_s0 = sld [smem:[#allocation2 + $0xde]]  ;;  %v579_v4 = vstv %s4030_s23 }
  0x86   : > { %6565 = sst [smem:[#allocation78_spill]] %s4116_s21  ;;  %s4132_s21 = sld [smem:[#allocation2 + $0xdb]]  ;;  %828 = vrot.lane.b32.xlu1 %v3987_v8, %s6498_s1  ;;  %826 = vrot.lane.b32.xlu0 %v3990_v9, %s6498_s1  ;;  %v4255_v55 = vmul.f32 %v3901_v6, %v579_v4  ;;  %v4264_v5 = vmul.f32 %v3901_v6, %v597_v10  ;;  %v4271_v29 = vmul.f32 %v3904_v7, %v579_v4  ;;  %v719_v53 = vstv %s4146_s4 }
  0x87   : > { %s4172_s1 = sld [smem:[#allocation2 + $0x79]]  ;;  %s4212_s27 = sld [smem:[#allocation2 + $0x142]]  ;;  %v725_v54 = vstv %s4148_s11  ;;  %v4326_v48 = vmul.f32 %v3987_v8, %v719_v53  ;;  %v4344_v4 = vmul.f32 %v3987_v8, %v737_v51  ;;  %v4357_v10 = vmul.f32 %v3990_v9, %v719_v53 }
  0x88   : > { %6570 = sst [smem:[#allocation51_spill]] %s4124_s5  ;;  %s4218_s22 = sld [smem:[#allocation2 + $0x17]]  ;;  %v4338_v49 = vmul.f32 %v3987_v8, %v725_v54  ;;  %v4360_v7 = vmul.f32 %v3990_v9, %v725_v54  ;;  %v4392_v54 = vmul.f32 %v3990_v9, %v737_v51 }
  0x89   : > { %6575 = sst [smem:[#allocation81_spill]] %s4134_s15  ;;  %s4226_s9 = sld [smem:[#allocation2 + $0xdf]]  ;;  %v731_v15 = vstv %s4162_s28 }
  0x8a   : > { %6583 = sst [smem:[#allocation82_spill]] %s4170_s20  ;;  %884 = vrot.lane.b32.xlu1 %v4137_v58, %s6504_s19  ;;  %882 = vrot.lane.b32.xlu0 %v4140_v59, %s6504_s19  ;;  %s4220_s19 = sld [smem:[#allocation2 + $0x7b]]  ;;  %v4341_v6 = vmul.f32 %v3987_v8, %v731_v15  ;;  %6632 = vst [vmem:[#allocation105_spill] sm:$0xff] %v4360_v7  ;;  %v4389_v53 = vmul.f32 %v3990_v9, %v731_v15  ;;  %6643 = vst [vmem:[#allocation109_spill] sm:$0xff] %v4392_v54 }
  0x8b   : > { %6587 = sst [smem:[#allocation84_spill]] %s4186_s26  ;;  %s4196_s20 = sld [smem:[#allocation2 + $0x7a]] }
  0x8c   : > { %6574 = sst [smem:[#allocation80_spill]] %s4132_s21  ;;  %s4236_s13 = sld [smem:[#allocation2 + $0x7c]]  ;;  %6642 = vst [vmem:[#allocation108_spill] sm:$0xff] %v4389_v53 }
  0x8d   : > { %6584 = sst [smem:[#allocation83_spill]] %s4172_s1  ;;  %s4194_s1 = sld [smem:[#allocation2 + $0x16]] }
  0x8e   : > { %6589 = sst [smem:[#allocation85_spill]] %s4188_s8  ;;  %s4234_s12 = sld [smem:[#allocation2 + $0x18]] }
  0x8f   : > { %6593 = sst [smem:[#allocation88_spill]] %s4210_s0  ;;  %s4228_s0 = sld [smem:[#allocation2 + $0x143]] }
  0x90   : > { %6594 = sst [smem:[#allocation89_spill]] %s4212_s27  ;;  %s6604_s30 = smov 126  }
  0x91   : > { %6592 = sst [smem:[#allocation87_spill]] %s4196_s20  ;;  %912 = vrot.lane.b32.xlu1 %v4137_v58, %s6604_s30  ;;  %910 = vrot.lane.b32.xlu0 %v4140_v59, %s6604_s30  ;;  %s4250_s10 = sld [smem:[#allocation2 + $0xe0]] }
  0x92   : > { %6596 = sst [smem:[#allocation90_spill]] %s4218_s22  ;;  %s4252_s18 = sld [smem:[#allocation2 + $0x144]] }
  0x93   : > { %6591 = sst [smem:[#allocation86_spill]] %s4194_s1  ;;  %s4266_s14 = sld [smem:[#allocation2 + $0x19]] }
  0x94   : > { %6597 = sst [smem:[#allocation91_spill]] %s4220_s19  ;;  %s4268_s20 = sld [smem:[#allocation2 + $0x7d]] }
  0x95   : > { %6600 = sst [smem:[#allocation92_spill]] %s4226_s9  ;;  %s4278_s30 = sld [smem:[#allocation2 + $0xe1]] }
  0x96   : > { %6601 = sst [smem:[#allocation93_spill]] %s4228_s0  ;;  %s4288_s0 = sld [smem:[#allocation2 + $0x7e]] }
  0x97   : > { %6602 = sst [smem:[#allocation94_spill]] %s4234_s12  ;;  %s6618_s9 = smov 125  }
  0x98   : > { %6603 = sst [smem:[#allocation95_spill]] %s4236_s13  ;;  %s4286_s13 = sld [smem:[#allocation2 + $0x1a]]  ;;  %940 = vrot.lane.b32.xlu1 %v4137_v58, %s6618_s9  ;;  %938 = vrot.lane.b32.xlu0 %v4140_v59, %s6618_s9 }
  0x99   : > { %6609 = sst [smem:[#allocation96_spill]] %s4250_s10  ;;  %s4280_s10 = sld [smem:[#allocation2 + $0x145]]  ;;  %v859_v41 = vstv %s4266_s14 }
  0x9a   : > { %6611 = sst [smem:[#allocation97_spill]] %s4252_s18  ;;  %s4302_s2 = sld [smem:[#allocation2 + $0xe2]]  ;;  %v865_v8 = vstv %s4268_s20  ;;  %v4417_v40 = vmul.f32 %v4137_v58, %v859_v41  ;;  %v4437_v51 = vmul.f32 %v4140_v59, %v859_v41 }
  0x9b   : > { %s4304_s7 = sld [smem:[#allocation2 + $0x146]]  ;;  %s4310_s24 = sld [smem:[#allocation2 + $0x1b]]  ;;  %v871_v36 = vstv %s4278_s30  ;;  %v4420_v34 = vmul.f32 %v4137_v58, %v865_v8 }
  0x9c   : > { %6617 = sst [smem:[#allocation99_spill]] %s4288_s0  ;;  %s4312_s9 = sld [smem:[#allocation2 + $0x7f]]  ;;  %6648 = vst [vmem:[#allocation114_spill] sm:$0xff] %v4417_v40  ;;  %v4423_v28 = vmul.f32 %v4137_v58, %v871_v36  ;;  %6654 = vst [vmem:[#allocation119_spill] sm:$0xff] %v4437_v51  ;;  %v4477_v15 = vmul.f32 %v4140_v59, %v871_v36 }
  0x9d   : > { %s4318_s4 = sld [smem:[#allocation2 + $0xe3]]  ;;  %s4320_s6 = sld [smem:[#allocation2 + $0x147]]  ;;  %6649 = vst [vmem:[#allocation115_spill] sm:$0xff] %v4420_v34 }
  0x9e   : > { %6615 = sst [smem:[#allocation98_spill]] %s4286_s13  ;;  %s4328_s28 = sld [smem:[#allocation2 + $0x1c]]  ;;  %6650 = vst [vmem:[#allocation116_spill] sm:$0xff] %v4423_v28  ;;  %6664 = vst [vmem:[#allocation127_spill] sm:$0xff] %v4477_v15 }
  0x9f   : > { %s4330_s12 = sld [smem:[#allocation2 + $0x80]]  ;;  %s6628_s23 = smov 124   ;;  %v877_v38 = vstv %s4280_s10 }
  0xa0   : > { %968 = vrot.lane.b32.xlu1 %v4137_v58, %s6628_s23  ;;  %966 = vrot.lane.b32.xlu0 %v4140_v59, %s6628_s23  ;;  %s4346_s29 = sld [smem:[#allocation2 + $0xe4]]  ;;  %s4348_s17 = sld [smem:[#allocation2 + $0x148]]  ;;  %v4426_v9 = vmul.f32 %v4137_v58, %v877_v38  ;;  %v4440_v58 = vmul.f32 %v4140_v59, %v865_v8  ;;  %v4480_v35 = vmul.f32 %v4140_v59, %v877_v38 }
  0xa1   : > { %s4364_s15 = sld [smem:[#allocation2 + $0x1d]]  ;;  %s4366_s16 = sld [smem:[#allocation2 + $0x81]] }
  0xa2   : > { %6622 = sst [smem:[#allocation100_spill]] %s4312_s9  ;;  %s4372_s18 = sld [smem:[#allocation2 + $0x1e]]  ;;  %6651 = vst [vmem:[#allocation117_spill] sm:$0xff] %v4426_v9  ;;  %6655 = vst [vmem:[#allocation120_spill] sm:$0xff] %v4440_v58 }
  0xa3   : > { %6623 = sst [smem:[#allocation101_spill]] %s4318_s4  ;;  %s4374_s23 = sld [smem:[#allocation2 + $0x82]]  ;;  %6665 = vst [vmem:[#allocation128_spill] sm:$0xff] %v4480_v35 }
  0xa4   : > { %6624 = sst [smem:[#allocation102_spill]] %s4320_s6  ;;  %s6638_s8 = smov 127  }
  0xa5   : > { %6627 = sst [smem:[#allocation103_spill]] %s4330_s12  ;;  %s4380_s25 = sld [smem:[#allocation2 + $0xe6]]  ;;  %1024 = vrot.lane.b32.xlu1 %v4351_v12, %s6638_s8  ;;  %1022 = vrot.lane.b32.xlu0 %v4354_v50, %s6638_s8 }
  0xa6   : > { %6631 = sst [smem:[#allocation104_spill]] %s4348_s17  ;;  %s4396_s14 = sld [smem:[#allocation2 + $0xe5]] }
  0xa7   : > { %6633 = sst [smem:[#allocation106_spill]] %s4364_s15  ;;  %s4404_s27 = sld [smem:[#allocation2 + $0x1f]] }
  0xa8   : > { %6634 = sst [smem:[#allocation107_spill]] %s4366_s16  ;;  %s4398_s20 = sld [smem:[#allocation2 + $0x149]]  ;;  %v999_v39 = vstv %s4372_s18 }
  0xa9   : > { %s4382_s16 = sld [smem:[#allocation2 + $0x14a]]  ;;  %s4406_s8 = sld [smem:[#allocation2 + $0x83]]  ;;  %v1005_v16 = vstv %s4374_s23  ;;  %v4497_v38 = vmul.f32 %v4351_v12, %v999_v39  ;;  %v4531_v8 = vmul.f32 %v4354_v50, %v999_v39 }
  0xaa   : > { %s4412_s30 = sld [smem:[#allocation2 + $0xe7]]  ;;  %s4414_s10 = sld [smem:[#allocation2 + $0x14b]]  ;;  %v4500_v59 = vmul.f32 %v4351_v12, %v1005_v16  ;;  %v4534_v13 = vmul.f32 %v4354_v50, %v1005_v16 }
  0xab   : > { %s4428_s5 = sld [smem:[#allocation2 + $0x20]]  ;;  %s4430_s1 = sld [smem:[#allocation2 + $0x84]]  ;;  %v1011_v27 = vstv %s4380_s25  ;;  %6669 = vst [vmem:[#allocation130_spill] sm:$0xff] %v4497_v38  ;;  %6674 = vst [vmem:[#allocation134_spill] sm:$0xff] %v4531_v8 }
  0xac   : > { %6644 = sst [smem:[#allocation110_spill]] %s4396_s14  ;;  %s6653_s21 = smov 126   ;;  %6670 = vst [vmem:[#allocation131_spill] sm:$0xff] %v4500_v59  ;;  %v4503_v41 = vmul.f32 %v4351_v12, %v1011_v27  ;;  %6675 = vst [vmem:[#allocation135_spill] sm:$0xff] %v4534_v13 }
  0xad   : > { %1052 = vrot.lane.b32.xlu1 %v4351_v12, %s6653_s21  ;;  %1050 = vrot.lane.b32.xlu0 %v4354_v50, %s6653_s21  ;;  %s4444_s26 = sld [smem:[#allocation2 + $0xe8]]  ;;  %s4446_s11 = sld [smem:[#allocation2 + $0x14c]] }
  0xae   : > { %6645 = sst [smem:[#allocation111_spill]] %s4398_s20  ;;  %s4452_s3 = sld [smem:[#allocation2 + $0x21]]  ;;  %6671 = vst [vmem:[#allocation132_spill] sm:$0xff] %v4503_v41 }
  0xaf   : > { %s4454_s19 = sld [smem:[#allocation2 + $0x85]]  ;;  %s4460_s0 = sld [smem:[#allocation2 + $0xe9]]  ;;  %v1017_v17 = vstv %s4382_s16 }
  0xb0   : > { %6646 = sst [smem:[#allocation112_spill]] %s4412_s30  ;;  %s4468_s9 = sld [smem:[#allocation2 + $0x22]]  ;;  %v4506_v26 = vmul.f32 %v4351_v12, %v1017_v17  ;;  %v4562_v59 = vmul.f32 %v4354_v50, %v1017_v17  ;;  %v211_v17 = vpop.permute.xlu1 %210 }
  0xb1   : > { %6647 = sst [smem:[#allocation113_spill]] %s4414_s10  ;;  %s4462_s13 = sld [smem:[#allocation2 + $0x14d]] }
  0xb2   : > { %6652 = sst [smem:[#allocation118_spill]] %s4428_s5  ;;  %s4470_s4 = sld [smem:[#allocation2 + $0x86]]  ;;  %6672 = vst [vmem:[#allocation133_spill] sm:$0xff] %v4506_v26  ;;  %6678 = vst [vmem:[#allocation137_spill] sm:$0xff] %v4562_v59 }
  0xb3   : > { %s6663_s6 = smov 125   ;;  %s6666_s18 = sld [smem:[#allocation17_spill]] }
  0xb4   : > { %6656 = sst [smem:[#allocation121_spill]] %s4452_s3  ;;  %1080 = vrot.lane.b32.xlu1 %v4351_v12, %s6663_s6  ;;  %1078 = vrot.lane.b32.xlu0 %v4354_v50, %s6663_s6  ;;  %s4484_s23 = sld [smem:[#allocation2 + $0xea]] }
  0xb5   : > { %6657 = sst [smem:[#allocation122_spill]] %s4454_s19  ;;  %s4486_s16 = sld [smem:[#allocation2 + $0x14e]] }
  0xb6   : > { %6658 = sst [smem:[#allocation123_spill]] %s4460_s0  ;;  %s4492_s25 = sld [smem:[#allocation2 + $0x23]] }
  0xb7   : > { %6659 = sst [smem:[#allocation124_spill]] %s4462_s13  ;;  %s4494_s12 = sld [smem:[#allocation2 + $0x87]] }
  0xb8   : > { %6661 = sst [smem:[#allocation125_spill]] %s4468_s9  ;;  %s4508_s14 = sld [smem:[#allocation2 + $0xeb]] }
  0xb9   : > { %6662 = sst [smem:[#allocation126_spill]] %s4470_s4  ;;  %s4510_s20 = sld [smem:[#allocation2 + $0x14f]]  ;;  %v4513_v36 = vld [vmem:[%s6666_s18 + $0x22] sm:$0xff]  ;;  %v4516_v18 = vld [vmem:[%s6666_s18 + $0x1a] sm:$0xff] }
  0xba   : > { %6667 = sst [smem:[#allocation17_spill]] %s4484_s23  ;;  %s4522_s22 = sld [smem:[#allocation2 + $0x24]] }
  0xbb   : > { %6668 = sst [smem:[#allocation129_spill]] %s4486_s16  ;;  %s4524_s15 = sld [smem:[#allocation2 + $0x88]] }
  0xbc   : > { %s6673_s17 = smov 124   ;;  %s4542_s10 = sld [smem:[#allocation2 + $0xec]]  ;;  %v1139_v13 = vstv %s4492_s25 }
  0xbd   : > { %1108 = vrot.lane.b32.xlu1 %v4351_v12, %s6673_s17  ;;  %1106 = vrot.lane.b32.xlu0 %v4354_v50, %s6673_s17  ;;  %s4544_s30 = sld [smem:[#allocation2 + $0x150]]  ;;  %v1145_v58 = vstv %s4494_s12  ;;  %s6676_s5 = smov 127   ;;  %v4559_v12 = vmul.f32 %v4354_v50, %v1011_v27  ;;  %v4567_v16 = vmul.f32 %v4513_v36, %v1139_v13  ;;  %v183_v50 = vpop.permute.xlu0 %182  ;;  %v4583_v39 = vmul.f32 %v4516_v18, %v1139_v13 }
  0xbe   : > { %v1151_v38 = vstv %s4508_s14  ;;  %s6679_s13 = sld [smem:[#allocation18_spill]]  ;;  %s6680_s23 = sld [smem:[#allocation19_spill]]  ;;  %v4570_v15 = vmul.f32 %v4513_v36, %v1145_v58  ;;  %v4586_v41 = vmul.f32 %v4516_v18, %v1145_v58 }
  0xbf   : > { %6677 = vst [vmem:[#allocation136_spill] sm:$0xff] %v4559_v12  ;;  %v1157_v8 = vstv %s4510_s20  ;;  %6681 = vst [vmem:[#allocation138_spill] sm:$0xff] %v4567_v16  ;;  %v4573_v35 = vmul.f32 %v4513_v36, %v1151_v38  ;;  %s6684_s12 = sld [smem:[#allocation22_spill]]  ;;  %s6686_s25 = sld [smem:[#allocation23_spill]]  ;;  %v4589_v26 = vmul.f32 %v4516_v18, %v1151_v38 }
  0xc0   : > { %6682 = vst [vmem:[#allocation139_spill] sm:$0xff] %v4570_v15  ;;  %v4576_v27 = vmul.f32 %v4513_v36, %v1157_v8  ;;  %s4578_s14 = sld [smem:[#allocation2 + $0x25]]  ;;  %s6687_s20 = sld [smem:[#allocation24_spill]]  ;;  %6690 = vst [vmem:[#allocation142_spill] sm:$0xff] %v4583_v39  ;;  %v4592_v22 = vmul.f32 %v4516_v18, %v1157_v8 }
  0xc1   : > { %1164 = vrot.lane.b32.xlu1 %v4513_v36, %s6676_s5  ;;  %1162 = vrot.lane.b32.xlu0 %v4516_v18, %s6676_s5  ;;  %6683 = vst [vmem:[#allocation140_spill] sm:$0xff] %v4573_v35  ;;  %s4580_s16 = sld [smem:[#allocation2 + $0x89]]  ;;  %s6689_s9 = sld [smem:[#allocation20_spill]]  ;;  %6692 = vst [vmem:[#allocation143_spill] sm:$0xff] %v4586_v41  ;;  %v185_v51 = vpop.permute.xlu0 %184 }
  0xc2   : > { %6685 = vst [vmem:[#allocation141_spill] sm:$0xff] %v4576_v27  ;;  %s6688_s4 = sld [smem:[#allocation25_spill]]  ;;  %s6691_s0 = sld [smem:[#allocation21_spill]]  ;;  %6693 = vst [vmem:[#allocation144_spill] sm:$0xff] %v4589_v26 }
  0xc3   : > { %6694 = vst [vmem:[#allocation145_spill] sm:$0xff] %v4592_v22  ;;  %s4594_s19 = sld [smem:[#allocation2 + $0xed]]  ;;  %s4596_s3 = sld [smem:[#allocation2 + $0x151]] }
  0xc4   : > { %v6695_v14 = vstv %s6679_s13  ;;  %v6696_v13 = vstv %s6680_s23  ;;  %v6704_v9 = vstv %s6680_s23  ;;  %s6710_s23 = sld [smem:[#allocation27_spill]] }
  0xc5   : > { %v216_v27 = vmul.f32 %v6695_v14, %v211_v17  ;;  %v222_v39 = vmul.f32 %v6696_v13, %v211_v17  ;;  %v6697_v58 = vstv %s6684_s12  ;;  %v6698_v16 = vstv %s6686_s25  ;;  %1192 = vrot.lane.b32.xlu1 %v4513_v36, %s6653_s21  ;;  %1190 = vrot.lane.b32.xlu0 %v4516_v18, %s6653_s21 }
  0xc6   : > { %v188_v41 = vmul.f32 %v6697_v58, %v183_v50  ;;  %v194_v38 = vmul.f32 %v6698_v16, %v183_v50  ;;  %v6699_v26 = vstv %s6687_s20  ;;  %v6711_v34 = vstv %s6687_s20  ;;  %s6724_s20 = sld [smem:[#allocation33_spill]] }
  0xc7   : > { %v200_v8 = vmul.f32 %v6699_v26, %v183_v50  ;;  %v6701_v14 = vstv %s6689_s9  ;;  %v6705_v15 = vstv %s6689_s9  ;;  %s6712_s9 = sld [smem:[#allocation28_spill]] }
  0xc8   : > { %v6700_v22 = vstv %s6688_s4  ;;  %v228_v12 = vmul.f32 %v6701_v14, %v211_v17  ;;  %v6702_v13 = vstv %s6691_s0  ;;  %v190_v16 = vadd.f32 %v188_v41, %v4022_v19  ;;  %v213_v14 = vpop.permute.xlu1 %212 }
  0xc9   : > { %v206_v59 = vmul.f32 %v6700_v22, %v183_v50  ;;  %v234_v35 = vmul.f32 %v6702_v13, %v211_v17  ;;  %v196_v26 = vadd.f32 %v194_v38, %v4025_v20  ;;  %v202_v22 = vadd.f32 %v200_v8, %v4028_v21  ;;  %1220 = vrot.lane.b32.xlu1 %v4513_v36, %s6663_s6 }
  0xca   : > { %v6703_v17 = vstv %s6679_s13  ;;  %v223_v58 = vmul.f32 %v6704_v9, %v213_v14  ;;  %v229_v28 = vmul.f32 %v6705_v15, %v213_v14  ;;  %v6706_v19 = vstv %s6691_s0  ;;  %s6708_s13 = sld [smem:[#allocation26_spill]]  ;;  %s6714_s0 = sld [smem:[#allocation29_spill]]  ;;  %1218 = vrot.lane.b32.xlu0 %v4516_v18, %s6663_s6 }
  0xcb   : > { %v208_v50 = vadd.f32 %v206_v59, %v4036_v23  ;;  %v217_v13 = vmul.f32 %v6703_v17, %v213_v14  ;;  %v235_v41 = vmul.f32 %v6706_v19, %v213_v14  ;;  %v218_v20 = vadd.f32 %v216_v27, %v190_v16 }
  0xcc   : > { %v224_v38 = vadd.f32 %v222_v39, %v196_v26  ;;  %v230_v21 = vadd.f32 %v228_v12, %v202_v22  ;;  %v6707_v23 = vstv %s6684_s12  ;;  %v6709_v17 = vstv %s6686_s25  ;;  %v241_v12 = vpop.permute.xlu1 %240  ;;  %s6722_s12 = sld [smem:[#allocation31_spill]]  ;;  %s6723_s25 = sld [smem:[#allocation32_spill]] }
  0xcd   : > { %v236_v8 = vadd.f32 %v234_v35, %v208_v50  ;;  %v189_v59 = vmul.f32 %v6707_v23, %v185_v51  ;;  %v195_v9 = vmul.f32 %v6709_v17, %v185_v51  ;;  %v201_v15 = vmul.f32 %v6711_v34, %v185_v51  ;;  %v239_v35 = vpop.permute.xlu0 %238  ;;  %1248 = vrot.lane.b32.xlu1 %v4513_v36, %s6673_s17 }
  0xce   : > { %v6713_v40 = vstv %s6688_s4  ;;  %v6716_v23 = vstv %s6710_s23  ;;  %v6717_v27 = vstv %s6712_s9  ;;  %1246 = vrot.lane.b32.xlu0 %v4516_v18, %s6673_s17  ;;  %s6721_s4 = sld [smem:[#allocation30_spill]]  ;;  %s6734_s23 = sld [smem:[#allocation36_spill]] }
  0xcf   : > { %v207_v14 = vmul.f32 %v6713_v40, %v185_v51  ;;  %v191_v22 = vadd.f32 %v189_v59, %v4039_v24  ;;  %v197_v50 = vadd.f32 %v195_v9, %v4042_v25  ;;  %v203_v34 = vadd.f32 %v201_v15, %v4061_v30  ;;  %v4667_v30 = vld [vmem:[%s6666_s18 + $0x23] sm:$0xff]  ;;  %s6735_s9 = sld [smem:[#allocation37_spill]] }
  0xd0   : > { %v6715_v51 = vstv %s6708_s13  ;;  %v251_v17 = vmul.f32 %v6716_v23, %v241_v12  ;;  %v257_v16 = vmul.f32 %v6717_v27, %v241_v12  ;;  %v6718_v26 = vstv %s6714_s0  ;;  %s6733_s13 = sld [smem:[#allocation35_spill]]  ;;  %s6736_s0 = sld [smem:[#allocation38_spill]] }
  0xd1   : > { %v209_v40 = vadd.f32 %v207_v14, %v4064_v31  ;;  %v245_v19 = vmul.f32 %v6715_v51, %v241_v12  ;;  %v263_v39 = vmul.f32 %v6718_v26, %v241_v12  ;;  %v219_v24 = vadd.f32 %v217_v13, %v191_v22  ;;  %v4678_v13 = vld [vmem:[%s6666_s18 + $0x1b] sm:$0xff]  ;;  %1304 = vrot.lane.b32.xlu1 %v4667_v30, %s6676_s5 }
  0xd2   : > { %v225_v25 = vadd.f32 %v223_v58, %v197_v50  ;;  %v231_v59 = vadd.f32 %v229_v28, %v203_v34  ;;  %v6719_v31 = vmov %v6715_v51  ;;  %v6720_v14 = vmov %v6716_v23  ;;  %v269_v58 = vpop.permute.xlu1 %268  ;;  %v267_v28 = vpop.permute.xlu0 %266  ;;  %1302 = vrot.lane.b32.xlu0 %v4678_v13, %s6676_s5 }
  0xd3   : > { %v237_v9 = vadd.f32 %v235_v41, %v209_v40  ;;  %v244_v15 = vmul.f32 %v6719_v31, %v239_v35  ;;  %v250_v51 = vmul.f32 %v6720_v14, %v239_v35  ;;  %v256_v12 = vmul.f32 %v6717_v27, %v239_v35 }
  0xd4   : > { %v262_v36 = vmul.f32 %v6718_v26, %v239_v35  ;;  %v247_v18 = vadd.f32 %v245_v19, %v219_v24  ;;  %v253_v41 = vadd.f32 %v251_v17, %v225_v25  ;;  %v259_v22 = vadd.f32 %v257_v16, %v231_v59 }
  0xd5   : > { %v265_v50 = vadd.f32 %v263_v39, %v237_v9  ;;  %v246_v34 = vadd.f32 %v244_v15, %v218_v20  ;;  %v252_v40 = vadd.f32 %v250_v51, %v224_v38  ;;  %v258_v23 = vadd.f32 %v256_v12, %v230_v21  ;;  %1332 = vrot.lane.b32.xlu1 %v4667_v30, %s6653_s21 }
  0xd6   : > { %v264_v31 = vadd.f32 %v262_v36, %v236_v8  ;;  %v6725_v35 = vstv %s6721_s4  ;;  %v6726_v27 = vstv %s6722_s12  ;;  %v6727_v54 = vstv %s6723_s25  ;;  %v325_v25 = vpop.permute.xlu1 %324  ;;  %v323_v59 = vpop.permute.xlu0 %322  ;;  %1330 = vrot.lane.b32.xlu0 %v4678_v13, %s6653_s21  ;;  %s6743_s4 = sld [smem:[#allocation39_spill]]  ;;  %s6745_s12 = sld [smem:[#allocation40_spill]] }
  0xd7   : > { %v273_v14 = vmul.f32 %v6725_v35, %v269_v58  ;;  %v279_v26 = vmul.f32 %v6726_v27, %v269_v58  ;;  %v285_v53 = vmul.f32 %v6727_v54, %v269_v58  ;;  %v6728_v7 = vstv %s6724_s20  ;;  %s6747_s25 = sld [smem:[#allocation41_spill]]  ;;  %s6748_s20 = sld [smem:[#allocation42_spill]] }
  0xd8   : > { %v291_v19 = vmul.f32 %v6728_v7, %v269_v58  ;;  %v6729_v16 = vmov %v6725_v35  ;;  %v6730_v20 = vmov %v6726_v27  ;;  %v6731_v21 = vmov %v6727_v54 }
  0xd9   : > { %v272_v39 = vmul.f32 %v6729_v16, %v267_v28  ;;  %v278_v38 = vmul.f32 %v6730_v20, %v267_v28  ;;  %v284_v8 = vmul.f32 %v6731_v21, %v267_v28  ;;  %v6732_v17 = vmov %v6728_v7  ;;  %1360 = vrot.lane.b32.xlu1 %v4667_v30, %s6663_s6 }
  0xda   : > { %v290_v24 = vmul.f32 %v6732_v17, %v267_v28  ;;  %v275_v9 = vadd.f32 %v273_v14, %v247_v18  ;;  %v281_v15 = vadd.f32 %v279_v26, %v253_v41  ;;  %v287_v51 = vadd.f32 %v285_v53, %v259_v22  ;;  %1358 = vrot.lane.b32.xlu0 %v4678_v13, %s6663_s6 }
  0xdb   : > { %v293_v12 = vadd.f32 %v291_v19, %v265_v50  ;;  %v274_v54 = vadd.f32 %v272_v39, %v246_v34  ;;  %v280_v7 = vadd.f32 %v278_v38, %v252_v40  ;;  %v286_v36 = vadd.f32 %v284_v8, %v258_v23  ;;  %v353_v40 = vpop.permute.xlu1 %352  ;;  %v351_v23 = vpop.permute.xlu0 %350 }
  0xdc   : > { %v292_v58 = vadd.f32 %v290_v24, %v264_v31  ;;  %v303_v28 = vadd.f32 %v4089_v42, %v275_v9  ;;  %v309_v18 = vadd.f32 %v4092_v43, %v281_v15  ;;  %v315_v53 = vadd.f32 %v4095_v44, %v287_v51 }
  0xdd   : > { %v321_v41 = vadd.f32 %v4109_v46, %v293_v12  ;;  %v302_v22 = vadd.f32 %v4098_v45, %v274_v54  ;;  %v308_v50 = vadd.f32 %v4112_v47, %v280_v7  ;;  %v314_v34 = vadd.f32 %v4155_v0, %v286_v36  ;;  %1388 = vrot.lane.b32.xlu1 %v4667_v30, %s6673_s17 }
  0xde   : > { %v320_v42 = vadd.f32 %v4158_v1, %v292_v58  ;;  %v6737_v43 = vstv %s6733_s13  ;;  %v6738_v35 = vstv %s6734_s23  ;;  %v6739_v14 = vstv %s6735_s9  ;;  %s6757_s13 = sld [smem:[#allocation43_spill]]  ;;  %s6758_s23 = sld [smem:[#allocation44_spill]]  ;;  %1386 = vrot.lane.b32.xlu0 %v4678_v13, %s6673_s17 }
  0xdf   : > { %v329_v31 = vmul.f32 %v6737_v43, %v325_v25  ;;  %v335_v44 = vmul.f32 %v6738_v35, %v325_v25  ;;  %v341_v27 = vmul.f32 %v6739_v14, %v325_v25  ;;  %v6740_v46 = vstv %s6736_s0  ;;  %v379_v51 = vpop.permute.xlu0 %378  ;;  %s6759_s9 = sld [smem:[#allocation45_spill]]  ;;  %s6760_s0 = sld [smem:[#allocation46_spill]] }
  0xe0   : > { %v347_v26 = vmul.f32 %v6740_v46, %v325_v25  ;;  %v6741_v19 = vmov %v6737_v43  ;;  %v6742_v39 = vmov %v6738_v35  ;;  %v6744_v47 = vmov %v6739_v14 }
  0xe1   : > { %v328_v16 = vmul.f32 %v6741_v19, %v323_v59  ;;  %v334_v45 = vmul.f32 %v6742_v39, %v323_v59  ;;  %v340_v0 = vmul.f32 %v6744_v47, %v323_v59  ;;  %v6746_v20 = vmov %v6740_v46  ;;  %v4753_v46 = vld [vmem:[%s6666_s18 + $0x24] sm:$0xff] }
  0xe2   : > { %v346_v1 = vmul.f32 %v6746_v20, %v323_v59  ;;  %v331_v38 = vadd.f32 %v329_v31, %v303_v28  ;;  %v337_v21 = vadd.f32 %v335_v44, %v309_v18  ;;  %v343_v8 = vadd.f32 %v341_v27, %v315_v53  ;;  %v381_v59 = vpop.permute.xlu1 %380  ;;  %1444 = vrot.lane.b32.xlu1 %v4753_v46, %s6676_s5 }
  0xe3   : > { %v349_v17 = vadd.f32 %v347_v26, %v321_v41  ;;  %v330_v24 = vadd.f32 %v328_v16, %v302_v22  ;;  %v336_v25 = vadd.f32 %v334_v45, %v308_v50  ;;  %v342_v9 = vadd.f32 %v340_v0, %v314_v34  ;;  %v407_v39 = vpop.permute.xlu0 %406  ;;  %v4756_v45 = vld [vmem:[%s6666_s18 + $0x1c] sm:$0xff] }
  0xe4   : > { %v348_v15 = vadd.f32 %v346_v1, %v320_v42  ;;  %v6749_v12 = vstv %s6743_s4  ;;  %v6750_v7 = vstv %s6745_s12  ;;  %v6751_v58 = vstv %s6747_s25  ;;  %s6767_s4 = sld [smem:[#allocation47_spill]]  ;;  %s6769_s12 = sld [smem:[#allocation48_spill]]  ;;  %1442 = vrot.lane.b32.xlu0 %v4756_v45, %s6676_s5 }
  0xe5   : > { %v357_v54 = vmul.f32 %v6749_v12, %v353_v40  ;;  %v363_v36 = vmul.f32 %v6750_v7, %v353_v40  ;;  %v369_v28 = vmul.f32 %v6751_v58, %v353_v40  ;;  %v6752_v18 = vstv %s6748_s20  ;;  %s6771_s25 = sld [smem:[#allocation49_spill]]  ;;  %s6772_s20 = sld [smem:[#allocation50_spill]] }
  0xe6   : > { %v375_v53 = vmul.f32 %v6752_v18, %v353_v40  ;;  %v6753_v43 = vmov %v6749_v12  ;;  %v6754_v31 = vmov %v6750_v7  ;;  %v6755_v44 = vmov %v6751_v58  ;;  %v409_v30 = vpop.permute.xlu1 %408  ;;  %1472 = vrot.lane.b32.xlu1 %v4753_v46, %s6653_s21 }
  0xe7   : > { %v356_v41 = vmul.f32 %v6753_v43, %v351_v23  ;;  %v362_v35 = vmul.f32 %v6754_v31, %v351_v23  ;;  %v368_v22 = vmul.f32 %v6755_v44, %v351_v23  ;;  %v6756_v50 = vmov %v6752_v18  ;;  %v463_v31 = vpop.permute.xlu0 %462 }
  0xe8   : > { %v374_v34 = vmul.f32 %v6756_v50, %v351_v23  ;;  %v359_v42 = vadd.f32 %v357_v54, %v331_v38  ;;  %v365_v14 = vadd.f32 %v363_v36, %v337_v21  ;;  %v371_v40 = vadd.f32 %v369_v28, %v343_v8  ;;  %1470 = vrot.lane.b32.xlu0 %v4756_v45, %s6653_s21 }
  0xe9   : > { %v377_v27 = vadd.f32 %v375_v53, %v349_v17  ;;  %v358_v23 = vadd.f32 %v356_v41, %v330_v24  ;;  %v364_v26 = vadd.f32 %v362_v35, %v336_v25  ;;  %v370_v19 = vadd.f32 %v368_v22, %v342_v9 }
  0xea   : > { %v376_v16 = vadd.f32 %v374_v34, %v348_v15  ;;  %v6761_v47 = vstv %s6757_s13  ;;  %v6762_v20 = vstv %s6758_s23  ;;  %v6763_v38 = vstv %s6759_s9  ;;  %s6781_s13 = sld [smem:[#allocation53_spill]]  ;;  %s6782_s23 = sld [smem:[#allocation54_spill]]  ;;  %1500 = vrot.lane.b32.xlu1 %v4753_v46, %s6663_s6 }
  0xeb   : > { %v385_v0 = vmul.f32 %v6761_v47, %v381_v59  ;;  %v391_v1 = vmul.f32 %v6762_v20, %v381_v59  ;;  %v397_v21 = vmul.f32 %v6763_v38, %v381_v59  ;;  %v6764_v8 = vstv %s6760_s0  ;;  %s6783_s9 = sld [smem:[#allocation55_spill]]  ;;  %s6784_s0 = sld [smem:[#allocation56_spill]] }
  0xec   : > { %v403_v17 = vmul.f32 %v6764_v8, %v381_v59  ;;  %v6765_v13 = vmov %v6761_v47  ;;  %v6766_v54 = vmov %v6762_v20  ;;  %v6768_v25 = vmov %v6763_v38  ;;  %1498 = vrot.lane.b32.xlu0 %v4756_v45, %s6663_s6 }
  0xed   : > { %v384_v12 = vmul.f32 %v6765_v13, %v379_v51  ;;  %v390_v24 = vmul.f32 %v6766_v54, %v379_v51  ;;  %v396_v9 = vmul.f32 %v6768_v25, %v379_v51  ;;  %v6770_v15 = vmov %v6764_v8 }
  0xee   : > { %v402_v7 = vmul.f32 %v6770_v15, %v379_v51  ;;  %v387_v36 = vadd.f32 %v385_v0, %v359_v42  ;;  %v393_v58 = vadd.f32 %v391_v1, %v365_v14  ;;  %v399_v59 = vadd.f32 %v397_v21, %v371_v40  ;;  %v465_v51 = vpop.permute.xlu1 %464  ;;  %1528 = vrot.lane.b32.xlu1 %v4753_v46, %s6673_s17 }
  0xef   : > { %v405_v28 = vadd.f32 %v403_v17, %v377_v27  ;;  %v386_v18 = vadd.f32 %v384_v12, %v358_v23  ;;  %v392_v53 = vadd.f32 %v390_v24, %v364_v26  ;;  %v398_v43 = vadd.f32 %v396_v9, %v370_v19 }
  0xf0   : > { %v404_v41 = vadd.f32 %v402_v7, %v376_v16  ;;  %v6773_v35 = vstv %s6767_s4  ;;  %v6774_v22 = vstv %s6769_s12  ;;  %v6775_v34 = vstv %s6771_s25  ;;  %s6790_s4 = sld [smem:[#allocation57_spill]]  ;;  %s6792_s12 = sld [smem:[#allocation58_spill]]  ;;  %1526 = vrot.lane.b32.xlu0 %v4756_v45, %s6673_s17 }
  0xf1   : > { %v413_v44 = vmul.f32 %v6773_v35, %v409_v30  ;;  %v419_v50 = vmul.f32 %v6774_v22, %v409_v30  ;;  %v425_v42 = vmul.f32 %v6775_v34, %v409_v30  ;;  %v6776_v14 = vstv %s6772_s20  ;;  %s6794_s25 = sld [smem:[#allocation59_spill]]  ;;  %s6796_s20 = sld [smem:[#allocation60_spill]] }
  0xf2   : > { %v431_v47 = vmul.f32 %v6776_v14, %v409_v30  ;;  %v6777_v40 = vmov %v6773_v35  ;;  %v6778_v27 = vmov %v6774_v22  ;;  %v6779_v1 = vmov %v6775_v34  ;;  %v493_v54 = vpop.permute.xlu1 %492 }
  0xf3   : > { %v412_v0 = vmul.f32 %v6777_v40, %v407_v39  ;;  %v418_v20 = vmul.f32 %v6778_v27, %v407_v39  ;;  %v424_v38 = vmul.f32 %v6779_v1, %v407_v39  ;;  %v6780_v23 = vmov %v6776_v14 }
  0xf4   : > { %v430_v26 = vmul.f32 %v6780_v23, %v407_v39  ;;  %v415_v19 = vadd.f32 %v413_v44, %v387_v36  ;;  %v421_v16 = vadd.f32 %v419_v50, %v393_v58  ;;  %v427_v21 = vadd.f32 %v425_v42, %v399_v59  ;;  %v491_v39 = vpop.permute.xlu0 %490 }
  0xf5   : > { %v433_v8 = vadd.f32 %v431_v47, %v405_v28  ;;  %v414_v30 = vadd.f32 %v412_v0, %v386_v18  ;;  %v420_v17 = vadd.f32 %v418_v20, %v392_v53  ;;  %v426_v13 = vadd.f32 %v424_v38, %v398_v43 }
  0xf6   : > { %v432_v12 = vadd.f32 %v430_v26, %v404_v41  ;;  %v443_v24 = vadd.f32 %v4175_v3, %v415_v19  ;;  %v449_v25 = vadd.f32 %v4178_v32, %v421_v16  ;;  %v455_v9 = vadd.f32 %v4181_v33, %v427_v21  ;;  %v521_v50 = vpop.permute.xlu1 %520 }
  0xf7   : > { %v461_v15 = vadd.f32 %v4203_v61, %v433_v8  ;;  %v442_v7 = vadd.f32 %v4184_v37, %v414_v30  ;;  %v448_v36 = vadd.f32 %v4206_v11, %v420_v17  ;;  %v454_v58 = vadd.f32 %v4243_v57, %v426_v13  ;;  %v4839_v8 = vld [vmem:[%s6666_s18 + $0x38] sm:$0xff] }
  0xf8   : > { %v460_v59 = vadd.f32 %v4246_v56, %v432_v12  ;;  %v6785_v3 = vstv %s6781_s13  ;;  %v6786_v18 = vstv %s6782_s23  ;;  %v6787_v53 = vstv %s6783_s9  ;;  %v519_v34 = vpop.permute.xlu0 %518  ;;  %s6803_s13 = sld [smem:[#allocation61_spill]]  ;;  %s6805_s23 = sld [smem:[#allocation62_spill]]  ;;  %1584 = vrot.lane.b32.xlu1 %v4839_v8, %s6676_s5 }
  0xf9   : > { %v469_v28 = vmul.f32 %v6785_v3, %v465_v51  ;;  %v475_v32 = vmul.f32 %v6786_v18, %v465_v51  ;;  %v481_v43 = vmul.f32 %v6787_v53, %v465_v51  ;;  %v6788_v33 = vstv %s6784_s0  ;;  %s6807_s9 = sld [smem:[#allocation63_spill]]  ;;  %s6808_s0 = sld [smem:[#allocation64_spill]] }
  0xfa   : > { %v487_v41 = vmul.f32 %v6788_v33, %v465_v51  ;;  %v6789_v37 = vmov %v6785_v3  ;;  %v6791_v57 = vmov %v6786_v18  ;;  %v6793_v61 = vmov %v6787_v53 }
  0xfb   : > { %v468_v11 = vmul.f32 %v6789_v37, %v463_v31  ;;  %v474_v56 = vmul.f32 %v6791_v57, %v463_v31  ;;  %v480_v35 = vmul.f32 %v6793_v61, %v463_v31  ;;  %v6795_v44 = vmov %v6788_v33 }
  0xfc   : > { %v486_v22 = vmul.f32 %v6795_v44, %v463_v31  ;;  %v471_v51 = vadd.f32 %v469_v28, %v443_v24  ;;  %v477_v42 = vadd.f32 %v475_v32, %v449_v25  ;;  %v483_v14 = vadd.f32 %v481_v43, %v455_v9  ;;  %1612 = vrot.lane.b32.xlu1 %v4839_v8, %s6653_s21 }
  0xfd   : > { %v489_v47 = vadd.f32 %v487_v41, %v461_v15  ;;  %v470_v40 = vadd.f32 %v468_v11, %v442_v7  ;;  %v476_v0 = vadd.f32 %v474_v56, %v448_v36  ;;  %v482_v27 = vadd.f32 %v480_v35, %v454_v58  ;;  %v549_v15 = vpop.permute.xlu1 %548  ;;  %v547_v7 = vpop.permute.xlu0 %546 }
  0xfe   : > { %v488_v20 = vadd.f32 %v486_v22, %v460_v59  ;;  %v6797_v31 = vstv %s6790_s4  ;;  %v6798_v38 = vstv %s6792_s12  ;;  %v6799_v26 = vstv %s6794_s25  ;;  %s6814_s4 = sld [smem:[#allocation65_spill]]  ;;  %s6816_s12 = sld [smem:[#allocation66_spill]] }
  0xff   : > { %v497_v1 = vmul.f32 %v6797_v31, %v493_v54  ;;  %v503_v23 = vmul.f32 %v6798_v38, %v493_v54  ;;  %v509_v19 = vmul.f32 %v6799_v26, %v493_v54  ;;  %v6800_v16 = vstv %s6796_s20  ;;  %s6818_s25 = sld [smem:[#allocation67_spill]]  ;;  %s6820_s20 = sld [smem:[#allocation68_spill]] }
 0x100   : > { %v515_v21 = vmul.f32 %v6800_v16, %v493_v54  ;;  %v6801_v30 = vmov %v6797_v31  ;;  %v6802_v13 = vmov %v6798_v38  ;;  %v6804_v24 = vmov %v6799_v26  ;;  %v4850_v54 = vld [vmem:[%s6666_s18 + $0x30] sm:$0xff]  ;;  %1640 = vrot.lane.b32.xlu1 %v4839_v8, %s6663_s6 }
 0x101   : > { %v496_v17 = vmul.f32 %v6801_v30, %v491_v39  ;;  %v502_v12 = vmul.f32 %v6802_v13, %v491_v39  ;;  %v508_v46 = vmul.f32 %v6804_v24, %v491_v39  ;;  %v6806_v25 = vmov %v6800_v16  ;;  %1582 = vrot.lane.b32.xlu0 %v4850_v54, %s6676_s5 }
 0x102   : > { %v514_v9 = vmul.f32 %v6806_v25, %v491_v39  ;;  %v499_v45 = vadd.f32 %v497_v1, %v471_v51  ;;  %v505_v36 = vadd.f32 %v503_v23, %v477_v42  ;;  %v511_v58 = vadd.f32 %v509_v19, %v483_v14 }
 0x103   : > { %v517_v59 = vadd.f32 %v515_v21, %v489_v47  ;;  %v498_v3 = vadd.f32 %v496_v17, %v470_v40  ;;  %v504_v28 = vadd.f32 %v502_v12, %v476_v0  ;;  %v510_v18 = vadd.f32 %v508_v46, %v482_v27  ;;  %v605_v47 = vpop.permute.xlu1 %604  ;;  %v603_v40 = vpop.permute.xlu0 %602 }
 0x104   : > { %v516_v32 = vadd.f32 %v514_v9, %v488_v20  ;;  %v6809_v39 = vstv %s6803_s13  ;;  %v6810_v43 = vstv %s6805_s23  ;;  %v6811_v41 = vstv %s6807_s9  ;;  %s6829_s13 = sld [smem:[#allocation34_spill]]  ;;  %s6830_s23 = sld [smem:[#allocation69_spill]]  ;;  %1668 = vrot.lane.b32.xlu1 %v4839_v8, %s6673_s17 }
 0x105   : > { %v525_v53 = vmul.f32 %v6809_v39, %v521_v50  ;;  %v531_v33 = vmul.f32 %v6810_v43, %v521_v50  ;;  %v537_v37 = vmul.f32 %v6811_v41, %v521_v50  ;;  %v6812_v11 = vstv %s6808_s0  ;;  %1610 = vrot.lane.b32.xlu0 %v4850_v54, %s6653_s21  ;;  %s6831_s9 = sld [smem:[#allocation70_spill]]  ;;  %s6832_s0 = sld [smem:[#allocation71_spill]] }
 0x106   : > { %v543_v57 = vmul.f32 %v6812_v11, %v521_v50  ;;  %v6813_v56 = vmov %v6809_v39  ;;  %v6815_v35 = vmov %v6810_v43  ;;  %v6817_v22 = vmov %v6811_v41 }
 0x107   : > { %v524_v61 = vmul.f32 %v6813_v56, %v519_v34  ;;  %v530_v44 = vmul.f32 %v6815_v35, %v519_v34  ;;  %v536_v51 = vmul.f32 %v6817_v22, %v519_v34  ;;  %v6819_v42 = vmov %v6812_v11 }
 0x108   : > { %v542_v14 = vmul.f32 %v6819_v42, %v519_v34  ;;  %v527_v50 = vadd.f32 %v525_v53, %v499_v45  ;;  %v533_v0 = vadd.f32 %v531_v33, %v505_v36  ;;  %v539_v27 = vadd.f32 %v537_v37, %v511_v58 }
 0x109   : > { %v545_v20 = vadd.f32 %v543_v57, %v517_v59  ;;  %v526_v31 = vadd.f32 %v524_v61, %v498_v3  ;;  %v532_v1 = vadd.f32 %v530_v44, %v504_v28  ;;  %v538_v38 = vadd.f32 %v536_v51, %v510_v18  ;;  %v633_v59 = vpop.permute.xlu1 %632  ;;  %v631_v3 = vpop.permute.xlu0 %630  ;;  %1638 = vrot.lane.b32.xlu0 %v4850_v54, %s6663_s6 }
 0x10a   : > { %v544_v23 = vadd.f32 %v542_v14, %v516_v32  ;;  %v6821_v26 = vstv %s6814_s4  ;;  %v6822_v34 = vstv %s6816_s12  ;;  %v6823_v21 = vstv %s6818_s25  ;;  %s6841_s4 = sld [smem:[#allocation72_spill]]  ;;  %s6842_s12 = sld [smem:[#allocation73_spill]] }
 0x10b   : > { %v553_v19 = vmul.f32 %v6821_v26, %v549_v15  ;;  %v559_v16 = vmul.f32 %v6822_v34, %v549_v15  ;;  %v565_v30 = vmul.f32 %v6823_v21, %v549_v15  ;;  %v6824_v17 = vstv %s6820_s20  ;;  %s6843_s25 = sld [smem:[#allocation74_spill]]  ;;  %s6844_s20 = sld [smem:[#allocation75_spill]] }
 0x10c   : > { %v571_v13 = vmul.f32 %v6824_v17, %v549_v15  ;;  %v6825_v12 = vmov %v6821_v26  ;;  %v6826_v46 = vmov %v6822_v34  ;;  %v6827_v9 = vmov %v6823_v21  ;;  %v4925_v26 = vld [vmem:[%s6666_s18 + $0x39] sm:$0xff] }
 0x10d   : > { %v552_v24 = vmul.f32 %v6825_v12, %v547_v7  ;;  %v558_v25 = vmul.f32 %v6826_v46, %v547_v7  ;;  %v564_v45 = vmul.f32 %v6827_v9, %v547_v7  ;;  %v6828_v36 = vmov %v6824_v17  ;;  %v661_v35 = vpop.permute.xlu1 %660  ;;  %1666 = vrot.lane.b32.xlu0 %v4850_v54, %s6673_s17 }
 0x10e   : > { %v570_v58 = vmul.f32 %v6828_v36, %v547_v7  ;;  %v555_v28 = vadd.f32 %v553_v19, %v527_v50  ;;  %v561_v18 = vadd.f32 %v559_v16, %v533_v0  ;;  %v567_v32 = vadd.f32 %v565_v30, %v539_v27  ;;  %v4928_v30 = vld [vmem:[%s6666_s18 + $0x31] sm:$0xff]  ;;  %1724 = vrot.lane.b32.xlu1 %v4925_v26, %s6676_s5 }
 0x10f   : > { %v573_v39 = vadd.f32 %v571_v13, %v545_v20  ;;  %v554_v53 = vadd.f32 %v552_v24, %v526_v31  ;;  %v560_v15 = vadd.f32 %v558_v25, %v532_v1  ;;  %v566_v43 = vadd.f32 %v564_v45, %v538_v38 }
 0x110   : > { %v572_v33 = vadd.f32 %v570_v58, %v544_v23  ;;  %v583_v7 = vadd.f32 %v4255_v55, %v555_v28  ;;  %v589_v41 = vadd.f32 %v4258_v60, %v561_v18  ;;  %v595_v37 = vadd.f32 %v4261_v63, %v567_v32  ;;  %v659_v60 = vpop.permute.xlu0 %658 }
 0x111   : > { %v601_v11 = vadd.f32 %v4264_v5, %v573_v39  ;;  %v582_v57 = vadd.f32 %v4271_v29, %v554_v53  ;;  %v588_v56 = vadd.f32 %v4274_v2, %v560_v15  ;;  %v594_v61 = vadd.f32 %v4295_v62, %v566_v43  ;;  %v689_v8 = vpop.permute.xlu1 %688  ;;  %1722 = vrot.lane.b32.xlu0 %v4928_v30, %s6676_s5 }
 0x112   : > { %v600_v55 = vadd.f32 %v4298_v52, %v572_v33  ;;  %v6833_v44 = vstv %s6829_s13  ;;  %v6834_v63 = vstv %s6830_s23  ;;  %v6835_v42 = vstv %s6831_s9  ;;  %s6851_s13 = sld [smem:[#allocation76_spill]]  ;;  %s6853_s23 = sld [smem:[#allocation77_spill]]  ;;  %1752 = vrot.lane.b32.xlu1 %v4925_v26, %s6653_s21 }
 0x113   : > { %v609_v22 = vmul.f32 %v6833_v44, %v605_v47  ;;  %v615_v51 = vmul.f32 %v6834_v63, %v605_v47  ;;  %v621_v5 = vmul.f32 %v6835_v42, %v605_v47  ;;  %v6836_v14 = vstv %s6832_s0  ;;  %s6855_s9 = sld [smem:[#allocation78_spill]]  ;;  %s6856_s0 = sld [smem:[#allocation79_spill]] }
 0x114   : > { %v627_v50 = vmul.f32 %v6836_v14, %v605_v47  ;;  %v6837_v0 = vmov %v6833_v44  ;;  %v6838_v29 = vmov %v6834_v63  ;;  %v6839_v2 = vmov %v6835_v42  ;;  %v687_v21 = vpop.permute.xlu0 %686 }
 0x115   : > { %v608_v27 = vmul.f32 %v6837_v0, %v603_v40  ;;  %v614_v20 = vmul.f32 %v6838_v29, %v603_v40  ;;  %v620_v62 = vmul.f32 %v6839_v2, %v603_v40  ;;  %v6840_v31 = vmov %v6836_v14  ;;  %1750 = vrot.lane.b32.xlu0 %v4928_v30, %s6653_s21 }
 0x116   : > { %v626_v52 = vmul.f32 %v6840_v31, %v603_v40  ;;  %v611_v1 = vadd.f32 %v609_v22, %v583_v7  ;;  %v617_v38 = vadd.f32 %v615_v51, %v589_v41  ;;  %v623_v47 = vadd.f32 %v621_v5, %v595_v37  ;;  %1780 = vrot.lane.b32.xlu1 %v4925_v26, %s6663_s6 }
 0x117   : > { %v629_v23 = vadd.f32 %v627_v50, %v601_v11  ;;  %v610_v40 = vadd.f32 %v608_v27, %v582_v57  ;;  %v616_v19 = vadd.f32 %v614_v20, %v588_v56  ;;  %v622_v34 = vadd.f32 %v620_v62, %v594_v61 }
 0x118   : > { %v628_v16 = vadd.f32 %v626_v52, %v600_v55  ;;  %v6845_v17 = vstv %s6841_s4  ;;  %v6846_v12 = vstv %s6842_s12  ;;  %v6847_v46 = vstv %s6843_s25  ;;  %v743_v57 = vpop.permute.xlu0 %742  ;;  %s6863_s4 = sld [smem:[#allocation51_spill]]  ;;  %s6865_s12 = sld [smem:[#allocation52_spill]] }
 0x119   : > { %v637_v13 = vmul.f32 %v6845_v17, %v633_v59  ;;  %v643_v24 = vmul.f32 %v6846_v12, %v633_v59  ;;  %v649_v25 = vmul.f32 %v6847_v46, %v633_v59  ;;  %v6848_v9 = vstv %s6844_s20  ;;  %s6867_s25 = sld [smem:[#allocation80_spill]]  ;;  %s6868_s20 = sld [smem:[#allocation81_spill]]  ;;  %1778 = vrot.lane.b32.xlu0 %v4928_v30, %s6663_s6 }
 0x11a   : > { %v655_v45 = vmul.f32 %v6848_v9, %v633_v59  ;;  %v6849_v54 = vmov %v6845_v17  ;;  %v6850_v58 = vmov %v6846_v12  ;;  %v6852_v18 = vmov %v6847_v46  ;;  %1808 = vrot.lane.b32.xlu1 %v4925_v26, %s6673_s17 }
 0x11b   : > { %v636_v36 = vmul.f32 %v6849_v54, %v631_v3  ;;  %v642_v28 = vmul.f32 %v6850_v58, %v631_v3  ;;  %v648_v32 = vmul.f32 %v6852_v18, %v631_v3  ;;  %v6854_v39 = vmov %v6848_v9 }
 0x11c   : > { %v654_v53 = vmul.f32 %v6854_v39, %v631_v3  ;;  %v639_v15 = vadd.f32 %v637_v13, %v611_v1  ;;  %v645_v43 = vadd.f32 %v643_v24, %v617_v38  ;;  %v651_v59 = vadd.f32 %v649_v25, %v623_v47  ;;  %v745_v3 = vpop.permute.xlu1 %744 }
 0x11d   : > { %v657_v33 = vadd.f32 %v655_v45, %v629_v23  ;;  %v638_v7 = vadd.f32 %v636_v36, %v610_v40  ;;  %v644_v41 = vadd.f32 %v642_v28, %v616_v19  ;;  %v650_v37 = vadd.f32 %v648_v32, %v622_v34  ;;  %v771_v40 = vpop.permute.xlu0 %770  ;;  %1806 = vrot.lane.b32.xlu0 %v4928_v30, %s6673_s17 }
 0x11e   : > { %v656_v11 = vadd.f32 %v654_v53, %v628_v16  ;;  %v6857_v56 = vstv %s6851_s13  ;;  %v6858_v55 = vstv %s6853_s23  ;;  %v6859_v22 = vstv %s6855_s9  ;;  %s6877_s13 = sld [smem:[#allocation82_spill]]  ;;  %s6878_s23 = sld [smem:[#allocation83_spill]] }
 0x11f   : > { %v665_v61 = vmul.f32 %v6857_v56, %v661_v35  ;;  %v671_v44 = vmul.f32 %v6858_v55, %v661_v35  ;;  %v677_v63 = vmul.f32 %v6859_v22, %v661_v35  ;;  %v6860_v51 = vstv %s6856_s0  ;;  %s6879_s9 = sld [smem:[#allocation84_spill]]  ;;  %s6880_s0 = sld [smem:[#allocation85_spill]] }
 0x120   : > { %v683_v42 = vmul.f32 %v6860_v51, %v661_v35  ;;  %v6861_v5 = vmov %v6857_v56  ;;  %v6862_v50 = vmov %v6858_v55  ;;  %v6864_v27 = vmov %v6859_v22  ;;  %v6881_v55 = vld [vmem:[#allocation105_spill] sm:$0xff]  ;;  %v6882_v22 = vld [vmem:[#allocation108_spill] sm:$0xff] }
 0x121   : > { %v664_v14 = vmul.f32 %v6861_v5, %v659_v60  ;;  %v670_v0 = vmul.f32 %v6862_v50, %v659_v60  ;;  %v676_v29 = vmul.f32 %v6864_v27, %v659_v60  ;;  %v6866_v20 = vmov %v6860_v51  ;;  %v6883_v51 = vld [vmem:[#allocation109_spill] sm:$0xff] }
 0x122   : > { %v682_v2 = vmul.f32 %v6866_v20, %v659_v60  ;;  %v667_v62 = vadd.f32 %v665_v61, %v639_v15  ;;  %v673_v31 = vadd.f32 %v671_v44, %v645_v43  ;;  %v679_v35 = vadd.f32 %v677_v63, %v651_v59  ;;  %v773_v60 = vpop.permute.xlu1 %772 }
 0x123   : > { %v685_v52 = vadd.f32 %v683_v42, %v657_v33  ;;  %v666_v1 = vadd.f32 %v664_v14, %v638_v7  ;;  %v672_v38 = vadd.f32 %v670_v0, %v644_v41  ;;  %v678_v47 = vadd.f32 %v676_v29, %v650_v37 }
 0x124   : > { %v684_v23 = vadd.f32 %v682_v2, %v656_v11  ;;  %v6869_v19 = vstv %s6863_s4  ;;  %v6870_v16 = vstv %s6865_s12  ;;  %v6871_v13 = vstv %s6867_s25  ;;  %s6890_s4 = sld [smem:[#allocation86_spill]]  ;;  %s6892_s12 = sld [smem:[#allocation87_spill]] }
 0x125   : > { %v693_v34 = vmul.f32 %v6869_v19, %v689_v8  ;;  %v699_v17 = vmul.f32 %v6870_v16, %v689_v8  ;;  %v705_v12 = vmul.f32 %v6871_v13, %v689_v8  ;;  %v6872_v24 = vstv %s6868_s20  ;;  %s6894_s25 = sld [smem:[#allocation88_spill]]  ;;  %s6895_s20 = sld [smem:[#allocation89_spill]] }
 0x126   : > { %v711_v46 = vmul.f32 %v6872_v24, %v689_v8  ;;  %v6873_v25 = vmov %v6869_v19  ;;  %v6874_v45 = vmov %v6870_v16  ;;  %v6875_v36 = vmov %v6871_v13  ;;  %v801_v7 = vpop.permute.xlu1 %800 }
 0x127   : > { %v692_v9 = vmul.f32 %v6873_v25, %v687_v21  ;;  %v698_v54 = vmul.f32 %v6874_v45, %v687_v21  ;;  %v704_v58 = vmul.f32 %v6875_v36, %v687_v21  ;;  %v6876_v28 = vmov %v6872_v24 }
 0x128   : > { %v710_v18 = vmul.f32 %v6876_v28, %v687_v21  ;;  %v695_v32 = vadd.f32 %v693_v34, %v667_v62  ;;  %v701_v39 = vadd.f32 %v699_v17, %v673_v31  ;;  %v707_v53 = vadd.f32 %v705_v12, %v679_v35  ;;  %v799_v21 = vpop.permute.xlu0 %798 }
 0x129   : > { %v713_v15 = vadd.f32 %v711_v46, %v685_v52  ;;  %v694_v8 = vadd.f32 %v692_v9, %v666_v1  ;;  %v700_v43 = vadd.f32 %v698_v54, %v672_v38  ;;  %v706_v59 = vadd.f32 %v704_v58, %v678_v47 }
 0x12a   : > { %v712_v33 = vadd.f32 %v710_v18, %v684_v23  ;;  %v723_v41 = vadd.f32 %v4326_v48, %v695_v32  ;;  %v729_v37 = vadd.f32 %v4338_v49, %v701_v39  ;;  %v735_v11 = vadd.f32 %v4341_v6, %v707_v53  ;;  %v829_v52 = vpop.permute.xlu1 %828 }
 0x12b   : > { %v741_v56 = vadd.f32 %v4344_v4, %v713_v15  ;;  %v722_v61 = vadd.f32 %v4357_v10, %v694_v8  ;;  %v728_v44 = vadd.f32 %v6881_v55, %v700_v43  ;;  %v734_v63 = vadd.f32 %v6882_v22, %v706_v59  ;;  %v5011_v10 = vld [vmem:[%s6666_s18 + $0x3a] sm:$0xff] }
 0x12c   : > { %v740_v42 = vadd.f32 %v6883_v51, %v712_v33  ;;  %v6884_v48 = vstv %s6877_s13  ;;  %v6885_v5 = vstv %s6878_s23  ;;  %v6886_v6 = vstv %s6879_s9  ;;  %v827_v1 = vpop.permute.xlu0 %826  ;;  %1864 = vrot.lane.b32.xlu1 %v5011_v10, %s6676_s5  ;;  %s6901_s13 = sld [smem:[#allocation90_spill]]  ;;  %s6903_s23 = sld [smem:[#allocation91_spill]] }
 0x12d   : > { %v749_v49 = vmul.f32 %v6884_v48, %v745_v3  ;;  %v755_v14 = vmul.f32 %v6885_v5, %v745_v3  ;;  %v761_v50 = vmul.f32 %v6886_v6, %v745_v3  ;;  %v6887_v0 = vstv %s6880_s0  ;;  %s6905_s9 = sld [smem:[#allocation92_spill]]  ;;  %s6907_s0 = sld [smem:[#allocation93_spill]] }
 0x12e   : > { %v767_v4 = vmul.f32 %v6887_v0, %v745_v3  ;;  %v6888_v27 = vmov %v6884_v48  ;;  %v6889_v20 = vmov %v6885_v5  ;;  %v6891_v62 = vmov %v6886_v6  ;;  %v5022_v3 = vld [vmem:[%s6666_s18 + $0x32] sm:$0xff]  ;;  %v5044_v15 = vpop.permute.xlu1 %884 }
 0x12f   : > { %v748_v29 = vmul.f32 %v6888_v27, %v743_v57  ;;  %v754_v2 = vmul.f32 %v6889_v20, %v743_v57  ;;  %v760_v26 = vmul.f32 %v6891_v62, %v743_v57  ;;  %v6893_v31 = vmov %v6887_v0  ;;  %1862 = vrot.lane.b32.xlu0 %v5022_v3, %s6676_s5 }
 0x130   : > { %v766_v35 = vmul.f32 %v6893_v31, %v743_v57  ;;  %v751_v30 = vadd.f32 %v749_v49, %v723_v41  ;;  %v757_v38 = vadd.f32 %v755_v14, %v729_v37  ;;  %v763_v47 = vadd.f32 %v761_v50, %v735_v11  ;;  %v5046_v8 = vpop.permute.xlu0 %882  ;;  %1892 = vrot.lane.b32.xlu1 %v5011_v10, %s6653_s21 }
 0x131   : > { %v769_v23 = vadd.f32 %v767_v4, %v741_v56  ;;  %v750_v19 = vadd.f32 %v748_v29, %v722_v61  ;;  %v756_v34 = vadd.f32 %v754_v2, %v728_v44  ;;  %v762_v16 = vadd.f32 %v760_v26, %v734_v63 }
 0x132   : > { %v768_v17 = vadd.f32 %v766_v35, %v740_v42  ;;  %v6896_v57 = vstv %s6890_s4  ;;  %v6897_v12 = vstv %s6892_s12  ;;  %v6898_v46 = vstv %s6894_s25  ;;  %s6913_s4 = sld [smem:[#allocation94_spill]]  ;;  %s6915_s12 = sld [smem:[#allocation95_spill]]  ;;  %v5068_v27 = vpop.permute.xlu1 %912 }
 0x133   : > { %v777_v13 = vmul.f32 %v6896_v57, %v773_v60  ;;  %v783_v24 = vmul.f32 %v6897_v12, %v773_v60  ;;  %v789_v25 = vmul.f32 %v6898_v46, %v773_v60  ;;  %v6899_v9 = vstv %s6895_s20  ;;  %1890 = vrot.lane.b32.xlu0 %v5022_v3, %s6653_s21  ;;  %s6917_s25 = sld [smem:[#allocation96_spill]]  ;;  %s6919_s20 = sld [smem:[#allocation97_spill]] }
 0x134   : > { %v795_v45 = vmul.f32 %v6899_v9, %v773_v60  ;;  %v6900_v54 = vmov %v6896_v57  ;;  %v6902_v58 = vmov %v6897_v12  ;;  %v6904_v18 = vmov %v6898_v46  ;;  %v5070_v29 = vpop.permute.xlu0 %910  ;;  %1920 = vrot.lane.b32.xlu1 %v5011_v10, %s6663_s6 }
 0x135   : > { %v776_v36 = vmul.f32 %v6900_v54, %v771_v40  ;;  %v782_v28 = vmul.f32 %v6902_v58, %v771_v40  ;;  %v788_v32 = vmul.f32 %v6904_v18, %v771_v40  ;;  %v6906_v39 = vmov %v6899_v9 }
 0x136   : > { %v794_v53 = vmul.f32 %v6906_v39, %v771_v40  ;;  %v779_v60 = vadd.f32 %v777_v13, %v751_v30  ;;  %v785_v43 = vadd.f32 %v783_v24, %v757_v38  ;;  %v791_v59 = vadd.f32 %v789_v25, %v763_v47  ;;  %v5092_v54 = vpop.permute.xlu1 %940 }
 0x137   : > { %v797_v33 = vadd.f32 %v795_v45, %v769_v23  ;;  %v778_v41 = vadd.f32 %v776_v36, %v750_v19  ;;  %v784_v37 = vadd.f32 %v782_v28, %v756_v34  ;;  %v790_v11 = vadd.f32 %v788_v32, %v762_v16  ;;  %1918 = vrot.lane.b32.xlu0 %v5022_v3, %s6663_s6 }
 0x138   : > { %v796_v56 = vadd.f32 %v794_v53, %v768_v17  ;;  %v6908_v40 = vstv %s6901_s13  ;;  %v6909_v55 = vstv %s6903_s23  ;;  %v6910_v22 = vstv %s6905_s9  ;;  %v5094_v36 = vpop.permute.xlu0 %938  ;;  %s6928_s13 = sld [smem:[#allocation98_spill]]  ;;  %s6929_s23 = sld [smem:[#allocation99_spill]]  ;;  %1948 = vrot.lane.b32.xlu1 %v5011_v10, %s6673_s17  ;;  %v6935_v10 = vld [vmem:[#allocation120_spill] sm:$0xff] }
 0x139   : > { %v805_v61 = vmul.f32 %v6908_v40, %v801_v7  ;;  %v811_v44 = vmul.f32 %v6909_v55, %v801_v7  ;;  %v817_v63 = vmul.f32 %v6910_v22, %v801_v7  ;;  %v6911_v51 = vstv %s6907_s0  ;;  %s6944_s9 = sld [smem:[#allocation100_spill]]  ;;  %s6946_s0 = sld [smem:[#allocation101_spill]] }
 0x13a   : > { %v823_v42 = vmul.f32 %v6911_v51, %v801_v7  ;;  %v6912_v48 = vmov %v6908_v40  ;;  %v6914_v5 = vmov %v6909_v55  ;;  %v6916_v6 = vmov %v6910_v22  ;;  %v5105_v40 = vld [vmem:[%s6666_s18 + $0x3b] sm:$0xff]  ;;  %v6936_v22 = vld [vmem:[#allocation127_spill] sm:$0xff] }
 0x13b   : > { %v804_v49 = vmul.f32 %v6912_v48, %v799_v21  ;;  %v810_v14 = vmul.f32 %v6914_v5, %v799_v21  ;;  %v816_v50 = vmul.f32 %v6916_v6, %v799_v21  ;;  %v6918_v0 = vmov %v6911_v51  ;;  %1946 = vrot.lane.b32.xlu0 %v5022_v3, %s6673_s17  ;;  %v6937_v51 = vld [vmem:[#allocation128_spill] sm:$0xff] }
 0x13c   : > { %v822_v4 = vmul.f32 %v6918_v0, %v799_v21  ;;  %v807_v7 = vadd.f32 %v805_v61, %v779_v60  ;;  %v813_v20 = vadd.f32 %v811_v44, %v785_v43  ;;  %v819_v2 = vadd.f32 %v817_v63, %v791_v59  ;;  %v6931_v59 = vld [vmem:[#allocation115_spill] sm:$0xff]  ;;  %v6934_v61 = vld [vmem:[#allocation119_spill] sm:$0xff]  ;;  %2004 = vrot.lane.b32.xlu1 %v5105_v40, %s6676_s5 }
 0x13d   : > { %v825_v62 = vadd.f32 %v823_v42, %v797_v33  ;;  %v806_v26 = vadd.f32 %v804_v49, %v778_v41  ;;  %v812_v31 = vadd.f32 %v810_v14, %v784_v37  ;;  %v818_v35 = vadd.f32 %v816_v50, %v790_v11  ;;  %v6932_v41 = vld [vmem:[#allocation116_spill] sm:$0xff]  ;;  %v6933_v11 = vld [vmem:[#allocation117_spill] sm:$0xff] }
 0x13e   : > { %v824_v30 = vadd.f32 %v822_v4, %v796_v56  ;;  %v6920_v21 = vstv %s6913_s4  ;;  %v6921_v47 = vstv %s6915_s12  ;;  %v6922_v19 = vstv %s6917_s25  ;;  %v5112_v48 = vld [vmem:[%s6666_s18 + $0x33] sm:$0xff]  ;;  %s6948_s4 = sld [smem:[#allocation102_spill]]  ;;  %s6965_s12 = sld [smem:[#allocation107_spill]] }
 0x13f   : > { %v833_v38 = vmul.f32 %v6920_v21, %v829_v52  ;;  %v839_v23 = vmul.f32 %v6921_v47, %v829_v52  ;;  %v845_v34 = vmul.f32 %v6922_v19, %v829_v52  ;;  %v6923_v16 = vstv %s6919_s20  ;;  %2002 = vrot.lane.b32.xlu0 %v5112_v48, %s6676_s5  ;;  %s6967_s25 = sld [smem:[#allocation110_spill]]  ;;  %s6969_s20 = sld [smem:[#allocation111_spill]] }
 0x140   : > { %v851_v17 = vmul.f32 %v6923_v16, %v829_v52  ;;  %v6924_v57 = vmov %v6920_v21  ;;  %v6925_v12 = vmov %v6921_v47  ;;  %v6926_v46 = vmov %v6922_v19  ;;  %2032 = vrot.lane.b32.xlu1 %v5105_v40, %s6653_s21 }
 0x141   : > { %v832_v13 = vmul.f32 %v6924_v57, %v827_v1  ;;  %v838_v24 = vmul.f32 %v6925_v12, %v827_v1  ;;  %v844_v25 = vmul.f32 %v6926_v46, %v827_v1  ;;  %v6927_v9 = vmov %v6923_v16 }
 0x142   : > { %v850_v45 = vmul.f32 %v6927_v9, %v827_v1  ;;  %v835_v58 = vadd.f32 %v833_v38, %v807_v7  ;;  %v841_v28 = vadd.f32 %v839_v23, %v813_v20  ;;  %v847_v18 = vadd.f32 %v845_v34, %v819_v2  ;;  %v6930_v1 = vld [vmem:[#allocation114_spill] sm:$0xff]  ;;  %v969_v7 = vpop.permute.xlu1 %968  ;;  %v967_v38 = vpop.permute.xlu0 %966 }
 0x143   : > { %v853_v52 = vadd.f32 %v851_v17, %v825_v62  ;;  %v834_v32 = vadd.f32 %v832_v13, %v806_v26  ;;  %v840_v39 = vadd.f32 %v838_v24, %v812_v31  ;;  %v846_v53 = vadd.f32 %v844_v25, %v818_v35  ;;  %2030 = vrot.lane.b32.xlu0 %v5112_v48, %s6653_s21 }
 0x144   : > { %v852_v60 = vadd.f32 %v850_v45, %v824_v30  ;;  %v863_v43 = vadd.f32 %v6930_v1, %v835_v58  ;;  %v869_v33 = vadd.f32 %v6931_v59, %v841_v28  ;;  %v875_v37 = vadd.f32 %v6932_v41, %v847_v18  ;;  %2060 = vrot.lane.b32.xlu1 %v5105_v40, %s6663_s6 }
 0x145   : > { %v881_v56 = vadd.f32 %v6933_v11, %v853_v52  ;;  %v862_v55 = vadd.f32 %v6934_v61, %v834_v32  ;;  %v868_v44 = vadd.f32 %v6935_v10, %v840_v39  ;;  %v874_v63 = vadd.f32 %v6936_v22, %v846_v53 }
 0x146   : > { %v880_v42 = vadd.f32 %v6937_v51, %v852_v60  ;;  %v6938_v49 = vstv %s6928_s13  ;;  %v6939_v14 = vstv %s6929_s23  ;;  %v6940_v3 = vstv %s4302_s2  ;;  %s6956_s2 = sld [smem:[#allocation103_spill]]  ;;  %s7007_s23 = sld [smem:[#allocation123_spill]] }
 0x147   : > { %v889_v5 = vmul.f32 %v6938_v49, %v5044_v15  ;;  %v895_v6 = vmul.f32 %v6939_v14, %v5044_v15  ;;  %v901_v50 = vmul.f32 %v6940_v3, %v5044_v15  ;;  %v6941_v0 = vstv %s4304_s7  ;;  %s6958_s7 = sld [smem:[#allocation104_spill]]  ;;  %2058 = vrot.lane.b32.xlu0 %v5112_v48, %s6663_s6  ;;  %s6993_s13 = sld [smem:[#allocation118_spill]] }
 0x148   : > { %v907_v4 = vmul.f32 %v6941_v0, %v5044_v15  ;;  %v6942_v20 = vmov %v6938_v49  ;;  %v6943_v62 = vmov %v6939_v14  ;;  %v6945_v31 = vmov %v6940_v3  ;;  %2088 = vrot.lane.b32.xlu1 %v5105_v40, %s6673_s17  ;;  %v6981_v40 = vld [vmem:[#allocation130_spill] sm:$0xff] }
 0x149   : > { %v888_v2 = vmul.f32 %v6942_v20, %v5046_v8  ;;  %v894_v26 = vmul.f32 %v6943_v62, %v5046_v8  ;;  %v900_v35 = vmul.f32 %v6945_v31, %v5046_v8  ;;  %v6947_v30 = vmov %v6941_v0 }
 0x14a   : > { %v906_v21 = vmul.f32 %v6947_v30, %v5046_v8  ;;  %v891_v15 = vadd.f32 %v889_v5, %v863_v43  ;;  %v897_v47 = vadd.f32 %v895_v6, %v869_v33  ;;  %v903_v23 = vadd.f32 %v901_v50, %v875_v37  ;;  %v1025_v33 = vpop.permute.xlu1 %1024 }
 0x14b   : > { %v909_v19 = vadd.f32 %v907_v4, %v881_v56  ;;  %v890_v34 = vadd.f32 %v888_v2, %v862_v55  ;;  %v896_v16 = vadd.f32 %v894_v26, %v868_v44  ;;  %v902_v17 = vadd.f32 %v900_v35, %v874_v63  ;;  %v1023_v56 = vpop.permute.xlu0 %1022  ;;  %2086 = vrot.lane.b32.xlu0 %v5112_v48, %s6673_s17 }
 0x14c   : > { %v908_v57 = vadd.f32 %v906_v21, %v880_v42  ;;  %v6949_v8 = vstv %s4310_s24  ;;  %v6950_v12 = vstv %s6944_s9  ;;  %v6951_v46 = vstv %s6946_s0  ;;  %s6963_s24 = sld [smem:[#allocation106_spill]]  ;;  %s7009_s9 = sld [smem:[#allocation124_spill]] }
 0x14d   : > { %v917_v13 = vmul.f32 %v6949_v8, %v5068_v27  ;;  %v923_v24 = vmul.f32 %v6950_v12, %v5068_v27  ;;  %v929_v25 = vmul.f32 %v6951_v46, %v5068_v27  ;;  %v6952_v9 = vstv %s6948_s4  ;;  %s7019_s0 = sld [smem:[#allocation129_spill]] }
 0x14e   : > { %v935_v45 = vmul.f32 %v6952_v9, %v5068_v27  ;;  %v6953_v58 = vmov %v6949_v8  ;;  %v6954_v18 = vmov %v6950_v12  ;;  %v6955_v32 = vmov %v6951_v46  ;;  %s5330_s4 = sld [smem:[#allocation2 + $0x26]] }
 0x14f   : > { %v916_v28 = vmul.f32 %v6953_v58, %v5070_v29  ;;  %v922_v52 = vmul.f32 %v6954_v18, %v5070_v29  ;;  %v928_v39 = vmul.f32 %v6955_v32, %v5070_v29  ;;  %v6957_v53 = vmov %v6952_v9 }
 0x150   : > { %v934_v60 = vmul.f32 %v6957_v53, %v5070_v29  ;;  %v919_v27 = vadd.f32 %v917_v13, %v891_v15  ;;  %v925_v1 = vadd.f32 %v923_v24, %v897_v47  ;;  %v931_v43 = vadd.f32 %v929_v25, %v903_v23 }
 0x151   : > { %v937_v59 = vadd.f32 %v935_v45, %v909_v19  ;;  %v918_v41 = vadd.f32 %v916_v28, %v890_v34  ;;  %v924_v37 = vadd.f32 %v922_v52, %v896_v16  ;;  %v930_v11 = vadd.f32 %v928_v39, %v902_v17  ;;  %v1053_v17 = vpop.permute.xlu1 %1052  ;;  %v1051_v45 = vpop.permute.xlu0 %1050 }
 0x152   : > { %v936_v29 = vadd.f32 %v934_v60, %v908_v57  ;;  %v6959_v61 = vstv %s4328_s28  ;;  %v6960_v10 = vstv %s6956_s2  ;;  %v6961_v22 = vstv %s4346_s29  ;;  %s6979_s29 = sld [smem:[#allocation112_spill]]  ;;  %s6980_s28 = sld [smem:[#allocation113_spill]]  ;;  %v5222_v60 = vld [vmem:[%s6666_s18 + $0x34] sm:$0xff] }
 0x153   : > { %v945_v55 = vmul.f32 %v6959_v61, %v5092_v54  ;;  %v951_v44 = vmul.f32 %v6960_v10, %v5092_v54  ;;  %v957_v63 = vmul.f32 %v6961_v22, %v5092_v54  ;;  %v6962_v51 = vstv %s6958_s7  ;;  %2142 = vrot.lane.b32.xlu0 %v5222_v60, %s6676_s5  ;;  %s5332_s2 = sld [smem:[#allocation2 + $0x8a]]  ;;  %s5342_s7 = sld [smem:[#allocation2 + $0xee]] }
 0x154   : > { %v963_v42 = vmul.f32 %v6962_v51, %v5092_v54  ;;  %v6964_v49 = vmov %v6959_v61  ;;  %v6966_v14 = vmov %v6960_v10  ;;  %v6968_v3 = vmov %v6961_v22  ;;  %v6986_v61 = vld [vmem:[#allocation135_spill] sm:$0xff]  ;;  %v6987_v10 = vld [vmem:[#allocation136_spill] sm:$0xff]  ;;  %v6988_v22 = vld [vmem:[#allocation137_spill] sm:$0xff] }
 0x155   : > { %v944_v5 = vmul.f32 %v6964_v49, %v5094_v36  ;;  %v950_v6 = vmul.f32 %v6966_v14, %v5094_v36  ;;  %v956_v50 = vmul.f32 %v6968_v3, %v5094_v36  ;;  %v6970_v0 = vmov %v6962_v51 }
 0x156   : > { %v962_v4 = vmul.f32 %v6970_v0, %v5094_v36  ;;  %v947_v54 = vadd.f32 %v945_v55, %v919_v27  ;;  %v953_v20 = vadd.f32 %v951_v44, %v925_v1  ;;  %v959_v2 = vadd.f32 %v957_v63, %v931_v43  ;;  %v6982_v1 = vld [vmem:[#allocation131_spill] sm:$0xff]  ;;  %v1081_v0 = vpop.permute.xlu1 %1080 }
 0x157   : > { %v965_v62 = vadd.f32 %v963_v42, %v937_v59  ;;  %v946_v26 = vadd.f32 %v944_v5, %v918_v41  ;;  %v952_v31 = vadd.f32 %v950_v6, %v924_v37  ;;  %v958_v35 = vadd.f32 %v956_v50, %v930_v11  ;;  %v6983_v59 = vld [vmem:[#allocation132_spill] sm:$0xff]  ;;  %v6984_v41 = vld [vmem:[#allocation133_spill] sm:$0xff]  ;;  %v6985_v11 = vld [vmem:[#allocation134_spill] sm:$0xff]  ;;  %2170 = vrot.lane.b32.xlu0 %v5222_v60, %s6653_s21 }
 0x158   : > { %v964_v30 = vadd.f32 %v962_v4, %v936_v29  ;;  %v6971_v21 = vstv %s6963_s24  ;;  %v6972_v15 = vstv %s6965_s12  ;;  %v6973_v23 = vstv %s6967_s25  ;;  %s5344_s24 = sld [smem:[#allocation2 + $0x152]]  ;;  %s5382_s12 = sld [smem:[#allocation2 + $0x28]] }
 0x159   : > { %v973_v36 = vmul.f32 %v6971_v21, %v969_v7  ;;  %v979_v47 = vmul.f32 %v6972_v15, %v969_v7  ;;  %v985_v19 = vmul.f32 %v6973_v23, %v969_v7  ;;  %v6974_v34 = vstv %s6969_s20  ;;  %s5384_s25 = sld [smem:[#allocation2 + $0x8c]]  ;;  %s5420_s20 = sld [smem:[#allocation2 + $0xf1]] }
 0x15a   : > { %v991_v16 = vmul.f32 %v6974_v34, %v969_v7  ;;  %v6975_v57 = vmov %v6971_v21  ;;  %v6976_v13 = vmov %v6972_v15  ;;  %v6977_v24 = vmov %v6973_v23  ;;  %v5219_v7 = vld [vmem:[%s6666_s18 + $0x3c] sm:$0xff] }
 0x15b   : > { %v972_v8 = vmul.f32 %v6975_v57, %v967_v38  ;;  %v978_v12 = vmul.f32 %v6976_v13, %v967_v38  ;;  %v984_v46 = vmul.f32 %v6977_v24, %v967_v38  ;;  %v6978_v25 = vmov %v6974_v34  ;;  %2144 = vrot.lane.b32.xlu1 %v5219_v7, %s6676_s5 }
 0x15c   : > { %v990_v9 = vmul.f32 %v6978_v25, %v967_v38  ;;  %v975_v58 = vadd.f32 %v973_v36, %v947_v54  ;;  %v981_v28 = vadd.f32 %v979_v47, %v953_v20  ;;  %v987_v18 = vadd.f32 %v985_v19, %v959_v2  ;;  %2198 = vrot.lane.b32.xlu0 %v5222_v60, %s6663_s6 }
 0x15d   : > { %v993_v52 = vadd.f32 %v991_v16, %v965_v62  ;;  %v974_v32 = vadd.f32 %v972_v8, %v946_v26  ;;  %v980_v39 = vadd.f32 %v978_v12, %v952_v31  ;;  %v986_v38 = vadd.f32 %v984_v46, %v958_v35 }
 0x15e   : > { %v992_v53 = vadd.f32 %v990_v9, %v964_v30  ;;  %v1003_v27 = vadd.f32 %v6981_v40, %v975_v58  ;;  %v1009_v43 = vadd.f32 %v6982_v1, %v981_v28  ;;  %v1015_v48 = vadd.f32 %v6983_v59, %v987_v18  ;;  %v1079_v30 = vpop.permute.xlu0 %1078 }
 0x15f   : > { %v1021_v37 = vadd.f32 %v6984_v41, %v993_v52  ;;  %v1002_v29 = vadd.f32 %v6985_v11, %v974_v32  ;;  %v1008_v55 = vadd.f32 %v6986_v61, %v980_v39  ;;  %v1014_v44 = vadd.f32 %v6987_v10, %v986_v38  ;;  %2172 = vrot.lane.b32.xlu1 %v5219_v7, %s6653_s21 }
 0x160   : > { %v1020_v63 = vadd.f32 %v6988_v22, %v992_v53  ;;  %v6989_v51 = vstv %s4404_s27  ;;  %v6990_v49 = vstv %s4406_s8  ;;  %v6991_v14 = vstv %s6979_s29  ;;  %s7003_s8 = sld [smem:[#allocation121_spill]]  ;;  %s7005_s27 = sld [smem:[#allocation122_spill]]  ;;  %2226 = vrot.lane.b32.xlu0 %v5222_v60, %s6673_s17 }
 0x161   : > { %v1029_v42 = vmul.f32 %v6989_v51, %v1025_v33  ;;  %v1035_v5 = vmul.f32 %v6990_v49, %v1025_v33  ;;  %v1041_v6 = vmul.f32 %v6991_v14, %v1025_v33  ;;  %v6992_v3 = vstv %s6980_s28  ;;  %s5422_s29 = sld [smem:[#allocation2 + $0x155]]  ;;  %s5430_s28 = sld [smem:[#allocation2 + $0x2a]] }
 0x162   : > { %v1047_v50 = vmul.f32 %v6992_v3, %v1025_v33  ;;  %v6994_v4 = vmov %v6989_v51  ;;  %v6995_v20 = vmov %v6990_v49  ;;  %v6996_v62 = vmov %v6991_v14  ;;  %v1107_v41 = vpop.permute.xlu0 %1106 }
 0x163   : > { %v1028_v54 = vmul.f32 %v6994_v4, %v1023_v56  ;;  %v1034_v2 = vmul.f32 %v6995_v20, %v1023_v56  ;;  %v1040_v26 = vmul.f32 %v6996_v62, %v1023_v56  ;;  %v6997_v31 = vmov %v6992_v3  ;;  %2200 = vrot.lane.b32.xlu1 %v5219_v7, %s6663_s6 }
 0x164   : > { %v1046_v35 = vmul.f32 %v6997_v31, %v1023_v56  ;;  %v1031_v33 = vadd.f32 %v1029_v42, %v1003_v27  ;;  %v1037_v21 = vadd.f32 %v1035_v5, %v1009_v43  ;;  %v1043_v36 = vadd.f32 %v1041_v6, %v1015_v48  ;;  %v1109_v27 = vpop.permute.xlu1 %1108 }
 0x165   : > { %v1049_v15 = vadd.f32 %v1047_v50, %v1021_v37  ;;  %v1030_v47 = vadd.f32 %v1028_v54, %v1002_v29  ;;  %v1036_v23 = vadd.f32 %v1034_v2, %v1008_v55  ;;  %v1042_v19 = vadd.f32 %v1040_v26, %v1014_v44 }
 0x166   : > { %v1048_v34 = vadd.f32 %v1046_v35, %v1020_v63  ;;  %v6998_v16 = vstv %s6993_s13  ;;  %v6999_v8 = vstv %s4430_s1  ;;  %v7000_v13 = vstv %s4444_s26  ;;  %s7014_s1 = sld [smem:[#allocation125_spill]]  ;;  %s7015_s26 = sld [smem:[#allocation126_spill]] }
 0x167   : > { %v1057_v57 = vmul.f32 %v6998_v16, %v1053_v17  ;;  %v1063_v56 = vmul.f32 %v6999_v8, %v1053_v17  ;;  %v1069_v12 = vmul.f32 %v7000_v13, %v1053_v17  ;;  %v7001_v24 = vstv %s4446_s11  ;;  %s7017_s11 = sld [smem:[#allocation17_spill]]  ;;  %2228 = vrot.lane.b32.xlu1 %v5219_v7, %s6673_s17  ;;  %s5432_s13 = sld [smem:[#allocation2 + $0x8e]] }
 0x168   : > { %v1075_v46 = vmul.f32 %v7001_v24, %v1053_v17  ;;  %v7002_v25 = vmov %v6998_v16  ;;  %v7004_v58 = vmov %v6999_v8  ;;  %v7006_v18 = vmov %v7000_v13 }
 0x169   : > { %v1056_v9 = vmul.f32 %v7002_v25, %v1051_v45  ;;  %v1062_v28 = vmul.f32 %v7004_v58, %v1051_v45  ;;  %v1068_v52 = vmul.f32 %v7006_v18, %v1051_v45  ;;  %v7008_v32 = vmov %v7001_v24  ;;  %v5316_v24 = vld [vmem:[%s6666_s18 + $0x48] sm:$0xff] }
 0x16a   : > { %v1074_v39 = vmul.f32 %v7008_v32, %v1051_v45  ;;  %v1059_v38 = vadd.f32 %v1057_v57, %v1031_v33  ;;  %v1065_v53 = vadd.f32 %v1063_v56, %v1037_v21  ;;  %v1071_v17 = vadd.f32 %v1069_v12, %v1043_v36  ;;  %v1163_v12 = vpop.permute.xlu0 %1162  ;;  %v7030_v32 = vld [vmem:[#allocation138_spill] sm:$0xff]  ;;  %2282 = vrot.lane.b32.xlu0 %v5316_v24, %s6676_s5 }
 0x16b   : > { %v1077_v40 = vadd.f32 %v1075_v46, %v1049_v15  ;;  %v1058_v1 = vadd.f32 %v1056_v9, %v1030_v47  ;;  %v1064_v43 = vadd.f32 %v1062_v28, %v1036_v23  ;;  %v1070_v59 = vadd.f32 %v1068_v52, %v1042_v19  ;;  %v1165_v47 = vpop.permute.xlu1 %1164  ;;  %v5305_v23 = vld [vmem:[%s6666_s18 + $0x50] sm:$0xff] }
 0x16c   : > { %v1076_v48 = vadd.f32 %v1074_v39, %v1048_v34  ;;  %v7010_v37 = vstv %s7003_s8  ;;  %v7011_v45 = vstv %s7005_s27  ;;  %v7012_v61 = vstv %s7007_s23  ;;  %2284 = vrot.lane.b32.xlu1 %v5305_v23, %s6676_s5  ;;  %s5436_s8 = sld [smem:[#allocation2 + $0xf2]]  ;;  %s5438_s27 = sld [smem:[#allocation2 + $0x156]] }
 0x16d   : > { %v1085_v11 = vmul.f32 %v7010_v37, %v1081_v0  ;;  %v1091_v29 = vmul.f32 %v7011_v45, %v1081_v0  ;;  %v1097_v55 = vmul.f32 %v7012_v61, %v1081_v0  ;;  %v7013_v10 = vstv %s7009_s9  ;;  %s5448_s23 = sld [smem:[#allocation2 + $0x2b]]  ;;  %s5450_s9 = sld [smem:[#allocation2 + $0x8f]] }
 0x16e   : > { %v1103_v44 = vmul.f32 %v7013_v10, %v1081_v0  ;;  %v7016_v22 = vmov %v7010_v37  ;;  %v7018_v51 = vmov %v7011_v45  ;;  %v7020_v49 = vmov %v7012_v61  ;;  %v7036_v37 = vld [vmem:[#allocation144_spill] sm:$0xff]  ;;  %v7037_v45 = vld [vmem:[#allocation145_spill] sm:$0xff]  ;;  %2310 = vrot.lane.b32.xlu0 %v5316_v24, %s6653_s21 }
 0x16f   : > { %v1084_v63 = vmul.f32 %v7016_v22, %v1079_v30  ;;  %v1090_v42 = vmul.f32 %v7018_v51, %v1079_v30  ;;  %v1096_v5 = vmul.f32 %v7020_v49, %v1079_v30  ;;  %v7021_v14 = vmov %v7013_v10  ;;  %v1193_v49 = vpop.permute.xlu1 %1192 }
 0x170   : > { %v1102_v6 = vmul.f32 %v7021_v14, %v1079_v30  ;;  %v1087_v3 = vadd.f32 %v1085_v11, %v1059_v38  ;;  %v1093_v50 = vadd.f32 %v1091_v29, %v1065_v53  ;;  %v1099_v0 = vadd.f32 %v1097_v55, %v1071_v17  ;;  %v7031_v38 = vld [vmem:[#allocation139_spill] sm:$0xff]  ;;  %v7032_v17 = vld [vmem:[#allocation140_spill] sm:$0xff]  ;;  %2312 = vrot.lane.b32.xlu1 %v5305_v23, %s6653_s21 }
 0x171   : > { %v1105_v4 = vadd.f32 %v1103_v44, %v1077_v40  ;;  %v1086_v54 = vadd.f32 %v1084_v63, %v1058_v1  ;;  %v1092_v20 = vadd.f32 %v1090_v42, %v1064_v43  ;;  %v1098_v2 = vadd.f32 %v1096_v5, %v1070_v59  ;;  %v7034_v43 = vld [vmem:[#allocation142_spill] sm:$0xff] }
 0x172   : > { %v1104_v62 = vadd.f32 %v1102_v6, %v1076_v48  ;;  %v7022_v26 = vstv %s7014_s1  ;;  %v7023_v35 = vstv %s7015_s26  ;;  %v7024_v33 = vstv %s7017_s11  ;;  %v7035_v48 = vld [vmem:[#allocation143_spill] sm:$0xff]  ;;  %2338 = vrot.lane.b32.xlu0 %v5316_v24, %s6663_s6  ;;  %s5454_s1 = sld [smem:[#allocation2 + $0xf3]]  ;;  %s5456_s26 = sld [smem:[#allocation2 + $0x157]] }
 0x173   : > { %v1113_v31 = vmul.f32 %v7022_v26, %v1109_v27  ;;  %v1119_v30 = vmul.f32 %v7023_v35, %v1109_v27  ;;  %v1125_v21 = vmul.f32 %v7024_v33, %v1109_v27  ;;  %v7025_v36 = vstv %s7019_s0  ;;  %s5467_s11 = sld [smem:[#allocation2 + $0x2c]]  ;;  %s5469_s0 = sld [smem:[#allocation2 + $0x90]] }
 0x174   : > { %v1131_v15 = vmul.f32 %v7025_v36, %v1109_v27  ;;  %v7026_v19 = vmov %v7022_v26  ;;  %v7027_v16 = vmov %v7023_v35  ;;  %v7028_v8 = vmov %v7024_v33  ;;  %v7033_v27 = vld [vmem:[#allocation141_spill] sm:$0xff]  ;;  %2340 = vrot.lane.b32.xlu1 %v5305_v23, %s6663_s6 }
 0x175   : > { %v1112_v34 = vmul.f32 %v7026_v19, %v1107_v41  ;;  %v1118_v57 = vmul.f32 %v7027_v16, %v1107_v41  ;;  %v1124_v7 = vmul.f32 %v7028_v8, %v1107_v41  ;;  %v7029_v56 = vmov %v7025_v36 }
 0x176   : > { %v1130_v13 = vmul.f32 %v7029_v56, %v1107_v41  ;;  %v1115_v46 = vadd.f32 %v1113_v31, %v1087_v3  ;;  %v1121_v25 = vadd.f32 %v1119_v30, %v1093_v50  ;;  %v1127_v9 = vadd.f32 %v1125_v21, %v1099_v0  ;;  %2366 = vrot.lane.b32.xlu0 %v5316_v24, %s6673_s17 }
 0x177   : > { %v1133_v58 = vadd.f32 %v1131_v15, %v1105_v4  ;;  %v1114_v28 = vadd.f32 %v1112_v34, %v1086_v54  ;;  %v1120_v60 = vadd.f32 %v1118_v57, %v1092_v20  ;;  %v1126_v18 = vadd.f32 %v1124_v7, %v1098_v2  ;;  %v1191_v20 = vpop.permute.xlu0 %1190 }
 0x178   : > { %v1132_v52 = vadd.f32 %v1130_v13, %v1104_v62  ;;  %v1143_v39 = vadd.f32 %v7030_v32, %v1115_v46  ;;  %v1149_v53 = vadd.f32 %v7031_v38, %v1121_v25  ;;  %v1155_v40 = vadd.f32 %v7032_v17, %v1127_v9  ;;  %v1221_v32 = vpop.permute.xlu1 %1220  ;;  %2368 = vrot.lane.b32.xlu1 %v5305_v23, %s6673_s17 }
 0x179   : > { %v1161_v1 = vadd.f32 %v7033_v27, %v1133_v58  ;;  %v1142_v59 = vadd.f32 %v7034_v43, %v1114_v28  ;;  %v1148_v41 = vadd.f32 %v7035_v48, %v1120_v60  ;;  %v1154_v11 = vadd.f32 %v7036_v37, %v1126_v18 }
 0x17a   : > { %v1160_v29 = vadd.f32 %v7037_v45, %v1132_v52  ;;  %v7038_v61 = vstv %s4522_s22  ;;  %v7039_v10 = vstv %s4524_s15  ;;  %v7040_v22 = vstv %s4542_s10  ;;  %s5358_s15 = sld [smem:[#allocation2 + $0x27]]  ;;  %s5360_s22 = sld [smem:[#allocation2 + $0x8b]] }
 0x17b   : > { %v1169_v55 = vmul.f32 %v7038_v61, %v1165_v47  ;;  %v1175_v44 = vmul.f32 %v7039_v10, %v1165_v47  ;;  %v1181_v63 = vmul.f32 %v7040_v22, %v1165_v47  ;;  %v7041_v51 = vstv %s4544_s30  ;;  %s5370_s30 = sld [smem:[#allocation2 + $0xef]]  ;;  %s5372_s10 = sld [smem:[#allocation2 + $0x153]] }
 0x17c   : > { %v1187_v42 = vmul.f32 %v7041_v51, %v1165_v47  ;;  %v7042_v5 = vmov %v7038_v61  ;;  %v7043_v6 = vmov %v7039_v10  ;;  %v7044_v50 = vmov %v7040_v22 }
 0x17d   : > { %v1168_v14 = vmul.f32 %v7042_v5, %v1163_v12  ;;  %v1174_v3 = vmul.f32 %v7043_v6, %v1163_v12  ;;  %v1180_v0 = vmul.f32 %v7044_v50, %v1163_v12  ;;  %v7045_v4 = vmov %v7041_v51  ;;  %v5403_v5 = vld [vmem:[%s6666_s18 + $0x51] sm:$0xff] }
 0x17e   : > { %v1186_v54 = vmul.f32 %v7045_v4, %v1163_v12  ;;  %v1171_v2 = vadd.f32 %v1169_v55, %v1143_v39  ;;  %v1177_v62 = vadd.f32 %v1175_v44, %v1149_v53  ;;  %v1183_v26 = vadd.f32 %v1181_v63, %v1155_v40  ;;  %v1219_v40 = vpop.permute.xlu0 %1218  ;;  %2424 = vrot.lane.b32.xlu1 %v5403_v5, %s6676_s5 }
 0x17f   : > { %v1189_v31 = vadd.f32 %v1187_v42, %v1161_v1  ;;  %v1170_v35 = vadd.f32 %v1168_v14, %v1142_v59  ;;  %v1176_v30 = vadd.f32 %v1174_v3, %v1148_v41  ;;  %v1182_v33 = vadd.f32 %v1180_v0, %v1154_v11  ;;  %v5406_v14 = vld [vmem:[%s6666_s18 + $0x49] sm:$0xff]  ;;  %v1249_v0 = vpop.permute.xlu1 %1248 }
 0x180   : > { %v1188_v21 = vadd.f32 %v1186_v54, %v1160_v29  ;;  %v7046_v36 = vstv %s4578_s14  ;;  %v7047_v47 = vstv %s4580_s16  ;;  %v7048_v34 = vstv %s4594_s19  ;;  %s5388_s19 = sld [smem:[#allocation2 + $0xf0]]  ;;  %s5412_s16 = sld [smem:[#allocation2 + $0x29]]  ;;  %2422 = vrot.lane.b32.xlu0 %v5406_v14, %s6676_s5 }
 0x181   : > { %v1197_v15 = vmul.f32 %v7046_v36, %v1193_v49  ;;  %v1203_v19 = vmul.f32 %v7047_v47, %v1193_v49  ;;  %v1209_v16 = vmul.f32 %v7048_v34, %v1193_v49  ;;  %v7049_v57 = vstv %s4596_s3  ;;  %s5390_s3 = sld [smem:[#allocation2 + $0x154]]  ;;  %s5414_s14 = sld [smem:[#allocation2 + $0x8d]] }
 0x182   : > { %v1215_v8 = vmul.f32 %v7049_v57, %v1193_v49  ;;  %v7050_v7 = vmov %v7046_v36  ;;  %v7051_v13 = vmov %v7047_v47  ;;  %v7052_v46 = vmov %v7048_v34  ;;  %2452 = vrot.lane.b32.xlu1 %v5403_v5, %s6653_s21 }
 0x183   : > { %v1196_v56 = vmul.f32 %v7050_v7, %v1191_v20  ;;  %v1202_v12 = vmul.f32 %v7051_v13, %v1191_v20  ;;  %v1208_v25 = vmul.f32 %v7052_v46, %v1191_v20  ;;  %v7053_v9 = vmov %v7049_v57 }
 0x184   : > { %v1214_v58 = vmul.f32 %v7053_v9, %v1191_v20  ;;  %v1199_v28 = vadd.f32 %v1197_v15, %v1171_v2  ;;  %v1205_v60 = vadd.f32 %v1203_v19, %v1177_v62  ;;  %v1211_v18 = vadd.f32 %v1209_v16, %v1183_v26  ;;  %v1247_v62 = vpop.permute.xlu0 %1246  ;;  %v3591_v26 = vld [vmem:[%s6666_s18 + $0x23] sm:$0xff]  ;;  %v3592_v19 = vld [vmem:[%s6666_s18 + $0x1b] sm:$0xff]  ;;  %2450 = vrot.lane.b32.xlu0 %v5406_v14, %s6653_s21 }
 0x185   : > { %v1217_v52 = vadd.f32 %v1215_v8, %v1189_v31  ;;  %v1198_v39 = vadd.f32 %v1196_v56, %v1170_v35  ;;  %v1204_v38 = vadd.f32 %v1202_v12, %v1176_v30  ;;  %v1210_v53 = vadd.f32 %v1208_v25, %v1182_v33 }
 0x186   : > { %v1216_v17 = vadd.f32 %v1214_v58, %v1188_v21  ;;  %v1223_v27 = vstv %s5330_s4  ;;  %v1229_v1 = vstv %s5332_s2  ;;  %v1235_v43 = vstv %s5342_s7  ;;  %2480 = vrot.lane.b32.xlu1 %v5403_v5, %s6663_s6  ;;  %s5471_s4 = sld [smem:[#allocation2 + $0xf4]]  ;;  %s5473_s2 = sld [smem:[#allocation2 + $0x158]] }
 0x187   : > { %v1241_v59 = vstv %s5344_s24  ;;  %v1225_v48 = vmul.f32 %v1223_v27, %v1221_v32  ;;  %v1231_v41 = vmul.f32 %v1229_v1, %v1221_v32  ;;  %v1237_v37 = vmul.f32 %v1235_v43, %v1221_v32  ;;  %s5477_s7 = sld [smem:[#allocation2 + $0x2d]]  ;;  %s5479_s24 = sld [smem:[#allocation2 + $0x91]] }
 0x188   : > { %v1243_v11 = vmul.f32 %v1241_v59, %v1221_v32  ;;  %v1224_v45 = vmul.f32 %v1223_v27, %v1219_v40  ;;  %v1230_v29 = vmul.f32 %v1229_v1, %v1219_v40  ;;  %v1236_v61 = vmul.f32 %v1235_v43, %v1219_v40  ;;  %2478 = vrot.lane.b32.xlu0 %v5406_v14, %s6663_s6 }
 0x189   : > { %v1242_v55 = vmul.f32 %v1241_v59, %v1219_v40  ;;  %v1227_v10 = vadd.f32 %v1225_v48, %v1199_v28  ;;  %v1233_v44 = vadd.f32 %v1231_v41, %v1205_v60  ;;  %v1239_v22 = vadd.f32 %v1237_v37, %v1211_v18  ;;  %v1305_v28 = vpop.permute.xlu1 %1304 }
 0x18a   : > { %v1245_v63 = vadd.f32 %v1243_v11, %v1217_v52  ;;  %v1226_v51 = vadd.f32 %v1224_v45, %v1198_v39  ;;  %v1232_v23 = vadd.f32 %v1230_v29, %v1204_v38  ;;  %v1238_v42 = vadd.f32 %v1236_v61, %v1210_v53  ;;  %v1303_v39 = vpop.permute.xlu0 %1302  ;;  %2508 = vrot.lane.b32.xlu1 %v5403_v5, %s6673_s17 }
 0x18b   : > { %v1244_v49 = vadd.f32 %v1242_v55, %v1216_v17  ;;  %v1251_v6 = vstv %s5358_s15  ;;  %v1257_v3 = vstv %s5360_s22  ;;  %v1263_v24 = vstv %s5370_s30  ;;  %s5481_s15 = sld [smem:[#allocation2 + $0xf5]]  ;;  %s5483_s22 = sld [smem:[#allocation2 + $0x159]] }
 0x18c   : > { %v1269_v50 = vstv %s5372_s10  ;;  %v1279_v4 = vstv %s5382_s12  ;;  %v1285_v54 = vstv %s5384_s25  ;;  %v1291_v20 = vstv %s5388_s19  ;;  %s5502_s30 = sld [smem:[#allocation2 + $0x2e]]  ;;  %s5504_s10 = sld [smem:[#allocation2 + $0x92]] }
 0x18d   : > { %v1297_v2 = vstv %s5390_s3  ;;  %v1281_v31 = vmul.f32 %v3591_v26, %v1279_v4  ;;  %v1287_v35 = vmul.f32 %v3591_v26, %v1285_v54  ;;  %v1293_v30 = vmul.f32 %v3591_v26, %v1291_v20  ;;  %2506 = vrot.lane.b32.xlu0 %v5406_v14, %s6673_s17  ;;  %v5488_v14 = vld [vmem:[%s6666_s18 + $0x4a] sm:$0xff]  ;;  %s5510_s12 = sld [smem:[#allocation2 + $0xf6]]  ;;  %s5512_s25 = sld [smem:[#allocation2 + $0x15a]] }
 0x18e   : > { %v1299_v33 = vmul.f32 %v3591_v26, %v1297_v2  ;;  %v1253_v21 = vmul.f32 %v1251_v6, %v1249_v0  ;;  %v1259_v36 = vmul.f32 %v1257_v3, %v1249_v0  ;;  %v1265_v15 = vmul.f32 %v1263_v24, %v1249_v0  ;;  %s5520_s19 = sld [smem:[#allocation2 + $0x2f]]  ;;  %s5522_s3 = sld [smem:[#allocation2 + $0x93]] }
 0x18f   : > { %v1271_v47 = vmul.f32 %v1269_v50, %v1249_v0  ;;  %v1280_v34 = vmul.f32 %v3592_v19, %v1279_v4  ;;  %v1286_v16 = vmul.f32 %v3592_v19, %v1285_v54  ;;  %v1292_v57 = vmul.f32 %v3592_v19, %v1291_v20  ;;  %v5461_v54 = vld [vmem:[%s6666_s18 + $0x52] sm:$0xff] }
 0x190   : > { %v1298_v8 = vmul.f32 %v3592_v19, %v1297_v2  ;;  %v1255_v7 = vadd.f32 %v1253_v21, %v1227_v10  ;;  %v1261_v56 = vadd.f32 %v1259_v36, %v1233_v44  ;;  %v1267_v13 = vadd.f32 %v1265_v15, %v1239_v22  ;;  %2564 = vrot.lane.b32.xlu1 %v5461_v54, %s6676_s5 }
 0x191   : > { %v1273_v12 = vadd.f32 %v1271_v47, %v1245_v63  ;;  %v1252_v46 = vmul.f32 %v1251_v6, %v1247_v62  ;;  %v1258_v25 = vmul.f32 %v1257_v3, %v1247_v62  ;;  %v1264_v9 = vmul.f32 %v1263_v24, %v1247_v62  ;;  %v1331_v3 = vpop.permute.xlu0 %1330  ;;  %2562 = vrot.lane.b32.xlu0 %v5488_v14, %s6676_s5 }
 0x192   : > { %v1270_v58 = vmul.f32 %v1269_v50, %v1247_v62  ;;  %v1283_v60 = vadd.f32 %v1281_v31, %v1255_v7  ;;  %v1289_v18 = vadd.f32 %v1287_v35, %v1261_v56  ;;  %v1295_v52 = vadd.f32 %v1293_v30, %v1267_v13 }
 0x193   : > { %v1301_v32 = vadd.f32 %v1299_v33, %v1273_v12  ;;  %v1254_v38 = vadd.f32 %v1252_v46, %v1226_v51  ;;  %v1260_v53 = vadd.f32 %v1258_v25, %v1232_v23  ;;  %v1266_v17 = vadd.f32 %v1264_v9, %v1238_v42  ;;  %v1333_v51 = vpop.permute.xlu1 %1332 }
 0x194   : > { %v1272_v40 = vadd.f32 %v1270_v58, %v1244_v49  ;;  %v1307_v27 = vstv %s5412_s16  ;;  %v1313_v1 = vstv %s5414_s14  ;;  %v1319_v43 = vstv %s5420_s20  ;;  %2592 = vrot.lane.b32.xlu1 %v5461_v54, %s6653_s21  ;;  %s5526_s16 = sld [smem:[#allocation2 + $0xf7]]  ;;  %s5528_s14 = sld [smem:[#allocation2 + $0x15b]] }
 0x195   : > { %v1325_v59 = vstv %s5422_s29  ;;  %v1282_v48 = vadd.f32 %v1280_v34, %v1254_v38  ;;  %v1288_v41 = vadd.f32 %v1286_v16, %v1260_v53  ;;  %v1294_v37 = vadd.f32 %v1292_v57, %v1266_v17  ;;  %v1359_v12 = vpop.permute.xlu0 %1358  ;;  %2590 = vrot.lane.b32.xlu0 %v5488_v14, %s6653_s21  ;;  %s5541_s20 = sld [smem:[#allocation2 + $0x30]]  ;;  %s5543_s29 = sld [smem:[#allocation2 + $0x94]] }
 0x196   : > { %v1300_v11 = vadd.f32 %v1298_v8, %v1272_v40  ;;  %v1309_v45 = vmul.f32 %v1307_v27, %v1305_v28  ;;  %v1315_v29 = vmul.f32 %v1313_v1, %v1305_v28  ;;  %v1321_v61 = vmul.f32 %v1319_v43, %v1305_v28 }
 0x197   : > { %v1327_v55 = vmul.f32 %v1325_v59, %v1305_v28  ;;  %v1308_v10 = vmul.f32 %v1307_v27, %v1303_v39  ;;  %v1314_v44 = vmul.f32 %v1313_v1, %v1303_v39  ;;  %v1320_v22 = vmul.f32 %v1319_v43, %v1303_v39  ;;  %v1361_v57 = vpop.permute.xlu1 %1360 }
 0x198   : > { %v1326_v63 = vmul.f32 %v1325_v59, %v1303_v39  ;;  %v1311_v23 = vadd.f32 %v1309_v45, %v1283_v60  ;;  %v1317_v42 = vadd.f32 %v1315_v29, %v1289_v18  ;;  %v1323_v49 = vadd.f32 %v1321_v61, %v1295_v52  ;;  %2620 = vrot.lane.b32.xlu1 %v5461_v54, %s6663_s6 }
 0x199   : > { %v1329_v6 = vadd.f32 %v1327_v55, %v1301_v32  ;;  %v1310_v24 = vadd.f32 %v1308_v10, %v1282_v48  ;;  %v1316_v50 = vadd.f32 %v1314_v44, %v1288_v41  ;;  %v1322_v0 = vadd.f32 %v1320_v22, %v1294_v37  ;;  %2618 = vrot.lane.b32.xlu0 %v5488_v14, %s6663_s6 }
 0x19a   : > { %v1328_v4 = vadd.f32 %v1326_v63, %v1300_v11  ;;  %v1335_v20 = vstv %s5430_s28  ;;  %v1341_v2 = vstv %s5432_s13  ;;  %v1347_v62 = vstv %s5436_s8  ;;  %v1387_v63 = vpop.permute.xlu0 %1386  ;;  %s5550_s28 = sld [smem:[#allocation2 + $0xf8]]  ;;  %s5552_s13 = sld [smem:[#allocation2 + $0x15c]] }
 0x19b   : > { %v1353_v26 = vstv %s5438_s27  ;;  %v1337_v31 = vmul.f32 %v1335_v20, %v1333_v51  ;;  %v1343_v35 = vmul.f32 %v1341_v2, %v1333_v51  ;;  %v1349_v30 = vmul.f32 %v1347_v62, %v1333_v51  ;;  %v1389_v61 = vpop.permute.xlu1 %1388  ;;  %s5560_s8 = sld [smem:[#allocation2 + $0x31]]  ;;  %s5562_s27 = sld [smem:[#allocation2 + $0x95]] }
 0x19c   : > { %v1355_v33 = vmul.f32 %v1353_v26, %v1333_v51  ;;  %v1336_v5 = vmul.f32 %v1335_v20, %v1331_v3  ;;  %v1342_v21 = vmul.f32 %v1341_v2, %v1331_v3  ;;  %v1348_v36 = vmul.f32 %v1347_v62, %v1331_v3  ;;  %v3593_v51 = vld [vmem:[%s6666_s18 + $0x24] sm:$0xff]  ;;  %2648 = vrot.lane.b32.xlu1 %v5461_v54, %s6673_s17 }
 0x19d   : > { %v1354_v15 = vmul.f32 %v1353_v26, %v1331_v3  ;;  %v1339_v47 = vadd.f32 %v1337_v31, %v1311_v23  ;;  %v1345_v19 = vadd.f32 %v1343_v35, %v1317_v42  ;;  %v1351_v34 = vadd.f32 %v1349_v30, %v1323_v49  ;;  %2646 = vrot.lane.b32.xlu0 %v5488_v14, %s6673_s17 }
 0x19e   : > { %v1357_v16 = vadd.f32 %v1355_v33, %v1329_v6  ;;  %v1338_v8 = vadd.f32 %v1336_v5, %v1310_v24  ;;  %v1344_v7 = vadd.f32 %v1342_v21, %v1316_v50  ;;  %v1350_v56 = vadd.f32 %v1348_v36, %v1322_v0 }
 0x19f   : > { %v1356_v13 = vadd.f32 %v1354_v15, %v1328_v4  ;;  %v1363_v46 = vstv %s5448_s23  ;;  %v1369_v25 = vstv %s5450_s9  ;;  %v1375_v9 = vstv %s5454_s1  ;;  %v3594_v4 = vld [vmem:[%s6666_s18 + $0x1c] sm:$0xff]  ;;  %s5564_s23 = sld [smem:[#allocation2 + $0xf9]]  ;;  %s5566_s9 = sld [smem:[#allocation2 + $0x15d]] }
 0x1a0   : > { %v1381_v58 = vstv %s5456_s26  ;;  %v1365_v28 = vmul.f32 %v1363_v46, %v1361_v57  ;;  %v1371_v60 = vmul.f32 %v1369_v25, %v1361_v57  ;;  %v1377_v18 = vmul.f32 %v1375_v9, %v1361_v57  ;;  %s5570_s1 = sld [smem:[#allocation2 + $0x32]]  ;;  %s5572_s26 = sld [smem:[#allocation2 + $0x96]] }
 0x1a1   : > { %v1383_v52 = vmul.f32 %v1381_v58, %v1361_v57  ;;  %v1364_v32 = vmul.f32 %v1363_v46, %v1359_v12  ;;  %v1370_v39 = vmul.f32 %v1369_v25, %v1359_v12  ;;  %v1376_v38 = vmul.f32 %v1375_v9, %v1359_v12  ;;  %v5533_v46 = vld [vmem:[%s6666_s18 + $0x53] sm:$0xff] }
 0x1a2   : > { %v1382_v53 = vmul.f32 %v1381_v58, %v1359_v12  ;;  %v1367_v17 = vadd.f32 %v1365_v28, %v1339_v47  ;;  %v1373_v40 = vadd.f32 %v1371_v60, %v1345_v19  ;;  %v1379_v27 = vadd.f32 %v1377_v18, %v1351_v34  ;;  %v1445_v47 = vpop.permute.xlu1 %1444  ;;  %2704 = vrot.lane.b32.xlu1 %v5533_v46, %s6676_s5 }
 0x1a3   : > { %v1385_v1 = vadd.f32 %v1383_v52, %v1357_v16  ;;  %v1366_v43 = vadd.f32 %v1364_v32, %v1338_v8  ;;  %v1372_v59 = vadd.f32 %v1370_v39, %v1344_v7  ;;  %v1378_v48 = vadd.f32 %v1376_v38, %v1350_v56  ;;  %v1443_v8 = vpop.permute.xlu0 %1442 }
 0x1a4   : > { %v1384_v41 = vadd.f32 %v1382_v53, %v1356_v13  ;;  %v1391_v37 = vstv %s5467_s11  ;;  %v1397_v11 = vstv %s5469_s0  ;;  %v1403_v45 = vstv %s5471_s4  ;;  %s5574_s11 = sld [smem:[#allocation2 + $0xfa]]  ;;  %s5576_s0 = sld [smem:[#allocation2 + $0x15e]] }
 0x1a5   : > { %v1409_v29 = vstv %s5473_s2  ;;  %v1419_v55 = vstv %s5477_s7  ;;  %v1425_v10 = vstv %s5479_s24  ;;  %v1431_v44 = vstv %s5481_s15  ;;  %s5592_s4 = sld [smem:[#allocation2 + $0x33]]  ;;  %s5594_s2 = sld [smem:[#allocation2 + $0x97]] }
 0x1a6   : > { %v1437_v22 = vstv %s5483_s22  ;;  %v1421_v23 = vmul.f32 %v3593_v51, %v1419_v55  ;;  %v1427_v42 = vmul.f32 %v3593_v51, %v1425_v10  ;;  %v1433_v49 = vmul.f32 %v3593_v51, %v1431_v44  ;;  %v1473_v14 = vpop.permute.xlu1 %1472  ;;  %2732 = vrot.lane.b32.xlu1 %v5533_v46, %s6653_s21  ;;  %s5600_s7 = sld [smem:[#allocation2 + $0xfb]]  ;;  %s5602_s24 = sld [smem:[#allocation2 + $0x15f]] }
 0x1a7   : > { %v1439_v6 = vmul.f32 %v3593_v51, %v1437_v22  ;;  %v1393_v3 = vmul.f32 %v1391_v37, %v1389_v61  ;;  %v1399_v24 = vmul.f32 %v1397_v11, %v1389_v61  ;;  %v1405_v50 = vmul.f32 %v1403_v45, %v1389_v61  ;;  %s5616_s15 = sld [smem:[#allocation2 + $0x34]]  ;;  %s5618_s22 = sld [smem:[#allocation2 + $0x98]] }
 0x1a8   : > { %v1411_v0 = vmul.f32 %v1409_v29, %v1389_v61  ;;  %v1420_v20 = vmul.f32 %v3594_v4, %v1419_v55  ;;  %v1426_v2 = vmul.f32 %v3594_v4, %v1425_v10  ;;  %v1432_v62 = vmul.f32 %v3594_v4, %v1431_v44 }
 0x1a9   : > { %v1438_v26 = vmul.f32 %v3594_v4, %v1437_v22  ;;  %v1395_v31 = vadd.f32 %v1393_v3, %v1367_v17  ;;  %v1401_v35 = vadd.f32 %v1399_v24, %v1373_v40  ;;  %v1407_v30 = vadd.f32 %v1405_v50, %v1379_v27  ;;  %v5548_v17 = vld [vmem:[%s6666_s18 + $0x4b] sm:$0xff] }
 0x1aa   : > { %v1413_v33 = vadd.f32 %v1411_v0, %v1385_v1  ;;  %v1392_v5 = vmul.f32 %v1391_v37, %v1387_v63  ;;  %v1398_v21 = vmul.f32 %v1397_v11, %v1387_v63  ;;  %v1404_v36 = vmul.f32 %v1403_v45, %v1387_v63  ;;  %v1471_v11 = vpop.permute.xlu0 %1470  ;;  %2702 = vrot.lane.b32.xlu0 %v5548_v17, %s6676_s5 }
 0x1ab   : > { %v1410_v15 = vmul.f32 %v1409_v29, %v1387_v63  ;;  %v1423_v19 = vadd.f32 %v1421_v23, %v1395_v31  ;;  %v1429_v34 = vadd.f32 %v1427_v42, %v1401_v35  ;;  %v1435_v16 = vadd.f32 %v1433_v49, %v1407_v30  ;;  %2760 = vrot.lane.b32.xlu1 %v5533_v46, %s6663_s6 }
 0x1ac   : > { %v1441_v57 = vadd.f32 %v1439_v6, %v1413_v33  ;;  %v1394_v7 = vadd.f32 %v1392_v5, %v1366_v43  ;;  %v1400_v56 = vadd.f32 %v1398_v21, %v1372_v59  ;;  %v1406_v13 = vadd.f32 %v1404_v36, %v1378_v48 }
 0x1ad   : > { %v1412_v12 = vadd.f32 %v1410_v15, %v1384_v41  ;;  %v1447_v25 = vstv %s5502_s30  ;;  %v1453_v9 = vstv %s5504_s10  ;;  %v1459_v58 = vstv %s5510_s12  ;;  %s5622_s30 = sld [smem:[#allocation2 + $0xfc]]  ;;  %s5624_s10 = sld [smem:[#allocation2 + $0x160]] }
 0x1ae   : > { %v1465_v28 = vstv %s5512_s25  ;;  %v1422_v60 = vadd.f32 %v1420_v20, %v1394_v7  ;;  %v1428_v18 = vadd.f32 %v1426_v2, %v1400_v56  ;;  %v1434_v52 = vadd.f32 %v1432_v62, %v1406_v13  ;;  %v1501_v62 = vpop.permute.xlu1 %1500  ;;  %2730 = vrot.lane.b32.xlu0 %v5548_v17, %s6653_s21  ;;  %v1499_v33 = vpop.permute.xlu0 %1498  ;;  %s5636_s12 = sld [smem:[#allocation2 + $0x99]]  ;;  %s5640_s25 = sld [smem:[#allocation2 + $0xfd]] }
 0x1af   : > { %v1440_v32 = vadd.f32 %v1438_v26, %v1412_v12  ;;  %v1449_v39 = vmul.f32 %v1447_v25, %v1445_v47  ;;  %v1455_v54 = vmul.f32 %v1453_v9, %v1445_v47  ;;  %v1461_v38 = vmul.f32 %v1459_v58, %v1445_v47  ;;  %2788 = vrot.lane.b32.xlu1 %v5533_v46, %s6673_s17 }
 0x1b0   : > { %v1467_v53 = vmul.f32 %v1465_v28, %v1445_v47  ;;  %v1448_v40 = vmul.f32 %v1447_v25, %v1443_v8  ;;  %v1454_v27 = vmul.f32 %v1453_v9, %v1443_v8  ;;  %v1460_v1 = vmul.f32 %v1459_v58, %v1443_v8 }
 0x1b1   : > { %v1466_v43 = vmul.f32 %v1465_v28, %v1443_v8  ;;  %v1451_v59 = vadd.f32 %v1449_v39, %v1423_v19  ;;  %v1457_v48 = vadd.f32 %v1455_v54, %v1429_v34  ;;  %v1463_v41 = vadd.f32 %v1461_v38, %v1435_v16 }
 0x1b2   : > { %v1469_v37 = vadd.f32 %v1467_v53, %v1441_v57  ;;  %v1450_v45 = vadd.f32 %v1448_v40, %v1422_v60  ;;  %v1456_v29 = vadd.f32 %v1454_v27, %v1428_v18  ;;  %v1462_v61 = vadd.f32 %v1460_v1, %v1434_v52  ;;  %2758 = vrot.lane.b32.xlu0 %v5548_v17, %s6663_s6  ;;  %v1529_v38 = vpop.permute.xlu1 %1528 }
 0x1b3   : > { %v1468_v55 = vadd.f32 %v1466_v43, %v1440_v32  ;;  %v1475_v10 = vstv %s5520_s19  ;;  %v1481_v44 = vstv %s5522_s3  ;;  %v1487_v22 = vstv %s5526_s16  ;;  %v1527_v43 = vpop.permute.xlu0 %1526  ;;  %s5642_s19 = sld [smem:[#allocation2 + $0x161]]  ;;  %s5652_s3 = sld [smem:[#allocation2 + $0x9a]] }
 0x1b4   : > { %v1493_v63 = vstv %s5528_s14  ;;  %v1477_v51 = vmul.f32 %v1475_v10, %v1473_v14  ;;  %v1483_v23 = vmul.f32 %v1481_v44, %v1473_v14  ;;  %v1489_v42 = vmul.f32 %v1487_v22, %v1473_v14  ;;  %s5654_s16 = sld [smem:[#allocation2 + $0xfe]]  ;;  %s5656_s14 = sld [smem:[#allocation2 + $0x162]] }
 0x1b5   : > { %v1495_v49 = vmul.f32 %v1493_v63, %v1473_v14  ;;  %v1476_v6 = vmul.f32 %v1475_v10, %v1471_v11  ;;  %v1482_v3 = vmul.f32 %v1481_v44, %v1471_v11  ;;  %v1488_v24 = vmul.f32 %v1487_v22, %v1471_v11  ;;  %v3595_v14 = vld [vmem:[%s6666_s18 + $0x38] sm:$0xff]  ;;  %v3596_v10 = vld [vmem:[%s6666_s18 + $0x30] sm:$0xff] }
 0x1b6   : > { %v1494_v50 = vmul.f32 %v1493_v63, %v1471_v11  ;;  %v1479_v0 = vadd.f32 %v1477_v51, %v1451_v59  ;;  %v1485_v4 = vadd.f32 %v1483_v23, %v1457_v48  ;;  %v1491_v20 = vadd.f32 %v1489_v42, %v1463_v41  ;;  %2786 = vrot.lane.b32.xlu0 %v5548_v17, %s6673_s17  ;;  %v5614_v23 = vld [vmem:[%s6666_s18 + $0x4c] sm:$0xff] }
 0x1b7   : > { %v1497_v2 = vadd.f32 %v1495_v49, %v1469_v37  ;;  %v1478_v26 = vadd.f32 %v1476_v6, %v1450_v45  ;;  %v1484_v31 = vadd.f32 %v1482_v3, %v1456_v29  ;;  %v1490_v35 = vadd.f32 %v1488_v24, %v1462_v61 }
 0x1b8   : > { %v1496_v30 = vadd.f32 %v1494_v50, %v1468_v55  ;;  %v1503_v5 = vstv %s5541_s20  ;;  %v1509_v21 = vstv %s5543_s29  ;;  %v1515_v36 = vstv %s5550_s28  ;;  %v5610_v55 = vld [vmem:[%s6666_s18 + $0x54] sm:$0xff]  ;;  %s5660_s20 = sld [smem:[#allocation2 + $0x37]]  ;;  %s5662_s29 = sld [smem:[#allocation2 + $0x9b]] }
 0x1b9   : > { %v1521_v15 = vstv %s5552_s13  ;;  %v1505_v47 = vmul.f32 %v1503_v5, %v1501_v62  ;;  %v1511_v19 = vmul.f32 %v1509_v21, %v1501_v62  ;;  %v1517_v34 = vmul.f32 %v1515_v36, %v1501_v62  ;;  %2844 = vrot.lane.b32.xlu1 %v5610_v55, %s6676_s5  ;;  %s5664_s28 = sld [smem:[#allocation2 + $0xff]]  ;;  %s5682_s13 = sld [smem:[#allocation2 + $0x9c]] }
 0x1ba   : > { %v1523_v16 = vmul.f32 %v1521_v15, %v1501_v62  ;;  %v1504_v57 = vmul.f32 %v1503_v5, %v1499_v33  ;;  %v1510_v8 = vmul.f32 %v1509_v21, %v1499_v33  ;;  %v1516_v7 = vmul.f32 %v1515_v36, %v1499_v33  ;;  %2842 = vrot.lane.b32.xlu0 %v5614_v23, %s6676_s5  ;;  %s5634_s5 = sld [smem:[#allocation2 + $0x35]] }
 0x1bb   : > { %v1522_v56 = vmul.f32 %v1521_v15, %v1499_v33  ;;  %v1507_v13 = vadd.f32 %v1505_v47, %v1479_v0  ;;  %v1513_v12 = vadd.f32 %v1511_v19, %v1485_v4  ;;  %v1519_v25 = vadd.f32 %v1517_v34, %v1491_v20  ;;  %v1585_v4 = vpop.permute.xlu1 %1584 }
 0x1bc   : > { %v1525_v9 = vadd.f32 %v1523_v16, %v1497_v2  ;;  %v1506_v58 = vadd.f32 %v1504_v57, %v1478_v26  ;;  %v1512_v28 = vadd.f32 %v1510_v8, %v1484_v31  ;;  %v1518_v60 = vadd.f32 %v1516_v7, %v1490_v35  ;;  %v1583_v26 = vpop.permute.xlu0 %1582 }
 0x1bd   : > { %v1524_v18 = vadd.f32 %v1522_v56, %v1496_v30  ;;  %v1531_v52 = vstv %s5560_s8  ;;  %v1537_v32 = vstv %s5562_s27  ;;  %v1543_v39 = vstv %s5564_s23  ;;  %2872 = vrot.lane.b32.xlu1 %v5610_v55, %s6653_s21  ;;  %s5688_s8 = sld [smem:[#allocation2 + $0x100]]  ;;  %s5690_s27 = sld [smem:[#allocation2 + $0x164]] }
 0x1be   : > { %v1549_v54 = vstv %s5566_s9  ;;  %v1559_v53 = vstv %s5570_s1  ;;  %v1565_v40 = vstv %s5572_s26  ;;  %v1571_v27 = vstv %s5574_s11  ;;  %s5694_s23 = sld [smem:[#allocation2 + $0x39]]  ;;  %s5696_s9 = sld [smem:[#allocation2 + $0x9d]] }
 0x1bf   : > { %v1577_v1 = vstv %s5576_s0  ;;  %v1561_v59 = vmul.f32 %v3595_v14, %v1559_v53  ;;  %v1567_v48 = vmul.f32 %v3595_v14, %v1565_v40  ;;  %v1573_v41 = vmul.f32 %v3595_v14, %v1571_v27  ;;  %2870 = vrot.lane.b32.xlu0 %v5614_v23, %s6653_s21  ;;  %s5650_s21 = sld [smem:[#allocation2 + $0x36]]  ;;  %s5698_s1 = sld [smem:[#allocation2 + $0x101]] }
 0x1c0   : > { %v1579_v37 = vmul.f32 %v3595_v14, %v1577_v1  ;;  %v1533_v11 = vmul.f32 %v1531_v52, %v1529_v38  ;;  %v1539_v45 = vmul.f32 %v1537_v32, %v1529_v38  ;;  %v1545_v29 = vmul.f32 %v1543_v39, %v1529_v38  ;;  %s5700_s26 = sld [smem:[#allocation2 + $0x165]]  ;;  %s5706_s11 = sld [smem:[#allocation2 + $0x3a]] }
 0x1c1   : > { %v1551_v61 = vmul.f32 %v1549_v54, %v1529_v38  ;;  %v1560_v44 = vmul.f32 %v3596_v10, %v1559_v53  ;;  %v1566_v22 = vmul.f32 %v3596_v10, %v1565_v40  ;;  %v1572_v63 = vmul.f32 %v3596_v10, %v1571_v27  ;;  %2900 = vrot.lane.b32.xlu1 %v5610_v55, %s6663_s6  ;;  %s5708_s0 = sld [smem:[#allocation2 + $0x9e]] }
 0x1c2   : > { %v1578_v51 = vmul.f32 %v3596_v10, %v1577_v1  ;;  %v1535_v42 = vadd.f32 %v1533_v11, %v1507_v13  ;;  %v1541_v49 = vadd.f32 %v1539_v45, %v1513_v12  ;;  %v1547_v6 = vadd.f32 %v1545_v29, %v1519_v25 }
 0x1c3   : > { %v1553_v46 = vadd.f32 %v1551_v61, %v1525_v9  ;;  %v1532_v3 = vmul.f32 %v1531_v52, %v1527_v43  ;;  %v1538_v24 = vmul.f32 %v1537_v32, %v1527_v43  ;;  %v1544_v50 = vmul.f32 %v1543_v39, %v1527_v43  ;;  %v1611_v32 = vpop.permute.xlu0 %1610  ;;  %2898 = vrot.lane.b32.xlu0 %v5614_v23, %s6663_s6  ;;  %s5666_s6 = sld [smem:[#allocation2 + $0x163]] }
 0x1c4   : > { %v1550_v0 = vmul.f32 %v1549_v54, %v1527_v43  ;;  %v1563_v17 = vadd.f32 %v1561_v59, %v1535_v42  ;;  %v1569_v20 = vadd.f32 %v1567_v48, %v1541_v49  ;;  %v1575_v2 = vadd.f32 %v1573_v41, %v1547_v6 }
 0x1c5   : > { %v1581_v62 = vadd.f32 %v1579_v37, %v1553_v46  ;;  %v1534_v31 = vadd.f32 %v1532_v3, %v1506_v58  ;;  %v1540_v35 = vadd.f32 %v1538_v24, %v1512_v28  ;;  %v1546_v30 = vadd.f32 %v1544_v50, %v1518_v60  ;;  %v1613_v58 = vpop.permute.xlu1 %1612  ;;  %2928 = vrot.lane.b32.xlu1 %v5610_v55, %s6673_s17 }
 0x1c6   : > { %v1552_v33 = vadd.f32 %v1550_v0, %v1524_v18  ;;  %v1587_v5 = vstv %s5592_s4  ;;  %v1593_v21 = vstv %s5594_s2  ;;  %v1599_v36 = vstv %s5600_s7  ;;  %s5710_s4 = sld [smem:[#allocation2 + $0x102]]  ;;  %s5712_s2 = sld [smem:[#allocation2 + $0x166]] }
 0x1c7   : > { %v1605_v15 = vstv %s5602_s24  ;;  %v1562_v47 = vadd.f32 %v1560_v44, %v1534_v31  ;;  %v1568_v19 = vadd.f32 %v1566_v22, %v1540_v35  ;;  %v1574_v34 = vadd.f32 %v1572_v63, %v1546_v30  ;;  %v1639_v46 = vpop.permute.xlu0 %1638  ;;  %2926 = vrot.lane.b32.xlu0 %v5614_v23, %s6673_s17  ;;  %s5680_s17 = sld [smem:[#allocation2 + $0x38]]  ;;  %s5718_s7 = sld [smem:[#allocation2 + $0x3b]] }
 0x1c8   : > { %v1580_v16 = vadd.f32 %v1578_v51, %v1552_v33  ;;  %v1589_v57 = vmul.f32 %v1587_v5, %v1585_v4  ;;  %v1595_v8 = vmul.f32 %v1593_v21, %v1585_v4  ;;  %v1601_v7 = vmul.f32 %v1599_v36, %v1585_v4  ;;  %s5720_s24 = sld [smem:[#allocation2 + $0x9f]] }
 0x1c9   : > { %v1607_v56 = vmul.f32 %v1605_v15, %v1585_v4  ;;  %v1588_v13 = vmul.f32 %v1587_v5, %v1583_v26  ;;  %v1594_v12 = vmul.f32 %v1593_v21, %v1583_v26  ;;  %v1600_v25 = vmul.f32 %v1599_v36, %v1583_v26  ;;  %v1641_v63 = vpop.permute.xlu1 %1640 }
 0x1ca   : > { %v1606_v9 = vmul.f32 %v1605_v15, %v1583_v26  ;;  %v1591_v28 = vadd.f32 %v1589_v57, %v1563_v17  ;;  %v1597_v60 = vadd.f32 %v1595_v8, %v1569_v20  ;;  %v1603_v18 = vadd.f32 %v1601_v7, %v1575_v2 }
 0x1cb   : > { %v1609_v52 = vadd.f32 %v1607_v56, %v1581_v62  ;;  %v1590_v39 = vadd.f32 %v1588_v13, %v1562_v47  ;;  %v1596_v54 = vadd.f32 %v1594_v12, %v1568_v19  ;;  %v1602_v38 = vadd.f32 %v1600_v25, %v1574_v34  ;;  %v1667_v12 = vpop.permute.xlu0 %1666  ;;  %v3597_v25 = vld [vmem:[%s6666_s18 + $0x39] sm:$0xff] }
 0x1cc   : > { %v1608_v53 = vadd.f32 %v1606_v9, %v1580_v16  ;;  %v1615_v40 = vstv %s5616_s15  ;;  %v1621_v27 = vstv %s5618_s22  ;;  %v1627_v1 = vstv %s5622_s30  ;;  %s5722_s15 = sld [smem:[#allocation2 + $0x103]]  ;;  %s5724_s22 = sld [smem:[#allocation2 + $0x167]] }
 0x1cd   : > { %v1633_v43 = vstv %s5624_s10  ;;  %v1617_v14 = vmul.f32 %v1615_v40, %v1613_v58  ;;  %v1623_v59 = vmul.f32 %v1621_v27, %v1613_v58  ;;  %v1629_v48 = vmul.f32 %v1627_v1, %v1613_v58  ;;  %v1669_v57 = vpop.permute.xlu1 %1668  ;;  %s5726_s30 = sld [smem:[#allocation2 + $0x3c]]  ;;  %s5728_s10 = sld [smem:[#allocation2 + $0xa0]] }
 0x1ce   : > { %v1635_v41 = vmul.f32 %v1633_v43, %v1613_v58  ;;  %v1616_v37 = vmul.f32 %v1615_v40, %v1611_v32  ;;  %v1622_v11 = vmul.f32 %v1621_v27, %v1611_v32  ;;  %v1628_v45 = vmul.f32 %v1627_v1, %v1611_v32 }
 0x1cf   : > { %v1634_v29 = vmul.f32 %v1633_v43, %v1611_v32  ;;  %v1619_v61 = vadd.f32 %v1617_v14, %v1591_v28  ;;  %v1625_v10 = vadd.f32 %v1623_v59, %v1597_v60  ;;  %v1631_v44 = vadd.f32 %v1629_v48, %v1603_v18 }
 0x1d0   : > { %v1637_v22 = vadd.f32 %v1635_v41, %v1609_v52  ;;  %v1618_v51 = vadd.f32 %v1616_v37, %v1590_v39  ;;  %v1624_v42 = vadd.f32 %v1622_v11, %v1596_v54  ;;  %v1630_v49 = vadd.f32 %v1628_v45, %v1602_v38  ;;  %v3598_v54 = vld [vmem:[%s6666_s18 + $0x31] sm:$0xff] }
 0x1d1   : > { %v1636_v6 = vadd.f32 %v1634_v29, %v1608_v53  ;;  %v1643_v3 = vstv %s5634_s5  ;;  %v1649_v24 = vstv %s5636_s12  ;;  %v1655_v50 = vstv %s5640_s25  ;;  %v1725_v45 = vpop.permute.xlu1 %1724  ;;  %s5730_s5 = sld [smem:[#allocation2 + $0x104]]  ;;  %s5732_s12 = sld [smem:[#allocation2 + $0x168]] }
 0x1d2   : > { %v1661_v0 = vstv %s5642_s19  ;;  %v1645_v4 = vmul.f32 %v1643_v3, %v1641_v63  ;;  %v1651_v17 = vmul.f32 %v1649_v24, %v1641_v63  ;;  %v1657_v20 = vmul.f32 %v1655_v50, %v1641_v63  ;;  %s5742_s25 = sld [smem:[#allocation2 + $0x3d]]  ;;  %s5744_s19 = sld [smem:[#allocation2 + $0xa1]] }
 0x1d3   : > { %v1663_v2 = vmul.f32 %v1661_v0, %v1641_v63  ;;  %v1644_v55 = vmul.f32 %v1643_v3, %v1639_v46  ;;  %v1650_v62 = vmul.f32 %v1649_v24, %v1639_v46  ;;  %v1656_v26 = vmul.f32 %v1655_v50, %v1639_v46 }
 0x1d4   : > { %v1662_v31 = vmul.f32 %v1661_v0, %v1639_v46  ;;  %v1647_v35 = vadd.f32 %v1645_v4, %v1619_v61  ;;  %v1653_v30 = vadd.f32 %v1651_v17, %v1625_v10  ;;  %v1659_v33 = vadd.f32 %v1657_v20, %v1631_v44 }
 0x1d5   : > { %v1665_v5 = vadd.f32 %v1663_v2, %v1637_v22  ;;  %v1646_v21 = vadd.f32 %v1644_v55, %v1618_v51  ;;  %v1652_v36 = vadd.f32 %v1650_v62, %v1624_v42  ;;  %v1658_v15 = vadd.f32 %v1656_v26, %v1630_v49  ;;  %v1723_v22 = vpop.permute.xlu0 %1722 }
 0x1d6   : > { %v1664_v47 = vadd.f32 %v1662_v31, %v1636_v6  ;;  %v1671_v19 = vstv %s5650_s21  ;;  %v1677_v23 = vstv %s5652_s3  ;;  %v1683_v34 = vstv %s5654_s16  ;;  %s5750_s21 = sld [smem:[#allocation2 + $0x105]]  ;;  %s5752_s3 = sld [smem:[#allocation2 + $0x169]] }
 0x1d7   : > { %v1689_v16 = vstv %s5656_s14  ;;  %v1699_v8 = vstv %s5660_s20  ;;  %v1705_v7 = vstv %s5662_s29  ;;  %v1711_v56 = vstv %s5664_s28  ;;  %s5756_s16 = sld [smem:[#allocation2 + $0x3e]]  ;;  %s5758_s14 = sld [smem:[#allocation2 + $0xa2]] }
 0x1d8   : > { %v1717_v13 = vstv %s5666_s6  ;;  %v1701_v9 = vmul.f32 %v3597_v25, %v1699_v8  ;;  %v1707_v58 = vmul.f32 %v3597_v25, %v1705_v7  ;;  %v1713_v28 = vmul.f32 %v3597_v25, %v1711_v56  ;;  %s5760_s20 = sld [smem:[#allocation2 + $0x106]]  ;;  %s5762_s29 = sld [smem:[#allocation2 + $0x16a]] }
 0x1d9   : > { %v1719_v60 = vmul.f32 %v3597_v25, %v1717_v13  ;;  %v1673_v18 = vmul.f32 %v1671_v19, %v1669_v57  ;;  %v1679_v52 = vmul.f32 %v1677_v23, %v1669_v57  ;;  %v1685_v32 = vmul.f32 %v1683_v34, %v1669_v57  ;;  %s5768_s28 = sld [smem:[#allocation2 + $0x3f]]  ;;  %s5770_s6 = sld [smem:[#allocation2 + $0xa3]] }
 0x1da   : > { %v1691_v39 = vmul.f32 %v1689_v16, %v1669_v57  ;;  %v1700_v38 = vmul.f32 %v3598_v54, %v1699_v8  ;;  %v1706_v53 = vmul.f32 %v3598_v54, %v1705_v7  ;;  %v1712_v40 = vmul.f32 %v3598_v54, %v1711_v56 }
 0x1db   : > { %v1718_v27 = vmul.f32 %v3598_v54, %v1717_v13  ;;  %v1675_v1 = vadd.f32 %v1673_v18, %v1647_v35  ;;  %v1681_v43 = vadd.f32 %v1679_v52, %v1653_v30  ;;  %v1687_v14 = vadd.f32 %v1685_v32, %v1659_v33  ;;  %v1753_v33 = vpop.permute.xlu1 %1752 }
 0x1dc   : > { %v1693_v59 = vadd.f32 %v1691_v39, %v1665_v5  ;;  %v1672_v48 = vmul.f32 %v1671_v19, %v1667_v12  ;;  %v1678_v41 = vmul.f32 %v1677_v23, %v1667_v12  ;;  %v1684_v37 = vmul.f32 %v1683_v34, %v1667_v12 }
 0x1dd   : > { %v1690_v11 = vmul.f32 %v1689_v16, %v1667_v12  ;;  %v1703_v29 = vadd.f32 %v1701_v9, %v1675_v1  ;;  %v1709_v61 = vadd.f32 %v1707_v58, %v1681_v43  ;;  %v1715_v10 = vadd.f32 %v1713_v28, %v1687_v14 }
 0x1de   : > { %v1721_v44 = vadd.f32 %v1719_v60, %v1693_v59  ;;  %v1674_v63 = vadd.f32 %v1672_v48, %v1646_v21  ;;  %v1680_v51 = vadd.f32 %v1678_v41, %v1652_v36  ;;  %v1686_v42 = vadd.f32 %v1684_v37, %v1658_v15 }
 0x1df   : > { %v1692_v49 = vadd.f32 %v1690_v11, %v1664_v47  ;;  %v1727_v6 = vstv %s5680_s17  ;;  %v1733_v46 = vstv %s5682_s13  ;;  %v1739_v3 = vstv %s5688_s8  ;;  %v1751_v47 = vpop.permute.xlu0 %1750  ;;  %s5772_s17 = sld [smem:[#allocation2 + $0x107]]  ;;  %s5774_s13 = sld [smem:[#allocation2 + $0x16b]] }
 0x1e0   : > { %v1745_v24 = vstv %s5690_s27  ;;  %v1702_v50 = vadd.f32 %v1700_v38, %v1674_v63  ;;  %v1708_v0 = vadd.f32 %v1706_v53, %v1680_v51  ;;  %v1714_v4 = vadd.f32 %v1712_v40, %v1686_v42  ;;  %v1781_v38 = vpop.permute.xlu1 %1780  ;;  %s5780_s8 = sld [smem:[#allocation2 + $0x40]]  ;;  %s5782_s27 = sld [smem:[#allocation2 + $0xa4]] }
 0x1e1   : > { %v1720_v17 = vadd.f32 %v1718_v27, %v1692_v49  ;;  %v1729_v20 = vmul.f32 %v1727_v6, %v1725_v45  ;;  %v1735_v2 = vmul.f32 %v1733_v46, %v1725_v45  ;;  %v1741_v55 = vmul.f32 %v1739_v3, %v1725_v45 }
 0x1e2   : > { %v1747_v62 = vmul.f32 %v1745_v24, %v1725_v45  ;;  %v1728_v26 = vmul.f32 %v1727_v6, %v1723_v22  ;;  %v1734_v31 = vmul.f32 %v1733_v46, %v1723_v22  ;;  %v1740_v35 = vmul.f32 %v1739_v3, %v1723_v22 }
 0x1e3   : > { %v1746_v30 = vmul.f32 %v1745_v24, %v1723_v22  ;;  %v1731_v5 = vadd.f32 %v1729_v20, %v1703_v29  ;;  %v1737_v21 = vadd.f32 %v1735_v2, %v1709_v61  ;;  %v1743_v36 = vadd.f32 %v1741_v55, %v1715_v10  ;;  %v1779_v43 = vpop.permute.xlu0 %1778 }
 0x1e4   : > { %v1749_v15 = vadd.f32 %v1747_v62, %v1721_v44  ;;  %v1730_v19 = vadd.f32 %v1728_v26, %v1702_v50  ;;  %v1736_v23 = vadd.f32 %v1734_v31, %v1708_v0  ;;  %v1742_v34 = vadd.f32 %v1740_v35, %v1714_v4  ;;  %v1809_v50 = vpop.permute.xlu1 %1808  ;;  %v3599_v35 = vld [vmem:[%s6666_s18 + $0x3a] sm:$0xff] }
 0x1e5   : > { %v1748_v16 = vadd.f32 %v1746_v30, %v1720_v17  ;;  %v1755_v57 = vstv %s5694_s23  ;;  %v1761_v8 = vstv %s5696_s9  ;;  %v1767_v7 = vstv %s5698_s1  ;;  %s5784_s23 = sld [smem:[#allocation2 + $0x108]]  ;;  %s5786_s9 = sld [smem:[#allocation2 + $0x16c]] }
 0x1e6   : > { %v1773_v56 = vstv %s5700_s26  ;;  %v1757_v13 = vmul.f32 %v1755_v57, %v1753_v33  ;;  %v1763_v12 = vmul.f32 %v1761_v8, %v1753_v33  ;;  %v1769_v25 = vmul.f32 %v1767_v7, %v1753_v33  ;;  %s5792_s1 = sld [smem:[#allocation2 + $0x41]]  ;;  %s5794_s26 = sld [smem:[#allocation2 + $0xa5]] }
 0x1e7   : > { %v1775_v9 = vmul.f32 %v1773_v56, %v1753_v33  ;;  %v1756_v58 = vmul.f32 %v1755_v57, %v1751_v47  ;;  %v1762_v28 = vmul.f32 %v1761_v8, %v1751_v47  ;;  %v1768_v60 = vmul.f32 %v1767_v7, %v1751_v47  ;;  %v1807_v2 = vpop.permute.xlu0 %1806 }
 0x1e8   : > { %v1774_v18 = vmul.f32 %v1773_v56, %v1751_v47  ;;  %v1759_v52 = vadd.f32 %v1757_v13, %v1731_v5  ;;  %v1765_v32 = vadd.f32 %v1763_v12, %v1737_v21  ;;  %v1771_v39 = vadd.f32 %v1769_v25, %v1743_v36  ;;  %v1865_v25 = vpop.permute.xlu1 %1864 }
 0x1e9   : > { %v1777_v54 = vadd.f32 %v1775_v9, %v1749_v15  ;;  %v1758_v53 = vadd.f32 %v1756_v58, %v1730_v19  ;;  %v1764_v40 = vadd.f32 %v1762_v28, %v1736_v23  ;;  %v1770_v27 = vadd.f32 %v1768_v60, %v1742_v34  ;;  %v3600_v23 = vld [vmem:[%s6666_s18 + $0x32] sm:$0xff] }
 0x1ea   : > { %v1776_v1 = vadd.f32 %v1774_v18, %v1748_v16  ;;  %v1783_v14 = vstv %s5706_s11  ;;  %v1789_v59 = vstv %s5708_s0  ;;  %v1795_v48 = vstv %s5710_s4  ;;  %s5796_s11 = sld [smem:[#allocation2 + $0x109]]  ;;  %s5798_s0 = sld [smem:[#allocation2 + $0x16d]] }
 0x1eb   : > { %v1801_v41 = vstv %s5712_s2  ;;  %v1785_v37 = vmul.f32 %v1783_v14, %v1781_v38  ;;  %v1791_v11 = vmul.f32 %v1789_v59, %v1781_v38  ;;  %v1797_v45 = vmul.f32 %v1795_v48, %v1781_v38  ;;  %v1863_v18 = vpop.permute.xlu0 %1862  ;;  %s5800_s4 = sld [smem:[#allocation2 + $0x42]]  ;;  %s5802_s2 = sld [smem:[#allocation2 + $0xa6]] }
 0x1ec   : > { %v1803_v29 = vmul.f32 %v1801_v41, %v1781_v38  ;;  %v1784_v61 = vmul.f32 %v1783_v14, %v1779_v43  ;;  %v1790_v10 = vmul.f32 %v1789_v59, %v1779_v43  ;;  %v1796_v44 = vmul.f32 %v1795_v48, %v1779_v43 }
 0x1ed   : > { %v1802_v22 = vmul.f32 %v1801_v41, %v1779_v43  ;;  %v1787_v63 = vadd.f32 %v1785_v37, %v1759_v52  ;;  %v1793_v51 = vadd.f32 %v1791_v11, %v1765_v32  ;;  %v1799_v42 = vadd.f32 %v1797_v45, %v1771_v39 }
 0x1ee   : > { %v1805_v49 = vadd.f32 %v1803_v29, %v1777_v54  ;;  %v1786_v6 = vadd.f32 %v1784_v61, %v1758_v53  ;;  %v1792_v46 = vadd.f32 %v1790_v10, %v1764_v40  ;;  %v1798_v3 = vadd.f32 %v1796_v44, %v1770_v27  ;;  %v1893_v44 = vpop.permute.xlu1 %1892 }
 0x1ef   : > { %v1804_v24 = vadd.f32 %v1802_v22, %v1776_v1  ;;  %v1811_v0 = vstv %s5718_s7  ;;  %v1817_v4 = vstv %s5720_s24  ;;  %v1823_v17 = vstv %s5722_s15  ;;  %s5804_s7 = sld [smem:[#allocation2 + $0x10a]]  ;;  %s5806_s24 = sld [smem:[#allocation2 + $0x16e]] }
 0x1f0   : > { %v1829_v20 = vstv %s5724_s22  ;;  %v1839_v55 = vstv %s5726_s30  ;;  %v1845_v62 = vstv %s5728_s10  ;;  %v1851_v26 = vstv %s5730_s5  ;;  %s5816_s15 = sld [smem:[#allocation2 + $0x43]]  ;;  %s5818_s22 = sld [smem:[#allocation2 + $0xa7]] }
 0x1f1   : > { %v1857_v31 = vstv %s5732_s12  ;;  %v1841_v30 = vmul.f32 %v3599_v35, %v1839_v55  ;;  %v1847_v33 = vmul.f32 %v3599_v35, %v1845_v62  ;;  %v1853_v5 = vmul.f32 %v3599_v35, %v1851_v26  ;;  %s5821_s30 = sld [smem:[#allocation2 + $0x10b]]  ;;  %s5823_s10 = sld [smem:[#allocation2 + $0x16f]] }
 0x1f2   : > { %v1859_v21 = vmul.f32 %v3599_v35, %v1857_v31  ;;  %v1813_v36 = vmul.f32 %v1811_v0, %v1809_v50  ;;  %v1819_v15 = vmul.f32 %v1817_v4, %v1809_v50  ;;  %v1825_v47 = vmul.f32 %v1823_v17, %v1809_v50  ;;  %s5830_s5 = sld [smem:[#allocation2 + $0x44]]  ;;  %s5832_s12 = sld [smem:[#allocation2 + $0xa8]] }
 0x1f3   : > { %v1831_v19 = vmul.f32 %v1829_v20, %v1809_v50  ;;  %v1840_v34 = vmul.f32 %v3600_v23, %v1839_v55  ;;  %v1846_v16 = vmul.f32 %v3600_v23, %v1845_v62  ;;  %v1852_v57 = vmul.f32 %v3600_v23, %v1851_v26 }
 0x1f4   : > { %v1858_v8 = vmul.f32 %v3600_v23, %v1857_v31  ;;  %v1815_v7 = vadd.f32 %v1813_v36, %v1787_v63  ;;  %v1821_v56 = vadd.f32 %v1819_v15, %v1793_v51  ;;  %v1827_v13 = vadd.f32 %v1825_v47, %v1799_v42  ;;  %v1921_v15 = vpop.permute.xlu1 %1920 }
 0x1f5   : > { %v1833_v12 = vadd.f32 %v1831_v19, %v1805_v49  ;;  %v1812_v9 = vmul.f32 %v1811_v0, %v1807_v2  ;;  %v1818_v58 = vmul.f32 %v1817_v4, %v1807_v2  ;;  %v1824_v28 = vmul.f32 %v1823_v17, %v1807_v2  ;;  %v1891_v49 = vpop.permute.xlu0 %1890 }
 0x1f6   : > { %v1830_v60 = vmul.f32 %v1829_v20, %v1807_v2  ;;  %v1843_v52 = vadd.f32 %v1841_v30, %v1815_v7  ;;  %v1849_v32 = vadd.f32 %v1847_v33, %v1821_v56  ;;  %v1855_v39 = vadd.f32 %v1853_v5, %v1827_v13 }
 0x1f7   : > { %v1861_v54 = vadd.f32 %v1859_v21, %v1833_v12  ;;  %v1814_v38 = vadd.f32 %v1812_v9, %v1786_v6  ;;  %v1820_v53 = vadd.f32 %v1818_v58, %v1792_v46  ;;  %v1826_v40 = vadd.f32 %v1824_v28, %v1798_v3 }
 0x1f8   : > { %v1832_v27 = vadd.f32 %v1830_v60, %v1804_v24  ;;  %v1867_v1 = vstv %s5742_s25  ;;  %v1873_v43 = vstv %s5744_s19  ;;  %v1879_v14 = vstv %s5750_s21  ;;  %s5834_s25 = sld [smem:[#allocation2 + $0x10c]]  ;;  %s5836_s19 = sld [smem:[#allocation2 + $0x170]] }
 0x1f9   : > { %v1885_v59 = vstv %s5752_s3  ;;  %v1842_v48 = vadd.f32 %v1840_v34, %v1814_v38  ;;  %v1848_v41 = vadd.f32 %v1846_v16, %v1820_v53  ;;  %v1854_v37 = vadd.f32 %v1852_v57, %v1826_v40  ;;  %v1919_v16 = vpop.permute.xlu0 %1918  ;;  %s5842_s21 = sld [smem:[#allocation2 + $0x45]]  ;;  %s5844_s3 = sld [smem:[#allocation2 + $0xa9]] }
 0x1fa   : > { %v1860_v11 = vadd.f32 %v1858_v8, %v1832_v27  ;;  %v1869_v45 = vmul.f32 %v1867_v1, %v1865_v25  ;;  %v1875_v29 = vmul.f32 %v1873_v43, %v1865_v25  ;;  %v1881_v61 = vmul.f32 %v1879_v14, %v1865_v25 }
 0x1fb   : > { %v1887_v10 = vmul.f32 %v1885_v59, %v1865_v25  ;;  %v1868_v22 = vmul.f32 %v1867_v1, %v1863_v18  ;;  %v1874_v63 = vmul.f32 %v1873_v43, %v1863_v18  ;;  %v1880_v51 = vmul.f32 %v1879_v14, %v1863_v18  ;;  %v1949_v1 = vpop.permute.xlu1 %1948 }
 0x1fc   : > { %v1886_v42 = vmul.f32 %v1885_v59, %v1863_v18  ;;  %v1871_v6 = vadd.f32 %v1869_v45, %v1843_v52  ;;  %v1877_v46 = vadd.f32 %v1875_v29, %v1849_v32  ;;  %v1883_v3 = vadd.f32 %v1881_v61, %v1855_v39 }
 0x1fd   : > { %v1889_v24 = vadd.f32 %v1887_v10, %v1861_v54  ;;  %v1870_v50 = vadd.f32 %v1868_v22, %v1842_v48  ;;  %v1876_v0 = vadd.f32 %v1874_v63, %v1848_v41  ;;  %v1882_v4 = vadd.f32 %v1880_v51, %v1854_v37  ;;  %v1947_v41 = vpop.permute.xlu0 %1946 }
 0x1fe   : > { %v1888_v17 = vadd.f32 %v1886_v42, %v1860_v11  ;;  %v1895_v20 = vstv %s5756_s16  ;;  %v1901_v2 = vstv %s5758_s14  ;;  %v1907_v55 = vstv %s5760_s20  ;;  %s5846_s16 = sld [smem:[#allocation2 + $0x10d]]  ;;  %s5848_s14 = sld [smem:[#allocation2 + $0x171]] }
 0x1ff   : > { %v1913_v62 = vstv %s5762_s29  ;;  %v1897_v26 = vmul.f32 %v1895_v20, %v1893_v44  ;;  %v1903_v31 = vmul.f32 %v1901_v2, %v1893_v44  ;;  %v1909_v35 = vmul.f32 %v1907_v55, %v1893_v44  ;;  %s5854_s20 = sld [smem:[#allocation2 + $0x46]]  ;;  %s5856_s29 = sld [smem:[#allocation2 + $0xaa]] }
 0x200   : > { %v1915_v30 = vmul.f32 %v1913_v62, %v1893_v44  ;;  %v1896_v33 = vmul.f32 %v1895_v20, %v1891_v49  ;;  %v1902_v5 = vmul.f32 %v1901_v2, %v1891_v49  ;;  %v1908_v21 = vmul.f32 %v1907_v55, %v1891_v49 }
 0x201   : > { %v1914_v36 = vmul.f32 %v1913_v62, %v1891_v49  ;;  %v1899_v47 = vadd.f32 %v1897_v26, %v1871_v6  ;;  %v1905_v19 = vadd.f32 %v1903_v31, %v1877_v46  ;;  %v1911_v23 = vadd.f32 %v1909_v35, %v1883_v3  ;;  %v2005_v26 = vpop.permute.xlu1 %2004  ;;  %v3601_v31 = vld [vmem:[%s6666_s18 + $0x3b] sm:$0xff] }
 0x202   : > { %v1917_v34 = vadd.f32 %v1915_v30, %v1889_v24  ;;  %v1898_v57 = vadd.f32 %v1896_v33, %v1870_v50  ;;  %v1904_v8 = vadd.f32 %v1902_v5, %v1876_v0  ;;  %v1910_v7 = vadd.f32 %v1908_v21, %v1882_v4  ;;  %v2003_v21 = vpop.permute.xlu0 %2002 }
 0x203   : > { %v1916_v56 = vadd.f32 %v1914_v36, %v1888_v17  ;;  %v1923_v13 = vstv %s5768_s28  ;;  %v1929_v12 = vstv %s5770_s6  ;;  %v1935_v25 = vstv %s5772_s17  ;;  %s5858_s28 = sld [smem:[#allocation2 + $0x10e]]  ;;  %s5860_s6 = sld [smem:[#allocation2 + $0x172]] }
 0x204   : > { %v1941_v9 = vstv %s5774_s13  ;;  %v1925_v58 = vmul.f32 %v1923_v13, %v1921_v15  ;;  %v1931_v28 = vmul.f32 %v1929_v12, %v1921_v15  ;;  %v1937_v60 = vmul.f32 %v1935_v25, %v1921_v15  ;;  %s5862_s17 = sld [smem:[#allocation2 + $0x47]]  ;;  %s5864_s13 = sld [smem:[#allocation2 + $0xab]] }
 0x205   : > { %v1943_v18 = vmul.f32 %v1941_v9, %v1921_v15  ;;  %v1924_v52 = vmul.f32 %v1923_v13, %v1919_v16  ;;  %v1930_v32 = vmul.f32 %v1929_v12, %v1919_v16  ;;  %v1936_v39 = vmul.f32 %v1935_v25, %v1919_v16  ;;  %v3602_v12 = vld [vmem:[%s6666_s18 + $0x33] sm:$0xff] }
 0x206   : > { %v1942_v54 = vmul.f32 %v1941_v9, %v1919_v16  ;;  %v1927_v38 = vadd.f32 %v1925_v58, %v1899_v47  ;;  %v1933_v53 = vadd.f32 %v1931_v28, %v1905_v19  ;;  %v1939_v40 = vadd.f32 %v1937_v60, %v1911_v23 }
 0x207   : > { %v1945_v27 = vadd.f32 %v1943_v18, %v1917_v34  ;;  %v1926_v43 = vadd.f32 %v1924_v52, %v1898_v57  ;;  %v1932_v14 = vadd.f32 %v1930_v32, %v1904_v8  ;;  %v1938_v59 = vadd.f32 %v1936_v39, %v1910_v7  ;;  %v2033_v39 = vpop.permute.xlu1 %2032 }
 0x208   : > { %v1944_v48 = vadd.f32 %v1942_v54, %v1916_v56  ;;  %v1951_v37 = vstv %s5780_s8  ;;  %v1957_v11 = vstv %s5782_s27  ;;  %v1963_v45 = vstv %s5784_s23  ;;  %s5866_s8 = sld [smem:[#allocation2 + $0x10f]]  ;;  %s5868_s27 = sld [smem:[#allocation2 + $0x173]] }
 0x209   : > { %v1969_v29 = vstv %s5786_s9  ;;  %v1953_v61 = vmul.f32 %v1951_v37, %v1949_v1  ;;  %v1959_v10 = vmul.f32 %v1957_v11, %v1949_v1  ;;  %v1965_v44 = vmul.f32 %v1963_v45, %v1949_v1  ;;  %s5878_s23 = sld [smem:[#allocation2 + $0x48]]  ;;  %s5880_s9 = sld [smem:[#allocation2 + $0xac]] }
 0x20a   : > { %v1971_v22 = vmul.f32 %v1969_v29, %v1949_v1  ;;  %v1952_v63 = vmul.f32 %v1951_v37, %v1947_v41  ;;  %v1958_v51 = vmul.f32 %v1957_v11, %v1947_v41  ;;  %v1964_v42 = vmul.f32 %v1963_v45, %v1947_v41 }
 0x20b   : > { %v1970_v49 = vmul.f32 %v1969_v29, %v1947_v41  ;;  %v1955_v6 = vadd.f32 %v1953_v61, %v1927_v38  ;;  %v1961_v46 = vadd.f32 %v1959_v10, %v1933_v53  ;;  %v1967_v3 = vadd.f32 %v1965_v44, %v1939_v40 }
 0x20c   : > { %v1973_v24 = vadd.f32 %v1971_v22, %v1945_v27  ;;  %v1954_v50 = vadd.f32 %v1952_v63, %v1926_v43  ;;  %v1960_v0 = vadd.f32 %v1958_v51, %v1932_v14  ;;  %v1966_v4 = vadd.f32 %v1964_v42, %v1938_v59  ;;  %v2031_v27 = vpop.permute.xlu0 %2030 }
 0x20d   : > { %v1972_v17 = vadd.f32 %v1970_v49, %v1944_v48  ;;  %v1979_v20 = vstv %s5792_s1  ;;  %v1985_v2 = vstv %s5794_s26  ;;  %v1991_v55 = vstv %s5796_s11  ;;  %s5883_s1 = sld [smem:[#allocation2 + $0x110]]  ;;  %s5885_s26 = sld [smem:[#allocation2 + $0x174]] }
 0x20e   : > { %v1997_v62 = vstv %s5798_s0  ;;  %v1981_v35 = vmul.f32 %v3601_v31, %v1979_v20  ;;  %v1987_v30 = vmul.f32 %v3601_v31, %v1985_v2  ;;  %v1993_v33 = vmul.f32 %v3601_v31, %v1991_v55  ;;  %s5892_s11 = sld [smem:[#allocation2 + $0x49]]  ;;  %s5894_s0 = sld [smem:[#allocation2 + $0xad]] }
 0x20f   : > { %v1999_v5 = vmul.f32 %v3601_v31, %v1997_v62  ;;  %v2007_v36 = vstv %s5800_s4  ;;  %v2013_v15 = vstv %s5802_s2  ;;  %v2019_v47 = vstv %s5804_s7  ;;  %s5896_s4 = sld [smem:[#allocation2 + $0x111]]  ;;  %s5898_s2 = sld [smem:[#allocation2 + $0x175]] }
 0x210   : > { %v2025_v19 = vstv %s5806_s24  ;;  %v1983_v23 = vadd.f32 %v1981_v35, %v1955_v6  ;;  %v1989_v34 = vadd.f32 %v1987_v30, %v1961_v46  ;;  %v1995_v16 = vadd.f32 %v1993_v33, %v1967_v3  ;;  %v2061_v3 = vpop.permute.xlu1 %2060  ;;  %s5904_s7 = sld [smem:[#allocation2 + $0x4a]]  ;;  %s5906_s24 = sld [smem:[#allocation2 + $0xae]] }
 0x211   : > { %v2001_v57 = vadd.f32 %v1999_v5, %v1973_v24  ;;  %v2009_v8 = vmul.f32 %v2007_v36, %v2005_v26  ;;  %v2015_v7 = vmul.f32 %v2013_v15, %v2005_v26  ;;  %v2021_v56 = vmul.f32 %v2019_v47, %v2005_v26 }
 0x212   : > { %v2027_v13 = vmul.f32 %v2025_v19, %v2005_v26  ;;  %v1980_v25 = vmul.f32 %v3602_v12, %v1979_v20  ;;  %v1986_v9 = vmul.f32 %v3602_v12, %v1985_v2  ;;  %v1992_v58 = vmul.f32 %v3602_v12, %v1991_v55 }
 0x213   : > { %v1998_v28 = vmul.f32 %v3602_v12, %v1997_v62  ;;  %v2011_v60 = vadd.f32 %v2009_v8, %v1983_v23  ;;  %v2017_v18 = vadd.f32 %v2015_v7, %v1989_v34  ;;  %v2023_v52 = vadd.f32 %v2021_v56, %v1995_v16 }
 0x214   : > { %v2029_v32 = vadd.f32 %v2027_v13, %v2001_v57  ;;  %v1982_v54 = vadd.f32 %v1980_v25, %v1954_v50  ;;  %v1988_v38 = vadd.f32 %v1986_v9, %v1960_v0  ;;  %v1994_v53 = vadd.f32 %v1992_v58, %v1966_v4  ;;  %v2089_v7 = vpop.permute.xlu1 %2088 }
 0x215   : > { %v2000_v40 = vadd.f32 %v1998_v28, %v1972_v17  ;;  %v2008_v1 = vmul.f32 %v2007_v36, %v2003_v21  ;;  %v2014_v43 = vmul.f32 %v2013_v15, %v2003_v21  ;;  %v2020_v14 = vmul.f32 %v2019_v47, %v2003_v21  ;;  %v2059_v17 = vpop.permute.xlu0 %2058 }
 0x216   : > { %v2026_v59 = vmul.f32 %v2025_v19, %v2003_v21  ;;  %v2035_v48 = vstv %s5816_s15  ;;  %v2041_v41 = vstv %s5818_s22  ;;  %v2047_v37 = vstv %s5821_s30  ;;  %s5908_s15 = sld [smem:[#allocation2 + $0x112]]  ;;  %s5910_s22 = sld [smem:[#allocation2 + $0x176]] }
 0x217   : > { %v2053_v11 = vstv %s5823_s10  ;;  %v2010_v45 = vadd.f32 %v2008_v1, %v1982_v54  ;;  %v2016_v29 = vadd.f32 %v2014_v43, %v1988_v38  ;;  %v2022_v61 = vadd.f32 %v2020_v14, %v1994_v53  ;;  %s5916_s30 = sld [smem:[#allocation2 + $0x4b]]  ;;  %s5918_s10 = sld [smem:[#allocation2 + $0xaf]] }
 0x218   : > { %v2028_v10 = vadd.f32 %v2026_v59, %v2000_v40  ;;  %v2037_v44 = vmul.f32 %v2035_v48, %v2033_v39  ;;  %v2043_v22 = vmul.f32 %v2041_v41, %v2033_v39  ;;  %v2049_v63 = vmul.f32 %v2047_v37, %v2033_v39 }
 0x219   : > { %v2055_v51 = vmul.f32 %v2053_v11, %v2033_v39  ;;  %v2036_v42 = vmul.f32 %v2035_v48, %v2031_v27  ;;  %v2042_v49 = vmul.f32 %v2041_v41, %v2031_v27  ;;  %v2048_v6 = vmul.f32 %v2047_v37, %v2031_v27  ;;  %v2087_v9 = vpop.permute.xlu0 %2086 }
 0x21a   : > { %v2054_v46 = vmul.f32 %v2053_v11, %v2031_v27  ;;  %v2039_v24 = vadd.f32 %v2037_v44, %v2011_v60  ;;  %v2045_v50 = vadd.f32 %v2043_v22, %v2017_v18  ;;  %v2051_v0 = vadd.f32 %v2049_v63, %v2023_v52  ;;  %v2145_v44 = vpop.permute.xlu1 %2144  ;;  %v3603_v22 = vld [vmem:[%s6666_s18 + $0x3c] sm:$0xff] }
 0x21b   : > { %v2057_v4 = vadd.f32 %v2055_v51, %v2029_v32  ;;  %v2038_v20 = vadd.f32 %v2036_v42, %v2010_v45  ;;  %v2044_v2 = vadd.f32 %v2042_v49, %v2016_v29  ;;  %v2050_v55 = vadd.f32 %v2048_v6, %v2022_v61 }
 0x21c   : > { %v2056_v62 = vadd.f32 %v2054_v46, %v2028_v10  ;;  %v2063_v26 = vstv %s5830_s5  ;;  %v2069_v31 = vstv %s5832_s12  ;;  %v2075_v35 = vstv %s5834_s25  ;;  %s5920_s5 = sld [smem:[#allocation2 + $0x113]]  ;;  %s5922_s12 = sld [smem:[#allocation2 + $0x177]] }
 0x21d   : > { %v2081_v30 = vstv %s5836_s19  ;;  %v2065_v33 = vmul.f32 %v2063_v26, %v2061_v3  ;;  %v2071_v5 = vmul.f32 %v2069_v31, %v2061_v3  ;;  %v2077_v21 = vmul.f32 %v2075_v35, %v2061_v3  ;;  %v2143_v6 = vpop.permute.xlu0 %2142  ;;  %s5924_s25 = sld [smem:[#allocation2 + $0x4c]]  ;;  %s5926_s19 = sld [smem:[#allocation2 + $0xb0]] }
 0x21e   : > { %v2083_v36 = vmul.f32 %v2081_v30, %v2061_v3  ;;  %v2064_v15 = vmul.f32 %v2063_v26, %v2059_v17  ;;  %v2070_v47 = vmul.f32 %v2069_v31, %v2059_v17  ;;  %v2076_v19 = vmul.f32 %v2075_v35, %v2059_v17  ;;  %v3604_v31 = vld [vmem:[%s6666_s18 + $0x34] sm:$0xff] }
 0x21f   : > { %v2082_v23 = vmul.f32 %v2081_v30, %v2059_v17  ;;  %v2067_v34 = vadd.f32 %v2065_v33, %v2039_v24  ;;  %v2073_v16 = vadd.f32 %v2071_v5, %v2045_v50  ;;  %v2079_v57 = vadd.f32 %v2077_v21, %v2051_v0 }
 0x220   : > { %v2085_v8 = vadd.f32 %v2083_v36, %v2057_v4  ;;  %v2066_v56 = vadd.f32 %v2064_v15, %v2038_v20  ;;  %v2072_v13 = vadd.f32 %v2070_v47, %v2044_v2  ;;  %v2078_v12 = vadd.f32 %v2076_v19, %v2050_v55  ;;  %v2173_v19 = vpop.permute.xlu1 %2172 }
 0x221   : > { %v2084_v25 = vadd.f32 %v2082_v23, %v2056_v62  ;;  %v2091_v58 = vstv %s5842_s21  ;;  %v2097_v28 = vstv %s5844_s3  ;;  %v2103_v60 = vstv %s5846_s16  ;;  %s5928_s21 = sld [smem:[#allocation2 + $0x114]]  ;;  %s5930_s3 = sld [smem:[#allocation2 + $0x178]] }
 0x222   : > { %v2109_v18 = vstv %s5848_s14  ;;  %v2093_v52 = vmul.f32 %v2091_v58, %v2089_v7  ;;  %v2099_v32 = vmul.f32 %v2097_v28, %v2089_v7  ;;  %v2105_v39 = vmul.f32 %v2103_v60, %v2089_v7  ;;  %s5940_s16 = sld [smem:[#allocation2 + $0x4d]]  ;;  %s5942_s14 = sld [smem:[#allocation2 + $0xb1]] }
 0x223   : > { %v2111_v54 = vmul.f32 %v2109_v18, %v2089_v7  ;;  %v2092_v38 = vmul.f32 %v2091_v58, %v2087_v9  ;;  %v2098_v53 = vmul.f32 %v2097_v28, %v2087_v9  ;;  %v2104_v40 = vmul.f32 %v2103_v60, %v2087_v9 }
 0x224   : > { %v2110_v27 = vmul.f32 %v2109_v18, %v2087_v9  ;;  %v2095_v1 = vadd.f32 %v2093_v52, %v2067_v34  ;;  %v2101_v43 = vadd.f32 %v2099_v32, %v2073_v16  ;;  %v2107_v14 = vadd.f32 %v2105_v39, %v2079_v57 }
 0x225   : > { %v2113_v59 = vadd.f32 %v2111_v54, %v2085_v8  ;;  %v2094_v48 = vadd.f32 %v2092_v38, %v2066_v56  ;;  %v2100_v41 = vadd.f32 %v2098_v53, %v2072_v13  ;;  %v2106_v37 = vadd.f32 %v2104_v40, %v2078_v12  ;;  %v2171_v8 = vpop.permute.xlu0 %2170 }
 0x226   : > { %v2112_v11 = vadd.f32 %v2110_v27, %v2084_v25  ;;  %v2119_v45 = vstv %s5854_s20  ;;  %v2125_v29 = vstv %s5856_s29  ;;  %v2131_v61 = vstv %s5858_s28  ;;  %s5945_s20 = sld [smem:[#allocation2 + $0x115]]  ;;  %s5947_s29 = sld [smem:[#allocation2 + $0x179]] }
 0x227   : > { %v2137_v10 = vstv %s5860_s6  ;;  %v2121_v63 = vmul.f32 %v3603_v22, %v2119_v45  ;;  %v2127_v51 = vmul.f32 %v3603_v22, %v2125_v29  ;;  %v2133_v42 = vmul.f32 %v3603_v22, %v2131_v61  ;;  %s5954_s28 = sld [smem:[#allocation2 + $0x4e]]  ;;  %s5956_s6 = sld [smem:[#allocation2 + $0xb2]] }
 0x228   : > { %v2139_v49 = vmul.f32 %v3603_v22, %v2137_v10  ;;  %v2147_v46 = vstv %s5862_s17  ;;  %v2153_v3 = vstv %s5864_s13  ;;  %v2159_v24 = vstv %s5866_s8  ;;  %s5958_s17 = sld [smem:[#allocation2 + $0x116]]  ;;  %s5960_s13 = sld [smem:[#allocation2 + $0x17a]] }
 0x229   : > { %v2165_v50 = vstv %s5868_s27  ;;  %v2123_v0 = vadd.f32 %v2121_v63, %v2095_v1  ;;  %v2129_v4 = vadd.f32 %v2127_v51, %v2101_v43  ;;  %v2135_v17 = vadd.f32 %v2133_v42, %v2107_v14  ;;  %v2201_v14 = vpop.permute.xlu1 %2200  ;;  %s5966_s8 = sld [smem:[#allocation2 + $0x4f]]  ;;  %s5968_s27 = sld [smem:[#allocation2 + $0xb3]] }
 0x22a   : > { %v2141_v20 = vadd.f32 %v2139_v49, %v2113_v59  ;;  %v2149_v2 = vmul.f32 %v2147_v46, %v2145_v44  ;;  %v2155_v55 = vmul.f32 %v2153_v3, %v2145_v44  ;;  %v2161_v62 = vmul.f32 %v2159_v24, %v2145_v44 }
 0x22b   : > { %v2167_v26 = vmul.f32 %v2165_v50, %v2145_v44  ;;  %v2120_v35 = vmul.f32 %v3604_v31, %v2119_v45  ;;  %v2126_v30 = vmul.f32 %v3604_v31, %v2125_v29  ;;  %v2132_v33 = vmul.f32 %v3604_v31, %v2131_v61 }
 0x22c   : > { %v2138_v5 = vmul.f32 %v3604_v31, %v2137_v10  ;;  %v2151_v21 = vadd.f32 %v2149_v2, %v2123_v0  ;;  %v2157_v36 = vadd.f32 %v2155_v55, %v2129_v4  ;;  %v2163_v15 = vadd.f32 %v2161_v62, %v2135_v17 }
 0x22d   : > { %v2169_v47 = vadd.f32 %v2167_v26, %v2141_v20  ;;  %v2122_v23 = vadd.f32 %v2120_v35, %v2094_v48  ;;  %v2128_v34 = vadd.f32 %v2126_v30, %v2100_v41  ;;  %v2134_v16 = vadd.f32 %v2132_v33, %v2106_v37  ;;  %v2229_v55 = vpop.permute.xlu1 %2228 }
 0x22e   : > { %v2140_v57 = vadd.f32 %v2138_v5, %v2112_v11  ;;  %v2148_v7 = vmul.f32 %v2147_v46, %v2143_v6  ;;  %v2154_v56 = vmul.f32 %v2153_v3, %v2143_v6  ;;  %v2160_v13 = vmul.f32 %v2159_v24, %v2143_v6  ;;  %v2199_v11 = vpop.permute.xlu0 %2198 }
 0x22f   : > { %v2166_v12 = vmul.f32 %v2165_v50, %v2143_v6  ;;  %v2175_v25 = vstv %s5878_s23  ;;  %v2181_v9 = vstv %s5880_s9  ;;  %v2187_v58 = vstv %s5883_s1  ;;  %s5970_s23 = sld [smem:[#allocation2 + $0x117]]  ;;  %s5972_s9 = sld [smem:[#allocation2 + $0x17b]] }
 0x230   : > { %v2193_v28 = vstv %s5885_s26  ;;  %v2150_v60 = vadd.f32 %v2148_v7, %v2122_v23  ;;  %v2156_v18 = vadd.f32 %v2154_v56, %v2128_v34  ;;  %v2162_v52 = vadd.f32 %v2160_v13, %v2134_v16  ;;  %s5978_s1 = sld [smem:[#allocation2 + $0x50]]  ;;  %s5980_s26 = sld [smem:[#allocation2 + $0xb4]] }
 0x231   : > { %v2168_v32 = vadd.f32 %v2166_v12, %v2140_v57  ;;  %v2177_v39 = vmul.f32 %v2175_v25, %v2173_v19  ;;  %v2183_v54 = vmul.f32 %v2181_v9, %v2173_v19  ;;  %v2189_v38 = vmul.f32 %v2187_v58, %v2173_v19 }
 0x232   : > { %v2195_v53 = vmul.f32 %v2193_v28, %v2173_v19  ;;  %v2176_v40 = vmul.f32 %v2175_v25, %v2171_v8  ;;  %v2182_v27 = vmul.f32 %v2181_v9, %v2171_v8  ;;  %v2188_v1 = vmul.f32 %v2187_v58, %v2171_v8  ;;  %v2227_v30 = vpop.permute.xlu0 %2226 }
 0x233   : > { %v2194_v43 = vmul.f32 %v2193_v28, %v2171_v8  ;;  %v2179_v59 = vadd.f32 %v2177_v39, %v2151_v21  ;;  %v2185_v48 = vadd.f32 %v2183_v54, %v2157_v36  ;;  %v2191_v41 = vadd.f32 %v2189_v38, %v2163_v15  ;;  %v2285_v39 = vpop.permute.xlu1 %2284  ;;  %v3605_v54 = vld [vmem:[%s6666_s18 + $0x50] sm:$0xff] }
 0x234   : > { %v2197_v37 = vadd.f32 %v2195_v53, %v2169_v47  ;;  %v2178_v45 = vadd.f32 %v2176_v40, %v2150_v60  ;;  %v2184_v29 = vadd.f32 %v2182_v27, %v2156_v18  ;;  %v2190_v61 = vadd.f32 %v2188_v1, %v2162_v52 }
 0x235   : > { %v2196_v10 = vadd.f32 %v2194_v43, %v2168_v32  ;;  %v2203_v44 = vstv %s5892_s11  ;;  %v2209_v22 = vstv %s5894_s0  ;;  %v2215_v63 = vstv %s5896_s4  ;;  %s5982_s11 = sld [smem:[#allocation2 + $0x118]]  ;;  %s5984_s0 = sld [smem:[#allocation2 + $0x17c]] }
 0x236   : > { %v2221_v51 = vstv %s5898_s2  ;;  %v2205_v42 = vmul.f32 %v2203_v44, %v2201_v14  ;;  %v2211_v49 = vmul.f32 %v2209_v22, %v2201_v14  ;;  %v2217_v6 = vmul.f32 %v2215_v63, %v2201_v14  ;;  %v2283_v1 = vpop.permute.xlu0 %2282  ;;  %s5986_s4 = sld [smem:[#allocation2 + $0x51]]  ;;  %s5988_s2 = sld [smem:[#allocation2 + $0xb5]] }
 0x237   : > { %v2223_v46 = vmul.f32 %v2221_v51, %v2201_v14  ;;  %v2204_v3 = vmul.f32 %v2203_v44, %v2199_v11  ;;  %v2210_v24 = vmul.f32 %v2209_v22, %v2199_v11  ;;  %v2216_v50 = vmul.f32 %v2215_v63, %v2199_v11  ;;  %v3606_v22 = vld [vmem:[%s6666_s18 + $0x48] sm:$0xff] }
 0x238   : > { %v2222_v0 = vmul.f32 %v2221_v51, %v2199_v11  ;;  %v2207_v4 = vadd.f32 %v2205_v42, %v2179_v59  ;;  %v2213_v17 = vadd.f32 %v2211_v49, %v2185_v48  ;;  %v2219_v20 = vadd.f32 %v2217_v6, %v2191_v41 }
 0x239   : > { %v2225_v2 = vadd.f32 %v2223_v46, %v2197_v37  ;;  %v2206_v62 = vadd.f32 %v2204_v3, %v2178_v45  ;;  %v2212_v26 = vadd.f32 %v2210_v24, %v2184_v29  ;;  %v2218_v31 = vadd.f32 %v2216_v50, %v2190_v61  ;;  %v2313_v50 = vpop.permute.xlu1 %2312 }
 0x23a   : > { %v2224_v35 = vadd.f32 %v2222_v0, %v2196_v10  ;;  %v2231_v33 = vstv %s5904_s7  ;;  %v2237_v5 = vstv %s5906_s24  ;;  %v2243_v21 = vstv %s5908_s15  ;;  %s5990_s7 = sld [smem:[#allocation2 + $0x119]]  ;;  %s5992_s24 = sld [smem:[#allocation2 + $0x17d]] }
 0x23b   : > { %v2249_v36 = vstv %s5910_s22  ;;  %v2233_v15 = vmul.f32 %v2231_v33, %v2229_v55  ;;  %v2239_v47 = vmul.f32 %v2237_v5, %v2229_v55  ;;  %v2245_v19 = vmul.f32 %v2243_v21, %v2229_v55  ;;  %s6002_s15 = sld [smem:[#allocation2 + $0x52]]  ;;  %s6004_s22 = sld [smem:[#allocation2 + $0xb6]] }
 0x23c   : > { %v2251_v23 = vmul.f32 %v2249_v36, %v2229_v55  ;;  %v2232_v34 = vmul.f32 %v2231_v33, %v2227_v30  ;;  %v2238_v16 = vmul.f32 %v2237_v5, %v2227_v30  ;;  %v2244_v57 = vmul.f32 %v2243_v21, %v2227_v30 }
 0x23d   : > { %v2250_v8 = vmul.f32 %v2249_v36, %v2227_v30  ;;  %v2235_v7 = vadd.f32 %v2233_v15, %v2207_v4  ;;  %v2241_v56 = vadd.f32 %v2239_v47, %v2213_v17  ;;  %v2247_v13 = vadd.f32 %v2245_v19, %v2219_v20 }
 0x23e   : > { %v2253_v12 = vadd.f32 %v2251_v23, %v2225_v2  ;;  %v2234_v25 = vadd.f32 %v2232_v34, %v2206_v62  ;;  %v2240_v9 = vadd.f32 %v2238_v16, %v2212_v26  ;;  %v2246_v58 = vadd.f32 %v2244_v57, %v2218_v31  ;;  %v2311_v2 = vpop.permute.xlu0 %2310 }
 0x23f   : > { %v2252_v28 = vadd.f32 %v2250_v8, %v2224_v35  ;;  %v2259_v60 = vstv %s5916_s30  ;;  %v2265_v18 = vstv %s5918_s10  ;;  %v2271_v52 = vstv %s5920_s5  ;;  %s6007_s30 = sld [smem:[#allocation2 + $0x11a]]  ;;  %s6009_s10 = sld [smem:[#allocation2 + $0x17e]] }
 0x240   : > { %v2277_v32 = vstv %s5922_s12  ;;  %v2261_v38 = vmul.f32 %v3605_v54, %v2259_v60  ;;  %v2267_v53 = vmul.f32 %v3605_v54, %v2265_v18  ;;  %v2273_v40 = vmul.f32 %v3605_v54, %v2271_v52  ;;  %s6016_s5 = sld [smem:[#allocation2 + $0x53]]  ;;  %s6018_s12 = sld [smem:[#allocation2 + $0xb7]] }
 0x241   : > { %v2279_v27 = vmul.f32 %v3605_v54, %v2277_v32  ;;  %v2287_v43 = vstv %s5924_s25  ;;  %v2293_v14 = vstv %s5926_s19  ;;  %v2299_v59 = vstv %s5928_s21  ;;  %s6020_s25 = sld [smem:[#allocation2 + $0x11b]]  ;;  %s6022_s19 = sld [smem:[#allocation2 + $0x17f]] }
 0x242   : > { %v2305_v48 = vstv %s5930_s3  ;;  %v2263_v41 = vadd.f32 %v2261_v38, %v2235_v7  ;;  %v2269_v37 = vadd.f32 %v2267_v53, %v2241_v56  ;;  %v2275_v11 = vadd.f32 %v2273_v40, %v2247_v13  ;;  %v2341_v13 = vpop.permute.xlu1 %2340  ;;  %s6028_s21 = sld [smem:[#allocation2 + $0x54]]  ;;  %s6030_s3 = sld [smem:[#allocation2 + $0xb8]] }
 0x243   : > { %v2281_v45 = vadd.f32 %v2279_v27, %v2253_v12  ;;  %v2289_v29 = vmul.f32 %v2287_v43, %v2285_v39  ;;  %v2295_v61 = vmul.f32 %v2293_v14, %v2285_v39  ;;  %v2301_v10 = vmul.f32 %v2299_v59, %v2285_v39 }
 0x244   : > { %v2307_v44 = vmul.f32 %v2305_v48, %v2285_v39  ;;  %v2260_v63 = vmul.f32 %v3606_v22, %v2259_v60  ;;  %v2266_v51 = vmul.f32 %v3606_v22, %v2265_v18  ;;  %v2272_v42 = vmul.f32 %v3606_v22, %v2271_v52 }
 0x245   : > { %v2278_v49 = vmul.f32 %v3606_v22, %v2277_v32  ;;  %v2291_v6 = vadd.f32 %v2289_v29, %v2263_v41  ;;  %v2297_v46 = vadd.f32 %v2295_v61, %v2269_v37  ;;  %v2303_v3 = vadd.f32 %v2301_v10, %v2275_v11 }
 0x246   : > { %v2309_v24 = vadd.f32 %v2307_v44, %v2281_v45  ;;  %v2262_v0 = vadd.f32 %v2260_v63, %v2234_v25  ;;  %v2268_v4 = vadd.f32 %v2266_v51, %v2240_v9  ;;  %v2274_v17 = vadd.f32 %v2272_v42, %v2246_v58  ;;  %v2369_v61 = vpop.permute.xlu1 %2368 }
 0x247   : > { %v2280_v20 = vadd.f32 %v2278_v49, %v2252_v28  ;;  %v2288_v55 = vmul.f32 %v2287_v43, %v2283_v1  ;;  %v2294_v62 = vmul.f32 %v2293_v14, %v2283_v1  ;;  %v2300_v26 = vmul.f32 %v2299_v59, %v2283_v1  ;;  %v2339_v28 = vpop.permute.xlu0 %2338 }
 0x248   : > { %v2306_v31 = vmul.f32 %v2305_v48, %v2283_v1  ;;  %v2315_v35 = vstv %s5940_s16  ;;  %v2321_v30 = vstv %s5942_s14  ;;  %v2327_v33 = vstv %s5945_s20  ;;  %s6032_s16 = sld [smem:[#allocation2 + $0x11c]]  ;;  %s6034_s14 = sld [smem:[#allocation2 + $0x180]] }
 0x249   : > { %v2333_v5 = vstv %s5947_s29  ;;  %v2290_v21 = vadd.f32 %v2288_v55, %v2262_v0  ;;  %v2296_v36 = vadd.f32 %v2294_v62, %v2268_v4  ;;  %v2302_v15 = vadd.f32 %v2300_v26, %v2274_v17  ;;  %s6040_s20 = sld [smem:[#allocation2 + $0x55]]  ;;  %s6042_s29 = sld [smem:[#allocation2 + $0xb9]] }
 0x24a   : > { %v2308_v47 = vadd.f32 %v2306_v31, %v2280_v20  ;;  %v2317_v19 = vmul.f32 %v2315_v35, %v2313_v50  ;;  %v2323_v23 = vmul.f32 %v2321_v30, %v2313_v50  ;;  %v2329_v34 = vmul.f32 %v2327_v33, %v2313_v50 }
 0x24b   : > { %v2335_v16 = vmul.f32 %v2333_v5, %v2313_v50  ;;  %v2316_v57 = vmul.f32 %v2315_v35, %v2311_v2  ;;  %v2322_v8 = vmul.f32 %v2321_v30, %v2311_v2  ;;  %v2328_v7 = vmul.f32 %v2327_v33, %v2311_v2  ;;  %v2367_v51 = vpop.permute.xlu0 %2366 }
 0x24c   : > { %v2334_v56 = vmul.f32 %v2333_v5, %v2311_v2  ;;  %v2319_v12 = vadd.f32 %v2317_v19, %v2291_v6  ;;  %v2325_v25 = vadd.f32 %v2323_v23, %v2297_v46  ;;  %v2331_v9 = vadd.f32 %v2329_v34, %v2303_v3  ;;  %v2425_v19 = vpop.permute.xlu1 %2424  ;;  %v3607_v23 = vld [vmem:[%s6666_s18 + $0x51] sm:$0xff] }
 0x24d   : > { %v2337_v58 = vadd.f32 %v2335_v16, %v2309_v24  ;;  %v2318_v60 = vadd.f32 %v2316_v57, %v2290_v21  ;;  %v2324_v18 = vadd.f32 %v2322_v8, %v2296_v36  ;;  %v2330_v52 = vadd.f32 %v2328_v7, %v2302_v15 }
 0x24e   : > { %v2336_v32 = vadd.f32 %v2334_v56, %v2308_v47  ;;  %v2343_v39 = vstv %s5954_s28  ;;  %v2349_v54 = vstv %s5956_s6  ;;  %v2355_v38 = vstv %s5958_s17  ;;  %s6044_s28 = sld [smem:[#allocation2 + $0x11d]]  ;;  %s6046_s6 = sld [smem:[#allocation2 + $0x181]] }
 0x24f   : > { %v2361_v53 = vstv %s5960_s13  ;;  %v2345_v40 = vmul.f32 %v2343_v39, %v2341_v13  ;;  %v2351_v27 = vmul.f32 %v2349_v54, %v2341_v13  ;;  %v2357_v1 = vmul.f32 %v2355_v38, %v2341_v13  ;;  %v2423_v7 = vpop.permute.xlu0 %2422  ;;  %s6048_s17 = sld [smem:[#allocation2 + $0x56]]  ;;  %s6050_s13 = sld [smem:[#allocation2 + $0xba]] }
 0x250   : > { %v2363_v43 = vmul.f32 %v2361_v53, %v2341_v13  ;;  %v2344_v14 = vmul.f32 %v2343_v39, %v2339_v28  ;;  %v2350_v59 = vmul.f32 %v2349_v54, %v2339_v28  ;;  %v2356_v48 = vmul.f32 %v2355_v38, %v2339_v28  ;;  %v3608_v54 = vld [vmem:[%s6666_s18 + $0x49] sm:$0xff] }
 0x251   : > { %v2362_v41 = vmul.f32 %v2361_v53, %v2339_v28  ;;  %v2347_v37 = vadd.f32 %v2345_v40, %v2319_v12  ;;  %v2353_v11 = vadd.f32 %v2351_v27, %v2325_v25  ;;  %v2359_v45 = vadd.f32 %v2357_v1, %v2331_v9 }
 0x252   : > { %v2365_v29 = vadd.f32 %v2363_v43, %v2337_v58  ;;  %v2346_v10 = vadd.f32 %v2344_v14, %v2318_v60  ;;  %v2352_v44 = vadd.f32 %v2350_v59, %v2324_v18  ;;  %v2358_v22 = vadd.f32 %v2356_v48, %v2330_v52  ;;  %v2453_v48 = vpop.permute.xlu1 %2452 }
 0x253   : > { %v2364_v63 = vadd.f32 %v2362_v41, %v2336_v32  ;;  %v2371_v42 = vstv %s5966_s8  ;;  %v2377_v49 = vstv %s5968_s27  ;;  %v2383_v6 = vstv %s5970_s23  ;;  %s6052_s8 = sld [smem:[#allocation2 + $0x11e]]  ;;  %s6054_s27 = sld [smem:[#allocation2 + $0x182]] }
 0x254   : > { %v2389_v46 = vstv %s5972_s9  ;;  %v2373_v3 = vmul.f32 %v2371_v42, %v2369_v61  ;;  %v2379_v24 = vmul.f32 %v2377_v49, %v2369_v61  ;;  %v2385_v50 = vmul.f32 %v2383_v6, %v2369_v61  ;;  %s6064_s23 = sld [smem:[#allocation2 + $0x57]]  ;;  %s6066_s9 = sld [smem:[#allocation2 + $0xbb]] }
 0x255   : > { %v2391_v0 = vmul.f32 %v2389_v46, %v2369_v61  ;;  %v2372_v4 = vmul.f32 %v2371_v42, %v2367_v51  ;;  %v2378_v17 = vmul.f32 %v2377_v49, %v2367_v51  ;;  %v2384_v20 = vmul.f32 %v2383_v6, %v2367_v51 }
 0x256   : > { %v2390_v2 = vmul.f32 %v2389_v46, %v2367_v51  ;;  %v2375_v55 = vadd.f32 %v2373_v3, %v2347_v37  ;;  %v2381_v62 = vadd.f32 %v2379_v24, %v2353_v11  ;;  %v2387_v26 = vadd.f32 %v2385_v50, %v2359_v45 }
 0x257   : > { %v2393_v31 = vadd.f32 %v2391_v0, %v2365_v29  ;;  %v2374_v35 = vadd.f32 %v2372_v4, %v2346_v10  ;;  %v2380_v30 = vadd.f32 %v2378_v17, %v2352_v44  ;;  %v2386_v33 = vadd.f32 %v2384_v20, %v2358_v22  ;;  %v2451_v29 = vpop.permute.xlu0 %2450 }
 0x258   : > { %v2392_v5 = vadd.f32 %v2390_v2, %v2364_v63  ;;  %v2399_v21 = vstv %s5978_s1  ;;  %v2405_v36 = vstv %s5980_s26  ;;  %v2411_v15 = vstv %s5982_s11  ;;  %s6069_s1 = sld [smem:[#allocation2 + $0x11f]]  ;;  %s6071_s26 = sld [smem:[#allocation2 + $0x183]] }
 0x259   : > { %v2417_v47 = vstv %s5984_s0  ;;  %v2401_v34 = vmul.f32 %v3607_v23, %v2399_v21  ;;  %v2407_v16 = vmul.f32 %v3607_v23, %v2405_v36  ;;  %v2413_v57 = vmul.f32 %v3607_v23, %v2411_v15  ;;  %s6078_s11 = sld [smem:[#allocation2 + $0x58]]  ;;  %s6080_s0 = sld [smem:[#allocation2 + $0xbc]] }
 0x25a   : > { %v2419_v8 = vmul.f32 %v3607_v23, %v2417_v47  ;;  %v2427_v56 = vstv %s5986_s4  ;;  %v2433_v13 = vstv %s5988_s2  ;;  %v2439_v12 = vstv %s5990_s7  ;;  %s6082_s4 = sld [smem:[#allocation2 + $0x120]]  ;;  %s6084_s2 = sld [smem:[#allocation2 + $0x184]] }
 0x25b   : > { %v2445_v25 = vstv %s5992_s24  ;;  %v2403_v9 = vadd.f32 %v2401_v34, %v2375_v55  ;;  %v2409_v58 = vadd.f32 %v2407_v16, %v2381_v62  ;;  %v2415_v28 = vadd.f32 %v2413_v57, %v2387_v26  ;;  %v2481_v26 = vpop.permute.xlu1 %2480  ;;  %s6090_s7 = sld [smem:[#allocation2 + $0x59]]  ;;  %s6092_s24 = sld [smem:[#allocation2 + $0xbd]] }
 0x25c   : > { %v2421_v60 = vadd.f32 %v2419_v8, %v2393_v31  ;;  %v2429_v18 = vmul.f32 %v2427_v56, %v2425_v19  ;;  %v2435_v52 = vmul.f32 %v2433_v13, %v2425_v19  ;;  %v2441_v32 = vmul.f32 %v2439_v12, %v2425_v19 }
 0x25d   : > { %v2447_v39 = vmul.f32 %v2445_v25, %v2425_v19  ;;  %v2400_v38 = vmul.f32 %v3608_v54, %v2399_v21  ;;  %v2406_v53 = vmul.f32 %v3608_v54, %v2405_v36  ;;  %v2412_v40 = vmul.f32 %v3608_v54, %v2411_v15 }
 0x25e   : > { %v2418_v27 = vmul.f32 %v3608_v54, %v2417_v47  ;;  %v2431_v1 = vadd.f32 %v2429_v18, %v2403_v9  ;;  %v2437_v43 = vadd.f32 %v2435_v52, %v2409_v58  ;;  %v2443_v14 = vadd.f32 %v2441_v32, %v2415_v28 }
 0x25f   : > { %v2449_v59 = vadd.f32 %v2447_v39, %v2421_v60  ;;  %v2402_v41 = vadd.f32 %v2400_v38, %v2374_v35  ;;  %v2408_v37 = vadd.f32 %v2406_v53, %v2380_v30  ;;  %v2414_v11 = vadd.f32 %v2412_v40, %v2386_v33  ;;  %v2509_v52 = vpop.permute.xlu1 %2508 }
 0x260   : > { %v2420_v45 = vadd.f32 %v2418_v27, %v2392_v5  ;;  %v2428_v61 = vmul.f32 %v2427_v56, %v2423_v7  ;;  %v2434_v10 = vmul.f32 %v2433_v13, %v2423_v7  ;;  %v2440_v44 = vmul.f32 %v2439_v12, %v2423_v7  ;;  %v2479_v5 = vpop.permute.xlu0 %2478 }
 0x261   : > { %v2446_v22 = vmul.f32 %v2445_v25, %v2423_v7  ;;  %v2455_v63 = vstv %s6002_s15  ;;  %v2461_v51 = vstv %s6004_s22  ;;  %v2467_v42 = vstv %s6007_s30  ;;  %s6094_s15 = sld [smem:[#allocation2 + $0x121]]  ;;  %s6096_s22 = sld [smem:[#allocation2 + $0x185]] }
 0x262   : > { %v2473_v49 = vstv %s6009_s10  ;;  %v2430_v6 = vadd.f32 %v2428_v61, %v2402_v41  ;;  %v2436_v46 = vadd.f32 %v2434_v10, %v2408_v37  ;;  %v2442_v3 = vadd.f32 %v2440_v44, %v2414_v11  ;;  %s6102_s30 = sld [smem:[#allocation2 + $0x5a]]  ;;  %s6104_s10 = sld [smem:[#allocation2 + $0xbe]] }
 0x263   : > { %v2448_v24 = vadd.f32 %v2446_v22, %v2420_v45  ;;  %v2457_v50 = vmul.f32 %v2455_v63, %v2453_v48  ;;  %v2463_v0 = vmul.f32 %v2461_v51, %v2453_v48  ;;  %v2469_v4 = vmul.f32 %v2467_v42, %v2453_v48 }
 0x264   : > { %v2475_v17 = vmul.f32 %v2473_v49, %v2453_v48  ;;  %v2456_v20 = vmul.f32 %v2455_v63, %v2451_v29  ;;  %v2462_v2 = vmul.f32 %v2461_v51, %v2451_v29  ;;  %v2468_v55 = vmul.f32 %v2467_v42, %v2451_v29  ;;  %v2507_v53 = vpop.permute.xlu0 %2506 }
 0x265   : > { %v2474_v62 = vmul.f32 %v2473_v49, %v2451_v29  ;;  %v2459_v31 = vadd.f32 %v2457_v50, %v2431_v1  ;;  %v2465_v35 = vadd.f32 %v2463_v0, %v2437_v43  ;;  %v2471_v30 = vadd.f32 %v2469_v4, %v2443_v14  ;;  %v2565_v50 = vpop.permute.xlu1 %2564  ;;  %v3609_v0 = vld [vmem:[%s6666_s18 + $0x52] sm:$0xff] }
 0x266   : > { %v2477_v33 = vadd.f32 %v2475_v17, %v2449_v59  ;;  %v2458_v21 = vadd.f32 %v2456_v20, %v2430_v6  ;;  %v2464_v36 = vadd.f32 %v2462_v2, %v2436_v46  ;;  %v2470_v15 = vadd.f32 %v2468_v55, %v2442_v3 }
 0x267   : > { %v2476_v47 = vadd.f32 %v2474_v62, %v2448_v24  ;;  %v2483_v19 = vstv %s6016_s5  ;;  %v2489_v23 = vstv %s6018_s12  ;;  %v2495_v34 = vstv %s6020_s25  ;;  %s6106_s5 = sld [smem:[#allocation2 + $0x122]]  ;;  %s6108_s12 = sld [smem:[#allocation2 + $0x186]] }
 0x268   : > { %v2501_v16 = vstv %s6022_s19  ;;  %v2485_v57 = vmul.f32 %v2483_v19, %v2481_v26  ;;  %v2491_v8 = vmul.f32 %v2489_v23, %v2481_v26  ;;  %v2497_v7 = vmul.f32 %v2495_v34, %v2481_v26  ;;  %v2563_v55 = vpop.permute.xlu0 %2562  ;;  %s6110_s25 = sld [smem:[#allocation2 + $0x5b]]  ;;  %s6112_s19 = sld [smem:[#allocation2 + $0xbf]] }
 0x269   : > { %v2503_v56 = vmul.f32 %v2501_v16, %v2481_v26  ;;  %v2484_v13 = vmul.f32 %v2483_v19, %v2479_v5  ;;  %v2490_v12 = vmul.f32 %v2489_v23, %v2479_v5  ;;  %v2496_v25 = vmul.f32 %v2495_v34, %v2479_v5  ;;  %v3610_v23 = vld [vmem:[%s6666_s18 + $0x4a] sm:$0xff] }
 0x26a   : > { %v2502_v9 = vmul.f32 %v2501_v16, %v2479_v5  ;;  %v2487_v58 = vadd.f32 %v2485_v57, %v2459_v31  ;;  %v2493_v28 = vadd.f32 %v2491_v8, %v2465_v35  ;;  %v2499_v60 = vadd.f32 %v2497_v7, %v2471_v30 }
 0x26b   : > { %v2505_v18 = vadd.f32 %v2503_v56, %v2477_v33  ;;  %v2486_v32 = vadd.f32 %v2484_v13, %v2458_v21  ;;  %v2492_v39 = vadd.f32 %v2490_v12, %v2464_v36  ;;  %v2498_v54 = vadd.f32 %v2496_v25, %v2470_v15  ;;  %v2593_v25 = vpop.permute.xlu1 %2592 }
 0x26c   : > { %v2504_v38 = vadd.f32 %v2502_v9, %v2476_v47  ;;  %v2511_v40 = vstv %s6028_s21  ;;  %v2517_v27 = vstv %s6030_s3  ;;  %v2523_v1 = vstv %s6032_s16  ;;  %s6114_s21 = sld [smem:[#allocation2 + $0x123]]  ;;  %s6116_s3 = sld [smem:[#allocation2 + $0x187]] }
 0x26d   : > { %v2529_v43 = vstv %s6034_s14  ;;  %v2513_v14 = vmul.f32 %v2511_v40, %v2509_v52  ;;  %v2519_v59 = vmul.f32 %v2517_v27, %v2509_v52  ;;  %v2525_v48 = vmul.f32 %v2523_v1, %v2509_v52  ;;  %s6126_s16 = sld [smem:[#allocation2 + $0x5c]]  ;;  %s6128_s14 = sld [smem:[#allocation2 + $0xc0]] }
 0x26e   : > { %v2531_v41 = vmul.f32 %v2529_v43, %v2509_v52  ;;  %v2512_v37 = vmul.f32 %v2511_v40, %v2507_v53  ;;  %v2518_v11 = vmul.f32 %v2517_v27, %v2507_v53  ;;  %v2524_v45 = vmul.f32 %v2523_v1, %v2507_v53 }
 0x26f   : > { %v2530_v29 = vmul.f32 %v2529_v43, %v2507_v53  ;;  %v2515_v61 = vadd.f32 %v2513_v14, %v2487_v58  ;;  %v2521_v10 = vadd.f32 %v2519_v59, %v2493_v28  ;;  %v2527_v44 = vadd.f32 %v2525_v48, %v2499_v60 }
 0x270   : > { %v2533_v22 = vadd.f32 %v2531_v41, %v2505_v18  ;;  %v2514_v63 = vadd.f32 %v2512_v37, %v2486_v32  ;;  %v2520_v51 = vadd.f32 %v2518_v11, %v2492_v39  ;;  %v2526_v42 = vadd.f32 %v2524_v45, %v2498_v54  ;;  %v2591_v18 = vpop.permute.xlu0 %2590 }
 0x271   : > { %v2532_v49 = vadd.f32 %v2530_v29, %v2504_v38  ;;  %v2539_v6 = vstv %s6040_s20  ;;  %v2545_v46 = vstv %s6042_s29  ;;  %v2551_v3 = vstv %s6044_s28  ;;  %s6131_s20 = sld [smem:[#allocation2 + $0x124]]  ;;  %s6133_s29 = sld [smem:[#allocation2 + $0x188]] }
 0x272   : > { %v2557_v24 = vstv %s6046_s6  ;;  %v2541_v4 = vmul.f32 %v3609_v0, %v2539_v6  ;;  %v2547_v17 = vmul.f32 %v3609_v0, %v2545_v46  ;;  %v2553_v20 = vmul.f32 %v3609_v0, %v2551_v3  ;;  %s6140_s28 = sld [smem:[#allocation2 + $0x5d]]  ;;  %s6142_s6 = sld [smem:[#allocation2 + $0xc1]] }
 0x273   : > { %v2559_v2 = vmul.f32 %v3609_v0, %v2557_v24  ;;  %v2567_v62 = vstv %s6048_s17  ;;  %v2573_v26 = vstv %s6050_s13  ;;  %v2579_v31 = vstv %s6052_s8  ;;  %s6144_s17 = sld [smem:[#allocation2 + $0x125]]  ;;  %s6146_s13 = sld [smem:[#allocation2 + $0x189]] }
 0x274   : > { %v2585_v35 = vstv %s6054_s27  ;;  %v2543_v30 = vadd.f32 %v2541_v4, %v2515_v61  ;;  %v2549_v33 = vadd.f32 %v2547_v17, %v2521_v10  ;;  %v2555_v5 = vadd.f32 %v2553_v20, %v2527_v44  ;;  %v2621_v44 = vpop.permute.xlu1 %2620  ;;  %s6152_s8 = sld [smem:[#allocation2 + $0x5e]]  ;;  %s6154_s27 = sld [smem:[#allocation2 + $0xc2]] }
 0x275   : > { %v2561_v21 = vadd.f32 %v2559_v2, %v2533_v22  ;;  %v2569_v36 = vmul.f32 %v2567_v62, %v2565_v50  ;;  %v2575_v15 = vmul.f32 %v2573_v26, %v2565_v50  ;;  %v2581_v47 = vmul.f32 %v2579_v31, %v2565_v50 }
 0x276   : > { %v2587_v19 = vmul.f32 %v2585_v35, %v2565_v50  ;;  %v2540_v34 = vmul.f32 %v3610_v23, %v2539_v6  ;;  %v2546_v16 = vmul.f32 %v3610_v23, %v2545_v46  ;;  %v2552_v57 = vmul.f32 %v3610_v23, %v2551_v3 }
 0x277   : > { %v2558_v8 = vmul.f32 %v3610_v23, %v2557_v24  ;;  %v2571_v7 = vadd.f32 %v2569_v36, %v2543_v30  ;;  %v2577_v56 = vadd.f32 %v2575_v15, %v2549_v33  ;;  %v2583_v13 = vadd.f32 %v2581_v47, %v2555_v5 }
 0x278   : > { %v2589_v12 = vadd.f32 %v2587_v19, %v2561_v21  ;;  %v2542_v9 = vadd.f32 %v2540_v34, %v2514_v63  ;;  %v2548_v58 = vadd.f32 %v2546_v16, %v2520_v51  ;;  %v2554_v28 = vadd.f32 %v2552_v57, %v2526_v42  ;;  %v2649_v15 = vpop.permute.xlu1 %2648 }
 0x279   : > { %v2560_v60 = vadd.f32 %v2558_v8, %v2532_v49  ;;  %v2568_v52 = vmul.f32 %v2567_v62, %v2563_v55  ;;  %v2574_v32 = vmul.f32 %v2573_v26, %v2563_v55  ;;  %v2580_v39 = vmul.f32 %v2579_v31, %v2563_v55  ;;  %v2619_v49 = vpop.permute.xlu0 %2618 }
 0x27a   : > { %v2586_v54 = vmul.f32 %v2585_v35, %v2563_v55  ;;  %v2595_v38 = vstv %s6064_s23  ;;  %v2601_v53 = vstv %s6066_s9  ;;  %v2607_v40 = vstv %s6069_s1  ;;  %s6156_s23 = sld [smem:[#allocation2 + $0x126]]  ;;  %s6158_s9 = sld [smem:[#allocation2 + $0x18a]] }
 0x27b   : > { %v2613_v27 = vstv %s6071_s26  ;;  %v2570_v1 = vadd.f32 %v2568_v52, %v2542_v9  ;;  %v2576_v43 = vadd.f32 %v2574_v32, %v2548_v58  ;;  %v2582_v14 = vadd.f32 %v2580_v39, %v2554_v28  ;;  %s6164_s1 = sld [smem:[#allocation2 + $0x5f]]  ;;  %s6166_s26 = sld [smem:[#allocation2 + $0xc3]] }
 0x27c   : > { %v2588_v59 = vadd.f32 %v2586_v54, %v2560_v60  ;;  %v2597_v48 = vmul.f32 %v2595_v38, %v2593_v25  ;;  %v2603_v41 = vmul.f32 %v2601_v53, %v2593_v25  ;;  %v2609_v37 = vmul.f32 %v2607_v40, %v2593_v25 }
 0x27d   : > { %v2615_v11 = vmul.f32 %v2613_v27, %v2593_v25  ;;  %v2596_v45 = vmul.f32 %v2595_v38, %v2591_v18  ;;  %v2602_v29 = vmul.f32 %v2601_v53, %v2591_v18  ;;  %v2608_v61 = vmul.f32 %v2607_v40, %v2591_v18  ;;  %v2647_v16 = vpop.permute.xlu0 %2646 }
 0x27e   : > { %v2614_v10 = vmul.f32 %v2613_v27, %v2591_v18  ;;  %v2599_v22 = vadd.f32 %v2597_v48, %v2571_v7  ;;  %v2605_v63 = vadd.f32 %v2603_v41, %v2577_v56  ;;  %v2611_v51 = vadd.f32 %v2609_v37, %v2583_v13  ;;  %v2705_v48 = vpop.permute.xlu1 %2704  ;;  %v3611_v41 = vld [vmem:[%s6666_s18 + $0x53] sm:$0xff] }
 0x27f   : > { %v2617_v42 = vadd.f32 %v2615_v11, %v2589_v12  ;;  %v2598_v6 = vadd.f32 %v2596_v45, %v2570_v1  ;;  %v2604_v46 = vadd.f32 %v2602_v29, %v2576_v43  ;;  %v2610_v3 = vadd.f32 %v2608_v61, %v2582_v14 }
 0x280   : > { %v2616_v24 = vadd.f32 %v2614_v10, %v2588_v59  ;;  %v2623_v50 = vstv %s6078_s11  ;;  %v2629_v0 = vstv %s6080_s0  ;;  %v2635_v4 = vstv %s6082_s4  ;;  %s6168_s11 = sld [smem:[#allocation2 + $0x127]]  ;;  %s6170_s0 = sld [smem:[#allocation2 + $0x18b]] }
 0x281   : > { %v2641_v17 = vstv %s6084_s2  ;;  %v2625_v20 = vmul.f32 %v2623_v50, %v2621_v44  ;;  %v2631_v2 = vmul.f32 %v2629_v0, %v2621_v44  ;;  %v2637_v55 = vmul.f32 %v2635_v4, %v2621_v44  ;;  %v2703_v61 = vpop.permute.xlu0 %2702  ;;  %s6172_s4 = sld [smem:[#allocation2 + $0x60]]  ;;  %s6174_s2 = sld [smem:[#allocation2 + $0xc4]] }
 0x282   : > { %v2643_v62 = vmul.f32 %v2641_v17, %v2621_v44  ;;  %v2624_v26 = vmul.f32 %v2623_v50, %v2619_v49  ;;  %v2630_v31 = vmul.f32 %v2629_v0, %v2619_v49  ;;  %v2636_v35 = vmul.f32 %v2635_v4, %v2619_v49  ;;  %v3612_v0 = vld [vmem:[%s6666_s18 + $0x4b] sm:$0xff] }
 0x283   : > { %v2642_v30 = vmul.f32 %v2641_v17, %v2619_v49  ;;  %v2627_v33 = vadd.f32 %v2625_v20, %v2599_v22  ;;  %v2633_v5 = vadd.f32 %v2631_v2, %v2605_v63  ;;  %v2639_v21 = vadd.f32 %v2637_v55, %v2611_v51 }
 0x284   : > { %v2645_v36 = vadd.f32 %v2643_v62, %v2617_v42  ;;  %v2626_v47 = vadd.f32 %v2624_v26, %v2598_v6  ;;  %v2632_v19 = vadd.f32 %v2630_v31, %v2604_v46  ;;  %v2638_v23 = vadd.f32 %v2636_v35, %v2610_v3  ;;  %v2733_v35 = vpop.permute.xlu1 %2732 }
 0x285   : > { %v2644_v34 = vadd.f32 %v2642_v30, %v2616_v24  ;;  %v2651_v57 = vstv %s6090_s7  ;;  %v2657_v8 = vstv %s6092_s24  ;;  %v2663_v7 = vstv %s6094_s15  ;;  %s6176_s7 = sld [smem:[#allocation2 + $0x128]]  ;;  %s6178_s24 = sld [smem:[#allocation2 + $0x18c]] }
 0x286   : > { %v2669_v56 = vstv %s6096_s22  ;;  %v2653_v13 = vmul.f32 %v2651_v57, %v2649_v15  ;;  %v2659_v12 = vmul.f32 %v2657_v8, %v2649_v15  ;;  %v2665_v25 = vmul.f32 %v2663_v7, %v2649_v15  ;;  %s6188_s15 = sld [smem:[#allocation2 + $0x61]]  ;;  %s6190_s22 = sld [smem:[#allocation2 + $0xc5]] }
 0x287   : > { %v2671_v9 = vmul.f32 %v2669_v56, %v2649_v15  ;;  %v2652_v58 = vmul.f32 %v2651_v57, %v2647_v16  ;;  %v2658_v28 = vmul.f32 %v2657_v8, %v2647_v16  ;;  %v2664_v60 = vmul.f32 %v2663_v7, %v2647_v16 }
 0x288   : > { %v2670_v18 = vmul.f32 %v2669_v56, %v2647_v16  ;;  %v2655_v52 = vadd.f32 %v2653_v13, %v2627_v33  ;;  %v2661_v32 = vadd.f32 %v2659_v12, %v2633_v5  ;;  %v2667_v39 = vadd.f32 %v2665_v25, %v2639_v21 }
 0x289   : > { %v2673_v54 = vadd.f32 %v2671_v9, %v2645_v36  ;;  %v2654_v38 = vadd.f32 %v2652_v58, %v2626_v47  ;;  %v2660_v53 = vadd.f32 %v2658_v28, %v2632_v19  ;;  %v2666_v40 = vadd.f32 %v2664_v60, %v2638_v23  ;;  %v2731_v36 = vpop.permute.xlu0 %2730 }
 0x28a   : > { %v2672_v27 = vadd.f32 %v2670_v18, %v2644_v34  ;;  %v2679_v1 = vstv %s6102_s30  ;;  %v2685_v43 = vstv %s6104_s10  ;;  %v2691_v14 = vstv %s6106_s5  ;;  %s6193_s30 = sld [smem:[#allocation2 + $0x129]]  ;;  %s6195_s10 = sld [smem:[#allocation2 + $0x18d]] }
 0x28b   : > { %v2697_v59 = vstv %s6108_s12  ;;  %v2681_v37 = vmul.f32 %v3611_v41, %v2679_v1  ;;  %v2687_v11 = vmul.f32 %v3611_v41, %v2685_v43  ;;  %v2693_v45 = vmul.f32 %v3611_v41, %v2691_v14  ;;  %s6202_s5 = sld [smem:[#allocation2 + $0x62]]  ;;  %s6204_s12 = sld [smem:[#allocation2 + $0xc6]] }
 0x28c   : > { %v2699_v29 = vmul.f32 %v3611_v41, %v2697_v59  ;;  %v2707_v10 = vstv %s6110_s25  ;;  %v2713_v44 = vstv %s6112_s19  ;;  %v2719_v22 = vstv %s6114_s21  ;;  %s6208_s25 = sld [smem:[#allocation2 + $0x18e]]  ;;  %s6214_s19 = sld [smem:[#allocation2 + $0x63]] }
 0x28d   : > { %v2725_v63 = vstv %s6116_s3  ;;  %v2683_v51 = vadd.f32 %v2681_v37, %v2655_v52  ;;  %v2689_v42 = vadd.f32 %v2687_v11, %v2661_v32  ;;  %v2695_v49 = vadd.f32 %v2693_v45, %v2667_v39  ;;  %v2761_v39 = vpop.permute.xlu1 %2760  ;;  %s6216_s21 = sld [smem:[#allocation2 + $0xc7]]  ;;  %s7054_s3 = sld [smem:[#allocation9_spill]] }
 0x28e   : > { %v2701_v6 = vadd.f32 %v2699_v29, %v2673_v54  ;;  %v2709_v46 = vmul.f32 %v2707_v10, %v2705_v48  ;;  %v2715_v3 = vmul.f32 %v2713_v44, %v2705_v48  ;;  %v2721_v24 = vmul.f32 %v2719_v22, %v2705_v48 }
 0x28f   : > { %v2727_v50 = vmul.f32 %v2725_v63, %v2705_v48  ;;  %v2680_v4 = vmul.f32 %v3612_v0, %v2679_v1  ;;  %v2686_v17 = vmul.f32 %v3612_v0, %v2685_v43  ;;  %v2692_v20 = vmul.f32 %v3612_v0, %v2691_v14 }
 0x290   : > { %v2698_v2 = vmul.f32 %v3612_v0, %v2697_v59  ;;  %v2711_v55 = vadd.f32 %v2709_v46, %v2683_v51  ;;  %v2717_v62 = vadd.f32 %v2715_v3, %v2689_v42  ;;  %v2723_v26 = vadd.f32 %v2721_v24, %v2695_v49 }
 0x291   : > { %v2729_v31 = vadd.f32 %v2727_v50, %v2701_v6  ;;  %v2682_v30 = vadd.f32 %v2680_v4, %v2654_v38  ;;  %v2688_v33 = vadd.f32 %v2686_v17, %v2660_v53  ;;  %v2694_v5 = vadd.f32 %v2692_v20, %v2666_v40  ;;  %v2789_v3 = vpop.permute.xlu1 %2788 }
 0x292   : > { %v2700_v21 = vadd.f32 %v2698_v2, %v2672_v27  ;;  %v2708_v15 = vmul.f32 %v2707_v10, %v2703_v61  ;;  %v2714_v47 = vmul.f32 %v2713_v44, %v2703_v61  ;;  %v2720_v19 = vmul.f32 %v2719_v22, %v2703_v61  ;;  %v2759_v27 = vpop.permute.xlu0 %2758 }
 0x293   : > { %v2726_v23 = vmul.f32 %v2725_v63, %v2703_v61  ;;  %v2735_v34 = vstv %s6126_s16  ;;  %v2741_v16 = vstv %s6128_s14  ;;  %v2747_v57 = vstv %s6131_s20  ;;  %s6218_s16 = sld [smem:[#allocation2 + $0x12b]]  ;;  %s6220_s14 = sld [smem:[#allocation2 + $0x18f]] }
 0x294   : > { %v2753_v8 = vstv %s6133_s29  ;;  %v2710_v7 = vadd.f32 %v2708_v15, %v2682_v30  ;;  %v2716_v56 = vadd.f32 %v2714_v47, %v2688_v33  ;;  %v2722_v13 = vadd.f32 %v2720_v19, %v2694_v5  ;;  %s148_s20 = sand.u32 1, %s7054_s3  }
 0x295   : > { %v2728_v12 = vadd.f32 %v2726_v23, %v2700_v21  ;;  %v2737_v25 = vmul.f32 %v2735_v34, %v2733_v35  ;;  %v2743_v9 = vmul.f32 %v2741_v16, %v2733_v35  ;;  %v2749_v58 = vmul.f32 %v2747_v57, %v2733_v35  ;;  %s3083_s29 = sshll.u32 %s148_s20, 6 }
 0x296   : > { %v2755_v28 = vmul.f32 %v2753_v8, %v2733_v35  ;;  %v2736_v60 = vmul.f32 %v2735_v34, %v2731_v36  ;;  %v2742_v18 = vmul.f32 %v2741_v16, %v2731_v36  ;;  %v2748_v52 = vmul.f32 %v2747_v57, %v2731_v36  ;;  %v2787_v17 = vpop.permute.xlu0 %2786 }
 0x297   : > { %v2754_v32 = vmul.f32 %v2753_v8, %v2731_v36  ;;  %v2739_v54 = vadd.f32 %v2737_v25, %v2711_v55  ;;  %v2745_v38 = vadd.f32 %v2743_v9, %v2717_v62  ;;  %v2751_v53 = vadd.f32 %v2749_v58, %v2723_v26  ;;  %v3613_v9 = vld [vmem:[%s6666_s18 + $0x54] sm:$0xff] }
 0x298   : > { %v2757_v40 = vadd.f32 %v2755_v28, %v2729_v31  ;;  %v2738_v1 = vadd.f32 %v2736_v60, %v2710_v7  ;;  %v2744_v43 = vadd.f32 %v2742_v18, %v2716_v56  ;;  %v2750_v14 = vadd.f32 %v2748_v52, %v2722_v13  ;;  %v2845_v7 = vpop.permute.xlu1 %2844 }
 0x299   : > { %v2756_v59 = vadd.f32 %v2754_v32, %v2728_v12  ;;  %v2763_v48 = vstv %s6140_s28  ;;  %v2769_v41 = vstv %s6142_s6  ;;  %v2775_v37 = vstv %s6144_s17  ;;  %s7055_s28 = sld [smem:[#allocation12_spill]]  ;;  %s150_s17 = scalar_lea.vmem [#allocation5], %s3083_s29 }
 0x29a   : > { %v2781_v11 = vstv %s6146_s13  ;;  %v2765_v45 = vmul.f32 %v2763_v48, %v2761_v39  ;;  %v2771_v29 = vmul.f32 %v2769_v41, %v2761_v39  ;;  %v2777_v61 = vmul.f32 %v2775_v37, %v2761_v39  ;;  %s2981_s13 = sshll.u32 %s150_s17, 4  ;;  %s6239_s13 = int_to_ptr.vmem [resolvable:$true] %s2981_s13 }
 0x29b   : > { %v2783_v10 = vmul.f32 %v2781_v11, %v2761_v39  ;;  %v2764_v44 = vmul.f32 %v2763_v48, %v2759_v27  ;;  %v2770_v22 = vmul.f32 %v2769_v41, %v2759_v27  ;;  %v2776_v63 = vmul.f32 %v2775_v37, %v2759_v27  ;;  %v3614_v41 = vld [vmem:[%s6666_s18 + $0x4c] sm:$0xff]  ;;  %s6206_s18 = sld [smem:[#allocation2 + $0x12a]] }
 0x29c   : > { %v2782_v51 = vmul.f32 %v2781_v11, %v2759_v27  ;;  %v2767_v42 = vadd.f32 %v2765_v45, %v2739_v54  ;;  %v2773_v49 = vadd.f32 %v2771_v29, %v2745_v38  ;;  %v2779_v6 = vadd.f32 %v2777_v61, %v2751_v53  ;;  %v2843_v38 = vpop.permute.xlu0 %2842  ;;  %v2873_v61 = vpop.permute.xlu1 %2872 }
 0x29d   : > { %v2785_v46 = vadd.f32 %v2783_v10, %v2757_v40  ;;  %v2766_v24 = vadd.f32 %v2764_v44, %v2738_v1  ;;  %v2772_v50 = vadd.f32 %v2770_v22, %v2744_v43  ;;  %v2778_v0 = vadd.f32 %v2776_v63, %v2750_v14 }
 0x29e   : > { %v2784_v4 = vadd.f32 %v2782_v51, %v2756_v59  ;;  %v2791_v20 = vstv %s6152_s8  ;;  %v2797_v2 = vstv %s6154_s27  ;;  %v2803_v55 = vstv %s6156_s23 }
 0x29f   : > { %v2809_v62 = vstv %s6158_s9  ;;  %v2793_v26 = vmul.f32 %v2791_v20, %v2789_v3  ;;  %v2799_v31 = vmul.f32 %v2797_v2, %v2789_v3  ;;  %v2805_v35 = vmul.f32 %v2803_v55, %v2789_v3  ;;  %s3533_s6 = sshll.u32 %s7055_s28, 10  ;;  %s7057_s9 = sld [smem:[#allocation148_spill]] }
 0x2a0   : > { %v2811_v30 = vmul.f32 %v2809_v62, %v2789_v3  ;;  %v2792_v33 = vmul.f32 %v2791_v20, %v2787_v17  ;;  %v2798_v5 = vmul.f32 %v2797_v2, %v2787_v17  ;;  %v2804_v21 = vmul.f32 %v2803_v55, %v2787_v17 }
 0x2a1   : > { %v2810_v36 = vmul.f32 %v2809_v62, %v2787_v17  ;;  %v2795_v15 = vadd.f32 %v2793_v26, %v2767_v42  ;;  %v2801_v47 = vadd.f32 %v2799_v31, %v2773_v49  ;;  %v2807_v19 = vadd.f32 %v2805_v35, %v2779_v6 }
 0x2a2   : > { %v2813_v23 = vadd.f32 %v2811_v30, %v2785_v46  ;;  %v2794_v34 = vadd.f32 %v2792_v33, %v2766_v24  ;;  %v2800_v16 = vadd.f32 %v2798_v5, %v2772_v50  ;;  %v2806_v57 = vadd.f32 %v2804_v21, %v2778_v0  ;;  %v2871_v0 = vpop.permute.xlu0 %2870  ;;  %v2901_v21 = vpop.permute.xlu1 %2900 }
 0x2a3   : > { %v2812_v8 = vadd.f32 %v2810_v36, %v2784_v4  ;;  %v2819_v56 = vstv %s6164_s1  ;;  %v2825_v13 = vstv %s6166_s26  ;;  %v2831_v12 = vstv %s6168_s11  ;;  %s6243_s11 = scalar_lea.sflag [#allocation3], %s148_s20 }
 0x2a4   : > { %v2837_v25 = vstv %s6170_s0  ;;  %v2821_v58 = vmul.f32 %v3613_v9, %v2819_v56  ;;  %v2827_v28 = vmul.f32 %v3613_v9, %v2825_v13  ;;  %v2833_v60 = vmul.f32 %v3613_v9, %v2831_v12  ;;  %s3630_s0 = scalar_lea.vmem %s6239_s13, 1024 }
 0x2a5   : > { %v2839_v18 = vmul.f32 %v3613_v9, %v2837_v25  ;;  %v2847_v52 = vstv %s6172_s4  ;;  %v2853_v32 = vstv %s6174_s2  ;;  %v2859_v39 = vstv %s6176_s7  ;;  %s7058_s1 = smov %s7057_s9  ;;  %s6237_s26 = scalar_lea.hbm %s7057_s9, %s3533_s6 }
 0x2a6   : > { %v2865_v54 = vstv %s6178_s24  ;;  %v2823_v53 = vadd.f32 %v2821_v58, %v2795_v15  ;;  %v2829_v40 = vadd.f32 %v2827_v28, %v2801_v47  ;;  %v2835_v27 = vadd.f32 %v2833_v60, %v2807_v19  ;;  %p3631_p9 = scmp.ne.s32.totalorder %s6239_s13, %s3630_s0  ;;  %s3703_s4 = smov [#allocation5]  }
 0x2a7   : > { %v2841_v1 = vadd.f32 %v2839_v18, %v2813_v23  ;;  %v2849_v43 = vmul.f32 %v2847_v52, %v2845_v7  ;;  %v2855_v14 = vmul.f32 %v2853_v32, %v2845_v7  ;;  %v2861_v59 = vmul.f32 %v2859_v39, %v2845_v7  ;;  %s3634_s2 = sshll.u32 %s3703_s4, 4  ;;  %s3635_s2 = int_to_ptr.vmem [resolvable:$false] %s3634_s2 }
 0x2a8   : > { %v2867_v48 = vmul.f32 %v2865_v54, %v2845_v7  ;;  %v2820_v37 = vmul.f32 %v3614_v41, %v2819_v56  ;;  %v2826_v11 = vmul.f32 %v3614_v41, %v2825_v13  ;;  %v2832_v45 = vmul.f32 %v3614_v41, %v2831_v12  ;;  %v2899_v12 = vpop.permute.xlu0 %2898  ;;  %p3632_p10 = pnand %p3631_p9, %p3759_p5  ;;  %s3636_s7 = scalar_lea.vmem %s3635_s2, 2048 }
 0x2a9   : > { %v2838_v29 = vmul.f32 %v3614_v41, %v2837_v25  ;;  %v2851_v10 = vadd.f32 %v2849_v43, %v2823_v53  ;;  %v2857_v44 = vadd.f32 %v2855_v14, %v2829_v40  ;;  %v2863_v22 = vadd.f32 %v2861_v59, %v2835_v27  ;;  %v2929_v40 = vpop.permute.xlu1 %2928  ;;  %p3637_p13 = scmp.lt.s32.totalorder %s6239_s13, %s3635_s2  ;;  %p3638_p0 = scmp.lt.s32.totalorder %s3636_s7, %s3630_s0 }
 0x2aa   : > { %v2869_v63 = vadd.f32 %v2867_v48, %v2841_v1  ;;  %v2822_v51 = vadd.f32 %v2820_v37, %v2794_v34  ;;  %v2828_v42 = vadd.f32 %v2826_v11, %v2800_v16  ;;  %v2834_v49 = vadd.f32 %v2832_v45, %v2806_v57  ;;  %p3633_p12 = pneg %p3632_p10 }
 0x2ab   : > { %v2840_v6 = vadd.f32 %v2838_v29, %v2812_v8  ;;  %v2848_v46 = vmul.f32 %v2847_v52, %v2843_v38  ;;  %v2854_v3 = vmul.f32 %v2853_v32, %v2843_v38  ;;  %v2860_v24 = vmul.f32 %v2859_v39, %v2843_v38  ;;  %p3639_p1 = por %p3638_p0, %p3637_p13 }
 0x2ac   : > { %v2866_v50 = vmul.f32 %v2865_v54, %v2843_v38  ;;  %v2875_v4 = vstv %s6188_s15  ;;  %v2881_v17 = vstv %s6190_s22  ;;  %v2887_v20 = vstv %s6193_s30 }
 0x2ad   : > { %v2893_v2 = vstv %s6195_s10  ;;  %v2850_v55 = vadd.f32 %v2848_v46, %v2822_v51  ;;  %v2856_v62 = vadd.f32 %v2854_v3, %v2828_v42  ;;  %v2862_v26 = vadd.f32 %v2860_v24, %v2834_v49  ;;  %p3640_p2 = pnand %p3639_p1, %p3633_p12 }
 0x2ae   : > { %v2868_v31 = vadd.f32 %v2866_v50, %v2840_v6  ;;  %v2877_v35 = vmul.f32 %v2875_v4, %v2873_v61  ;;  %v2883_v30 = vmul.f32 %v2881_v17, %v2873_v61  ;;  %v2889_v33 = vmul.f32 %v2887_v20, %v2873_v61 }
 0x2af   : > { %v2895_v5 = vmul.f32 %v2893_v2, %v2873_v61  ;;  %v2876_v36 = vmul.f32 %v2875_v4, %v2871_v0  ;;  %v2882_v15 = vmul.f32 %v2881_v17, %v2871_v0  ;;  %v2888_v47 = vmul.f32 %v2887_v20, %v2871_v0 }
 0x2b0   : > { %v2894_v19 = vmul.f32 %v2893_v2, %v2871_v0  ;;  %v2879_v23 = vadd.f32 %v2877_v35, %v2851_v10  ;;  %v2885_v34 = vadd.f32 %v2883_v30, %v2857_v44  ;;  %v2891_v16 = vadd.f32 %v2889_v33, %v2863_v22  ;;  %v2927_v10 = vpop.permute.xlu0 %2926 }
 0x2b1   : > { %v2897_v57 = vadd.f32 %v2895_v5, %v2869_v63  ;;  %v2878_v8 = vadd.f32 %v2876_v36, %v2850_v55  ;;  %v2884_v7 = vadd.f32 %v2882_v15, %v2856_v62  ;;  %v2890_v56 = vadd.f32 %v2888_v47, %v2862_v26 }
 0x2b2   : > { %v2896_v13 = vadd.f32 %v2894_v19, %v2868_v31  ;;  %v2903_v25 = vstv %s6202_s5  ;;  %v2909_v9 = vstv %s6204_s12  ;;  %v2915_v58 = vstv %s6206_s18 }
 0x2b3   : > { %v2921_v28 = vstv %s6208_s25  ;;  %v2905_v60 = vmul.f32 %v2903_v25, %v2901_v21  ;;  %v2911_v18 = vmul.f32 %v2909_v9, %v2901_v21  ;;  %v2917_v52 = vmul.f32 %v2915_v58, %v2901_v21 }
 0x2b4   : > { %v2923_v32 = vmul.f32 %v2921_v28, %v2901_v21  ;;  %v2904_v39 = vmul.f32 %v2903_v25, %v2899_v12  ;;  %v2910_v54 = vmul.f32 %v2909_v9, %v2899_v12  ;;  %v2916_v38 = vmul.f32 %v2915_v58, %v2899_v12 }
 0x2b5   : > { %v2922_v53 = vmul.f32 %v2921_v28, %v2899_v12  ;;  %v2931_v27 = vstv %s6214_s19  ;;  %v2937_v1 = vstv %s6216_s21  ;;  %v2943_v43 = vstv %s6218_s16 }
 0x2b6   : > { %v2949_v14 = vstv %s6220_s14  ;;  %v2907_v59 = vadd.f32 %v2905_v60, %v2879_v23  ;;  %v2913_v48 = vadd.f32 %v2911_v18, %v2885_v34  ;;  %v2919_v41 = vadd.f32 %v2917_v52, %v2891_v16 }
 0x2b7   : > { %v2925_v37 = vadd.f32 %v2923_v32, %v2897_v57  ;;  %v2933_v11 = vmul.f32 %v2931_v27, %v2929_v40  ;;  %v2939_v45 = vmul.f32 %v2937_v1, %v2929_v40  ;;  %v2945_v29 = vmul.f32 %v2943_v43, %v2929_v40 }
 0x2b8   : > { %v2951_v61 = vmul.f32 %v2949_v14, %v2929_v40  ;;  %v2906_v44 = vadd.f32 %v2904_v39, %v2878_v8  ;;  %v2912_v22 = vadd.f32 %v2910_v54, %v2884_v7  ;;  %v2918_v63 = vadd.f32 %v2916_v38, %v2890_v56 }
 0x2b9   : > { %v2924_v51 = vadd.f32 %v2922_v53, %v2896_v13  ;;  %v2935_v42 = vadd.f32 %v2933_v11, %v2907_v59  ;;  %v2941_v49 = vadd.f32 %v2939_v45, %v2913_v48  ;;  %v2947_v6 = vadd.f32 %v2945_v29, %v2919_v41 }
 0x2ba   : > { %v2953_v46 = vadd.f32 %v2951_v61, %v2925_v37  ;;  %v2932_v3 = vmul.f32 %v2931_v27, %v2927_v10  ;;  %v2938_v24 = vmul.f32 %v2937_v1, %v2927_v10  ;;  %v2944_v50 = vmul.f32 %v2943_v43, %v2927_v10 }
 0x2bb   : > { %v2950_v0 = vmul.f32 %v2949_v14, %v2927_v10  ;;  %2955 = vst [vmem:[%s150_s17 + $0x8] sm:$0xff] %v2935_v42  ;;  %3523 = vst [vmem:[%s150_s17 + $0x18] sm:$0xff] %v2941_v49 }
 0x2bc   : > { %3525 = vst [vmem:[%s150_s17 + $0x28] sm:$0xff] %v2947_v6  ;;  %3527 = vst [vmem:[%s150_s17 + $0x38] sm:$0xff] %v2953_v46  ;;  %v2934_v4 = vadd.f32 %v2932_v3, %v2906_v44  ;;  %v2940_v17 = vadd.f32 %v2938_v24, %v2912_v22  ;;  %v2946_v20 = vadd.f32 %v2944_v50, %v2918_v63 }
 0x2bd   : > { %v2952_v2 = vadd.f32 %v2950_v0, %v2924_v51 }
 0x2be   : > { %2954 = vst [vmem:[%s150_s17] sm:$0xff] %v2934_v4  ;;  %3522 = vst [vmem:[%s150_s17 + $0x10] sm:$0xff] %v2940_v17 }
 0x2bf   : > { %3524 = vst [vmem:[%s150_s17 + $0x20] sm:$0xff] %v2946_v20  ;;  %3526 = vst [vmem:[%s150_s17 + $0x30] sm:$0xff] %v2952_v2 }
 0x2c0   : > { %3643 = shalt.err (!%p3640_p2)
}
 0x2c1   : > { %s3644_s24 = scalar_lea.hbm %s6237_s26, 1024  ;;  %s3648_s30 = scalar_lea.hbm %s7058_s1, 2048 }
 0x2c2   : > { %p3645_p3 = scmp.ne.s32.totalorder %s6237_s26, %s3644_s24  ;;  %p3649_p8 = scmp.lt.u32.totalorder %s6237_s26, %s7058_s1 }
 0x2c3   : > { %p3650_p11 = scmp.lt.u32.totalorder %s3648_s30, %s3644_s24  ;;  %p3652_p10 = scmp.lt.u32.totalorder %s3644_s24, %s6237_s26 }
 0x2c4   : > { %p3646_p4 = pnand %p3645_p3, %p3759_p5 }
 0x2c5   : > { %p3651_p9 = por %p3650_p11, %p3649_p8 }
 0x2c6   : > { %p3647_p7 = pneg %p3646_p4 }
 0x2c7   : > { %p3653_p12 = por %p3652_p10, %p3651_p9 }
 0x2c9   : > { %p3654_p13 = pnand %p3653_p12, %p3647_p7 }
 0x2cb   : > { %3657 = shalt.err (!%p3654_p13)
}
 0x2cc   : > { %s3704_s12 = smov 128   ;;  %s3705_s18 = smov 8  }
 0x2cd   : > { %3539 = dma.vmem_to_hbm [thread:$0]  (%p3759_p5), %s6239_s13, 1024, %s6237_s26, %s6243_s11, %s3704_s12, %s3704_s12, %s3705_s18  }
 0x2ce PF: > { %s7059_s25 = sld [smem:[#allocation11_spill]]  ;;  %s7060_s19 = sld [smem:[#allocation8_spill]] }
 0x2d4   : > { %p3551_p0 = scmp.ge.s32.totalorder %s7059_s25, 2  ;;  %s2996_s3 = sand.u32 1, %s7060_s19  }
 0x2d5   : > { %s2997_s16 = scalar_lea.sflag [#allocation3], %s2996_s3 }
 0x2d6   : > { %p3546_p1 = pnand %p3551_p0, %p3763_p6 }
 0x2d8   : > { %3679 = dma.done.wait (!%p3546_p1), %s2997_s16, 1024  }
 0x2d9   : > { %3681 = vsyncadd (!%p3546_p1), %s2997_s16, 4294966272  ;;  %s7062_s12 = sld [smem:[#allocation13_spill]]  ;;  %s7063_s9 = sld [smem:[#allocation9_spill]] }
 0x2da   : > { %s7064_s10 = sld [smem:[#allocation10_spill]]  ;;  %s7065_s11 = sld [smem:[#allocation14_spill]] }
 0x2df   : > { %p13_p2 = scmp.ge.s32.totalorder %s7062_s12, 4  }
 0x2e1   :  { %15 = sbr.rel (!%p13_p2) target bundleno = 8 (0x8), region = 90 }
 0x2e8   :  { %3002 = vsyncpa [#allocation3], 1 }
 0x2e9   :  { %3004 = vsyncpa [#allocation3 + $0x1], 1 }
 0x2ea   :  { %3005 = vsyncpa [#allocation4], 1 }
 0x2eb   :  { %3007 = vsyncpa [#allocation4 + $0x1], 1 }

</bundles_post_ra>
